<compile_context>
chip_gen: v7x
topology: tpu7x:2x2x1
jax: 0.10.0
libtpu: 0.0.40
codegen_flags: <defaults>
</compile_context>

<pallas_src>
import functools

import jax
import jax.numpy as jnp
from jax.experimental import pallas as pl
from jax.experimental.pallas import tpu as pltpu


def _build_fold(fold_ref, act, pad):
    """Write activation `act` (H, W, Cin) into the kw-folded, padded scratch.

    fold_ref[r, ow, kx*Cin + c] == padded_act[r, ow + kx, c], where padded_act
    is `act` zero-padded by `pad` on both spatial dims.  Only the halo entries
    (pad rows, per-kx edge columns) are zeroed; the interior is overwritten
    every grid step, so no full-buffer zero fill is needed.
    """
    H, W, cin = act.shape
    k = 2 * pad + 1
    zrow = jnp.zeros((pad, W, k * cin), jnp.float32)
    fold_ref[0:pad, :, :] = zrow                       # top pad rows
    fold_ref[pad + H:, :, :] = zrow                    # bottom pad rows
    for kx in range(k):
        lo = max(0, pad - kx)                          # first valid output col
        hi = min(W, W + pad - kx)                      # one past last valid col
        if lo > 0:                                     # left halo columns
            fold_ref[pad:pad + H, 0:lo, kx * cin:(kx + 1) * cin] = (
                jnp.zeros((H, lo, cin), jnp.float32))
        if hi < W:                                     # right halo columns
            fold_ref[pad:pad + H, hi:W, kx * cin:(kx + 1) * cin] = (
                jnp.zeros((H, W - hi, cin), jnp.float32))
        fold_ref[pad:pad + H, lo:hi, kx * cin:(kx + 1) * cin] = (
            act[:, lo + kx - pad:hi + kx - pad, :])


def _conv_from_fold(fold_ref, w_ref, b_ref, H, relu):
    """kh matmuls with K = kw*Cin; chained f32 accumulation (MRB-friendly)."""
    kh = w_ref.shape[0]
    cout = w_ref.shape[2]
    W = fold_ref.shape[1]
    # Start the accumulator from the broadcast bias: saves a final add.
    acc = jnp.broadcast_to(b_ref[0, :], (H, W, cout)).astype(jnp.float32)
    for ky in range(kh):
        acc = acc + jax.lax.dot_general(
            fold_ref[ky:ky + H, :, :], w_ref[ky],
            dimension_numbers=(((2,), (0,)), ((), ())),
            preferred_element_type=jnp.float32)
    if relu:
        acc = jnp.maximum(acc, 0.0)
    return acc                                          # (H, W, Cout)


def _fused_flow_kernel(x_ref, w1_ref, b1_ref, w2_ref, b2_ref, w3_ref, b3_ref,
                       o_ref, fold1, fold2, fold3, *, H, W):
    """Fused conv1->relu->conv2->relu->conv3 for one batch element.

    x_ref : (1, 6, H*W)          NCHW input, spatial flattened (metadata only)
    wN_ref: (kh, kw*Cin, Cout)   pre-folded weights (VMEM resident)
    bN_ref: (1, Cout)
    o_ref : (1, 2, H*W)          lane-dense output tile
    foldN : VMEM scratch holding the kw-folded padded input of conv N.
    """
    # NCHW -> HWC relayout of the tiny input: one small 2-D XLU transpose
    # followed by a free sublane-split reshape.
    x_hwc = jnp.transpose(x_ref[0], (1, 0)).reshape(H, W, 6)

    _build_fold(fold1, x_hwc, pad=3)
    a1 = _conv_from_fold(fold1, w1_ref, b1_ref, H, relu=True)     # (H, W, 64)

    _build_fold(fold2, a1, pad=2)
    a2 = _conv_from_fold(fold2, w2_ref, b2_ref, H, relu=True)     # (H, W, 32)

    _build_fold(fold3, a2, pad=1)
    a3 = _conv_from_fold(fold3, w3_ref, b3_ref, H, relu=False)    # (H, W, 2)

    # Lane-dense store: (H*W, 2) -> (2, H*W), full-width writes.  The small
    # transpose is cheaper than relayouting conv3's RHS to channels-first.
    o_ref[0] = jnp.transpose(a3.reshape(H * W, 2), (1, 0)).astype(o_ref.dtype)


def prepare_params(params):
    """One-time relayout of PyTorch-layout params into the kernel layout.

    Conv weights (Cout, Cin, kh, kw) -> kw-folded (kh, kw*Cin, Cout); biases
    -> (1, Cout).  Call once at model-load time so the jitted forward pass
    contains no per-call weight transposes.
    """
    def fold_w(w):
        cout, cin, kh, kw = w.shape
        return jnp.transpose(w, (2, 3, 1, 0)).reshape(kh, kw * cin, cout)

    return dict(
        w1=fold_w(params["w1"]), b1=params["b1"].reshape(1, -1),
        w2=fold_w(params["w2"]), b2=params["b2"].reshape(1, -1),
        w3=fold_w(params["w3"]), b3=params["b3"].reshape(1, -1),
    )


@jax.jit
def optical_flow_estimator(x_nchw, fparams):
    """Forward pass matching the PyTorch module; NCHW in, NCHW out."""
    N, C, H, W = x_nchw.shape
    assert C == 6

    x = x_nchw.reshape(N, C, H * W)      # metadata-only (NCHW is contiguous)

    # TODO(synk): for N == 1 on v7x (2 TensorCores), split H into two halo'd
    # row bands to get a second "parallel" grid step; with N >= 2 the batch
    # axis already feeds both cores.
    # TODO(synk): at large H, W the lane-padded fold scratches outgrow v7x's
    # 64 MiB VMEM; tile H into halo'd row bands and re-derive vmem_limit_bytes.
    out = pl.pallas_call(
        functools.partial(_fused_flow_kernel, H=H, W=W),
        out_shape=jax.ShapeDtypeStruct((N, 2, H * W), jnp.float32),
        grid=(N,),
        in_specs=[
            pl.BlockSpec((1, 6, H * W), lambda i: (i, 0, 0)),
            pl.BlockSpec((7, 7 * 6, 64), lambda i: (0, 0, 0)),
            pl.BlockSpec((1, 64), lambda i: (0, 0)),
            pl.BlockSpec((5, 5 * 64, 32), lambda i: (0, 0, 0)),
            pl.BlockSpec((1, 32), lambda i: (0, 0)),
            pl.BlockSpec((3, 3 * 32, 2), lambda i: (0, 0, 0)),
            pl.BlockSpec((1, 2), lambda i: (0, 0)),
        ],
        out_specs=pl.BlockSpec((1, 2, H * W), lambda i: (i, 0, 0)),
        scratch_shapes=[
            pltpu.VMEM((H + 6, W, 7 * 6), jnp.float32),    # conv1 kw-fold
            pltpu.VMEM((H + 4, W, 5 * 64), jnp.float32),   # conv2 kw-fold
            pltpu.VMEM((H + 2, W, 3 * 32), jnp.float32),   # conv3 kw-fold
        ],
        compiler_params=pltpu.CompilerParams(
            dimension_semantics=("parallel",),
            vmem_limit_bytes=32 * 1024 * 1024,
        ),
    )(x, fparams["w1"], fparams["b1"], fparams["w2"], fparams["b2"],
      fparams["w3"], fparams["b3"])

    # Free metadata reshape to NCHW.
    return out.reshape(N, 2, H, W)


def _init_params(key):
    """Deterministic PyTorch-style (kaiming-uniform-ish) init."""
    def conv_init(k, cout, cin, ksize):
        kw_key, kb_key = jax.random.split(k)
        fan_in = cin * ksize * ksize
        bound = 1.0 / jnp.sqrt(fan_in)
        w = jax.random.uniform(kw_key, (cout, cin, ksize, ksize),
                               minval=-bound, maxval=bound, dtype=jnp.float32)
        b = jax.random.uniform(kb_key, (cout,),
                               minval=-bound, maxval=bound, dtype=jnp.float32)
        return w, b

    k1, k2, k3 = jax.random.split(key, 3)
    w1, b1 = conv_init(k1, 64, 6, 7)
    w2, b2 = conv_init(k2, 32, 64, 5)
    w3, b3 = conv_init(k3, 2, 32, 3)
    return dict(w1=w1, b1=b1, w2=w2, b2=b2, w3=w3, b3=b3)


def _reference(x_nchw, params):
    """Pure-JAX reference (lax conv) for correctness checking."""
    def conv(x, w, b, pad):
        y = jax.lax.conv_general_dilated(
            x, w, window_strides=(1, 1), padding=[(pad, pad), (pad, pad)],
            dimension_numbers=("NCHW", "OIHW", "NCHW"))
        return y + b[None, :, None, None]

    x = jax.nn.relu(conv(x_nchw, params["w1"], params["b1"], 3))
    x = jax.nn.relu(conv(x, params["w2"], params["b2"], 2))
    return conv(x, params["w3"], params["b3"], 1)


if __name__ == "__main__":
    key = jax.random.PRNGKey(0)
    pkey, xkey = jax.random.split(key)
    params = _init_params(pkey)
    fparams = prepare_params(params)        # one-time weight relayout

    # Small input consistent with the module: batch=2, channels=6, spatial=16.
    x = jax.random.normal(xkey, (2, 6, 16, 16), dtype=jnp.float32)

    out = jax.block_until_ready(optical_flow_estimator(x, fparams))
    ref = jax.block_until_ready(_reference(x, params))

    assert out.shape == (2, 2, 16, 16), out.shape
    assert jnp.allclose(out, ref, atol=1e-4, rtol=1e-4), (
        float(jnp.max(jnp.abs(out - ref))))

    print("KERNEL_OK")
</pallas_src>

<mosaic_0001>
module attributes {stable_mosaic.version = 11 : i64} {
  func.func @_fused_flow_kernel(%arg0: i32, %arg1: memref<1x6x256xf32, #tpu.memory_space<vmem>>, %arg2: memref<7x42x64xf32, #tpu.memory_space<vmem>>, %arg3: memref<1x64xf32, #tpu.memory_space<vmem>>, %arg4: memref<5x320x32xf32, #tpu.memory_space<vmem>>, %arg5: memref<1x32xf32, #tpu.memory_space<vmem>>, %arg6: memref<3x96x2xf32, #tpu.memory_space<vmem>>, %arg7: memref<1x2xf32, #tpu.memory_space<vmem>>, %arg8: memref<1x2x256xf32, #tpu.memory_space<vmem>>, %arg9: memref<22x16x42xf32, #tpu.memory_space<vmem>>, %arg10: memref<20x16x320xf32, #tpu.memory_space<vmem>>, %arg11: memref<18x16x96xf32, #tpu.memory_space<vmem>>) attributes {dimension_semantics = [#tpu.dimension_semantics<parallel>], iteration_bounds = array<i64: 2>, scalar_prefetch = 0 : i64, scratch_operands = 3 : i64, tpu.core_type = #tpu.core_type<tc>, window_params = [{transform_indices = @transform_0, window_bounds = array<i64: 1, 6, 256>}, {pipeline_mode = #tpu.pipeline_mode<synchronous>, transform_indices = @transform_1, window_bounds = array<i64: 7, 42, 64>}, {pipeline_mode = #tpu.pipeline_mode<synchronous>, transform_indices = @transform_2, window_bounds = array<i64: 1, 64>}, {pipeline_mode = #tpu.pipeline_mode<synchronous>, transform_indices = @transform_3, window_bounds = array<i64: 5, 320, 32>}, {pipeline_mode = #tpu.pipeline_mode<synchronous>, transform_indices = @transform_4, window_bounds = array<i64: 1, 32>}, {pipeline_mode = #tpu.pipeline_mode<synchronous>, transform_indices = @transform_5, window_bounds = array<i64: 3, 96, 2>}, {pipeline_mode = #tpu.pipeline_mode<synchronous>, transform_indices = @transform_6, window_bounds = array<i64: 1, 2>}, {transform_indices = @transform_7, window_bounds = array<i64: 1, 2, 256>}]} {
    %c0 = arith.constant 0 : index
    %c0_0 = arith.constant 0 : index
    %c0_1 = arith.constant 0 : index
    %0 = vector.load %arg1[%c0, %c0_0, %c0_1] : memref<1x6x256xf32, #tpu.memory_space<vmem>>, vector<1x6x256xf32>
    %1 = vector.shape_cast %0 : vector<1x6x256xf32> to vector<6x256xf32>
    %2 = tpu.transpose %1, [1, 0] : vector<6x256xf32> -> vector<256x6xf32>
    %3 = vector.shape_cast %2 : vector<256x6xf32> to vector<16x16x6xf32>
    %cst = arith.constant 0.000000e+00 : f32
    %4 = vector.broadcast %cst : f32 to vector<3x16x42xf32>
    %c0_2 = arith.constant 0 : index
    %c0_3 = arith.constant 0 : index
    %c0_4 = arith.constant 0 : index
    %5 = vector.load %arg9[%c0_2, %c0_3, %c0_4] : memref<22x16x42xf32, #tpu.memory_space<vmem>>, vector<3x16x42xf32>
    tpu.vector_store %arg9[%c0_2, %c0_3, %c0_4], %4 {strides = array<i32>} : memref<22x16x42xf32, #tpu.memory_space<vmem>>, vector<3x16x42xf32>,
    %c19 = arith.constant 19 : index
    %c0_5 = arith.constant 0 : index
    %c0_6 = arith.constant 0 : index
    %6 = vector.load %arg9[%c19, %c0_5, %c0_6] : memref<22x16x42xf32, #tpu.memory_space<vmem>>, vector<3x16x42xf32>
    tpu.vector_store %arg9[%c19, %c0_5, %c0_6], %4 {strides = array<i32>} : memref<22x16x42xf32, #tpu.memory_space<vmem>>, vector<3x16x42xf32>,
    %cst_7 = arith.constant 0.000000e+00 : f32
    %7 = vector.broadcast %cst_7 : f32 to vector<16x3x6xf32>
    %c3 = arith.constant 3 : index
    %c0_8 = arith.constant 0 : index
    %c0_9 = arith.constant 0 : index
    %8 = vector.load %arg9[%c3, %c0_8, %c0_9] : memref<22x16x42xf32, #tpu.memory_space<vmem>>, vector<16x3x6xf32>
    tpu.vector_store %arg9[%c3, %c0_8, %c0_9], %7 {strides = array<i32>} : memref<22x16x42xf32, #tpu.memory_space<vmem>>, vector<16x3x6xf32>,
    %9 = vector.extract_strided_slice %3 {offsets = [0, 0, 0], sizes = [16, 13, 6], strides = [1, 1, 1]} : vector<16x16x6xf32> to vector<16x13x6xf32>
    %c3_10 = arith.constant 3 : index
    %c3_11 = arith.constant 3 : index
    %c0_12 = arith.constant 0 : index
    %10 = vector.load %arg9[%c3_10, %c3_11, %c0_12] : memref<22x16x42xf32, #tpu.memory_space<vmem>>, vector<16x13x6xf32>
    tpu.vector_store %arg9[%c3_10, %c3_11, %c0_12], %9 {strides = array<i32>} : memref<22x16x42xf32, #tpu.memory_space<vmem>>, vector<16x13x6xf32>,
    %cst_13 = arith.constant 0.000000e+00 : f32
    %11 = vector.broadcast %cst_13 : f32 to vector<16x2x6xf32>
    %c3_14 = arith.constant 3 : index
    %c0_15 = arith.constant 0 : index
    %c6 = arith.constant 6 : index
    %12 = vector.load %arg9[%c3_14, %c0_15, %c6] : memref<22x16x42xf32, #tpu.memory_space<vmem>>, vector<16x2x6xf32>
    tpu.vector_store %arg9[%c3_14, %c0_15, %c6], %11 {strides = array<i32>} : memref<22x16x42xf32, #tpu.memory_space<vmem>>, vector<16x2x6xf32>,
    %13 = vector.extract_strided_slice %3 {offsets = [0, 0, 0], sizes = [16, 14, 6], strides = [1, 1, 1]} : vector<16x16x6xf32> to vector<16x14x6xf32>
    %c3_16 = arith.constant 3 : index
    %c2 = arith.constant 2 : index
    %c6_17 = arith.constant 6 : index
    %14 = vector.load %arg9[%c3_16, %c2, %c6_17] : memref<22x16x42xf32, #tpu.memory_space<vmem>>, vector<16x14x6xf32>
    tpu.vector_store %arg9[%c3_16, %c2, %c6_17], %13 {strides = array<i32>} : memref<22x16x42xf32, #tpu.memory_space<vmem>>, vector<16x14x6xf32>,
    %cst_18 = arith.constant 0.000000e+00 : f32
    %15 = vector.broadcast %cst_18 : f32 to vector<16x1x6xf32>
    %c3_19 = arith.constant 3 : index
    %c0_20 = arith.constant 0 : index
    %c12 = arith.constant 12 : index
    %16 = vector.load %arg9[%c3_19, %c0_20, %c12] : memref<22x16x42xf32, #tpu.memory_space<vmem>>, vector<16x1x6xf32>
    tpu.vector_store %arg9[%c3_19, %c0_20, %c12], %15 {strides = array<i32>} : memref<22x16x42xf32, #tpu.memory_space<vmem>>, vector<16x1x6xf32>,
    %17 = vector.extract_strided_slice %3 {offsets = [0, 0, 0], sizes = [16, 15, 6], strides = [1, 1, 1]} : vector<16x16x6xf32> to vector<16x15x6xf32>
    %c3_21 = arith.constant 3 : index
    %c1 = arith.constant 1 : index
    %c12_22 = arith.constant 12 : index
    %18 = vector.load %arg9[%c3_21, %c1, %c12_22] : memref<22x16x42xf32, #tpu.memory_space<vmem>>, vector<16x15x6xf32>
    tpu.vector_store %arg9[%c3_21, %c1, %c12_22], %17 {strides = array<i32>} : memref<22x16x42xf32, #tpu.memory_space<vmem>>, vector<16x15x6xf32>,
    %c3_23 = arith.constant 3 : index
    %c0_24 = arith.constant 0 : index
    %c18 = arith.constant 18 : index
    %19 = vector.load %arg9[%c3_23, %c0_24, %c18] : memref<22x16x42xf32, #tpu.memory_space<vmem>>, vector<16x16x6xf32>
    tpu.vector_store %arg9[%c3_23, %c0_24, %c18], %3 {strides = array<i32>} : memref<22x16x42xf32, #tpu.memory_space<vmem>>, vector<16x16x6xf32>,
    %cst_25 = arith.constant 0.000000e+00 : f32
    %20 = vector.broadcast %cst_25 : f32 to vector<16x1x6xf32>
    %c3_26 = arith.constant 3 : index
    %c15 = arith.constant 15 : index
    %c24 = arith.constant 24 : index
    %21 = vector.load %arg9[%c3_26, %c15, %c24] : memref<22x16x42xf32, #tpu.memory_space<vmem>>, vector<16x1x6xf32>
    tpu.vector_store %arg9[%c3_26, %c15, %c24], %20 {strides = array<i32>} : memref<22x16x42xf32, #tpu.memory_space<vmem>>, vector<16x1x6xf32>,
    %22 = vector.extract_strided_slice %3 {offsets = [0, 1, 0], sizes = [16, 15, 6], strides = [1, 1, 1]} : vector<16x16x6xf32> to vector<16x15x6xf32>
    %c3_27 = arith.constant 3 : index
    %c0_28 = arith.constant 0 : index
    %c24_29 = arith.constant 24 : index
    %23 = vector.load %arg9[%c3_27, %c0_28, %c24_29] : memref<22x16x42xf32, #tpu.memory_space<vmem>>, vector<16x15x6xf32>
    tpu.vector_store %arg9[%c3_27, %c0_28, %c24_29], %22 {strides = array<i32>} : memref<22x16x42xf32, #tpu.memory_space<vmem>>, vector<16x15x6xf32>,
    %cst_30 = arith.constant 0.000000e+00 : f32
    %24 = vector.broadcast %cst_30 : f32 to vector<16x2x6xf32>
    %c3_31 = arith.constant 3 : index
    %c14 = arith.constant 14 : index
    %c30 = arith.constant 30 : index
    %25 = vector.load %arg9[%c3_31, %c14, %c30] : memref<22x16x42xf32, #tpu.memory_space<vmem>>, vector<16x2x6xf32>
    tpu.vector_store %arg9[%c3_31, %c14, %c30], %24 {strides = array<i32>} : memref<22x16x42xf32, #tpu.memory_space<vmem>>, vector<16x2x6xf32>,
    %26 = vector.extract_strided_slice %3 {offsets = [0, 2, 0], sizes = [16, 14, 6], strides = [1, 1, 1]} : vector<16x16x6xf32> to vector<16x14x6xf32>
    %c3_32 = arith.constant 3 : index
    %c0_33 = arith.constant 0 : index
    %c30_34 = arith.constant 30 : index
    %27 = vector.load %arg9[%c3_32, %c0_33, %c30_34] : memref<22x16x42xf32, #tpu.memory_space<vmem>>, vector<16x14x6xf32>
    tpu.vector_store %arg9[%c3_32, %c0_33, %c30_34], %26 {strides = array<i32>} : memref<22x16x42xf32, #tpu.memory_space<vmem>>, vector<16x14x6xf32>,
    %cst_35 = arith.constant 0.000000e+00 : f32
    %28 = vector.broadcast %cst_35 : f32 to vector<16x3x6xf32>
    %c3_36 = arith.constant 3 : index
    %c13 = arith.constant 13 : index
    %c36 = arith.constant 36 : index
    %29 = vector.load %arg9[%c3_36, %c13, %c36] : memref<22x16x42xf32, #tpu.memory_space<vmem>>, vector<16x3x6xf32>
    tpu.vector_store %arg9[%c3_36, %c13, %c36], %28 {strides = array<i32>} : memref<22x16x42xf32, #tpu.memory_space<vmem>>, vector<16x3x6xf32>,
    %30 = vector.extract_strided_slice %3 {offsets = [0, 3, 0], sizes = [16, 13, 6], strides = [1, 1, 1]} : vector<16x16x6xf32> to vector<16x13x6xf32>
    %c3_37 = arith.constant 3 : index
    %c0_38 = arith.constant 0 : index
    %c36_39 = arith.constant 36 : index
    %31 = vector.load %arg9[%c3_37, %c0_38, %c36_39] : memref<22x16x42xf32, #tpu.memory_space<vmem>>, vector<16x13x6xf32>
    tpu.vector_store %arg9[%c3_37, %c0_38, %c36_39], %30 {strides = array<i32>} : memref<22x16x42xf32, #tpu.memory_space<vmem>>, vector<16x13x6xf32>,
    %c0_40 = arith.constant 0 : index
    %c0_41 = arith.constant 0 : index
    %32 = vector.load %arg3[%c0_40, %c0_41] : memref<1x64xf32, #tpu.memory_space<vmem>>, vector<1x64xf32>
    %33 = vector.shape_cast %32 : vector<1x64xf32> to vector<64xf32>
    %34 = vector.shape_cast %33 : vector<64xf32> to vector<1x1x64xf32>
    %35 = vector.broadcast %34 : vector<1x1x64xf32> to vector<16x16x64xf32>
    %c0_42 = arith.constant 0 : index
    %c0_43 = arith.constant 0 : index
    %c0_44 = arith.constant 0 : index
    %36 = vector.load %arg9[%c0_42, %c0_43, %c0_44] : memref<22x16x42xf32, #tpu.memory_space<vmem>>, vector<16x16x42xf32>
    %c0_45 = arith.constant 0 : index
    %c0_46 = arith.constant 0 : index
    %c0_47 = arith.constant 0 : index
    %37 = vector.load %arg2[%c0_45, %c0_46, %c0_47] : memref<7x42x64xf32, #tpu.memory_space<vmem>>, vector<1x42x64xf32>
    %38 = vector.shape_cast %37 : vector<1x42x64xf32> to vector<42x64xf32>
    %cst_48 = arith.constant dense<0.000000e+00> : vector<16x16x64xf32>
    %39 = tpu.matmul %36, %38, %cst_48 {dimension_numbers = #tpu.dot_dimension_numbers<[2], [0], [0, 1], [1], [0, 0, 0, 1, 1, 1], [], []>} : vector<16x16x42xf32>, vector<42x64xf32>, vector<16x16x64xf32> -> vector<16x16x64xf32>
    %40 = arith.addf %35, %39 : vector<16x16x64xf32>
    %c1_49 = arith.constant 1 : index
    %c0_50 = arith.constant 0 : index
    %c0_51 = arith.constant 0 : index
    %41 = vector.load %arg9[%c1_49, %c0_50, %c0_51] : memref<22x16x42xf32, #tpu.memory_space<vmem>>, vector<16x16x42xf32>
    %c1_52 = arith.constant 1 : index
    %c0_53 = arith.constant 0 : index
    %c0_54 = arith.constant 0 : index
    %42 = vector.load %arg2[%c1_52, %c0_53, %c0_54] : memref<7x42x64xf32, #tpu.memory_space<vmem>>, vector<1x42x64xf32>
    %43 = vector.shape_cast %42 : vector<1x42x64xf32> to vector<42x64xf32>
    %cst_55 = arith.constant dense<0.000000e+00> : vector<16x16x64xf32>
    %44 = tpu.matmul %41, %43, %cst_55 {dimension_numbers = #tpu.dot_dimension_numbers<[2], [0], [0, 1], [1], [0, 0, 0, 1, 1, 1], [], []>} : vector<16x16x42xf32>, vector<42x64xf32>, vector<16x16x64xf32> -> vector<16x16x64xf32>
    %45 = arith.addf %40, %44 : vector<16x16x64xf32>
    %c2_56 = arith.constant 2 : index
    %c0_57 = arith.constant 0 : index
    %c0_58 = arith.constant 0 : index
    %46 = vector.load %arg9[%c2_56, %c0_57, %c0_58] : memref<22x16x42xf32, #tpu.memory_space<vmem>>, vector<16x16x42xf32>
    %c2_59 = arith.constant 2 : index
    %c0_60 = arith.constant 0 : index
    %c0_61 = arith.constant 0 : index
    %47 = vector.load %arg2[%c2_59, %c0_60, %c0_61] : memref<7x42x64xf32, #tpu.memory_space<vmem>>, vector<1x42x64xf32>
    %48 = vector.shape_cast %47 : vector<1x42x64xf32> to vector<42x64xf32>
    %cst_62 = arith.constant dense<0.000000e+00> : vector<16x16x64xf32>
    %49 = tpu.matmul %46, %48, %cst_62 {dimension_numbers = #tpu.dot_dimension_numbers<[2], [0], [0, 1], [1], [0, 0, 0, 1, 1, 1], [], []>} : vector<16x16x42xf32>, vector<42x64xf32>, vector<16x16x64xf32> -> vector<16x16x64xf32>
    %50 = arith.addf %45, %49 : vector<16x16x64xf32>
    %c3_63 = arith.constant 3 : index
    %c0_64 = arith.constant 0 : index
    %c0_65 = arith.constant 0 : index
    %51 = vector.load %arg9[%c3_63, %c0_64, %c0_65] : memref<22x16x42xf32, #tpu.memory_space<vmem>>, vector<16x16x42xf32>
    %c3_66 = arith.constant 3 : index
    %c0_67 = arith.constant 0 : index
    %c0_68 = arith.constant 0 : index
    %52 = vector.load %arg2[%c3_66, %c0_67, %c0_68] : memref<7x42x64xf32, #tpu.memory_space<vmem>>, vector<1x42x64xf32>
    %53 = vector.shape_cast %52 : vector<1x42x64xf32> to vector<42x64xf32>
    %cst_69 = arith.constant dense<0.000000e+00> : vector<16x16x64xf32>
    %54 = tpu.matmul %51, %53, %cst_69 {dimension_numbers = #tpu.dot_dimension_numbers<[2], [0], [0, 1], [1], [0, 0, 0, 1, 1, 1], [], []>} : vector<16x16x42xf32>, vector<42x64xf32>, vector<16x16x64xf32> -> vector<16x16x64xf32>
    %55 = arith.addf %50, %54 : vector<16x16x64xf32>
    %c4 = arith.constant 4 : index
    %c0_70 = arith.constant 0 : index
    %c0_71 = arith.constant 0 : index
    %56 = vector.load %arg9[%c4, %c0_70, %c0_71] : memref<22x16x42xf32, #tpu.memory_space<vmem>>, vector<16x16x42xf32>
    %c4_72 = arith.constant 4 : index
    %c0_73 = arith.constant 0 : index
    %c0_74 = arith.constant 0 : index
    %57 = vector.load %arg2[%c4_72, %c0_73, %c0_74] : memref<7x42x64xf32, #tpu.memory_space<vmem>>, vector<1x42x64xf32>
    %58 = vector.shape_cast %57 : vector<1x42x64xf32> to vector<42x64xf32>
    %cst_75 = arith.constant dense<0.000000e+00> : vector<16x16x64xf32>
    %59 = tpu.matmul %56, %58, %cst_75 {dimension_numbers = #tpu.dot_dimension_numbers<[2], [0], [0, 1], [1], [0, 0, 0, 1, 1, 1], [], []>} : vector<16x16x42xf32>, vector<42x64xf32>, vector<16x16x64xf32> -> vector<16x16x64xf32>
    %60 = arith.addf %55, %59 : vector<16x16x64xf32>
    %c5 = arith.constant 5 : index
    %c0_76 = arith.constant 0 : index
    %c0_77 = arith.constant 0 : index
    %61 = vector.load %arg9[%c5, %c0_76, %c0_77] : memref<22x16x42xf32, #tpu.memory_space<vmem>>, vector<16x16x42xf32>
    %c5_78 = arith.constant 5 : index
    %c0_79 = arith.constant 0 : index
    %c0_80 = arith.constant 0 : index
    %62 = vector.load %arg2[%c5_78, %c0_79, %c0_80] : memref<7x42x64xf32, #tpu.memory_space<vmem>>, vector<1x42x64xf32>
    %63 = vector.shape_cast %62 : vector<1x42x64xf32> to vector<42x64xf32>
    %cst_81 = arith.constant dense<0.000000e+00> : vector<16x16x64xf32>
    %64 = tpu.matmul %61, %63, %cst_81 {dimension_numbers = #tpu.dot_dimension_numbers<[2], [0], [0, 1], [1], [0, 0, 0, 1, 1, 1], [], []>} : vector<16x16x42xf32>, vector<42x64xf32>, vector<16x16x64xf32> -> vector<16x16x64xf32>
    %65 = arith.addf %60, %64 : vector<16x16x64xf32>
    %c6_82 = arith.constant 6 : index
    %c0_83 = arith.constant 0 : index
    %c0_84 = arith.constant 0 : index
    %66 = vector.load %arg9[%c6_82, %c0_83, %c0_84] : memref<22x16x42xf32, #tpu.memory_space<vmem>>, vector<16x16x42xf32>
    %c6_85 = arith.constant 6 : index
    %c0_86 = arith.constant 0 : index
    %c0_87 = arith.constant 0 : index
    %67 = vector.load %arg2[%c6_85, %c0_86, %c0_87] : memref<7x42x64xf32, #tpu.memory_space<vmem>>, vector<1x42x64xf32>
    %68 = vector.shape_cast %67 : vector<1x42x64xf32> to vector<42x64xf32>
    %cst_88 = arith.constant dense<0.000000e+00> : vector<16x16x64xf32>
    %69 = tpu.matmul %66, %68, %cst_88 {dimension_numbers = #tpu.dot_dimension_numbers<[2], [0], [0, 1], [1], [0, 0, 0, 1, 1, 1], [], []>} : vector<16x16x42xf32>, vector<42x64xf32>, vector<16x16x64xf32> -> vector<16x16x64xf32>
    %70 = arith.addf %65, %69 : vector<16x16x64xf32>
    %cst_89 = arith.constant 0.000000e+00 : f32
    %71 = vector.broadcast %cst_89 : f32 to vector<16x16x64xf32>
    %72 = arith.maximumf %70, %71 : vector<16x16x64xf32>
    %cst_90 = arith.constant 0.000000e+00 : f32
    %73 = vector.broadcast %cst_90 : f32 to vector<2x16x320xf32>
    %c0_91 = arith.constant 0 : index
    %c0_92 = arith.constant 0 : index
    %c0_93 = arith.constant 0 : index
    %74 = vector.load %arg10[%c0_91, %c0_92, %c0_93] : memref<20x16x320xf32, #tpu.memory_space<vmem>>, vector<2x16x320xf32>
    tpu.vector_store %arg10[%c0_91, %c0_92, %c0_93], %73 {strides = array<i32>} : memref<20x16x320xf32, #tpu.memory_space<vmem>>, vector<2x16x320xf32>,
    %c18_94 = arith.constant 18 : index
    %c0_95 = arith.constant 0 : index
    %c0_96 = arith.constant 0 : index
    %75 = vector.load %arg10[%c18_94, %c0_95, %c0_96] : memref<20x16x320xf32, #tpu.memory_space<vmem>>, vector<2x16x320xf32>
    tpu.vector_store %arg10[%c18_94, %c0_95, %c0_96], %73 {strides = array<i32>} : memref<20x16x320xf32, #tpu.memory_space<vmem>>, vector<2x16x320xf32>,
    %cst_97 = arith.constant 0.000000e+00 : f32
    %76 = vector.broadcast %cst_97 : f32 to vector<16x2x64xf32>
    %c2_98 = arith.constant 2 : index
    %c0_99 = arith.constant 0 : index
    %c0_100 = arith.constant 0 : index
    %77 = vector.load %arg10[%c2_98, %c0_99, %c0_100] : memref<20x16x320xf32, #tpu.memory_space<vmem>>, vector<16x2x64xf32>
    tpu.vector_store %arg10[%c2_98, %c0_99, %c0_100], %76 {strides = array<i32>} : memref<20x16x320xf32, #tpu.memory_space<vmem>>, vector<16x2x64xf32>,
    %78 = vector.extract_strided_slice %72 {offsets = [0, 0, 0], sizes = [16, 14, 64], strides = [1, 1, 1]} : vector<16x16x64xf32> to vector<16x14x64xf32>
    %c2_101 = arith.constant 2 : index
    %c2_102 = arith.constant 2 : index
    %c0_103 = arith.constant 0 : index
    %79 = vector.load %arg10[%c2_101, %c2_102, %c0_103] : memref<20x16x320xf32, #tpu.memory_space<vmem>>, vector<16x14x64xf32>
    tpu.vector_store %arg10[%c2_101, %c2_102, %c0_103], %78 {strides = array<i32>} : memref<20x16x320xf32, #tpu.memory_space<vmem>>, vector<16x14x64xf32>,
    %cst_104 = arith.constant 0.000000e+00 : f32
    %80 = vector.broadcast %cst_104 : f32 to vector<16x1x64xf32>
    %c2_105 = arith.constant 2 : index
    %c0_106 = arith.constant 0 : index
    %c64 = arith.constant 64 : index
    %81 = vector.load %arg10[%c2_105, %c0_106, %c64] : memref<20x16x320xf32, #tpu.memory_space<vmem>>, vector<16x1x64xf32>
    tpu.vector_store %arg10[%c2_105, %c0_106, %c64], %80 {strides = array<i32>} : memref<20x16x320xf32, #tpu.memory_space<vmem>>, vector<16x1x64xf32>,
    %82 = vector.extract_strided_slice %72 {offsets = [0, 0, 0], sizes = [16, 15, 64], strides = [1, 1, 1]} : vector<16x16x64xf32> to vector<16x15x64xf32>
    %c2_107 = arith.constant 2 : index
    %c1_108 = arith.constant 1 : index
    %c64_109 = arith.constant 64 : index
    %83 = vector.load %arg10[%c2_107, %c1_108, %c64_109] : memref<20x16x320xf32, #tpu.memory_space<vmem>>, vector<16x15x64xf32>
    tpu.vector_store %arg10[%c2_107, %c1_108, %c64_109], %82 {strides = array<i32>} : memref<20x16x320xf32, #tpu.memory_space<vmem>>, vector<16x15x64xf32>,
    %c2_110 = arith.constant 2 : index
    %c0_111 = arith.constant 0 : index
    %c128 = arith.constant 128 : index
    %84 = vector.load %arg10[%c2_110, %c0_111, %c128] : memref<20x16x320xf32, #tpu.memory_space<vmem>>, vector<16x16x64xf32>
    tpu.vector_store %arg10[%c2_110, %c0_111, %c128], %72 {strides = array<i32>} : memref<20x16x320xf32, #tpu.memory_space<vmem>>, vector<16x16x64xf32>,
    %cst_112 = arith.constant 0.000000e+00 : f32
    %85 = vector.broadcast %cst_112 : f32 to vector<16x1x64xf32>
    %c2_113 = arith.constant 2 : index
    %c15_114 = arith.constant 15 : index
    %c192 = arith.constant 192 : index
    %86 = vector.load %arg10[%c2_113, %c15_114, %c192] : memref<20x16x320xf32, #tpu.memory_space<vmem>>, vector<16x1x64xf32>
    tpu.vector_store %arg10[%c2_113, %c15_114, %c192], %85 {strides = array<i32>} : memref<20x16x320xf32, #tpu.memory_space<vmem>>, vector<16x1x64xf32>,
    %87 = vector.extract_strided_slice %72 {offsets = [0, 1, 0], sizes = [16, 15, 64], strides = [1, 1, 1]} : vector<16x16x64xf32> to vector<16x15x64xf32>
    %c2_115 = arith.constant 2 : index
    %c0_116 = arith.constant 0 : index
    %c192_117 = arith.constant 192 : index
    %88 = vector.load %arg10[%c2_115, %c0_116, %c192_117] : memref<20x16x320xf32, #tpu.memory_space<vmem>>, vector<16x15x64xf32>
    tpu.vector_store %arg10[%c2_115, %c0_116, %c192_117], %87 {strides = array<i32>} : memref<20x16x320xf32, #tpu.memory_space<vmem>>, vector<16x15x64xf32>,
    %cst_118 = arith.constant 0.000000e+00 : f32
    %89 = vector.broadcast %cst_118 : f32 to vector<16x2x64xf32>
    %c2_119 = arith.constant 2 : index
    %c14_120 = arith.constant 14 : index
    %c256 = arith.constant 256 : index
    %90 = vector.load %arg10[%c2_119, %c14_120, %c256] : memref<20x16x320xf32, #tpu.memory_space<vmem>>, vector<16x2x64xf32>
    tpu.vector_store %arg10[%c2_119, %c14_120, %c256], %89 {strides = array<i32>} : memref<20x16x320xf32, #tpu.memory_space<vmem>>, vector<16x2x64xf32>,
    %91 = vector.extract_strided_slice %72 {offsets = [0, 2, 0], sizes = [16, 14, 64], strides = [1, 1, 1]} : vector<16x16x64xf32> to vector<16x14x64xf32>
    %c2_121 = arith.constant 2 : index
    %c0_122 = arith.constant 0 : index
    %c256_123 = arith.constant 256 : index
    %92 = vector.load %arg10[%c2_121, %c0_122, %c256_123] : memref<20x16x320xf32, #tpu.memory_space<vmem>>, vector<16x14x64xf32>
    tpu.vector_store %arg10[%c2_121, %c0_122, %c256_123], %91 {strides = array<i32>} : memref<20x16x320xf32, #tpu.memory_space<vmem>>, vector<16x14x64xf32>,
    %c0_124 = arith.constant 0 : index
    %c0_125 = arith.constant 0 : index
    %93 = vector.load %arg5[%c0_124, %c0_125] : memref<1x32xf32, #tpu.memory_space<vmem>>, vector<1x32xf32>
    %94 = vector.shape_cast %93 : vector<1x32xf32> to vector<32xf32>
    %95 = vector.shape_cast %94 : vector<32xf32> to vector<1x1x32xf32>
    %96 = vector.broadcast %95 : vector<1x1x32xf32> to vector<16x16x32xf32>
    %c0_126 = arith.constant 0 : index
    %c0_127 = arith.constant 0 : index
    %c0_128 = arith.constant 0 : index
    %97 = vector.load %arg10[%c0_126, %c0_127, %c0_128] : memref<20x16x320xf32, #tpu.memory_space<vmem>>, vector<16x16x320xf32>
    %c0_129 = arith.constant 0 : index
    %c0_130 = arith.constant 0 : index
    %c0_131 = arith.constant 0 : index
    %98 = vector.load %arg4[%c0_129, %c0_130, %c0_131] : memref<5x320x32xf32, #tpu.memory_space<vmem>>, vector<1x320x32xf32>
    %99 = vector.shape_cast %98 : vector<1x320x32xf32> to vector<320x32xf32>
    %cst_132 = arith.constant dense<0.000000e+00> : vector<16x16x32xf32>
    %100 = tpu.matmul %97, %99, %cst_132 {dimension_numbers = #tpu.dot_dimension_numbers<[2], [0], [0, 1], [1], [0, 0, 0, 1, 1, 1], [], []>} : vector<16x16x320xf32>, vector<320x32xf32>, vector<16x16x32xf32> -> vector<16x16x32xf32>
    %101 = arith.addf %96, %100 : vector<16x16x32xf32>
    %c1_133 = arith.constant 1 : index
    %c0_134 = arith.constant 0 : index
    %c0_135 = arith.constant 0 : index
    %102 = vector.load %arg10[%c1_133, %c0_134, %c0_135] : memref<20x16x320xf32, #tpu.memory_space<vmem>>, vector<16x16x320xf32>
    %c1_136 = arith.constant 1 : index
    %c0_137 = arith.constant 0 : index
    %c0_138 = arith.constant 0 : index
    %103 = vector.load %arg4[%c1_136, %c0_137, %c0_138] : memref<5x320x32xf32, #tpu.memory_space<vmem>>, vector<1x320x32xf32>
    %104 = vector.shape_cast %103 : vector<1x320x32xf32> to vector<320x32xf32>
    %cst_139 = arith.constant dense<0.000000e+00> : vector<16x16x32xf32>
    %105 = tpu.matmul %102, %104, %cst_139 {dimension_numbers = #tpu.dot_dimension_numbers<[2], [0], [0, 1], [1], [0, 0, 0, 1, 1, 1], [], []>} : vector<16x16x320xf32>, vector<320x32xf32>, vector<16x16x32xf32> -> vector<16x16x32xf32>
    %106 = arith.addf %101, %105 : vector<16x16x32xf32>
    %c2_140 = arith.constant 2 : index
    %c0_141 = arith.constant 0 : index
    %c0_142 = arith.constant 0 : index
    %107 = vector.load %arg10[%c2_140, %c0_141, %c0_142] : memref<20x16x320xf32, #tpu.memory_space<vmem>>, vector<16x16x320xf32>
    %c2_143 = arith.constant 2 : index
    %c0_144 = arith.constant 0 : index
    %c0_145 = arith.constant 0 : index
    %108 = vector.load %arg4[%c2_143, %c0_144, %c0_145] : memref<5x320x32xf32, #tpu.memory_space<vmem>>, vector<1x320x32xf32>
    %109 = vector.shape_cast %108 : vector<1x320x32xf32> to vector<320x32xf32>
    %cst_146 = arith.constant dense<0.000000e+00> : vector<16x16x32xf32>
    %110 = tpu.matmul %107, %109, %cst_146 {dimension_numbers = #tpu.dot_dimension_numbers<[2], [0], [0, 1], [1], [0, 0, 0, 1, 1, 1], [], []>} : vector<16x16x320xf32>, vector<320x32xf32>, vector<16x16x32xf32> -> vector<16x16x32xf32>
    %111 = arith.addf %106, %110 : vector<16x16x32xf32>
    %c3_147 = arith.constant 3 : index
    %c0_148 = arith.constant 0 : index
    %c0_149 = arith.constant 0 : index
    %112 = vector.load %arg10[%c3_147, %c0_148, %c0_149] : memref<20x16x320xf32, #tpu.memory_space<vmem>>, vector<16x16x320xf32>
    %c3_150 = arith.constant 3 : index
    %c0_151 = arith.constant 0 : index
    %c0_152 = arith.constant 0 : index
    %113 = vector.load %arg4[%c3_150, %c0_151, %c0_152] : memref<5x320x32xf32, #tpu.memory_space<vmem>>, vector<1x320x32xf32>
    %114 = vector.shape_cast %113 : vector<1x320x32xf32> to vector<320x32xf32>
    %cst_153 = arith.constant dense<0.000000e+00> : vector<16x16x32xf32>
    %115 = tpu.matmul %112, %114, %cst_153 {dimension_numbers = #tpu.dot_dimension_numbers<[2], [0], [0, 1], [1], [0, 0, 0, 1, 1, 1], [], []>} : vector<16x16x320xf32>, vector<320x32xf32>, vector<16x16x32xf32> -> vector<16x16x32xf32>
    %116 = arith.addf %111, %115 : vector<16x16x32xf32>
    %c4_154 = arith.constant 4 : index
    %c0_155 = arith.constant 0 : index
    %c0_156 = arith.constant 0 : index
    %117 = vector.load %arg10[%c4_154, %c0_155, %c0_156] : memref<20x16x320xf32, #tpu.memory_space<vmem>>, vector<16x16x320xf32>
    %c4_157 = arith.constant 4 : index
    %c0_158 = arith.constant 0 : index
    %c0_159 = arith.constant 0 : index
    %118 = vector.load %arg4[%c4_157, %c0_158, %c0_159] : memref<5x320x32xf32, #tpu.memory_space<vmem>>, vector<1x320x32xf32>
    %119 = vector.shape_cast %118 : vector<1x320x32xf32> to vector<320x32xf32>
    %cst_160 = arith.constant dense<0.000000e+00> : vector<16x16x32xf32>
    %120 = tpu.matmul %117, %119, %cst_160 {dimension_numbers = #tpu.dot_dimension_numbers<[2], [0], [0, 1], [1], [0, 0, 0, 1, 1, 1], [], []>} : vector<16x16x320xf32>, vector<320x32xf32>, vector<16x16x32xf32> -> vector<16x16x32xf32>
    %121 = arith.addf %116, %120 : vector<16x16x32xf32>
    %cst_161 = arith.constant 0.000000e+00 : f32
    %122 = vector.broadcast %cst_161 : f32 to vector<16x16x32xf32>
    %123 = arith.maximumf %121, %122 : vector<16x16x32xf32>
    %cst_162 = arith.constant 0.000000e+00 : f32
    %124 = vector.broadcast %cst_162 : f32 to vector<1x16x96xf32>
    %c0_163 = arith.constant 0 : index
    %c0_164 = arith.constant 0 : index
    %c0_165 = arith.constant 0 : index
    %125 = vector.load %arg11[%c0_163, %c0_164, %c0_165] : memref<18x16x96xf32, #tpu.memory_space<vmem>>, vector<1x16x96xf32>
    tpu.vector_store %arg11[%c0_163, %c0_164, %c0_165], %124 {strides = array<i32>} : memref<18x16x96xf32, #tpu.memory_space<vmem>>, vector<1x16x96xf32>,
    %c17 = arith.constant 17 : index
    %c0_166 = arith.constant 0 : index
    %c0_167 = arith.constant 0 : index
    %126 = vector.load %arg11[%c17, %c0_166, %c0_167] : memref<18x16x96xf32, #tpu.memory_space<vmem>>, vector<1x16x96xf32>
    tpu.vector_store %arg11[%c17, %c0_166, %c0_167], %124 {strides = array<i32>} : memref<18x16x96xf32, #tpu.memory_space<vmem>>, vector<1x16x96xf32>,
    %cst_168 = arith.constant 0.000000e+00 : f32
    %127 = vector.broadcast %cst_168 : f32 to vector<16x1x32xf32>
    %c1_169 = arith.constant 1 : index
    %c0_170 = arith.constant 0 : index
    %c0_171 = arith.constant 0 : index
    %128 = vector.load %arg11[%c1_169, %c0_170, %c0_171] : memref<18x16x96xf32, #tpu.memory_space<vmem>>, vector<16x1x32xf32>
    tpu.vector_store %arg11[%c1_169, %c0_170, %c0_171], %127 {strides = array<i32>} : memref<18x16x96xf32, #tpu.memory_space<vmem>>, vector<16x1x32xf32>,
    %129 = vector.extract_strided_slice %123 {offsets = [0, 0, 0], sizes = [16, 15, 32], strides = [1, 1, 1]} : vector<16x16x32xf32> to vector<16x15x32xf32>
    %c1_172 = arith.constant 1 : index
    %c1_173 = arith.constant 1 : index
    %c0_174 = arith.constant 0 : index
    %130 = vector.load %arg11[%c1_172, %c1_173, %c0_174] : memref<18x16x96xf32, #tpu.memory_space<vmem>>, vector<16x15x32xf32>
    tpu.vector_store %arg11[%c1_172, %c1_173, %c0_174], %129 {strides = array<i32>} : memref<18x16x96xf32, #tpu.memory_space<vmem>>, vector<16x15x32xf32>,
    %c1_175 = arith.constant 1 : index
    %c0_176 = arith.constant 0 : index
    %c32 = arith.constant 32 : index
    %131 = vector.load %arg11[%c1_175, %c0_176, %c32] : memref<18x16x96xf32, #tpu.memory_space<vmem>>, vector<16x16x32xf32>
    tpu.vector_store %arg11[%c1_175, %c0_176, %c32], %123 {strides = array<i32>} : memref<18x16x96xf32, #tpu.memory_space<vmem>>, vector<16x16x32xf32>,
    %cst_177 = arith.constant 0.000000e+00 : f32
    %132 = vector.broadcast %cst_177 : f32 to vector<16x1x32xf32>
    %c1_178 = arith.constant 1 : index
    %c15_179 = arith.constant 15 : index
    %c64_180 = arith.constant 64 : index
    %133 = vector.load %arg11[%c1_178, %c15_179, %c64_180] : memref<18x16x96xf32, #tpu.memory_space<vmem>>, vector<16x1x32xf32>
    tpu.vector_store %arg11[%c1_178, %c15_179, %c64_180], %132 {strides = array<i32>} : memref<18x16x96xf32, #tpu.memory_space<vmem>>, vector<16x1x32xf32>,
    %134 = vector.extract_strided_slice %123 {offsets = [0, 1, 0], sizes = [16, 15, 32], strides = [1, 1, 1]} : vector<16x16x32xf32> to vector<16x15x32xf32>
    %c1_181 = arith.constant 1 : index
    %c0_182 = arith.constant 0 : index
    %c64_183 = arith.constant 64 : index
    %135 = vector.load %arg11[%c1_181, %c0_182, %c64_183] : memref<18x16x96xf32, #tpu.memory_space<vmem>>, vector<16x15x32xf32>
    tpu.vector_store %arg11[%c1_181, %c0_182, %c64_183], %134 {strides = array<i32>} : memref<18x16x96xf32, #tpu.memory_space<vmem>>, vector<16x15x32xf32>,
    %c0_184 = arith.constant 0 : index
    %c0_185 = arith.constant 0 : index
    %136 = vector.load %arg7[%c0_184, %c0_185] : memref<1x2xf32, #tpu.memory_space<vmem>>, vector<1x2xf32>
    %137 = vector.shape_cast %136 : vector<1x2xf32> to vector<2xf32>
    %138 = vector.shape_cast %137 : vector<2xf32> to vector<1x1x2xf32>
    %139 = vector.broadcast %138 : vector<1x1x2xf32> to vector<16x16x2xf32>
    %c0_186 = arith.constant 0 : index
    %c0_187 = arith.constant 0 : index
    %c0_188 = arith.constant 0 : index
    %140 = vector.load %arg11[%c0_186, %c0_187, %c0_188] : memref<18x16x96xf32, #tpu.memory_space<vmem>>, vector<16x16x96xf32>
    %c0_189 = arith.constant 0 : index
    %c0_190 = arith.constant 0 : index
    %c0_191 = arith.constant 0 : index
    %141 = vector.load %arg6[%c0_189, %c0_190, %c0_191] : memref<3x96x2xf32, #tpu.memory_space<vmem>>, vector<1x96x2xf32>
    %142 = vector.shape_cast %141 : vector<1x96x2xf32> to vector<96x2xf32>
    %cst_192 = arith.constant dense<0.000000e+00> : vector<16x16x2xf32>
    %143 = tpu.matmul %140, %142, %cst_192 {dimension_numbers = #tpu.dot_dimension_numbers<[2], [0], [0, 1], [1], [0, 0, 0, 1, 1, 1], [], []>} : vector<16x16x96xf32>, vector<96x2xf32>, vector<16x16x2xf32> -> vector<16x16x2xf32>
    %144 = arith.addf %139, %143 : vector<16x16x2xf32>
    %c1_193 = arith.constant 1 : index
    %c0_194 = arith.constant 0 : index
    %c0_195 = arith.constant 0 : index
    %145 = vector.load %arg11[%c1_193, %c0_194, %c0_195] : memref<18x16x96xf32, #tpu.memory_space<vmem>>, vector<16x16x96xf32>
    %c1_196 = arith.constant 1 : index
    %c0_197 = arith.constant 0 : index
    %c0_198 = arith.constant 0 : index
    %146 = vector.load %arg6[%c1_196, %c0_197, %c0_198] : memref<3x96x2xf32, #tpu.memory_space<vmem>>, vector<1x96x2xf32>
    %147 = vector.shape_cast %146 : vector<1x96x2xf32> to vector<96x2xf32>
    %cst_199 = arith.constant dense<0.000000e+00> : vector<16x16x2xf32>
    %148 = tpu.matmul %145, %147, %cst_199 {dimension_numbers = #tpu.dot_dimension_numbers<[2], [0], [0, 1], [1], [0, 0, 0, 1, 1, 1], [], []>} : vector<16x16x96xf32>, vector<96x2xf32>, vector<16x16x2xf32> -> vector<16x16x2xf32>
    %149 = arith.addf %144, %148 : vector<16x16x2xf32>
    %c2_200 = arith.constant 2 : index
    %c0_201 = arith.constant 0 : index
    %c0_202 = arith.constant 0 : index
    %150 = vector.load %arg11[%c2_200, %c0_201, %c0_202] : memref<18x16x96xf32, #tpu.memory_space<vmem>>, vector<16x16x96xf32>
    %c2_203 = arith.constant 2 : index
    %c0_204 = arith.constant 0 : index
    %c0_205 = arith.constant 0 : index
    %151 = vector.load %arg6[%c2_203, %c0_204, %c0_205] : memref<3x96x2xf32, #tpu.memory_space<vmem>>, vector<1x96x2xf32>
    %152 = vector.shape_cast %151 : vector<1x96x2xf32> to vector<96x2xf32>
    %cst_206 = arith.constant dense<0.000000e+00> : vector<16x16x2xf32>
    %153 = tpu.matmul %150, %152, %cst_206 {dimension_numbers = #tpu.dot_dimension_numbers<[2], [0], [0, 1], [1], [0, 0, 0, 1, 1, 1], [], []>} : vector<16x16x96xf32>, vector<96x2xf32>, vector<16x16x2xf32> -> vector<16x16x2xf32>
    %154 = arith.addf %149, %153 : vector<16x16x2xf32>
    %155 = vector.shape_cast %154 : vector<16x16x2xf32> to vector<256x2xf32>
    %156 = tpu.transpose %155, [1, 0] : vector<256x2xf32> -> vector<2x256xf32>
    %c0_207 = arith.constant 0 : index
    %c0_208 = arith.constant 0 : index
    %c0_209 = arith.constant 0 : index
    %157 = vector.load %arg8[%c0_207, %c0_208, %c0_209] : memref<1x2x256xf32, #tpu.memory_space<vmem>>, vector<1x2x256xf32>
    %158 = vector.shape_cast %157 : vector<1x2x256xf32> to vector<2x256xf32>
    %159 = vector.shape_cast %156 : vector<2x256xf32> to vector<1x2x256xf32>
    tpu.vector_store %arg8[%c0_207, %c0_208, %c0_209], %159 {strides = array<i32>} : memref<1x2x256xf32, #tpu.memory_space<vmem>>, vector<1x2x256xf32>,
    return
  }
  func.func @transform_0(%arg0: i32) -> (i32, i32, i32) {
    %c0_i32 = arith.constant 0 : i32
    %c0_i32_0 = arith.constant 0 : i32
    %c0_i32_1 = arith.constant 0 : i32
    return %arg0, %c0_i32, %c0_i32_0 : i32, i32, i32
  }
  func.func @transform_1(%arg0: i32) -> (i32, i32, i32) {
    %c0_i32 = arith.constant 0 : i32
    %c0_i32_0 = arith.constant 0 : i32
    %c0_i32_1 = arith.constant 0 : i32
    %c0_i32_2 = arith.constant 0 : i32
    return %c0_i32, %c0_i32_0, %c0_i32_1 : i32, i32, i32
  }
  func.func @transform_2(%arg0: i32) -> (i32, i32) {
    %c0_i32 = arith.constant 0 : i32
    %c0_i32_0 = arith.constant 0 : i32
    %c0_i32_1 = arith.constant 0 : i32
    return %c0_i32, %c0_i32_0 : i32, i32
  }
  func.func @transform_3(%arg0: i32) -> (i32, i32, i32) {
    %c0_i32 = arith.constant 0 : i32
    %c0_i32_0 = arith.constant 0 : i32
    %c0_i32_1 = arith.constant 0 : i32
    %c0_i32_2 = arith.constant 0 : i32
    return %c0_i32, %c0_i32_0, %c0_i32_1 : i32, i32, i32
  }
  func.func @transform_4(%arg0: i32) -> (i32, i32) {
    %c0_i32 = arith.constant 0 : i32
    %c0_i32_0 = arith.constant 0 : i32
    %c0_i32_1 = arith.constant 0 : i32
    return %c0_i32, %c0_i32_0 : i32, i32
  }
  func.func @transform_5(%arg0: i32) -> (i32, i32, i32) {
    %c0_i32 = arith.constant 0 : i32
    %c0_i32_0 = arith.constant 0 : i32
    %c0_i32_1 = arith.constant 0 : i32
    %c0_i32_2 = arith.constant 0 : i32
    return %c0_i32, %c0_i32_0, %c0_i32_1 : i32, i32, i32
  }
  func.func @transform_6(%arg0: i32) -> (i32, i32) {
    %c0_i32 = arith.constant 0 : i32
    %c0_i32_0 = arith.constant 0 : i32
    %c0_i32_1 = arith.constant 0 : i32
    return %c0_i32, %c0_i32_0 : i32, i32
  }
  func.func @transform_7(%arg0: i32) -> (i32, i32, i32) {
    %c0_i32 = arith.constant 0 : i32
    %c0_i32_0 = arith.constant 0 : i32
    %c0_i32_1 = arith.constant 0 : i32
    return %arg0, %c0_i32, %c0_i32_0 : i32, i32, i32
  }
}

</mosaic_0001>

<bundles_post_ra>
// kernel: optical_flow_estimator.1
= control target key start
LH: loop header
LB: loop body
LE: loop exit
PB: predicated region body
PF: predicated region fallthrough
CT: control target
= control target key end

     0   :  { %s13378_s24 = smov 0   ;;  %s19031_s0 = inlined_call_operand.vmem [shape: f32[2,6,256], index: 0, kind: input, shape index: {}]   ;;  %s19032_s1 = inlined_call_operand.vmem [shape: f32[7,42,64], index: 1, kind: input, shape index: {}]   ;;  %s19033_s2 = inlined_call_operand.vmem [shape: f32[1,64], index: 2, kind: input, shape index: {}]   ;;  %s19034_s3 = inlined_call_operand.vmem [shape: f32[5,320,32], index: 3, kind: input, shape index: {}]   ;;  %s19035_s4 = inlined_call_operand.vmem [shape: f32[1,32], index: 4, kind: input, shape index: {}]   ;;  %s19036_s5 = inlined_call_operand.vmem [shape: f32[3,96,2], index: 5, kind: input, shape index: {}]   ;;  %s19037_s6 = inlined_call_operand.vmem [shape: f32[1,2], index: 6, kind: input, shape index: {}]   ;;  %s19038_s7 = inlined_call_operand.vmem [shape: f32[2,2,256], index: 7, kind: output, shape index: {}]  }
   0x1 LB: > { %s10172_s25 = sadd.s32 4294967295, %s13325_s24   ;;  %p10176_p0 = scmp.ge.s32.totalorder %s13325_s24, 1  ;;  %s13325_s24 = sphi %s13378_s24, %s17_s24  }
   0x2   : > { %p237_p1 = scmp.lt.s32.totalorder %s13325_s24, 3 }
   0x4   : > { %p238_p2 = pnand %p10176_p0, %p237_p1 }
   0x6   : > { %241 = sbr.rel (%p238_p2) target bundleno = 2874 (0xb3a), region = 48 }
   0xd   : > { %p269_p3 = scmp.lt.s32.totalorder %s10172_s25, 1  ;;  %vm360_vm0 = vcmask 43008   ;;  %v13327_v2 = vmov 0.0   ;;  %vm411_vm1 = vcmask 91184   ;;  %vm590_vm2 = vcmask 139360   ;;  %s13328_s30 = smov 6  }
   0xe   : > { %361 = vst.msk [vmem:[#allocation2 + $0x30] sm:$0x7] %vm360_vm0, %v13327_v2  ;;  %362 = vst.msk [vmem:[#allocation2 + $0x40] sm:$0x7] %vm360_vm0, %v13327_v2  ;;  %5161 = vmatprep.mubr.f32.mxu1 %v13327_v2  ;;  %vm377_vm3 = vcmask 48128   ;;  %vm379_vm4 = vcmask 45056  }
   0xf   : > { %s19418_s25 = smov (!%p269_p3, %s10172_s25), 1  ;;  %363 = vst.msk [vmem:[#allocation2 + $0x50] sm:$0x7] %vm360_vm0, %v13327_v2  ;;  %364 = vst.msk [vmem:[#allocation2 + $0x60] sm:$0x7] %vm360_vm0, %v13327_v2  ;;  %s13329_s8 = smov 12  }
  0x10   : > { %s10894_s26 = sshll.u32 %s19418_s25, 4  ;;  %365 = vst.msk [vmem:[#allocation2 + $0x70] sm:$0x7] %vm360_vm0, %v13327_v2  ;;  %366 = vst.msk [vmem:[#allocation2 + $0x80] sm:$0x7] %vm360_vm0, %v13327_v2  ;;  %s13330_s9 = smov 18  }
  0x11   : > { %s273_s29 = scalar_lea.vmem %s19031_s0, %s10894_s26  ;;  %367 = vst.msk [vmem:[#allocation2 + $0x90] sm:$0x7] %vm360_vm0, %v13327_v2  ;;  %368 = vst.msk [vmem:[#allocation2 + $0xa0] sm:$0x7] %vm360_vm0, %v13327_v2  ;;  %s13331_s10 = smov 24   ;;  %v1346_v7 = vld [vmem:[%s19032_s1] sm:$0xff] }
  0x12   : > { %v279_v0 = vld [vmem:[%s273_s29] sm:$0x3f]  ;;  %v280_v1 = vld [vmem:[%s273_s29 + $0x8] sm:$0x3f]  ;;  %369 = vst.msk [vmem:[#allocation2 + $0xb0] sm:$0x7] %vm360_vm0, %v13327_v2 }
  0x13   : > { %281 = vxpose.xlu0.b32.start.end [1/1] (short) %v279_v0, 128  ;;  %370 = vst.msk [vmem:[#allocation2 + $0xc0] sm:$0x7] %vm360_vm0, %v13327_v2  ;;  %371 = vst.msk [vmem:[#allocation2 + $0xd0] sm:$0x7] %vm360_vm0, %v13327_v2  ;;  %v1347_v8 = vld [vmem:[%s19032_s1 + $0x8] sm:$0xff]  ;;  %s13332_s15 = smov 30  }
  0x14   : > { %372 = vst.msk [vmem:[#allocation2 + $0xe0] sm:$0x7] %vm360_vm0, %v13327_v2  ;;  %373 = vst.msk [vmem:[#allocation2 + $0xf0] sm:$0x7] %vm360_vm0, %v13327_v2  ;;  %v12450_v9 = vpack.c.bf16 %v1347_v8, %v1346_v7  ;;  %v1348_v11 = vld [vmem:[%s19032_s1 + $0x10] sm:$0xff]  ;;  %v1349_v12 = vld [vmem:[%s19032_s1 + $0x18] sm:$0xff] }
  0x15   : > { %374 = vst.msk [vmem:[#allocation2 + $0x100] sm:$0x7] %vm360_vm0, %v13327_v2  ;;  %375 = vst.msk [vmem:[#allocation2 + $0x110] sm:$0x7] %vm360_vm0, %v13327_v2  ;;  %v12454_v13 = vpack.c.bf16 %v1349_v12, %v1348_v11  ;;  %vm345_vm5 = vcmask 343040   ;;  %s13333_s20 = smov 36  }
  0x16   : > { %376 = vst.msk [vmem:[#allocation2 + $0x120] sm:$0x7] %vm360_vm0, %v13327_v2  ;;  %4116 = vst [vmem:[#allocation3] sm:$0xff] %v13327_v2  ;;  %12451 = vmatprep.subr.bf16.mxu0 %v12450_v9  ;;  %v1350_v15 = vld [vmem:[%s19032_s1 + $0x20] sm:$0xff]  ;;  %v1351_v16 = vld [vmem:[%s19032_s1 + $0x28] sm:$0x3] }
  0x17   : > { %412 = vst.msk [vmem:[#allocation2 + $0x30] sm:$0x3] %vm411_vm1, %v13327_v2  ;;  %413 = vst.msk [vmem:[#allocation2 + $0x40] sm:$0x3] %vm411_vm1, %v13327_v2  ;;  %12453 = vmatpush3.bf16.msra.mxu0 %v12450_v9  ;;  %vm19039_vm6 = vcmask 1041408   ;;  %v12458_v17 = vpack.c.bf16 %v1351_v16, %v1350_v15  ;;  %vm13334_vm7 = vmmov 1  }
  0x18   : > { %414 = vst.msk [vmem:[#allocation2 + $0x50] sm:$0x3] %vm411_vm1, %v13327_v2  ;;  %415 = vst.msk [vmem:[#allocation2 + $0x60] sm:$0x3] %vm411_vm1, %v13327_v2  ;;  %12455 = vmatprep.subr.bf16.mxu0 %v12454_v13  ;;  %vm556_vm9 = vcmask 97328   ;;  %vm703_vm10 = vcmask 146528  }
  0x19   : > { %416 = vst.msk [vmem:[#allocation2 + $0x70] sm:$0x3] %vm411_vm1, %v13327_v2  ;;  %417 = vst.msk [vmem:[#allocation2 + $0x80] sm:$0x3] %vm411_vm1, %v13327_v2  ;;  %vm833_vm11 = vcmask 195728   ;;  %vm979_vm12 = vcmask 244929  }
  0x1a   : > { %418 = vst.msk [vmem:[#allocation2 + $0x90] sm:$0x3] %vm411_vm1, %v13327_v2  ;;  %419 = vst.msk [vmem:[#allocation2 + $0xa0] sm:$0x3] %vm411_vm1, %v13327_v2  ;;  %vm1126_vm13 = vcmask 294130   ;;  %vm1273_vm14 = vcmask 343331  }
  0x1b   : > { %420 = vst.msk [vmem:[#allocation2 + $0xb0] sm:$0x3] %vm411_vm1, %v13327_v2  ;;  %421 = vst.msk [vmem:[#allocation2 + $0xc0] sm:$0x3] %vm411_vm1, %v13327_v2  ;;  %12457 = vmatpush3.bf16.msra.mxu0 %v12454_v13  ;;  %vm558_vm15 = vcmask 95280   ;;  %vm705_vm0 = vcmask 145504  }
  0x1c   : > { %422 = vst.msk [vmem:[#allocation2 + $0xd0] sm:$0x3] %vm411_vm1, %v13327_v2  ;;  %423 = vst.msk [vmem:[#allocation2 + $0xe0] sm:$0x3] %vm411_vm1, %v13327_v2  ;;  %s13336_s18 = smov 64   ;;  %s13337_s26 = smov 32  }
  0x1d   : > { %424 = vst.msk [vmem:[#allocation2 + $0xf0] sm:$0x3] %vm411_vm1, %v13327_v2  ;;  %425 = vst.msk [vmem:[#allocation2 + $0x100] sm:$0x3] %vm411_vm1, %v13327_v2 }
  0x1e   : > { %426 = vst.msk [vmem:[#allocation2 + $0x110] sm:$0x3] %vm411_vm1, %v13327_v2  ;;  %427 = vst.msk [vmem:[#allocation2 + $0x120] sm:$0x3] %vm411_vm1, %v13327_v2  ;;  %vm866_vm1 = vcmask 237760  }
  0x1f   : > { %591 = vst.msk [vmem:[#allocation2 + $0x30] sm:$0x1] %vm590_vm2, %v13327_v2  ;;  %592 = vst.msk [vmem:[#allocation2 + $0x40] sm:$0x1] %vm590_vm2, %v13327_v2 }
  0x20   : > { %593 = vst.msk [vmem:[#allocation2 + $0x50] sm:$0x1] %vm590_vm2, %v13327_v2  ;;  %594 = vst.msk [vmem:[#allocation2 + $0x60] sm:$0x1] %vm590_vm2, %v13327_v2 }
  0x21   : > { %595 = vst.msk [vmem:[#allocation2 + $0x70] sm:$0x1] %vm590_vm2, %v13327_v2  ;;  %596 = vst.msk [vmem:[#allocation2 + $0x80] sm:$0x1] %vm590_vm2, %v13327_v2 }
  0x22   : > { %597 = vst.msk [vmem:[#allocation2 + $0x90] sm:$0x1] %vm590_vm2, %v13327_v2  ;;  %598 = vst.msk [vmem:[#allocation2 + $0xa0] sm:$0x1] %vm590_vm2, %v13327_v2 }
  0x23   : > { %599 = vst.msk [vmem:[#allocation2 + $0xb0] sm:$0x1] %vm590_vm2, %v13327_v2  ;;  %600 = vst.msk [vmem:[#allocation2 + $0xc0] sm:$0x1] %vm590_vm2, %v13327_v2 }
  0x24   : > { %601 = vst.msk [vmem:[#allocation2 + $0xd0] sm:$0x1] %vm590_vm2, %v13327_v2  ;;  %602 = vst.msk [vmem:[#allocation2 + $0xe0] sm:$0x1] %vm590_vm2, %v13327_v2 }
  0x25   : > { %603 = vst.msk [vmem:[#allocation2 + $0xf0] sm:$0x1] %vm590_vm2, %v13327_v2  ;;  %604 = vst.msk [vmem:[#allocation2 + $0x100] sm:$0x1] %vm590_vm2, %v13327_v2 }
  0x26   : > { %605 = vst.msk [vmem:[#allocation2 + $0x110] sm:$0x1] %vm590_vm2, %v13327_v2  ;;  %606 = vst.msk [vmem:[#allocation2 + $0x120] sm:$0x1] %vm590_vm2, %v13327_v2  ;;  %vm981_vm2 = vcmask 244928  }
  0x27   : > { %346 = vst.msk [vmem:[#allocation2] sm:$0xff] %vm345_vm5, %v13327_v2  ;;  %347 = vst.msk [vmem:[#allocation2 + $0x8] sm:$0xff] %vm345_vm5, %v13327_v2 }
  0x28   : > { %348 = vst.msk [vmem:[#allocation2 + $0x10] sm:$0xff] %vm345_vm5, %v13327_v2  ;;  %349 = vst.msk [vmem:[#allocation2 + $0x18] sm:$0xff] %vm345_vm5, %v13327_v2 }
  0x29   : > { %350 = vst.msk [vmem:[#allocation2 + $0x20] sm:$0xff] %vm345_vm5, %v13327_v2  ;;  %351 = vst.msk [vmem:[#allocation2 + $0x28] sm:$0xff] %vm345_vm5, %v13327_v2 }
  0x2a   : > { %353 = vst.msk [vmem:[#allocation2 + $0x130] sm:$0xff] %vm345_vm5, %v13327_v2  ;;  %354 = vst.msk [vmem:[#allocation2 + $0x138] sm:$0xff] %vm345_vm5, %v13327_v2 }
  0x2b   : > { %355 = vst.msk [vmem:[#allocation2 + $0x140] sm:$0xff] %vm345_vm5, %v13327_v2  ;;  %356 = vst.msk [vmem:[#allocation2 + $0x148] sm:$0xff] %vm345_vm5, %v13327_v2 }
  0x2c   : > { %357 = vst.msk [vmem:[#allocation2 + $0x150] sm:$0xff] %vm345_vm5, %v13327_v2  ;;  %358 = vst.msk [vmem:[#allocation2 + $0x158] sm:$0xff] %vm345_vm5, %v13327_v2 }
  0x2d   : > { %vm13562_vm8 = vmpackc.low %vm19039_vm6, %vm13334_vm7  ;;  %vm1160_vm7 = vcmask 338208   ;;  %vm1275_vm6 = vcmask 343328  }
  0x2e   : > { %12460 = vmatprep.subr.msk.bf16.mxu0 %vm13562_vm8, %v12458_v17  ;;  %v1314_v20 = vld [vmem:[#allocation2] sm:$0xff]  ;;  %v1315_v22 = vld [vmem:[#allocation2 + $0x8] sm:$0xff] }
  0x2f   : > { %12463 = vmatpush3.bf16.msk.msra.mxu0 %vm13562_vm8, %v12458_v17  ;;  %11506 = vmatprep.mubr.msk.f32.mxu0 %vm345_vm5, %v1314_v20  ;;  %v1316_v23 = vld [vmem:[#allocation2 + $0x10] sm:$0xff]  ;;  %v1317_v25 = vld [vmem:[#allocation2 + $0x18] sm:$0xff] }
  0x30   : > { %v1318_v26 = vld [vmem:[#allocation2 + $0x20] sm:$0xff]  ;;  %v1319_v28 = vld [vmem:[#allocation2 + $0x28] sm:$0xff] }
  0x32   : > { %11507 = vmatmul.mubr.msk.f32.vlgmr.msra.gmra.mrb[0].mxu0 %vm345_vm5, %v1315_v22 }
  0x33   : > { %11509 = vmatprep.mubr.msk.f32.mxu0 %vm345_vm5, %v1316_v23 }
  0x36   : > { %11510 = vmatmul.mubr.msk.f32.gmra.mrb[2].mxu0 %vm345_vm5, %v1317_v25 }
  0x37   : > { %11512 = vmatprep.mubr.msk.f32.mxu0 %vm345_vm5, %v1318_v26 }
  0x3a   : > { %11513 = vmatmul.mubr.msk.f32.gmra.mrb[4].mxu0 %vm345_vm5, %v1319_v28 }
  0x50   : > { %313 = vxpose.xlu0.b32.start.end [1/1] (short) %v280_v1, 128 }
  0x93   : > { %v297_v3 = vpop.trf.xlu0 }
  0x94   : > { %460 = vrot.lane.b32.xlu1 %v297_v3, %s13328_s30  ;;  %378 = vst.msk [vmem:[#allocation2 + $0x33] sm:$0xff] %vm377_vm3, %v297_v3 }
  0x97   : > { %v13492_v4 = vpop.trf.xlu0 }
  0x98   : > { %607 = vrot.lane.b32.xlu1 %v297_v3, %s13329_s8  ;;  %380 = vst.msk [vmem:[#allocation2 + $0x3b] sm:$0x1f] %vm379_vm4, %v13492_v4 }
  0x9b   : > { %v13497_v5 = vpop.trf.xlu0 }
  0x9c   : > { %737 = vrot.lane.b32.xlu1 %v297_v3, %s13330_s9  ;;  %381 = vst.msk [vmem:[#allocation2 + $0x43] sm:$0xff] %vm377_vm3, %v13497_v5 }
  0x9f   : > { %v13502_v6 = vpop.trf.xlu0 }
  0xa0   : > { %883 = vrot.lane.b32.xlu1 %v297_v3, %s13331_s10  ;;  %382 = vst.msk [vmem:[#allocation2 + $0x4b] sm:$0x1f] %vm379_vm4, %v13502_v6 }
  0xa3   : > { %v13513_v10 = vpop.trf.xlu0 }
  0xa4   : > { %1030 = vrot.lane.b32.xlu1 %v297_v3, %s13332_s15  ;;  %383 = vst.msk [vmem:[#allocation2 + $0x53] sm:$0xff] %vm377_vm3, %v13513_v10 }
  0xa7   : > { %v13524_v14 = vpop.trf.xlu0 }
  0xa8   : > { %1177 = vrot.lane.b32.xlu1 %v297_v3, %s13333_s20  ;;  %384 = vst.msk [vmem:[#allocation2 + $0x5b] sm:$0x1f] %vm379_vm4, %v13524_v14 }
  0xab   : > { %v13559_v18 = vpop.trf.xlu0 }
  0xac   : > { %462 = vrot.lane.b32.xlu1 %v13492_v4, %s13328_s30  ;;  %385 = vst.msk [vmem:[#allocation2 + $0x63] sm:$0xff] %vm377_vm3, %v13559_v18 }
  0xaf   : > { %v13574_v21 = vpop.trf.xlu0 }
  0xb0   : > { %609 = vrot.lane.b32.xlu1 %v13492_v4, %s13329_s8  ;;  %386 = vst.msk [vmem:[#allocation2 + $0x6b] sm:$0x1f] %vm379_vm4, %v13574_v21 }
  0xb3   : > { %v13582_v24 = vpop.trf.xlu0 }
  0xb4   : > { %739 = vrot.lane.b32.xlu1 %v13492_v4, %s13330_s9  ;;  %387 = vst.msk [vmem:[#allocation2 + $0x73] sm:$0xff] %vm377_vm3, %v13582_v24 }
  0xb5   : > { %743 = vrot.lane.b32.xlu0 %v13502_v6, %s13330_s9 }
  0xb7   : > { %v306_v27 = vpop.trf.xlu0 }
  0xb8   : > { %885 = vrot.lane.b32.xlu1 %v13492_v4, %s13331_s10  ;;  %388 = vst.msk [vmem:[#allocation2 + $0x7b] sm:$0x1f] %vm379_vm4, %v306_v27 }
  0xb9   : > { %897 = vrot.lane.b32.xlu0 %v13574_v21, %s13331_s10 }
  0xbb   : > { %v13599_v29 = vpop.trf.xlu0 }
  0xbc   : > { %1032 = vrot.lane.b32.xlu1 %v13492_v4, %s13332_s15  ;;  %389 = vst.msk [vmem:[#allocation2 + $0x83] sm:$0xff] %vm377_vm3, %v13599_v29 }
  0xbd   : > { %478 = vrot.lane.b32.xlu0 %v306_v27, %s13328_s30 }
  0xbf   : > { %v308_v30 = vpop.trf.xlu0 }
  0xc0   : > { %1179 = vrot.lane.b32.xlu1 %v13492_v4, %s13333_s20  ;;  %390 = vst.msk [vmem:[#allocation2 + $0x8b] sm:$0x1f] %vm379_vm4, %v308_v30 }
  0xc1   : > { %1044 = vrot.lane.b32.xlu0 %v13574_v21, %s13332_s15 }
  0xc3   : > { %v13611_v31 = vpop.trf.xlu0 }
  0xc4   : > { %464 = vrot.lane.b32.xlu1 %v13497_v5, %s13328_s30  ;;  %391 = vst.msk [vmem:[#allocation2 + $0x93] sm:$0xff] %vm377_vm3, %v13611_v31 }
  0xc5   : > { %625 = vrot.lane.b32.xlu0 %v306_v27, %s13329_s8 }
  0xc7   : > { %v13618_v32 = vpop.trf.xlu0 }
  0xc8   : > { %611 = vrot.lane.b32.xlu1 %v13497_v5, %s13329_s8  ;;  %392 = vst.msk [vmem:[#allocation2 + $0x9b] sm:$0x1f] %vm379_vm4, %v13618_v32 }
  0xc9   : > { %1191 = vrot.lane.b32.xlu0 %v13574_v21, %s13333_s20 }
  0xcb   : > { %v13626_v33 = vpop.trf.xlu0 }
  0xcc   : > { %741 = vrot.lane.b32.xlu1 %v13497_v5, %s13330_s9  ;;  %393 = vst.msk [vmem:[#allocation2 + $0xa3] sm:$0xff] %vm377_vm3, %v13626_v33 }
  0xcd   : > { %755 = vrot.lane.b32.xlu0 %v306_v27, %s13330_s9 }
  0xcf   : > { %v13633_v34 = vpop.trf.xlu0 }
  0xd0   : > { %466 = vrot.lane.b32.xlu1 %v13502_v6, %s13328_s30  ;;  %394 = vst.msk [vmem:[#allocation2 + $0xab] sm:$0x1f] %vm379_vm4, %v13633_v34 }
  0xd1   : > { %901 = vrot.lane.b32.xlu0 %v306_v27, %s13331_s10 }
  0xd3   : > { %v13640_v35 = vpop.trf.xlu0 }
  0xd4   : > { %613 = vrot.lane.b32.xlu1 %v13502_v6, %s13329_s8  ;;  %395 = vst.msk [vmem:[#allocation2 + $0xb3] sm:$0xff] %vm377_vm3, %v13640_v35 }
  0xd5   : > { %482 = vrot.lane.b32.xlu0 %v308_v30, %s13328_s30 }
  0xd7   : > { %v13647_v36 = vpop.trf.xlu0 }
  0xd8   : > { %887 = vrot.lane.b32.xlu1 %v13497_v5, %s13331_s10  ;;  %396 = vst.msk [vmem:[#allocation2 + $0xbb] sm:$0x1f] %vm379_vm4, %v13647_v36 }
  0xd9   : > { %1048 = vrot.lane.b32.xlu0 %v306_v27, %s13332_s15 }
  0xdb   : > { %v13654_v37 = vpop.trf.xlu0 }
  0xdc   : > { %1034 = vrot.lane.b32.xlu1 %v13497_v5, %s13332_s15  ;;  %397 = vst.msk [vmem:[#allocation2 + $0xc3] sm:$0xff] %vm377_vm3, %v13654_v37 }
  0xdd   : > { %629 = vrot.lane.b32.xlu0 %v308_v30, %s13329_s8 }
  0xdf   : > { %v13661_v38 = vpop.trf.xlu0 }
  0xe0   : > { %889 = vrot.lane.b32.xlu1 %v13502_v6, %s13331_s10  ;;  %398 = vst.msk [vmem:[#allocation2 + $0xcb] sm:$0x1f] %vm379_vm4, %v13661_v38 }
  0xe1   : > { %1195 = vrot.lane.b32.xlu0 %v306_v27, %s13333_s20 }
  0xe3   : > { %v13668_v39 = vpop.trf.xlu0 }
  0xe4   : > { %1036 = vrot.lane.b32.xlu1 %v13502_v6, %s13332_s15  ;;  %399 = vst.msk [vmem:[#allocation2 + $0xd3] sm:$0xff] %vm377_vm3, %v13668_v39 }
  0xe5   : > { %759 = vrot.lane.b32.xlu0 %v308_v30, %s13330_s9 }
  0xe7   : > { %v13675_v40 = vpop.trf.xlu0 }
  0xe8   : > { %468 = vrot.lane.b32.xlu1 %v13513_v10, %s13328_s30  ;;  %400 = vst.msk [vmem:[#allocation2 + $0xdb] sm:$0x1f] %vm379_vm4, %v13675_v40 }
  0xe9   : > { %905 = vrot.lane.b32.xlu0 %v308_v30, %s13331_s10 }
  0xeb   : > { %v13682_v41 = vpop.trf.xlu0 }
  0xec   : > { %615 = vrot.lane.b32.xlu1 %v13513_v10, %s13329_s8  ;;  %401 = vst.msk [vmem:[#allocation2 + $0xe3] sm:$0xff] %vm377_vm3, %v13682_v41 }
  0xed   : > { %486 = vrot.lane.b32.xlu0 %v13618_v32, %s13328_s30 }
  0xef   : > { %v13690_v42 = vpop.trf.xlu0 }
  0xf0   : > { %470 = vrot.lane.b32.xlu1 %v13524_v14, %s13328_s30  ;;  %402 = vst.msk [vmem:[#allocation2 + $0xeb] sm:$0x1f] %vm379_vm4, %v13690_v42 }
  0xf1   : > { %1052 = vrot.lane.b32.xlu0 %v308_v30, %s13332_s15 }
  0xf3   : > { %v13697_v43 = vpop.trf.xlu0 }
  0xf4   : > { %617 = vrot.lane.b32.xlu1 %v13524_v14, %s13329_s8  ;;  %403 = vst.msk [vmem:[#allocation2 + $0xf3] sm:$0xff] %vm377_vm3, %v13697_v43 }
  0xf5   : > { %633 = vrot.lane.b32.xlu0 %v13618_v32, %s13329_s8 }
  0xf7   : > { %v13705_v44 = vpop.trf.xlu0 }
  0xf8   : > { %1181 = vrot.lane.b32.xlu1 %v13497_v5, %s13333_s20  ;;  %404 = vst.msk [vmem:[#allocation2 + $0xfb] sm:$0x1f] %vm379_vm4, %v13705_v44 }
  0xf9   : > { %1199 = vrot.lane.b32.xlu0 %v308_v30, %s13333_s20 }
  0xfb   : > { %v13712_v45 = vpop.trf.xlu0 }
  0xfc   : > { %1183 = vrot.lane.b32.xlu1 %v13502_v6, %s13333_s20  ;;  %405 = vst.msk [vmem:[#allocation2 + $0x103] sm:$0xff] %vm377_vm3, %v13712_v45 }
  0xfd   : > { %763 = vrot.lane.b32.xlu0 %v13618_v32, %s13330_s9 }
  0xff   : > { %v13720_v46 = vpop.trf.xlu0 }
 0x100   : > { %745 = vrot.lane.b32.xlu1 %v13513_v10, %s13330_s9  ;;  %406 = vst.msk [vmem:[#allocation2 + $0x10b] sm:$0x1f] %vm379_vm4, %v13720_v46 }
 0x101   : > { %909 = vrot.lane.b32.xlu0 %v13618_v32, %s13331_s10 }
 0x103   : > { %v13728_v47 = vpop.trf.xlu0 }
 0x104   : > { %747 = vrot.lane.b32.xlu1 %v13524_v14, %s13330_s9  ;;  %407 = vst.msk [vmem:[#allocation2 + $0x113] sm:$0xff] %vm377_vm3, %v13728_v47 }
 0x105   : > { %490 = vrot.lane.b32.xlu0 %v13633_v34, %s13328_s30 }
 0x106   : > { %v461_v48 = vpop.permute.xlu1 %460 }
 0x107   : > { %557 = vst.msk [vmem:[#allocation2 + $0x32] sm:$0xff] %vm556_vm9, %v461_v48  ;;  %v13737_v49 = vpop.trf.xlu0 }
 0x108   : > { %891 = vrot.lane.b32.xlu1 %v13513_v10, %s13331_s10  ;;  %408 = vst.msk [vmem:[#allocation2 + $0x11b] sm:$0x1f] %vm379_vm4, %v13737_v49 }
 0x109   : > { %1056 = vrot.lane.b32.xlu0 %v13618_v32, %s13332_s15 }
 0x10a   : > { %v608_v50 = vpop.permute.xlu1 %607 }
 0x10b   : > { %704 = vst.msk [vmem:[#allocation2 + $0x31] sm:$0xff] %vm703_vm10, %v608_v50  ;;  %v13746_v51 = vpop.trf.xlu0 }
 0x10c   : > { %893 = vrot.lane.b32.xlu1 %v13524_v14, %s13331_s10  ;;  %409 = vst.msk [vmem:[#allocation2 + $0x123] sm:$0xff] %vm377_vm3, %v13746_v51  ;;  %vm1013_vm3 = vcmask 287984  }
 0x10d   : > { %637 = vrot.lane.b32.xlu0 %v13633_v34, %s13329_s8 }
 0x10e   : > { %v738_v52 = vpop.permute.xlu1 %737 }
 0x10f   : > { %834 = vst.msk [vmem:[#allocation2 + $0x30] sm:$0xff] %vm833_vm11, %v738_v52  ;;  %v13755_v53 = vpop.trf.xlu0 }
 0x110   : > { %472 = vrot.lane.b32.xlu1 %v13559_v18, %s13328_s30  ;;  %410 = vst.msk [vmem:[#allocation2 + $0x12b] sm:$0x1f] %vm379_vm4, %v13755_v53  ;;  %vm1128_vm4 = vcmask 294128  }
 0x111   : > { %1203 = vrot.lane.b32.xlu0 %v13618_v32, %s13333_s20 }
 0x112   : > { %v884_v54 = vpop.permute.xlu1 %883 }
 0x113   : > { %980 = vst.msk [vmem:[#allocation2 + $0x2f] sm:$0xfe] %vm979_vm12, %v884_v54 }
 0x114   : > { %474 = vrot.lane.b32.xlu1 %v13574_v21, %s13328_s30 }
 0x115   : > { %767 = vrot.lane.b32.xlu0 %v13633_v34, %s13330_s9 }
 0x116   : > { %v1031_v55 = vpop.permute.xlu1 %1030 }
 0x117   : > { %1127 = vst.msk [vmem:[#allocation2 + $0x2e] sm:$0xfc] %vm1126_vm13, %v1031_v55 }
 0x118   : > { %1038 = vrot.lane.b32.xlu1 %v13513_v10, %s13332_s15 }
 0x119   : > { %913 = vrot.lane.b32.xlu0 %v13633_v34, %s13331_s10 }
 0x11a   : > { %v1178_v56 = vpop.permute.xlu1 %1177 }
 0x11b   : > { %1274 = vst.msk [vmem:[#allocation2 + $0x2d] sm:$0xf8] %vm1273_vm14, %v1178_v56 }
 0x11c   : > { %1040 = vrot.lane.b32.xlu1 %v13524_v14, %s13332_s15 }
 0x11d   : > { %494 = vrot.lane.b32.xlu0 %v13647_v36, %s13328_s30 }
 0x11e   : > { %v463_v57 = vpop.permute.xlu1 %462 }
 0x11f   : > { %559 = vst.msk [vmem:[#allocation2 + $0x3a] sm:$0x3f] %vm558_vm15, %v463_v57 }
 0x120   : > { %619 = vrot.lane.b32.xlu1 %v13559_v18, %s13329_s8 }
 0x121   : > { %1060 = vrot.lane.b32.xlu0 %v13633_v34, %s13332_s15 }
 0x122   : > { %v610_v58 = vpop.permute.xlu1 %609 }
 0x123   : > { %706 = vst.msk [vmem:[#allocation2 + $0x39] sm:$0x7f] %vm705_vm0, %v610_v58 }
 0x124   : > { %621 = vrot.lane.b32.xlu1 %v13574_v21, %s13329_s8 }
 0x125   : > { %641 = vrot.lane.b32.xlu0 %v13647_v36, %s13329_s8 }
 0x126   : > { %v740_v59 = vpop.permute.xlu1 %739 }
 0x127   : > { %835 = vst.msk [vmem:[#allocation2 + $0x38] sm:$0xff] %vm833_vm11, %v740_v59  ;;  %v744_v60 = vpop.permute.xlu0 %743 }
 0x128   : > { %867 = vst.msk [vmem:[#allocation2 + $0x3f] sm:$0x1] %vm866_vm1, %v13327_v2  ;;  %1185 = vrot.lane.b32.xlu1 %v13513_v10, %s13333_s20 }
 0x129   : > { %1207 = vrot.lane.b32.xlu0 %v13633_v34, %s13333_s20 }
 0x12a   : > { %v886_v61 = vpop.permute.xlu1 %885 }
 0x12b   : > { %982 = vst.msk [vmem:[#allocation2 + $0x37] sm:$0xff] %vm981_vm2, %v886_v61  ;;  %v13796_v62 = vpop.permute.xlu0 %897 }
 0x12c   : > { %1014 = vst.msk [vmem:[#allocation2 + $0x3e] sm:$0x3] %vm1013_vm3, %v13327_v2  ;;  %1187 = vrot.lane.b32.xlu1 %v13524_v14, %s13333_s20 }
 0x12d   : > { %771 = vrot.lane.b32.xlu0 %v13647_v36, %s13330_s9 }
 0x12e   : > { %v1033_v63 = vpop.permute.xlu1 %1032 }
 0x12f   : > { %1129 = vst.msk [vmem:[#allocation2 + $0x36] sm:$0xff] %vm1128_vm4, %v1033_v63  ;;  %v479_v0 = vpop.permute.xlu0 %478 }
 0x130   : > { %1161 = vst.msk [vmem:[#allocation2 + $0x3d] sm:$0x7] %vm1160_vm7, %v13327_v2  ;;  %749 = vrot.lane.b32.xlu1 %v13559_v18, %s13330_s9 }
 0x131   : > { %567 = vst.msk [vmem:[#allocation2 + $0x7a] sm:$0x3f] %vm558_vm15, %v479_v0  ;;  %917 = vrot.lane.b32.xlu0 %v13647_v36, %s13331_s10 }
 0x132   : > { %v1180_v1 = vpop.permute.xlu1 %1179 }
 0x133   : > { %1276 = vst.msk [vmem:[#allocation2 + $0x35] sm:$0xff] %vm1275_vm6, %v1180_v1  ;;  %v13813_v3 = vpop.permute.xlu0 %1044 }
 0x134   : > { %751 = vrot.lane.b32.xlu1 %v13574_v21, %s13330_s9 }
 0x135   : > { %498 = vrot.lane.b32.xlu0 %v13661_v38, %s13328_s30 }
 0x136   : > { %v465_v4 = vpop.permute.xlu1 %464 }
 0x137   : > { %560 = vst.msk [vmem:[#allocation2 + $0x42] sm:$0xff] %vm556_vm9, %v465_v4  ;;  %v13820_v5 = vpop.permute.xlu0 %625 }
 0x138   : > { %895 = vrot.lane.b32.xlu1 %v13559_v18, %s13331_s10 }
 0x139   : > { %1064 = vrot.lane.b32.xlu0 %v13647_v36, %s13332_s15 }
 0x13a   : > { %v612_v6 = vpop.permute.xlu1 %611  ;;  %v1320_v7 = vld [vmem:[#allocation2 + $0x30] sm:$0xff]  ;;  %v1321_v8 = vld [vmem:[#allocation2 + $0x38] sm:$0xff] }
 0x13b   : > { %707 = vst.msk [vmem:[#allocation2 + $0x41] sm:$0xff] %vm703_vm10, %v612_v6  ;;  %11515 = vmatprep.mubr.msk.f32.mxu0 %vm345_vm5, %v1320_v7  ;;  %v13828_v9 = vpop.permute.xlu0 %1191 }
 0x13c   : > { %11516 = vmatmul.mubr.msk.f32.gmra.mrb[6].mxu0 %vm345_vm5, %v1321_v8  ;;  %476 = vrot.lane.b32.xlu1 %v13582_v24, %s13328_s30 }
 0x13d   : > { %645 = vrot.lane.b32.xlu0 %v13661_v38, %s13329_s8 }
 0x13e   : > { %v742_v10 = vpop.permute.xlu1 %741 }
 0x13f   : > { %836 = vst.msk [vmem:[#allocation2 + $0x40] sm:$0xff] %vm833_vm11, %v742_v10  ;;  %v13836_v11 = vpop.permute.xlu0 %755 }
 0x140   : > { %1042 = vrot.lane.b32.xlu1 %v13559_v18, %s13332_s15 }
 0x141   : > { %1211 = vrot.lane.b32.xlu0 %v13647_v36, %s13333_s20 }
 0x142   : > { %v467_v12 = vpop.permute.xlu1 %466 }
 0x143   : > { %561 = vst.msk [vmem:[#allocation2 + $0x4a] sm:$0x3f] %vm558_vm15, %v467_v12  ;;  %v13843_v13 = vpop.permute.xlu0 %901 }
 0x144   : > { %623 = vrot.lane.b32.xlu1 %v13582_v24, %s13329_s8 }
 0x145   : > { %775 = vrot.lane.b32.xlu0 %v13661_v38, %s13330_s9 }
 0x146   : > { %v614_v14 = vpop.permute.xlu1 %613 }
 0x147   : > { %708 = vst.msk [vmem:[#allocation2 + $0x49] sm:$0x7f] %vm705_vm0, %v614_v14  ;;  %v483_v15 = vpop.permute.xlu0 %482 }
 0x148   : > { %837 = vst.msk [vmem:[#allocation2 + $0x48] sm:$0xff] %vm833_vm11, %v744_v60  ;;  %1189 = vrot.lane.b32.xlu1 %v13559_v18, %s13333_s20 }
 0x149   : > { %569 = vst.msk [vmem:[#allocation2 + $0x8a] sm:$0x3f] %vm558_vm15, %v483_v15  ;;  %921 = vrot.lane.b32.xlu0 %v13661_v38, %s13331_s10 }
 0x14a   : > { %868 = vst.msk [vmem:[#allocation2 + $0x4f] sm:$0x1] %vm866_vm1, %v13327_v2  ;;  %v888_v16 = vpop.permute.xlu1 %887 }
 0x14b   : > { %983 = vst.msk [vmem:[#allocation2 + $0x3f] sm:$0xfe] %vm979_vm12, %v888_v16  ;;  %v13859_v17 = vpop.permute.xlu0 %1048 }
 0x14c   : > { %753 = vrot.lane.b32.xlu1 %v13582_v24, %s13330_s9 }
 0x14d   : > { %502 = vrot.lane.b32.xlu0 %v13675_v40, %s13328_s30 }
 0x14e   : > { %v1035_v20 = vpop.permute.xlu1 %1034 }
 0x14f   : > { %1130 = vst.msk [vmem:[#allocation2 + $0x3e] sm:$0xfc] %vm1126_vm13, %v1035_v20  ;;  %v13866_v18 = vpop.permute.xlu0 %629 }
 0x150   : > { %899 = vrot.lane.b32.xlu1 %v13582_v24, %s13331_s10 }
 0x151   : > { %1068 = vrot.lane.b32.xlu0 %v13661_v38, %s13332_s15 }
 0x152   : > { %v890_v21 = vpop.permute.xlu1 %889 }
 0x153   : > { %984 = vst.msk [vmem:[#allocation2 + $0x47] sm:$0xff] %vm981_vm2, %v890_v21  ;;  %v13873_v22 = vpop.permute.xlu0 %1195 }
 0x154   : > { %1015 = vst.msk [vmem:[#allocation2 + $0x4e] sm:$0x3] %vm1013_vm3, %v13327_v2  ;;  %480 = vrot.lane.b32.xlu1 %v13599_v29, %s13328_s30 }
 0x155   : > { %649 = vrot.lane.b32.xlu0 %v13675_v40, %s13329_s8 }
 0x156   : > { %v1037_v23 = vpop.permute.xlu1 %1036 }
 0x157   : > { %1131 = vst.msk [vmem:[#allocation2 + $0x46] sm:$0xff] %vm1128_vm4, %v1037_v23  ;;  %v13882_v25 = vpop.permute.xlu0 %759 }
 0x158   : > { %1162 = vst.msk [vmem:[#allocation2 + $0x4d] sm:$0x7] %vm1160_vm7, %v13327_v2  ;;  %1046 = vrot.lane.b32.xlu1 %v13582_v24, %s13332_s15 }
 0x159   : > { %1215 = vrot.lane.b32.xlu0 %v13661_v38, %s13333_s20 }
 0x15a   : > { %v469_v26 = vpop.permute.xlu1 %468 }
 0x15b   : > { %562 = vst.msk [vmem:[#allocation2 + $0x52] sm:$0xff] %vm556_vm9, %v469_v26  ;;  %v13891_v27 = vpop.permute.xlu0 %905 }
 0x15c   : > { %627 = vrot.lane.b32.xlu1 %v13599_v29, %s13329_s8 }
 0x15d   : > { %779 = vrot.lane.b32.xlu0 %v13675_v40, %s13330_s9 }
 0x15e   : > { %v616_v28 = vpop.permute.xlu1 %615 }
 0x15f   : > { %709 = vst.msk [vmem:[#allocation2 + $0x51] sm:$0xff] %vm703_vm10, %v616_v28  ;;  %v487_v30 = vpop.permute.xlu0 %486 }
 0x160   : > { %571 = vst.msk [vmem:[#allocation2 + $0x9a] sm:$0x3f] %vm558_vm15, %v487_v30  ;;  %1193 = vrot.lane.b32.xlu1 %v13582_v24, %s13333_s20 }
 0x161   : > { %925 = vrot.lane.b32.xlu0 %v13675_v40, %s13331_s10 }
 0x162   : > { %v471_v32 = vpop.permute.xlu1 %470 }
 0x163   : > { %563 = vst.msk [vmem:[#allocation2 + $0x5a] sm:$0x3f] %vm558_vm15, %v471_v32  ;;  %v13904_v34 = vpop.permute.xlu0 %1052 }
 0x164   : > { %757 = vrot.lane.b32.xlu1 %v13599_v29, %s13330_s9 }
 0x165   : > { %506 = vrot.lane.b32.xlu0 %v13690_v42, %s13328_s30 }
 0x166   : > { %v618_v36 = vpop.permute.xlu1 %617 }
 0x167   : > { %710 = vst.msk [vmem:[#allocation2 + $0x59] sm:$0x7f] %vm705_vm0, %v618_v36  ;;  %v13911_v38 = vpop.permute.xlu0 %633 }
 0x168   : > { %903 = vrot.lane.b32.xlu1 %v13599_v29, %s13331_s10 }
 0x169   : > { %1072 = vrot.lane.b32.xlu0 %v13675_v40, %s13332_s15 }
 0x16a   : > { %v1182_v24 = vpop.permute.xlu1 %1181 }
 0x16b   : > { %1277 = vst.msk [vmem:[#allocation2 + $0x3d] sm:$0xf8] %vm1273_vm14, %v1182_v24  ;;  %v13918_v48 = vpop.permute.xlu0 %1199 }
 0x16c   : > { %484 = vrot.lane.b32.xlu1 %v13611_v31, %s13328_s30 }
 0x16d   : > { %653 = vrot.lane.b32.xlu0 %v13690_v42, %s13329_s8 }
 0x16e   : > { %v1184_v50 = vpop.permute.xlu1 %1183 }
 0x16f   : > { %1278 = vst.msk [vmem:[#allocation2 + $0x45] sm:$0xff] %vm1275_vm6, %v1184_v50  ;;  %v13925_v52 = vpop.permute.xlu0 %763 }
 0x170   : > { %1050 = vrot.lane.b32.xlu1 %v13599_v29, %s13332_s15 }
 0x171   : > { %1219 = vrot.lane.b32.xlu0 %v13675_v40, %s13333_s20 }
 0x172   : > { %v746_v54 = vpop.permute.xlu1 %745 }
 0x173   : > { %838 = vst.msk [vmem:[#allocation2 + $0x50] sm:$0xff] %vm833_vm11, %v746_v54  ;;  %v13932_v55 = vpop.permute.xlu0 %909 }
 0x174   : > { %631 = vrot.lane.b32.xlu1 %v13611_v31, %s13329_s8 }
 0x175   : > { %783 = vrot.lane.b32.xlu0 %v13690_v42, %s13330_s9 }
 0x176   : > { %v748_v56 = vpop.permute.xlu1 %747  ;;  %v13938_v57 = vld [vmem:[#allocation2 + $0x40] sm:$0xff]  ;;  %v13940_v58 = vld [vmem:[#allocation2 + $0x48] sm:$0xff] }
 0x177   : > { %839 = vst.msk [vmem:[#allocation2 + $0x58] sm:$0xff] %vm833_vm11, %v748_v56  ;;  %11518 = vmatprep.mubr.msk.f32.mxu0 %vm345_vm5, %v13938_v57  ;;  %v491_v40 = vpop.permute.xlu0 %490 }
 0x178   : > { %869 = vst.msk [vmem:[#allocation2 + $0x5f] sm:$0x1] %vm866_vm1, %v13327_v2  ;;  %1197 = vrot.lane.b32.xlu1 %v13599_v29, %s13333_s20  ;;  %11519 = vmatmul.mubr.msk.f32.gmra.mrb[8].mxu0 %vm345_vm5, %v13940_v58 }
 0x179   : > { %573 = vst.msk [vmem:[#allocation2 + $0xaa] sm:$0x3f] %vm558_vm15, %v491_v40  ;;  %929 = vrot.lane.b32.xlu0 %v13690_v42, %s13331_s10 }
 0x17a   : > { %v892_v59 = vpop.permute.xlu1 %891 }
 0x17b   : > { %985 = vst.msk [vmem:[#allocation2 + $0x4f] sm:$0xfe] %vm979_vm12, %v892_v59  ;;  %v13955_v60 = vpop.permute.xlu0 %1056 }
 0x17c   : > { %761 = vrot.lane.b32.xlu1 %v13611_v31, %s13330_s9 }
 0x17d   : > { %510 = vrot.lane.b32.xlu0 %v13705_v44, %s13328_s30 }
 0x17e   : > { %v894_v61 = vpop.permute.xlu1 %893 }
 0x17f   : > { %986 = vst.msk [vmem:[#allocation2 + $0x57] sm:$0xff] %vm981_vm2, %v894_v61  ;;  %v13962_v29 = vpop.permute.xlu0 %637 }
 0x180   : > { %1016 = vst.msk [vmem:[#allocation2 + $0x5e] sm:$0x3] %vm1013_vm3, %v13327_v2  ;;  %907 = vrot.lane.b32.xlu1 %v13611_v31, %s13331_s10 }
 0x181   : > { %1076 = vrot.lane.b32.xlu0 %v13690_v42, %s13332_s15 }
 0x182   : > { %v473_v63 = vpop.permute.xlu1 %472 }
 0x183   : > { %564 = vst.msk [vmem:[#allocation2 + $0x62] sm:$0xff] %vm556_vm9, %v473_v63  ;;  %v13971_v0 = vpop.permute.xlu0 %1203 }
 0x184   : > { %488 = vrot.lane.b32.xlu1 %v13626_v33, %s13328_s30 }
 0x185   : > { %657 = vrot.lane.b32.xlu0 %v13705_v44, %s13329_s8 }
 0x186   : > { %v475_v1 = vpop.permute.xlu1 %474 }
 0x187   : > { %565 = vst.msk [vmem:[#allocation2 + $0x6a] sm:$0x3f] %vm558_vm15, %v475_v1  ;;  %v13978_v4 = vpop.permute.xlu0 %767 }
 0x188   : > { %1054 = vrot.lane.b32.xlu1 %v13611_v31, %s13332_s15 }
 0x189   : > { %1223 = vrot.lane.b32.xlu0 %v13690_v42, %s13333_s20 }
 0x18a   : > { %v1039_v6 = vpop.permute.xlu1 %1038 }
 0x18b   : > { %1132 = vst.msk [vmem:[#allocation2 + $0x4e] sm:$0xfc] %vm1126_vm13, %v1039_v6  ;;  %v13985_v7 = vpop.permute.xlu0 %913 }
 0x18c   : > { %635 = vrot.lane.b32.xlu1 %v13626_v33, %s13329_s8 }
 0x18d   : > { %787 = vrot.lane.b32.xlu0 %v13705_v44, %s13330_s9 }
 0x18e   : > { %v1041_v8 = vpop.permute.xlu1 %1040 }
 0x18f   : > { %1133 = vst.msk [vmem:[#allocation2 + $0x56] sm:$0xff] %vm1128_vm4, %v1041_v8  ;;  %v495_v10 = vpop.permute.xlu0 %494 }
 0x190   : > { %1163 = vst.msk [vmem:[#allocation2 + $0x5d] sm:$0x7] %vm1160_vm7, %v13327_v2  ;;  %1201 = vrot.lane.b32.xlu1 %v13611_v31, %s13333_s20 }
 0x191   : > { %575 = vst.msk [vmem:[#allocation2 + $0xba] sm:$0x3f] %vm558_vm15, %v495_v10  ;;  %933 = vrot.lane.b32.xlu0 %v13705_v44, %s13331_s10  ;;  %v10215_v10 = vld [vmem:[%s19032_s1 + $0x30] sm:$0xff] }
 0x192   : > { %v620_v42 = vpop.permute.xlu1 %619 }
 0x193   : > { %711 = vst.msk [vmem:[#allocation2 + $0x61] sm:$0xff] %vm703_vm10, %v620_v42  ;;  %v14000_v12 = vpop.permute.xlu0 %1060  ;;  %v10216_v42 = vld [vmem:[%s19032_s1 + $0x38] sm:$0xff] }
 0x194   : > { %765 = vrot.lane.b32.xlu1 %v13626_v33, %s13330_s9 }
 0x195   : > { %1080 = vrot.lane.b32.xlu0 %v13705_v44, %s13332_s15 }
 0x196   : > { %v622_v14 = vpop.permute.xlu1 %621 }
 0x197   : > { %712 = vst.msk [vmem:[#allocation2 + $0x69] sm:$0x7f] %vm705_vm0, %v622_v14  ;;  %v14007_v15 = vpop.permute.xlu0 %641 }
 0x198   : > { %911 = vrot.lane.b32.xlu1 %v13626_v33, %s13331_s10 }
 0x199   : > { %1227 = vrot.lane.b32.xlu0 %v13705_v44, %s13333_s20 }
 0x19a   : > { %v1186_v31 = vpop.permute.xlu1 %1185 }
 0x19b   : > { %1279 = vst.msk [vmem:[#allocation2 + $0x4d] sm:$0xf8] %vm1273_vm14, %v1186_v31  ;;  %v14014_v16 = vpop.permute.xlu0 %1207 }
 0x19c   : > { %492 = vrot.lane.b32.xlu1 %v13640_v35, %s13328_s30 }
 0x19d   : > { %514 = vrot.lane.b32.xlu0 %v13720_v46, %s13328_s30 }
 0x19e   : > { %v1188_v20 = vpop.permute.xlu1 %1187 }
 0x19f   : > { %1280 = vst.msk [vmem:[#allocation2 + $0x55] sm:$0xff] %vm1275_vm6, %v1188_v20  ;;  %v14021_v21 = vpop.permute.xlu0 %771 }
 0x1a0   : > { %1058 = vrot.lane.b32.xlu1 %v13626_v33, %s13332_s15 }
 0x1a1   : > { %661 = vrot.lane.b32.xlu0 %v13720_v46, %s13329_s8 }
 0x1a2   : > { %v750_v44 = vpop.permute.xlu1 %749 }
 0x1a3   : > { %840 = vst.msk [vmem:[#allocation2 + $0x60] sm:$0xff] %vm833_vm11, %v750_v44  ;;  %v14028_v23 = vpop.permute.xlu0 %917 }
 0x1a4   : > { %639 = vrot.lane.b32.xlu1 %v13640_v35, %s13329_s8 }
 0x1a5   : > { %791 = vrot.lane.b32.xlu0 %v13720_v46, %s13330_s9 }
 0x1a6   : > { %v752_v26 = vpop.permute.xlu1 %751  ;;  %v14034_v28 = vld [vmem:[#allocation2 + $0x50] sm:$0xff]  ;;  %v14036_v30 = vld [vmem:[#allocation2 + $0x58] sm:$0xff] }
 0x1a7   : > { %841 = vst.msk [vmem:[#allocation2 + $0x68] sm:$0xff] %vm833_vm11, %v752_v26  ;;  %11521 = vmatprep.mubr.msk.f32.mxu0 %vm345_vm5, %v14034_v28  ;;  %v499_v32 = vpop.permute.xlu0 %498 }
 0x1a8   : > { %870 = vst.msk [vmem:[#allocation2 + $0x6f] sm:$0x1] %vm866_vm1, %v13327_v2  ;;  %1205 = vrot.lane.b32.xlu1 %v13626_v33, %s13333_s20  ;;  %11522 = vmatmul.mubr.msk.f32.gmra.mrb[10].mxu0 %vm345_vm5, %v14036_v30 }
 0x1a9   : > { %988 = vst.msk [vmem:[#allocation2 + $0x67] sm:$0xff] %vm981_vm2, %v13796_v62  ;;  %937 = vrot.lane.b32.xlu0 %v13720_v46, %s13331_s10 }
 0x1aa   : > { %577 = vst.msk [vmem:[#allocation2 + $0xca] sm:$0x3f] %vm558_vm15, %v499_v32  ;;  %v896_v36 = vpop.permute.xlu1 %895 }
 0x1ab   : > { %1017 = vst.msk [vmem:[#allocation2 + $0x6e] sm:$0x3] %vm1013_vm3, %v13327_v2  ;;  %v14055_v24 = vpop.permute.xlu0 %1064 }
 0x1ac   : > { %987 = vst.msk [vmem:[#allocation2 + $0x5f] sm:$0xfe] %vm979_vm12, %v896_v36  ;;  %769 = vrot.lane.b32.xlu1 %v13640_v35, %s13330_s9 }
 0x1ad   : > { %1135 = vst.msk [vmem:[#allocation2 + $0x66] sm:$0xff] %vm1128_vm4, %v13813_v3  ;;  %1084 = vrot.lane.b32.xlu0 %v13720_v46, %s13332_s15 }
 0x1ae   : > { %1164 = vst.msk [vmem:[#allocation2 + $0x6d] sm:$0x7] %vm1160_vm7, %v13327_v2  ;;  %v477_v33 = vpop.permute.xlu1 %476 }
 0x1af   : > { %566 = vst.msk [vmem:[#allocation2 + $0x72] sm:$0xff] %vm556_vm9, %v477_v33  ;;  %v14066_v62 = vpop.permute.xlu0 %645  ;;  %v10217_v33 = vld [vmem:[%s19032_s1 + $0x40] sm:$0xff] }
 0x1b0   : > { %714 = vst.msk [vmem:[#allocation2 + $0x79] sm:$0x7f] %vm705_vm0, %v13820_v5  ;;  %915 = vrot.lane.b32.xlu1 %v13640_v35, %s13331_s10 }
 0x1b1   : > { %1231 = vrot.lane.b32.xlu0 %v13720_v46, %s13333_s20 }
 0x1b2   : > { %v1043_v3 = vpop.permute.xlu1 %1042 }
 0x1b3   : > { %1134 = vst.msk [vmem:[#allocation2 + $0x5e] sm:$0xfc] %vm1126_vm13, %v1043_v3  ;;  %v14075_v50 = vpop.permute.xlu0 %1211 }
 0x1b4   : > { %1282 = vst.msk [vmem:[#allocation2 + $0x65] sm:$0xff] %vm1275_vm6, %v13828_v9  ;;  %496 = vrot.lane.b32.xlu1 %v13654_v37, %s13328_s30 }
 0x1b5   : > { %518 = vrot.lane.b32.xlu0 %v13737_v49, %s13328_s30 }
 0x1b6   : > { %v624_v5 = vpop.permute.xlu1 %623 }
 0x1b7   : > { %713 = vst.msk [vmem:[#allocation2 + $0x71] sm:$0xff] %vm703_vm10, %v624_v5  ;;  %v14084_v54 = vpop.permute.xlu0 %775 }
 0x1b8   : > { %843 = vst.msk [vmem:[#allocation2 + $0x78] sm:$0xff] %vm833_vm11, %v13836_v11  ;;  %1062 = vrot.lane.b32.xlu1 %v13640_v35, %s13332_s15 }
 0x1b9   : > { %871 = vst.msk [vmem:[#allocation2 + $0x7f] sm:$0x1] %vm866_vm1, %v13327_v2  ;;  %665 = vrot.lane.b32.xlu0 %v13737_v49, %s13329_s8 }
 0x1ba   : > { %v1190_v46 = vpop.permute.xlu1 %1189 }
 0x1bb   : > { %1281 = vst.msk [vmem:[#allocation2 + $0x5d] sm:$0xf8] %vm1273_vm14, %v1190_v46  ;;  %v14095_v9 = vpop.permute.xlu0 %921  ;;  %v14118_v61 = vld [vmem:[#allocation2 + $0x68] sm:$0xff] }
 0x1bc   : > { %643 = vrot.lane.b32.xlu1 %v13654_v37, %s13329_s8 }
 0x1bd   : > { %795 = vrot.lane.b32.xlu0 %v13737_v49, %s13330_s9 }
 0x1be   : > { %v754_v11 = vpop.permute.xlu1 %753 }
 0x1bf   : > { %842 = vst.msk [vmem:[#allocation2 + $0x70] sm:$0xff] %vm833_vm11, %v754_v11  ;;  %v503_v56 = vpop.permute.xlu0 %502 }
 0x1c0   : > { %990 = vst.msk [vmem:[#allocation2 + $0x77] sm:$0xff] %vm981_vm2, %v13843_v13  ;;  %1209 = vrot.lane.b32.xlu1 %v13640_v35, %s13333_s20 }
 0x1c1   : > { %579 = vst.msk [vmem:[#allocation2 + $0xda] sm:$0x3f] %vm558_vm15, %v503_v56  ;;  %941 = vrot.lane.b32.xlu0 %v13737_v49, %s13331_s10 }
 0x1c2   : > { %1018 = vst.msk [vmem:[#allocation2 + $0x7e] sm:$0x3] %vm1013_vm3, %v13327_v2  ;;  %v900_v40 = vpop.permute.xlu1 %899  ;;  %v14111_v59 = vld [vmem:[#allocation2 + $0x60] sm:$0xff] }
 0x1c3   : > { %989 = vst.msk [vmem:[#allocation2 + $0x6f] sm:$0xfe] %vm979_vm12, %v900_v40  ;;  %11524 = vmatprep.mubr.msk.f32.mxu0 %vm345_vm5, %v14111_v59  ;;  %v14116_v13 = vpop.permute.xlu0 %1068 }
 0x1c4   : > { %1137 = vst.msk [vmem:[#allocation2 + $0x76] sm:$0xff] %vm1128_vm4, %v13859_v17  ;;  %773 = vrot.lane.b32.xlu1 %v13654_v37, %s13330_s9  ;;  %11525 = vmatmul.mubr.msk.f32.gmra.mrb[12].mxu0 %vm345_vm5, %v14118_v61 }
 0x1c5   : > { %1165 = vst.msk [vmem:[#allocation2 + $0x7d] sm:$0x7] %vm1160_vm7, %v13327_v2  ;;  %1088 = vrot.lane.b32.xlu0 %v13737_v49, %s13332_s15 }
 0x1c6   : > { %v481_v35 = vpop.permute.xlu1 %480 }
 0x1c7   : > { %568 = vst.msk [vmem:[#allocation2 + $0x82] sm:$0xff] %vm556_vm9, %v481_v35  ;;  %v14131_v63 = vpop.permute.xlu0 %649 }
 0x1c8   : > { %716 = vst.msk [vmem:[#allocation2 + $0x89] sm:$0x7f] %vm705_vm0, %v13866_v18  ;;  %919 = vrot.lane.b32.xlu1 %v13654_v37, %s13331_s10 }
 0x1c9   : > { %1235 = vrot.lane.b32.xlu0 %v13737_v49, %s13333_s20  ;;  %v14155_v49 = vld [vmem:[#allocation3] sm:$0xff] }
 0x1ca   : > { %v1047_v17 = vpop.permute.xlu1 %1046 }
 0x1cb   : > { %1136 = vst.msk [vmem:[#allocation2 + $0x6e] sm:$0xfc] %vm1126_vm13, %v1047_v17  ;;  %v14140_v2 = vpop.permute.xlu0 %1215 }
 0x1cc   : > { %1284 = vst.msk [vmem:[#allocation2 + $0x75] sm:$0xff] %vm1275_vm6, %v13873_v22  ;;  %500 = vrot.lane.b32.xlu1 %v13668_v39, %s13328_s30 }
 0x1cd   : > { %522 = vrot.lane.b32.xlu0 %v13755_v53, %s13328_s30 }
 0x1ce   : > { %v628_v18 = vpop.permute.xlu1 %627 }
 0x1cf   : > { %715 = vst.msk [vmem:[#allocation2 + $0x81] sm:$0xff] %vm703_vm10, %v628_v18  ;;  %v14149_v1 = vpop.permute.xlu0 %779 }
 0x1d0   : > { %845 = vst.msk [vmem:[#allocation2 + $0x88] sm:$0xff] %vm833_vm11, %v13882_v25  ;;  %1066 = vrot.lane.b32.xlu1 %v13654_v37, %s13332_s15 }
 0x1d1   : > { %872 = vst.msk [vmem:[#allocation2 + $0x8f] sm:$0x1] %vm866_vm1, %v14155_v49  ;;  %669 = vrot.lane.b32.xlu0 %v13755_v53, %s13329_s8 }
 0x1d2   : > { %v1194_v22 = vpop.permute.xlu1 %1193 }
 0x1d3   : > { %1283 = vst.msk [vmem:[#allocation2 + $0x6d] sm:$0xf8] %vm1273_vm14, %v1194_v22  ;;  %v14162_v6 = vpop.permute.xlu0 %925  ;;  %v14191_v20 = vld [vmem:[#allocation2 + $0x78] sm:$0xff] }
 0x1d4   : > { %647 = vrot.lane.b32.xlu1 %v13668_v39, %s13329_s8 }
 0x1d5   : > { %799 = vrot.lane.b32.xlu0 %v13755_v53, %s13330_s9 }
 0x1d6   : > { %v758_v25 = vpop.permute.xlu1 %757 }
 0x1d7   : > { %844 = vst.msk [vmem:[#allocation2 + $0x80] sm:$0xff] %vm833_vm11, %v758_v25  ;;  %v507_v8 = vpop.permute.xlu0 %506 }
 0x1d8   : > { %992 = vst.msk [vmem:[#allocation2 + $0x87] sm:$0xff] %vm981_vm2, %v13891_v27  ;;  %1213 = vrot.lane.b32.xlu1 %v13654_v37, %s13333_s20  ;;  %v12464_v27 = vpack.c.bf16 %v10216_v42, %v10215_v10 }
 0x1d9   : > { %581 = vst.msk [vmem:[#allocation2 + $0xea] sm:$0x3f] %vm558_vm15, %v507_v8  ;;  %945 = vrot.lane.b32.xlu0 %v13755_v53, %s13331_s10 }
 0x1da   : > { %1019 = vst.msk [vmem:[#allocation2 + $0x8e] sm:$0x3] %vm1013_vm3, %v14155_v49  ;;  %v904_v14 = vpop.permute.xlu1 %903  ;;  %v14184_v31 = vld [vmem:[#allocation2 + $0x70] sm:$0xff]  ;;  %12465 = vmatprep.subr.bf16.mxu0 %v12464_v27 }
 0x1db   : > { %991 = vst.msk [vmem:[#allocation2 + $0x7f] sm:$0xfe] %vm979_vm12, %v904_v14  ;;  %11527 = vmatprep.mubr.msk.f32.mxu0 %vm345_vm5, %v14184_v31  ;;  %v14189_v37 = vpop.permute.xlu0 %1072  ;;  %12467 = vmatpush3.bf16.msra.mxu0 %v12464_v27 }
 0x1dc   : > { %1139 = vst.msk [vmem:[#allocation2 + $0x86] sm:$0xff] %vm1128_vm4, %v13904_v34  ;;  %777 = vrot.lane.b32.xlu1 %v13668_v39, %s13330_s9  ;;  %11528 = vmatmul.mubr.msk.f32.gmra.mrb[14].mxu0 %vm345_vm5, %v14191_v20 }
 0x1dd   : > { %1166 = vst.msk [vmem:[#allocation2 + $0x8d] sm:$0x7] %vm1160_vm7, %v14155_v49  ;;  %1092 = vrot.lane.b32.xlu0 %v13755_v53, %s13332_s15 }
 0x1de   : > { %v485_v44 = vpop.permute.xlu1 %484 }
 0x1df   : > { %570 = vst.msk [vmem:[#allocation2 + $0x92] sm:$0xff] %vm556_vm9, %v485_v44  ;;  %v14204_v26 = vpop.permute.xlu0 %653 }
 0x1e0   : > { %718 = vst.msk [vmem:[#allocation2 + $0x99] sm:$0x7f] %vm705_vm0, %v13911_v38  ;;  %923 = vrot.lane.b32.xlu1 %v13668_v39, %s13331_s10 }
 0x1e1   : > { %1239 = vrot.lane.b32.xlu0 %v13755_v53, %s13333_s20 }
 0x1e2   : > { %v1051_v34 = vpop.permute.xlu1 %1050 }
 0x1e3   : > { %1138 = vst.msk [vmem:[#allocation2 + $0x7e] sm:$0xfc] %vm1126_vm13, %v1051_v34  ;;  %v14213_v32 = vpop.permute.xlu0 %1219 }
 0x1e4   : > { %1286 = vst.msk [vmem:[#allocation2 + $0x85] sm:$0xff] %vm1275_vm6, %v13918_v48  ;;  %504 = vrot.lane.b32.xlu1 %v13682_v41, %s13328_s30 }
 0x1e6   : > { %v632_v36 = vpop.permute.xlu1 %631 }
 0x1e7   : > { %717 = vst.msk [vmem:[#allocation2 + $0x91] sm:$0xff] %vm703_vm10, %v632_v36  ;;  %v14220_v38 = vpop.permute.xlu0 %783 }
 0x1e8   : > { %847 = vst.msk [vmem:[#allocation2 + $0x98] sm:$0xff] %vm833_vm11, %v13925_v52  ;;  %1070 = vrot.lane.b32.xlu1 %v13668_v39, %s13332_s15  ;;  %v10218_v52 = vld [vmem:[%s19032_s1 + $0x48] sm:$0xff] }
 0x1e9   : > { %873 = vst.msk [vmem:[#allocation2 + $0x9f] sm:$0x1] %vm866_vm1, %v14155_v49  ;;  %v12468_v5 = vpack.c.bf16 %v10218_v52, %v10217_v33  ;;  %v10255_v33 = vld [vmem:[%s19032_s1 + $0x68] sm:$0xff] }
 0x1ea   : > { %v1198_v53 = vpop.permute.xlu1 %1197 }
 0x1eb   : > { %1285 = vst.msk [vmem:[#allocation2 + $0x7d] sm:$0xf8] %vm1273_vm14, %v1198_v53  ;;  %v14229_v48 = vpop.permute.xlu0 %929  ;;  %12469 = vmatprep.subr.bf16.mxu0 %v12468_v5 }
 0x1ec   : > { %651 = vrot.lane.b32.xlu1 %v13682_v41, %s13329_s8  ;;  %12471 = vmatpush3.bf16.msra.mxu0 %v12468_v5 }
 0x1ee   : > { %v762_v3 = vpop.permute.xlu1 %761 }
 0x1ef   : > { %846 = vst.msk [vmem:[#allocation2 + $0x90] sm:$0xff] %vm833_vm11, %v762_v3  ;;  %v511_v46 = vpop.permute.xlu0 %510 }
 0x1f0   : > { %994 = vst.msk [vmem:[#allocation2 + $0x97] sm:$0xff] %vm981_vm2, %v13932_v55  ;;  %1217 = vrot.lane.b32.xlu1 %v13668_v39, %s13333_s20  ;;  %v14254_v55 = vld [vmem:[#allocation2 + $0x88] sm:$0xff] }
 0x1f1   : > { %583 = vst.msk [vmem:[#allocation2 + $0xfa] sm:$0x3f] %vm558_vm15, %v511_v46 }
 0x1f2   : > { %1020 = vst.msk [vmem:[#allocation2 + $0x9e] sm:$0x3] %vm1013_vm3, %v14155_v49  ;;  %v908_v11 = vpop.permute.xlu1 %907  ;;  %v14247_v56 = vld [vmem:[#allocation2 + $0x80] sm:$0xff] }
 0x1f3   : > { %993 = vst.msk [vmem:[#allocation2 + $0x8f] sm:$0xfe] %vm979_vm12, %v908_v11  ;;  %11530 = vmatprep.mubr.msk.f32.mxu0 %vm345_vm5, %v14247_v56  ;;  %v14252_v40 = vpop.permute.xlu0 %1076 }
 0x1f4   : > { %1141 = vst.msk [vmem:[#allocation2 + $0x96] sm:$0xff] %vm1128_vm4, %v13955_v60  ;;  %781 = vrot.lane.b32.xlu1 %v13682_v41, %s13330_s9  ;;  %11531 = vmatmul.mubr.msk.f32.gmra.mrb[16].mxu0 %vm345_vm5, %v14254_v55 }
 0x1f5   : > { %1167 = vst.msk [vmem:[#allocation2 + $0x9d] sm:$0x7] %vm1160_vm7, %v14155_v49 }
 0x1f6   : > { %v489_v39 = vpop.permute.xlu1 %488 }
 0x1f7   : > { %572 = vst.msk [vmem:[#allocation2 + $0xa2] sm:$0xff] %vm556_vm9, %v489_v39  ;;  %v14265_v35 = vpop.permute.xlu0 %657 }
 0x1f8   : > { %720 = vst.msk [vmem:[#allocation2 + $0xa9] sm:$0x7f] %vm705_vm0, %v13962_v29  ;;  %927 = vrot.lane.b32.xlu1 %v13682_v41, %s13331_s10  ;;  %v10219_v29 = vld [vmem:[%s19032_s1 + $0x50] sm:$0xff] }
 0x1fa   : > { %v1055_v60 = vpop.permute.xlu1 %1054 }
 0x1fb   : > { %1140 = vst.msk [vmem:[#allocation2 + $0x8e] sm:$0xfc] %vm1126_vm13, %v1055_v60  ;;  %v14272_v17 = vpop.permute.xlu0 %1223 }
 0x1fc   : > { %1288 = vst.msk [vmem:[#allocation2 + $0x95] sm:$0xff] %vm1275_vm6, %v13971_v0  ;;  %508 = vrot.lane.b32.xlu1 %v13697_v43, %s13328_s30  ;;  %v10220_v0 = vld [vmem:[%s19032_s1 + $0x58] sm:$0x3] }
 0x1fd   : > { %v12472_v8 = vpack.c.bf16 %v10220_v0, %v10219_v29 }
 0x1fe   : > { %v636_v18 = vpop.permute.xlu1 %635 }
 0x1ff   : > { %719 = vst.msk [vmem:[#allocation2 + $0xa1] sm:$0xff] %vm703_vm10, %v636_v18  ;;  %v14279_v22 = vpop.permute.xlu0 %787  ;;  %12474 = vmatprep.subr.msk.bf16.mxu0 %vm13562_vm8, %v12472_v8 }
 0x200   : > { %849 = vst.msk [vmem:[#allocation2 + $0xa8] sm:$0xff] %vm833_vm11, %v13978_v4  ;;  %1074 = vrot.lane.b32.xlu1 %v13682_v41, %s13332_s15  ;;  %12477 = vmatpush3.bf16.msk.msra.mxu0 %vm13562_vm8, %v12472_v8 }
 0x201   : > { %874 = vst.msk [vmem:[#allocation2 + $0xaf] sm:$0x1] %vm866_vm1, %v14155_v49 }
 0x202   : > { %v1202_v25 = vpop.permute.xlu1 %1201 }
 0x203   : > { %1287 = vst.msk [vmem:[#allocation2 + $0x8d] sm:$0xf8] %vm1273_vm14, %v1202_v25  ;;  %v14294_v10 = vpop.permute.xlu0 %933  ;;  %v14318_v34 = vld [vmem:[#allocation2 + $0x98] sm:$0xff] }
 0x204   : > { %655 = vrot.lane.b32.xlu1 %v13697_v43, %s13329_s8 }
 0x206   : > { %v766_v4 = vpop.permute.xlu1 %765 }
 0x207   : > { %848 = vst.msk [vmem:[#allocation2 + $0xa0] sm:$0xff] %vm833_vm11, %v766_v4  ;;  %v14303_v42 = vpop.permute.xlu0 %1080 }
 0x208   : > { %996 = vst.msk [vmem:[#allocation2 + $0xa7] sm:$0xff] %vm981_vm2, %v13985_v7  ;;  %1221 = vrot.lane.b32.xlu1 %v13682_v41, %s13333_s20 }
 0x209   : > { %1021 = vst.msk [vmem:[#allocation2 + $0xae] sm:$0x3] %vm1013_vm3, %v14155_v49 }
 0x20a   : > { %v912_v27 = vpop.permute.xlu1 %911  ;;  %v14311_v14 = vld [vmem:[#allocation2 + $0x90] sm:$0xff] }
 0x20b   : > { %995 = vst.msk [vmem:[#allocation2 + $0x9f] sm:$0xfe] %vm979_vm12, %v912_v27  ;;  %11533 = vmatprep.mubr.msk.f32.mxu0 %vm345_vm5, %v14311_v14  ;;  %v14316_v44 = vpop.permute.xlu0 %1227 }
 0x20c   : > { %1143 = vst.msk [vmem:[#allocation2 + $0xa6] sm:$0xff] %vm1128_vm4, %v14000_v12  ;;  %785 = vrot.lane.b32.xlu1 %v13697_v43, %s13330_s9  ;;  %11534 = vmatmul.mubr.msk.f32.gmra.mrb[18].mxu0 %vm345_vm5, %v14318_v34 }
 0x20d   : > { %1168 = vst.msk [vmem:[#allocation2 + $0xad] sm:$0x7] %vm1160_vm7, %v14155_v49 }
 0x20e   : > { %v493_v41 = vpop.permute.xlu1 %492 }
 0x20f   : > { %574 = vst.msk [vmem:[#allocation2 + $0xb2] sm:$0xff] %vm556_vm9, %v493_v41  ;;  %v515_v7 = vpop.permute.xlu0 %514 }
 0x210   : > { %722 = vst.msk [vmem:[#allocation2 + $0xb9] sm:$0x7f] %vm705_vm0, %v14007_v15  ;;  %931 = vrot.lane.b32.xlu1 %v13697_v43, %s13331_s10 }
 0x211   : > { %585 = vst.msk [vmem:[#allocation2 + $0x10a] sm:$0x3f] %vm558_vm15, %v515_v7 }
 0x212   : > { %v1059_v12 = vpop.permute.xlu1 %1058 }
 0x213   : > { %1142 = vst.msk [vmem:[#allocation2 + $0x9e] sm:$0xfc] %vm1126_vm13, %v1059_v12  ;;  %v14335_v36 = vpop.permute.xlu0 %661 }
 0x214   : > { %1290 = vst.msk [vmem:[#allocation2 + $0xa5] sm:$0xff] %vm1275_vm6, %v14014_v16  ;;  %1078 = vrot.lane.b32.xlu1 %v13697_v43, %s13332_s15  ;;  %v10254_v16 = vld [vmem:[%s19032_s1 + $0x60] sm:$0xff] }
 0x215   : > { %v14356_v3 = vpack.c.bf16 %v10255_v33, %v10254_v16 }
 0x216   : > { %v640_v53 = vpop.permute.xlu1 %639 }
 0x217   : > { %721 = vst.msk [vmem:[#allocation2 + $0xb1] sm:$0xff] %vm703_vm10, %v640_v53  ;;  %v14342_v15 = vpop.permute.xlu0 %791  ;;  %12479 = vmatprep.subr.bf16.mxu0 %v14356_v3 }
 0x218   : > { %851 = vst.msk [vmem:[#allocation2 + $0xb8] sm:$0xff] %vm833_vm11, %v14021_v21  ;;  %1225 = vrot.lane.b32.xlu1 %v13697_v43, %s13333_s20 }
 0x219   : > { %875 = vst.msk [vmem:[#allocation2 + $0xbf] sm:$0x1] %vm866_vm1, %v14155_v49 }
 0x21a   : > { %v1206_v52 = vpop.permute.xlu1 %1205 }
 0x21b   : > { %1289 = vst.msk [vmem:[#allocation2 + $0x9d] sm:$0xf8] %vm1273_vm14, %v1206_v52  ;;  %v14359_v21 = vpop.permute.xlu0 %937  ;;  %v14380_v60 = vld [vmem:[#allocation2 + $0xa8] sm:$0xff] }
 0x21c   : > { %512 = vrot.lane.b32.xlu1 %v13712_v45, %s13328_s30 }
 0x21e   : > { %v770_v43 = vpop.permute.xlu1 %769 }
 0x21f   : > { %850 = vst.msk [vmem:[#allocation2 + $0xb0] sm:$0xff] %vm833_vm11, %v770_v43  ;;  %v14365_v5 = vpop.permute.xlu0 %1084 }
 0x220   : > { %998 = vst.msk [vmem:[#allocation2 + $0xb7] sm:$0xff] %vm981_vm2, %v14028_v23  ;;  %659 = vrot.lane.b32.xlu1 %v13712_v45, %s13329_s8 }
 0x221   : > { %1022 = vst.msk [vmem:[#allocation2 + $0xbe] sm:$0x3] %vm1013_vm3, %v14155_v49 }
 0x222   : > { %v916_v46 = vpop.permute.xlu1 %915  ;;  %v14373_v11 = vld [vmem:[#allocation2 + $0xa0] sm:$0xff] }
 0x223   : > { %997 = vst.msk [vmem:[#allocation2 + $0xaf] sm:$0xfe] %vm979_vm12, %v916_v46  ;;  %11536 = vmatprep.mubr.msk.f32.mxu0 %vm345_vm5, %v14373_v11  ;;  %v14378_v39 = vpop.permute.xlu0 %1231 }
 0x224   : > { %1145 = vst.msk [vmem:[#allocation2 + $0xb6] sm:$0xff] %vm1128_vm4, %v14055_v24  ;;  %789 = vrot.lane.b32.xlu1 %v13712_v45, %s13330_s9  ;;  %11537 = vmatmul.mubr.msk.f32.gmra.mrb[20].mxu0 %vm345_vm5, %v14380_v60 }
 0x225   : > { %1169 = vst.msk [vmem:[#allocation2 + $0xbd] sm:$0x7] %vm1160_vm7, %v14155_v49 }
 0x226   : > { %v497_v23 = vpop.permute.xlu1 %496 }
 0x227   : > { %576 = vst.msk [vmem:[#allocation2 + $0xc2] sm:$0xff] %vm556_vm9, %v497_v23  ;;  %v519_v18 = vpop.permute.xlu0 %518 }
 0x228   : > { %724 = vst.msk [vmem:[#allocation2 + $0xc9] sm:$0x7f] %vm705_vm0, %v14066_v62  ;;  %935 = vrot.lane.b32.xlu1 %v13712_v45, %s13331_s10 }
 0x229   : > { %587 = vst.msk [vmem:[#allocation2 + $0x11a] sm:$0x3f] %vm558_vm15, %v519_v18 }
 0x22a   : > { %v1063_v24 = vpop.permute.xlu1 %1062 }
 0x22b   : > { %1144 = vst.msk [vmem:[#allocation2 + $0xae] sm:$0xfc] %vm1126_vm13, %v1063_v24  ;;  %v14397_v29 = vpop.permute.xlu0 %665 }
 0x22c   : > { %1292 = vst.msk [vmem:[#allocation2 + $0xb5] sm:$0xff] %vm1275_vm6, %v14075_v50  ;;  %1082 = vrot.lane.b32.xlu1 %v13712_v45, %s13332_s15 }
 0x22e   : > { %v644_v0 = vpop.permute.xlu1 %643 }
 0x22f   : > { %723 = vst.msk [vmem:[#allocation2 + $0xc1] sm:$0xff] %vm703_vm10, %v644_v0  ;;  %v14404_v62 = vpop.permute.xlu0 %795  ;;  %v1710_v0 = vld [vmem:[#allocation2 + $0x10] sm:$0xff] }
 0x230   : > { %853 = vst.msk [vmem:[#allocation2 + $0xc8] sm:$0xff] %vm833_vm11, %v14084_v54  ;;  %1229 = vrot.lane.b32.xlu1 %v13712_v45, %s13333_s20 }
 0x231   : > { %876 = vst.msk [vmem:[#allocation2 + $0xcf] sm:$0x1] %vm866_vm1, %v14155_v49 }
 0x232   : > { %v1210_v25 = vpop.permute.xlu1 %1209 }
 0x233   : > { %1291 = vst.msk [vmem:[#allocation2 + $0xad] sm:$0xf8] %vm1273_vm14, %v1210_v25  ;;  %v14413_v50 = vpop.permute.xlu0 %941  ;;  %v14433_v41 = vld [vmem:[#allocation2 + $0xb8] sm:$0xff] }
 0x234   : > { %516 = vrot.lane.b32.xlu1 %v13728_v47, %s13328_s30  ;;  %v3306_v19 = vld [vmem:[#allocation2 + $0xb8] sm:$0xff] }
 0x236   : > { %v774_v8 = vpop.permute.xlu1 %773 }
 0x237   : > { %852 = vst.msk [vmem:[#allocation2 + $0xc0] sm:$0xff] %vm833_vm11, %v774_v8  ;;  %v14418_v4 = vpop.permute.xlu0 %1088  ;;  %v10257_v8 = vld [vmem:[%s19032_s1 + $0x78] sm:$0xff] }
 0x238   : > { %1000 = vst.msk [vmem:[#allocation2 + $0xc7] sm:$0xff] %vm981_vm2, %v14095_v9  ;;  %663 = vrot.lane.b32.xlu1 %v13728_v47, %s13329_s8 }
 0x239   : > { %1023 = vst.msk [vmem:[#allocation2 + $0xce] sm:$0x3] %vm1013_vm3, %v14155_v49 }
 0x23a   : > { %v920_v45 = vpop.permute.xlu1 %919  ;;  %v14426_v54 = vld [vmem:[#allocation2 + $0xb0] sm:$0xff] }
 0x23b   : > { %999 = vst.msk [vmem:[#allocation2 + $0xbf] sm:$0xfe] %vm979_vm12, %v920_v45  ;;  %11539 = vmatprep.mubr.msk.f32.mxu0 %vm345_vm5, %v14426_v54  ;;  %v14431_v27 = vpop.permute.xlu0 %1235 }
 0x23c   : > { %1147 = vst.msk [vmem:[#allocation2 + $0xc6] sm:$0xff] %vm1128_vm4, %v14116_v13  ;;  %793 = vrot.lane.b32.xlu1 %v13728_v47, %s13330_s9  ;;  %11540 = vmatmul.mubr.msk.f32.gmra.mrb[22].mxu0 %vm345_vm5, %v14433_v41 }
 0x23d   : > { %1170 = vst.msk [vmem:[#allocation2 + $0xcd] sm:$0x7] %vm1160_vm7, %v14155_v49 }
 0x23e   : > { %v501_v9 = vpop.permute.xlu1 %500 }
 0x23f   : > { %578 = vst.msk [vmem:[#allocation2 + $0xd2] sm:$0xff] %vm556_vm9, %v501_v9  ;;  %v523_v7 = vpop.permute.xlu0 %522  ;;  %v14579_v9 = vld [vmem:[#allocation2 + $0x20] sm:$0xff] }
 0x240   : > { %726 = vst.msk [vmem:[#allocation2 + $0xd9] sm:$0x7f] %vm705_vm0, %v14131_v63  ;;  %939 = vrot.lane.b32.xlu1 %v13728_v47, %s13331_s10 }
 0x241   : > { %589 = vst.msk [vmem:[#allocation2 + $0x12a] sm:$0x3f] %vm558_vm15, %v523_v7  ;;  %vm19104_vm15 = vcmask 1041408  }
 0x242   : > { %v1067_v13 = vpop.permute.xlu1 %1066 }
 0x243   : > { %1146 = vst.msk [vmem:[#allocation2 + $0xbe] sm:$0xfc] %vm1126_vm13, %v1067_v13  ;;  %v10258_v13 = vld [vmem:[%s19032_s1 + $0x80] sm:$0xff] }
 0x244   : > { %1294 = vst.msk [vmem:[#allocation2 + $0xc5] sm:$0xff] %vm1275_vm6, %v14140_v2  ;;  %1086 = vrot.lane.b32.xlu1 %v13728_v47, %s13332_s15 }
 0x246   : > { %v648_v12 = vpop.permute.xlu1 %647 }
 0x247   : > { %725 = vst.msk [vmem:[#allocation2 + $0xd1] sm:$0xff] %vm703_vm10, %v648_v12  ;;  %v14596_v12 = vld [vmem:[#allocation2 + $0x28] sm:$0xff] }
 0x248   : > { %855 = vst.msk [vmem:[#allocation2 + $0xd8] sm:$0xff] %vm833_vm11, %v14149_v1  ;;  %1233 = vrot.lane.b32.xlu1 %v13728_v47, %s13333_s20 }
 0x249   : > { %877 = vst.msk [vmem:[#allocation2 + $0xdf] sm:$0x1] %vm866_vm1, %v14155_v49 }
 0x24a   : > { %v1214_v63 = vpop.permute.xlu1 %1213 }
 0x24b   : > { %1293 = vst.msk [vmem:[#allocation2 + $0xbd] sm:$0xf8] %vm1273_vm14, %v1214_v63  ;;  %v14476_v53 = vld [vmem:[#allocation2 + $0xc8] sm:$0xff] }
 0x24c   : > { %520 = vrot.lane.b32.xlu1 %v13746_v51, %s13328_s30 }
 0x24e   : > { %v778_v2 = vpop.permute.xlu1 %777 }
 0x24f   : > { %854 = vst.msk [vmem:[#allocation2 + $0xd0] sm:$0xff] %vm833_vm11, %v778_v2 }
 0x250   : > { %1002 = vst.msk [vmem:[#allocation2 + $0xd7] sm:$0xff] %vm981_vm2, %v14162_v6  ;;  %667 = vrot.lane.b32.xlu1 %v13746_v51, %s13329_s8 }
 0x251   : > { %1024 = vst.msk [vmem:[#allocation2 + $0xde] sm:$0x3] %vm1013_vm3, %v14155_v49 }
 0x252   : > { %v924_v47 = vpop.permute.xlu1 %923  ;;  %v14471_v1 = vld [vmem:[#allocation2 + $0xc0] sm:$0xff] }
 0x253   : > { %1001 = vst.msk [vmem:[#allocation2 + $0xcf] sm:$0xfe] %vm979_vm12, %v924_v47  ;;  %11542 = vmatprep.mubr.msk.f32.mxu0 %vm345_vm5, %v14471_v1  ;;  %v10294_v47 = vld [vmem:[%s19032_s1 + $0x98] sm:$0xff] }
 0x254   : > { %1149 = vst.msk [vmem:[#allocation2 + $0xd6] sm:$0xff] %vm1128_vm4, %v14189_v37  ;;  %797 = vrot.lane.b32.xlu1 %v13746_v51, %s13330_s9  ;;  %11543 = vmatmul.mubr.msk.f32.gmra.mrb[24].mxu0 %vm345_vm5, %v14476_v53 }
 0x255   : > { %1171 = vst.msk [vmem:[#allocation2 + $0xdd] sm:$0x7] %vm1160_vm7, %v14155_v49 }
 0x256   : > { %v505_v6 = vpop.permute.xlu1 %504 }
 0x257   : > { %580 = vst.msk [vmem:[#allocation2 + $0xe2] sm:$0xff] %vm556_vm9, %v505_v6 }
 0x258   : > { %728 = vst.msk [vmem:[#allocation2 + $0xe9] sm:$0x7f] %vm705_vm0, %v14204_v26  ;;  %943 = vrot.lane.b32.xlu1 %v13746_v51, %s13331_s10 }
 0x25a   : > { %v1071_v16 = vpop.permute.xlu1 %1070 }
 0x25b   : > { %1148 = vst.msk [vmem:[#allocation2 + $0xce] sm:$0xfc] %vm1126_vm13, %v1071_v16 }
 0x25c   : > { %1296 = vst.msk [vmem:[#allocation2 + $0xd5] sm:$0xff] %vm1275_vm6, %v14213_v32  ;;  %1090 = vrot.lane.b32.xlu1 %v13746_v51, %s13332_s15 }
 0x25e   : > { %v652_v37 = vpop.permute.xlu1 %651 }
 0x25f   : > { %727 = vst.msk [vmem:[#allocation2 + $0xe1] sm:$0xff] %vm703_vm10, %v652_v37 }
 0x260   : > { %857 = vst.msk [vmem:[#allocation2 + $0xe8] sm:$0xff] %vm833_vm11, %v14220_v38  ;;  %1237 = vrot.lane.b32.xlu1 %v13746_v51, %s13333_s20 }
 0x261   : > { %878 = vst.msk [vmem:[#allocation2 + $0xef] sm:$0x1] %vm866_vm1, %v14155_v49 }
 0x262   : > { %v1218_v26 = vpop.permute.xlu1 %1217 }
 0x263   : > { %1295 = vst.msk [vmem:[#allocation2 + $0xcd] sm:$0xf8] %vm1273_vm14, %v1218_v26  ;;  %v14514_v51 = vld [vmem:[#allocation2 + $0xd8] sm:$0xff] }
 0x266   : > { %v782_v33 = vpop.permute.xlu1 %781 }
 0x267   : > { %856 = vst.msk [vmem:[#allocation2 + $0xe0] sm:$0xff] %vm833_vm11, %v782_v33 }
 0x268   : > { %1004 = vst.msk [vmem:[#allocation2 + $0xe7] sm:$0xff] %vm981_vm2, %v14229_v48 }
 0x269   : > { %1025 = vst.msk [vmem:[#allocation2 + $0xee] sm:$0x3] %vm1013_vm3, %v14155_v49 }
 0x26a   : > { %v928_v32 = vpop.permute.xlu1 %927  ;;  %v14509_v38 = vld [vmem:[#allocation2 + $0xd0] sm:$0xff] }
 0x26b   : > { %1003 = vst.msk [vmem:[#allocation2 + $0xdf] sm:$0xfe] %vm979_vm12, %v928_v32  ;;  %11545 = vmatprep.mubr.msk.f32.mxu0 %vm345_vm5, %v14509_v38 }
 0x26c   : > { %1151 = vst.msk [vmem:[#allocation2 + $0xe6] sm:$0xff] %vm1128_vm4, %v14252_v40  ;;  %11546 = vmatmul.mubr.msk.f32.gmra.mrb[26].mxu0 %vm345_vm5, %v14514_v51 }
 0x26d   : > { %1172 = vst.msk [vmem:[#allocation2 + $0xed] sm:$0x7] %vm1160_vm7, %v14155_v49 }
 0x26e   : > { %v509_v48 = vpop.permute.xlu1 %508 }
 0x26f   : > { %582 = vst.msk [vmem:[#allocation2 + $0xf2] sm:$0xff] %vm556_vm9, %v509_v48 }
 0x270   : > { %730 = vst.msk [vmem:[#allocation2 + $0xf9] sm:$0x7f] %vm705_vm0, %v14265_v35 }
 0x272   : > { %v1075_v52 = vpop.permute.xlu1 %1074 }
 0x273   : > { %1150 = vst.msk [vmem:[#allocation2 + $0xde] sm:$0xfc] %vm1126_vm13, %v1075_v52 }
 0x274   : > { %1298 = vst.msk [vmem:[#allocation2 + $0xe5] sm:$0xff] %vm1275_vm6, %v14272_v17 }
 0x276   : > { %v656_v43 = vpop.permute.xlu1 %655 }
 0x277   : > { %729 = vst.msk [vmem:[#allocation2 + $0xf1] sm:$0xff] %vm703_vm10, %v656_v43 }
 0x278   : > { %859 = vst.msk [vmem:[#allocation2 + $0xf8] sm:$0xff] %vm833_vm11, %v14279_v22 }
 0x279   : > { %879 = vst.msk [vmem:[#allocation2 + $0xff] sm:$0x1] %vm866_vm1, %v14155_v49 }
 0x27a   : > { %v1222_v40 = vpop.permute.xlu1 %1221 }
 0x27b   : > { %1297 = vst.msk [vmem:[#allocation2 + $0xdd] sm:$0xf8] %vm1273_vm14, %v1222_v40  ;;  %v14544_v22 = vld [vmem:[#allocation2 + $0xe8] sm:$0xff] }
 0x27e   : > { %v786_v46 = vpop.permute.xlu1 %785 }
 0x27f   : > { %858 = vst.msk [vmem:[#allocation2 + $0xf0] sm:$0xff] %vm833_vm11, %v786_v46 }
 0x280   : > { %1006 = vst.msk [vmem:[#allocation2 + $0xf7] sm:$0xff] %vm981_vm2, %v14294_v10 }
 0x281   : > { %1026 = vst.msk [vmem:[#allocation2 + $0xfe] sm:$0x3] %vm1013_vm3, %v14155_v49 }
 0x282   : > { %v932_v35 = vpop.permute.xlu1 %931  ;;  %v14539_v17 = vld [vmem:[#allocation2 + $0xe0] sm:$0xff] }
 0x283   : > { %1005 = vst.msk [vmem:[#allocation2 + $0xef] sm:$0xfe] %vm979_vm12, %v932_v35  ;;  %11548 = vmatprep.mubr.msk.f32.mxu0 %vm345_vm5, %v14539_v17  ;;  %v10295_v35 = vld [vmem:[%s19032_s1 + $0xa0] sm:$0xff] }
 0x284   : > { %1153 = vst.msk [vmem:[#allocation2 + $0xf6] sm:$0xff] %vm1128_vm4, %v14303_v42  ;;  %11549 = vmatmul.mubr.msk.f32.gmra.mrb[28].mxu0 %vm345_vm5, %v14544_v22 }
 0x285   : > { %1173 = vst.msk [vmem:[#allocation2 + $0xfd] sm:$0x7] %vm1160_vm7, %v14155_v49 }
 0x286   : > { %v1079_v10 = vpop.permute.xlu1 %1078 }
 0x287   : > { %1152 = vst.msk [vmem:[#allocation2 + $0xee] sm:$0xfc] %vm1126_vm13, %v1079_v10  ;;  %v10296_v10 = vld [vmem:[%s19032_s1 + $0xa8] sm:$0xff] }
 0x288   : > { %1300 = vst.msk [vmem:[#allocation2 + $0xf5] sm:$0xff] %vm1275_vm6, %v14316_v44  ;;  %v10256_v44 = vld [vmem:[%s19032_s1 + $0x70] sm:$0xff] }
 0x289   : > { %v12482_v7 = vpack.c.bf16 %v10257_v8, %v10256_v44  ;;  %v10332_v44 = vld [vmem:[%s19032_s1 + $0xc0] sm:$0xff]  ;;  %v10333_v8 = vld [vmem:[%s19032_s1 + $0xc8] sm:$0xff] }
 0x28a   : > { %v1226_v23 = vpop.permute.xlu1 %1225 }
 0x28b   : > { %1299 = vst.msk [vmem:[#allocation2 + $0xed] sm:$0xf8] %vm1273_vm14, %v1226_v23  ;;  %v12496_v23 = vpack.c.bf16 %v10296_v10, %v10295_v35  ;;  %v3305_v35 = vld [vmem:[#allocation2 + $0xb0] sm:$0xff] }
 0x28c   : > { %v3703_v10 = vld [vmem:[#allocation2 + $0xd0] sm:$0xff] }
 0x28e   : > { %v513_v18 = vpop.permute.xlu1 %512 }
 0x28f   : > { %584 = vst.msk [vmem:[#allocation2 + $0x102] sm:$0xff] %vm556_vm9, %v513_v18  ;;  %v14564_v25 = vld [vmem:[#allocation2 + $0xf8] sm:$0xff]  ;;  %v10297_v18 = vld [vmem:[%s19032_s1 + $0xb0] sm:$0xff] }
 0x290   : > { %732 = vst.msk [vmem:[#allocation2 + $0x109] sm:$0x7f] %vm705_vm0, %v14335_v36  ;;  %v1711_v36 = vld [vmem:[#allocation2 + $0x18] sm:$0xff] }
 0x292   : > { %v660_v42 = vpop.permute.xlu1 %659  ;;  %v14559_v24 = vld [vmem:[#allocation2 + $0xf0] sm:$0xff] }
 0x293   : > { %731 = vst.msk [vmem:[#allocation2 + $0x101] sm:$0xff] %vm703_vm10, %v660_v42  ;;  %11551 = vmatprep.mubr.msk.f32.mxu0 %vm345_vm5, %v14559_v24  ;;  %v10298_v42 = vld [vmem:[%s19032_s1 + $0xb8] sm:$0x3] }
 0x294   : > { %861 = vst.msk [vmem:[#allocation2 + $0x108] sm:$0xff] %vm833_vm11, %v14342_v15  ;;  %11552 = vmatmul.mubr.msk.f32.gmra.mrb[30].mxu0 %vm345_vm5, %v14564_v25  ;;  %v10259_v15 = vld [vmem:[%s19032_s1 + $0x88] sm:$0x3] }
 0x295   : > { %880 = vst.msk [vmem:[#allocation2 + $0x10f] sm:$0x1] %vm866_vm1, %v14155_v49  ;;  %11566 = vmatprep.mubr.msk.f32.mxu0 %vm345_vm5, %v1710_v0  ;;  %v12486_v2 = vpack.c.bf16 %v10259_v15, %v10258_v13  ;;  %v12500_v0 = vpack.c.bf16 %v10298_v42, %v10297_v18  ;;  %v14768_v13 = vld [vmem:[#allocation2 + $0x58] sm:$0xff]  ;;  %v10334_v15 = vld [vmem:[%s19032_s1 + $0xd0] sm:$0xff] }
 0x296   : > { %v790_v45 = vpop.permute.xlu1 %789  ;;  %v10589_v18 = vld [vmem:[%s19034_s3 + $0x398] sm:$0xff] }
 0x297   : > { %860 = vst.msk [vmem:[#allocation2 + $0x100] sm:$0xff] %vm833_vm11, %v790_v45  ;;  %v12506_v45 = vpack.c.bf16 %v10333_v8, %v10332_v44  ;;  %v10590_v44 = vld [vmem:[%s19034_s3 + $0x3a0] sm:$0xff]  ;;  %v10591_v8 = vld [vmem:[%s19034_s3 + $0x3a8] sm:$0xff] }
 0x298   : > { %1008 = vst.msk [vmem:[#allocation2 + $0x107] sm:$0xff] %vm981_vm2, %v14359_v21  ;;  %11567 = vmatmul.mubr.msk.f32.vlgmr.msra.gmra.mrb[0].mxu0 %vm345_vm5, %v1711_v36  ;;  %v10293_v21 = vld [vmem:[%s19032_s1 + $0x90] sm:$0xff]  ;;  %v14752_v36 = vld [vmem:[#allocation2 + $0x40] sm:$0xff] }
 0x299   : > { %1027 = vst.msk [vmem:[#allocation2 + $0x10e] sm:$0x3] %vm1013_vm3, %v14155_v49  ;;  %12481 = vmatpush3.bf16.msra.mxu0 %v14356_v3  ;;  %11569 = vmatprep.mubr.msk.f32.mxu0 %vm345_vm5, %v14579_v9  ;;  %v14609_v3 = vld [vmem:[#allocation2 + $0x30] sm:$0xff]  ;;  %v14617_v16 = vpack.c.bf16 %v10294_v47, %v10293_v21  ;;  %v10337_v21 = vld [vmem:[%s19032_s1 + $0xe8] sm:$0x3] }
 0x29a   : > { %v936_v63 = vpop.permute.xlu1 %935  ;;  %12483 = vmatprep.subr.bf16.mxu0 %v12482_v7 }
 0x29b   : > { %1007 = vst.msk [vmem:[#allocation2 + $0xff] sm:$0xfe] %vm979_vm12, %v936_v63 }
 0x29c   : > { %1155 = vst.msk [vmem:[#allocation2 + $0x106] sm:$0xff] %vm1128_vm4, %v14365_v5  ;;  %11570 = vmatmul.mubr.msk.f32.gmra.mrb[2].mxu0 %vm345_vm5, %v14596_v12  ;;  %v14620_v5 = vld [vmem:[#allocation2 + $0x38] sm:$0xff] }
 0x29d   : > { %1174 = vst.msk [vmem:[#allocation2 + $0x10d] sm:$0x7] %vm1160_vm7, %v14155_v49  ;;  %11572 = vmatprep.mubr.msk.f32.mxu0 %vm345_vm5, %v14609_v3  ;;  %12485 = vmatpush3.bf16.msra.mxu0 %v12482_v7  ;;  %v14762_v7 = vld [vmem:[#allocation2 + $0x50] sm:$0xff] }
 0x29e   : > { %v1083_v6 = vpop.permute.xlu1 %1082  ;;  %12488 = vmatprep.subr.msk.bf16.mxu0 %vm13562_vm8, %v12486_v2 }
 0x29f   : > { %1154 = vst.msk [vmem:[#allocation2 + $0xfe] sm:$0xfc] %vm1126_vm13, %v1083_v6  ;;  %v10372_v6 = vld [vmem:[%s19032_s1 + $0xf8] sm:$0xff] }
 0x2a0   : > { %1302 = vst.msk [vmem:[#allocation2 + $0x105] sm:$0xff] %vm1275_vm6, %v14378_v39  ;;  %11573 = vmatmul.mubr.msk.f32.gmra.mrb[4].mxu0 %vm345_vm5, %v14620_v5 }
 0x2a1   : > { %11575 = vmatprep.mubr.msk.f32.mxu0 %vm345_vm5, %v13938_v57  ;;  %12491 = vmatpush3.bf16.msk.msra.mxu0 %vm13562_vm8, %v12486_v2  ;;  %v10336_v2 = vld [vmem:[%s19032_s1 + $0xe0] sm:$0xff] }
 0x2a2   : > { %v1230_v37 = vpop.permute.xlu1 %1229  ;;  %12493 = vmatprep.subr.bf16.mxu0 %v14617_v16  ;;  %v12514_v47 = vpack.c.bf16 %v10337_v21, %v10336_v2  ;;  %v4965_v21 = vld [vmem:[%s19034_s3 + $0x20] sm:$0xff] }
 0x2a3   : > { %1301 = vst.msk [vmem:[#allocation2 + $0xfd] sm:$0xf8] %vm1273_vm14, %v1230_v37  ;;  %v14862_v37 = vld [vmem:[#allocation2 + $0x68] sm:$0xff] }
 0x2a4   : > { %11576 = vmatmul.mubr.msk.f32.gmra.mrb[6].mxu0 %vm345_vm5, %v13940_v58 }
 0x2a5   : > { %11578 = vmatprep.mubr.msk.f32.mxu0 %vm345_vm5, %v14034_v28 }
 0x2a6   : > { %v517_v39 = vpop.permute.xlu1 %516 }
 0x2a7   : > { %586 = vst.msk [vmem:[#allocation2 + $0x112] sm:$0xff] %vm556_vm9, %v517_v39  ;;  %v10375_v39 = vld [vmem:[%s19032_s1 + $0x110] sm:$0xff] }
 0x2a8   : > { %734 = vst.msk [vmem:[#allocation2 + $0x119] sm:$0x7f] %vm705_vm0, %v14397_v29  ;;  %11579 = vmatmul.mubr.msk.f32.gmra.mrb[8].mxu0 %vm345_vm5, %v14036_v30  ;;  %v670_v29 = vpop.permute.xlu0 %669 }
 0x2a9   : > { %11581 = vmatprep.mubr.msk.f32.mxu0 %vm345_vm5, %v14111_v59 }
 0x2aa   : > { %v664_v57 = vpop.permute.xlu1 %663  ;;  %v14716_v40 = vld [vmem:[#allocation2 + $0x100] sm:$0xff] }
 0x2ab   : > { %733 = vst.msk [vmem:[#allocation2 + $0x111] sm:$0xff] %vm703_vm10, %v664_v57  ;;  %v10376_v57 = vld [vmem:[%s19032_s1 + $0x118] sm:$0x3] }
 0x2ac   : > { %863 = vst.msk [vmem:[#allocation2 + $0x118] sm:$0xff] %vm833_vm11, %v14404_v62  ;;  %11582 = vmatmul.mubr.msk.f32.gmra.mrb[10].mxu0 %vm345_vm5, %v14118_v61 }
 0x2ad   : > { %881 = vst.msk [vmem:[#allocation2 + $0x11f] sm:$0x1] %vm866_vm1, %v14155_v49  ;;  %11584 = vmatprep.mubr.msk.f32.mxu0 %vm345_vm5, %v14184_v31 }
 0x2ae   : > { %v794_v58 = vpop.permute.xlu1 %793 }
 0x2af   : > { %862 = vst.msk [vmem:[#allocation2 + $0x110] sm:$0xff] %vm833_vm11, %v794_v58  ;;  %v12528_v58 = vpack.c.bf16 %v10376_v57, %v10375_v39  ;;  %v4973_v39 = vld [vmem:[%s19034_s3 + $0x60] sm:$0xff]  ;;  %v4974_v57 = vld [vmem:[%s19034_s3 + $0x68] sm:$0xff] }
 0x2b0   : > { %1010 = vst.msk [vmem:[#allocation2 + $0x117] sm:$0xff] %vm981_vm2, %v14413_v50  ;;  %11585 = vmatmul.mubr.msk.f32.gmra.mrb[12].mxu0 %vm345_vm5, %v14191_v20  ;;  %v800_v50 = vpop.permute.xlu0 %799 }
 0x2b1   : > { %1028 = vst.msk [vmem:[#allocation2 + $0x11e] sm:$0x3] %vm1013_vm3, %v14155_v49  ;;  %11587 = vmatprep.mubr.msk.f32.mxu0 %vm345_vm5, %v14247_v56 }
 0x2b2   : > { %v940_v28 = vpop.permute.xlu1 %939 }
 0x2b3   : > { %1009 = vst.msk [vmem:[#allocation2 + $0x10f] sm:$0xfe] %vm979_vm12, %v940_v28  ;;  %v10410_v28 = vld [vmem:[%s19032_s1 + $0x120] sm:$0xff] }
 0x2b4   : > { %1157 = vst.msk [vmem:[#allocation2 + $0x116] sm:$0xff] %vm1128_vm4, %v14418_v4  ;;  %11588 = vmatmul.mubr.msk.f32.gmra.mrb[14].mxu0 %vm345_vm5, %v14254_v55  ;;  %v946_v26 = vpop.permute.xlu0 %945 }
 0x2b5   : > { %1175 = vst.msk [vmem:[#allocation2 + $0x11d] sm:$0x7] %vm1160_vm7, %v14155_v49  ;;  %11590 = vmatprep.mubr.msk.f32.mxu0 %vm345_vm5, %v14311_v14 }
 0x2b6   : > { %v1087_v30 = vpop.permute.xlu1 %1086 }
 0x2b7   : > { %1156 = vst.msk [vmem:[#allocation2 + $0x10e] sm:$0xfc] %vm1126_vm13, %v1087_v30  ;;  %v10411_v30 = vld [vmem:[%s19032_s1 + $0x128] sm:$0xff] }
 0x2b8   : > { %1304 = vst.msk [vmem:[#allocation2 + $0x115] sm:$0xff] %vm1275_vm6, %v14431_v27  ;;  %11591 = vmatmul.mubr.msk.f32.gmra.mrb[16].mxu0 %vm345_vm5, %v14318_v34  ;;  %v1093_v32 = vpop.permute.xlu0 %1092 }
 0x2b9   : > { %11593 = vmatprep.mubr.msk.f32.mxu0 %vm345_vm5, %v14373_v11 }
 0x2ba   : > { %v1234_v62 = vpop.permute.xlu1 %1233 }
 0x2bb   : > { %1303 = vst.msk [vmem:[#allocation2 + $0x10d] sm:$0xf8] %vm1273_vm14, %v1234_v62  ;;  %v14950_v62 = vld [vmem:[#allocation2 + $0x70] sm:$0xff] }
 0x2bc   : > { %11594 = vmatmul.mubr.msk.f32.gmra.mrb[18].mxu0 %vm345_vm5, %v14380_v60  ;;  %v1240_v43 = vpop.permute.xlu0 %1239 }
 0x2bd   : > { %11596 = vmatprep.mubr.msk.f32.mxu0 %vm345_vm5, %v14426_v54 }
 0x2be   : > { %v521_v4 = vpop.permute.xlu1 %520 }
 0x2bf   : > { %588 = vst.msk [vmem:[#allocation2 + $0x122] sm:$0xff] %vm556_vm9, %v521_v4  ;;  %v14960_v4 = vld [vmem:[#allocation2 + $0x80] sm:$0xff]  ;;  %vm4305_vm9 = vcmask 1040896  }
 0x2c0   : > { %736 = vst.msk [vmem:[#allocation2 + $0x129] sm:$0x7f] %vm705_vm0, %v670_v29  ;;  %11597 = vmatmul.mubr.msk.f32.gmra.mrb[20].mxu0 %vm345_vm5, %v14433_v41  ;;  %v12534_v29 = vpack.c.bf16 %v10411_v30, %v10410_v28  ;;  %v4975_v28 = vld [vmem:[%s19034_s3 + $0x70] sm:$0xff]  ;;  %v4976_v30 = vld [vmem:[%s19034_s3 + $0x78] sm:$0xff]  ;;  %vm19106_vm0 = vmmov %vm19104_vm15 }
 0x2c1   : > { %11599 = vmatprep.mubr.msk.f32.mxu0 %vm345_vm5, %v14471_v1 }
 0x2c2   : > { %v668_v27 = vpop.permute.xlu1 %667 }
 0x2c3   : > { %735 = vst.msk [vmem:[#allocation2 + $0x121] sm:$0xff] %vm703_vm10, %v668_v27  ;;  %v14964_v27 = vld [vmem:[#allocation2 + $0x88] sm:$0xff]  ;;  %vm4826_vm10 = vcmask 521216  }
 0x2c4   : > { %865 = vst.msk [vmem:[#allocation2 + $0x128] sm:$0xff] %vm833_vm11, %v800_v50  ;;  %11600 = vmatmul.mubr.msk.f32.gmra.mrb[22].mxu0 %vm345_vm5, %v14476_v53  ;;  %v14956_v50 = vld [vmem:[#allocation2 + $0x78] sm:$0xff] }
 0x2c5   : > { %882 = vst.msk [vmem:[#allocation2 + $0x12f] sm:$0x1] %vm866_vm1, %v14155_v49  ;;  %11602 = vmatprep.mubr.msk.f32.mxu0 %vm345_vm5, %v14509_v38  ;;  %vm19107_vm1 = vmmov %vm19106_vm0 }
 0x2c6   : > { %v798_v33 = vpop.permute.xlu1 %797 }
 0x2c7   : > { %864 = vst.msk [vmem:[#allocation2 + $0x120] sm:$0xff] %vm833_vm11, %v798_v33  ;;  %v10414_v33 = vld [vmem:[%s19032_s1 + $0x140] sm:$0xff]  ;;  %vm4744_vm11 = vcmask 1045504  }
 0x2c8   : > { %1012 = vst.msk [vmem:[#allocation2 + $0x127] sm:$0xff] %vm981_vm2, %v946_v26  ;;  %11603 = vmatmul.mubr.msk.f32.gmra.mrb[24].mxu0 %vm345_vm5, %v14514_v51  ;;  %v14968_v26 = vld [vmem:[#allocation2 + $0x90] sm:$0xff]  ;;  %vm19108_vm2 = vmmov %vm19106_vm0 }
 0x2c9   : > { %1029 = vst.msk [vmem:[#allocation2 + $0x12e] sm:$0x3] %vm1013_vm3, %v14155_v49  ;;  %11605 = vmatprep.mubr.msk.f32.mxu0 %vm345_vm5, %v14539_v17  ;;  %vm19109_vm3 = vmmov %vm19106_vm0 }
 0x2ca   : > { %v944_v48 = vpop.permute.xlu1 %943 }
 0x2cb   : > { %1011 = vst.msk [vmem:[#allocation2 + $0x11f] sm:$0xfe] %vm979_vm12, %v944_v48  ;;  %vm4549_vm12 = vcmask 1046528  }
 0x2cc   : > { %1159 = vst.msk [vmem:[#allocation2 + $0x126] sm:$0xff] %vm1128_vm4, %v1093_v32  ;;  %11606 = vmatmul.mubr.msk.f32.gmra.mrb[26].mxu0 %vm345_vm5, %v14544_v22  ;;  %v10415_v32 = vld [vmem:[%s19032_s1 + $0x148] sm:$0x3]  ;;  %vm19110_vm4 = vmmov %vm19106_vm0 }
 0x2cd   : > { %1176 = vst.msk [vmem:[#allocation2 + $0x12d] sm:$0x7] %vm1160_vm7, %v14155_v49  ;;  %11608 = vmatprep.mubr.msk.f32.mxu0 %vm345_vm5, %v14559_v24  ;;  %v14721_v49 = vld [vmem:[#allocation2 + $0x108] sm:$0xff]  ;;  %v12542_v48 = vpack.c.bf16 %v10415_v32, %v10414_v33  ;;  %v4984_v33 = vld [vmem:[%s19034_s3 + $0xb8] sm:$0xff]  ;;  %vm19111_vm7 = vmmov %vm19106_vm0 }
 0x2ce   : > { %v1091_v52 = vpop.permute.xlu1 %1090 }
 0x2cf   : > { %1158 = vst.msk [vmem:[#allocation2 + $0x11e] sm:$0xfc] %vm1126_vm13, %v1091_v52  ;;  %v3302_v52 = vld [vmem:[#allocation2 + $0x98] sm:$0xff]  ;;  %vm4322_vm13 = vcmask 1040384  }
 0x2d0   : > { %1306 = vst.msk [vmem:[#allocation2 + $0x125] sm:$0xff] %vm1275_vm6, %v1240_v43  ;;  %11609 = vmatmul.mubr.msk.f32.gmra.mrb[28].mxu0 %vm345_vm5, %v14564_v25  ;;  %v3303_v43 = vld [vmem:[#allocation2 + $0xa0] sm:$0xff]  ;;  %vm4727_vm6 = vcmask 523270  }
 0x2d1   : > { %11611 = vmatprep.mubr.msk.f32.mxu0 %vm345_vm5, %v14716_v40 }
 0x2d2   : > { %v1238_v46 = vpop.permute.xlu1 %1237 }
 0x2d3   : > { %1305 = vst.msk [vmem:[#allocation2 + $0x11d] sm:$0xf8] %vm1273_vm14, %v1238_v46  ;;  %v3304_v46 = vld [vmem:[#allocation2 + $0xa8] sm:$0xff]  ;;  %vm4272_vm14 = vcmask 523266  }
 0x2d4   : > { %11612 = vmatmul.mubr.msk.f32.gmra.mrb[30].mxu0 %vm345_vm5, %v14721_v49 }
 0x2d5   : > { %11626 = vmatprep.mubr.msk.f32.mxu0 %vm345_vm5, %v14579_v9  ;;  %v14758_v9 = vld [vmem:[#allocation2 + $0x48] sm:$0xff] }
 0x2d8   : > { %11627 = vmatmul.mubr.msk.f32.vlgmr.msra.gmra.mrb[0].mxu0 %vm345_vm5, %v14596_v12  ;;  %v10335_v12 = vld [vmem:[%s19032_s1 + $0xd8] sm:$0xff] }
 0x2d9   : > { %12495 = vmatpush3.bf16.msra.mxu0 %v14617_v16  ;;  %11629 = vmatprep.mubr.msk.f32.mxu0 %vm345_vm5, %v14609_v3  ;;  %v12510_v63 = vpack.c.bf16 %v10335_v12, %v10334_v15  ;;  %v19055_v15 = vmov 0.0|0.0   ;;  %v4963_v12 = vld [vmem:[%s19034_s3 + $0x10] sm:$0xff] }
 0x2da   : > { %12497 = vmatprep.subr.bf16.mxu0 %v12496_v23  ;;  %12548 = vmatprep.subr.bf16.mxu1 %v19055_v15 }
 0x2dc   : > { %11630 = vmatmul.mubr.msk.f32.gmra.mrb[2].mxu0 %vm345_vm5, %v14620_v5 }
 0x2dd   : > { %11632 = vmatprep.mubr.msk.f32.mxu0 %vm345_vm5, %v14752_v36  ;;  %12499 = vmatpush3.bf16.msra.mxu0 %v12496_v23  ;;  %v3704_v23 = vld [vmem:[#allocation2 + $0xd8] sm:$0xff] }
 0x2de   : > { %12502 = vmatprep.subr.msk.bf16.mxu0 %vm13562_vm8, %v12500_v0 }
 0x2e0   : > { %11633 = vmatmul.mubr.msk.f32.gmra.mrb[4].mxu0 %vm345_vm5, %v14758_v9 }
 0x2e1   : > { %11635 = vmatprep.mubr.msk.f32.mxu0 %vm345_vm5, %v14762_v7  ;;  %12505 = vmatpush3.bf16.msk.msra.mxu0 %vm13562_vm8, %v12500_v0  ;;  %v15154_v0 = vld [vmem:[#allocation3] sm:$0xff] }
 0x2e2   : > { %12507 = vmatprep.subr.bf16.mxu0 %v12506_v45  ;;  %4728 = vst.msk [vmem:[#allocation3 + $0x88] sm:$0xc0] %vm4727_vm6, %v15154_v0  ;;  %4729 = vst.msk [vmem:[#allocation3 + $0xb8] sm:$0xc0] %vm4727_vm6, %v15154_v0 }
 0x2e3   : > { %4730 = vst.msk [vmem:[#allocation3 + $0xe8] sm:$0xc0] %vm4727_vm6, %v15154_v0  ;;  %4731 = vst.msk [vmem:[#allocation3 + $0x118] sm:$0xc0] %vm4727_vm6, %v15154_v0 }
 0x2e4   : > { %11636 = vmatmul.mubr.msk.f32.gmra.mrb[6].mxu0 %vm345_vm5, %v14768_v13  ;;  %4732 = vst.msk [vmem:[#allocation3 + $0x148] sm:$0xc0] %vm4727_vm6, %v15154_v0  ;;  %4733 = vst.msk [vmem:[#allocation3 + $0x178] sm:$0xc0] %vm4727_vm6, %v15154_v0 }
 0x2e5   : > { %11638 = vmatprep.mubr.msk.f32.mxu0 %vm345_vm5, %v14111_v59  ;;  %v14816_v59 = vld [vmem:[#allocation2 + $0x110] sm:$0xff]  ;;  %4734 = vst.msk [vmem:[#allocation3 + $0x1a8] sm:$0xc0] %vm4727_vm6, %v15154_v0  ;;  %4735 = vst.msk [vmem:[#allocation3 + $0x1d8] sm:$0xc0] %vm4727_vm6, %v15154_v0 }
 0x2e6   : > { %4736 = vst.msk [vmem:[#allocation3 + $0x208] sm:$0xc0] %vm4727_vm6, %v15154_v0  ;;  %4737 = vst.msk [vmem:[#allocation3 + $0x238] sm:$0xc0] %vm4727_vm6, %v15154_v0 }
 0x2e7   : > { %4738 = vst.msk [vmem:[#allocation3 + $0x268] sm:$0xc0] %vm4727_vm6, %v15154_v0  ;;  %4739 = vst.msk [vmem:[#allocation3 + $0x298] sm:$0xc0] %vm4727_vm6, %v15154_v0 }
 0x2e8   : > { %11639 = vmatmul.mubr.msk.f32.gmra.mrb[8].mxu0 %vm345_vm5, %v14118_v61  ;;  %v14820_v61 = vld [vmem:[#allocation2 + $0x118] sm:$0xff]  ;;  %4740 = vst.msk [vmem:[#allocation3 + $0x2c8] sm:$0xc0] %vm4727_vm6, %v15154_v0  ;;  %4741 = vst.msk [vmem:[#allocation3 + $0x2f8] sm:$0xc0] %vm4727_vm6, %v15154_v0 }
 0x2e9   : > { %11641 = vmatprep.mubr.msk.f32.mxu0 %vm345_vm5, %v14184_v31  ;;  %4742 = vst.msk [vmem:[#allocation3 + $0x328] sm:$0xc0] %vm4727_vm6, %v15154_v0  ;;  %4743 = vst.msk [vmem:[#allocation3 + $0x358] sm:$0xc0] %vm4727_vm6, %v15154_v0 }
 0x2ea   : > { %vm19112_vm6 = vmmov %vm19106_vm0 }
 0x2ec   : > { %11642 = vmatmul.mubr.msk.f32.gmra.mrb[10].mxu0 %vm345_vm5, %v14191_v20 }
 0x2ed   : > { %11644 = vmatprep.mubr.msk.f32.mxu0 %vm345_vm5, %v14247_v56 }
 0x2f0   : > { %11645 = vmatmul.mubr.msk.f32.gmra.mrb[12].mxu0 %vm345_vm5, %v14254_v55 }
 0x2f1   : > { %11647 = vmatprep.mubr.msk.f32.mxu0 %vm345_vm5, %v14311_v14 }
 0x2f4   : > { %11648 = vmatmul.mubr.msk.f32.gmra.mrb[14].mxu0 %vm345_vm5, %v14318_v34 }
 0x2f5   : > { %11650 = vmatprep.mubr.msk.f32.mxu0 %vm345_vm5, %v14373_v11 }
 0x2f8   : > { %11651 = vmatmul.mubr.msk.f32.gmra.mrb[16].mxu0 %vm345_vm5, %v14380_v60 }
 0x2f9   : > { %11653 = vmatprep.mubr.msk.f32.mxu0 %vm345_vm5, %v14426_v54 }
 0x2fc   : > { %11654 = vmatmul.mubr.msk.f32.gmra.mrb[18].mxu0 %vm345_vm5, %v14433_v41 }
 0x2fd   : > { %11656 = vmatprep.mubr.msk.f32.mxu0 %vm345_vm5, %v14471_v1 }
 0x300   : > { %11657 = vmatmul.mubr.msk.f32.gmra.mrb[20].mxu0 %vm345_vm5, %v14476_v53 }
 0x301   : > { %11659 = vmatprep.mubr.msk.f32.mxu0 %vm345_vm5, %v14509_v38 }
 0x304   : > { %11660 = vmatmul.mubr.msk.f32.gmra.mrb[22].mxu0 %vm345_vm5, %v14514_v51 }
 0x305   : > { %11662 = vmatprep.mubr.msk.f32.mxu0 %vm345_vm5, %v14539_v17 }
 0x308   : > { %11663 = vmatmul.mubr.msk.f32.gmra.mrb[24].mxu0 %vm345_vm5, %v14544_v22 }
 0x309   : > { %11665 = vmatprep.mubr.msk.f32.mxu0 %vm345_vm5, %v14559_v24 }
 0x30c   : > { %11666 = vmatmul.mubr.msk.f32.gmra.mrb[26].mxu0 %vm345_vm5, %v14564_v25 }
 0x30d   : > { %11668 = vmatprep.mubr.msk.f32.mxu0 %vm345_vm5, %v14716_v40 }
 0x310   : > { %11669 = vmatmul.mubr.msk.f32.gmra.mrb[28].mxu0 %vm345_vm5, %v14721_v49 }
 0x311   : > { %11671 = vmatprep.mubr.msk.f32.mxu0 %vm345_vm5, %v14816_v59 }
 0x314   : > { %11672 = vmatmul.mubr.msk.f32.gmra.mrb[30].mxu0 %vm345_vm5, %v14820_v61 }
 0x315   : > { %11686 = vmatprep.mubr.msk.f32.mxu0 %vm345_vm5, %v14609_v3  ;;  %v10371_v3 = vld [vmem:[%s19032_s1 + $0xf0] sm:$0xff] }
 0x316   : > { %v12520_v16 = vpack.c.bf16 %v10372_v6, %v10371_v3  ;;  %v4967_v6 = vld [vmem:[%s19034_s3 + $0x30] sm:$0xff] }
 0x318   : > { %11687 = vmatmul.mubr.msk.f32.vlgmr.msra.gmra.mrb[0].mxu0 %vm345_vm5, %v14620_v5  ;;  %v14856_v5 = vld [vmem:[#allocation2 + $0x60] sm:$0xff] }
 0x319   : > { %12509 = vmatpush3.bf16.msra.mxu0 %v12506_v45  ;;  %11689 = vmatprep.mubr.msk.f32.mxu0 %vm345_vm5, %v14752_v36  ;;  %v10592_v45 = vld [vmem:[%s19034_s3 + $0x3b0] sm:$0xff] }
 0x31a   : > { %12511 = vmatprep.subr.bf16.mxu0 %v12510_v63 }
 0x31c   : > { %11690 = vmatmul.mubr.msk.f32.gmra.mrb[2].mxu0 %vm345_vm5, %v14758_v9 }
 0x31d   : > { %11692 = vmatprep.mubr.msk.f32.mxu0 %vm345_vm5, %v14762_v7  ;;  %12513 = vmatpush3.bf16.msra.mxu0 %v12510_v63  ;;  %v4964_v63 = vld [vmem:[%s19034_s3 + $0x18] sm:$0xff] }
 0x31e   : > { %12516 = vmatprep.subr.msk.bf16.mxu0 %vm13562_vm8, %v12514_v47  ;;  %v12552_v2 = vpack.c.bf16 %v4964_v63, %v4963_v12  ;;  %v10638_v12 = vld [vmem:[%s19034_s3 + $0x420] sm:$0xff]  ;;  %v10639_v63 = vld [vmem:[%s19034_s3 + $0x428] sm:$0xff] }
 0x320   : > { %11693 = vmatmul.mubr.msk.f32.gmra.mrb[4].mxu0 %vm345_vm5, %v14768_v13 }
 0x321   : > { %11695 = vmatprep.mubr.msk.f32.mxu0 %vm345_vm5, %v14856_v5  ;;  %12519 = vmatpush3.bf16.msk.msra.mxu0 %vm13562_vm8, %v12514_v47  ;;  %v4966_v47 = vld [vmem:[%s19034_s3 + $0x28] sm:$0xff] }
 0x322   : > { %12521 = vmatprep.subr.bf16.mxu0 %v12520_v16  ;;  %v12555_v3 = vpack.c.bf16 %v4966_v47, %v4965_v21 }
 0x324   : > { %11696 = vmatmul.mubr.msk.f32.gmra.mrb[6].mxu0 %vm345_vm5, %v14862_v37 }
 0x325   : > { %11698 = vmatprep.mubr.msk.f32.mxu0 %vm345_vm5, %v14184_v31  ;;  %v14910_v31 = vld [vmem:[#allocation2 + $0x120] sm:$0xff] }
 0x328   : > { %11699 = vmatmul.mubr.msk.f32.gmra.mrb[8].mxu0 %vm345_vm5, %v14191_v20  ;;  %v14914_v20 = vld [vmem:[#allocation2 + $0x128] sm:$0xff] }
 0x329   : > { %11701 = vmatprep.mubr.msk.f32.mxu0 %vm345_vm5, %v14247_v56  ;;  %v10373_v56 = vld [vmem:[%s19032_s1 + $0x100] sm:$0xff] }
 0x32c   : > { %11702 = vmatmul.mubr.msk.f32.gmra.mrb[10].mxu0 %vm345_vm5, %v14254_v55  ;;  %v10374_v55 = vld [vmem:[%s19032_s1 + $0x108] sm:$0xff] }
 0x32d   : > { %11704 = vmatprep.mubr.msk.f32.mxu0 %vm345_vm5, %v14311_v14  ;;  %v12524_v14 = vpack.c.bf16 %v10374_v55, %v10373_v56  ;;  %v4971_v56 = vld [vmem:[%s19034_s3 + $0x50] sm:$0xff]  ;;  %v4972_v55 = vld [vmem:[%s19034_s3 + $0x58] sm:$0xff] }
 0x330   : > { %11705 = vmatmul.mubr.msk.f32.gmra.mrb[12].mxu0 %vm345_vm5, %v14318_v34 }
 0x331   : > { %11707 = vmatprep.mubr.msk.f32.mxu0 %vm345_vm5, %v14373_v11 }
 0x334   : > { %11708 = vmatmul.mubr.msk.f32.gmra.mrb[14].mxu0 %vm345_vm5, %v14380_v60 }
 0x335   : > { %11710 = vmatprep.mubr.msk.f32.mxu0 %vm345_vm5, %v14426_v54 }
 0x338   : > { %11711 = vmatmul.mubr.msk.f32.gmra.mrb[16].mxu0 %vm345_vm5, %v14433_v41 }
 0x339   : > { %11713 = vmatprep.mubr.msk.f32.mxu0 %vm345_vm5, %v14471_v1 }
 0x33c   : > { %11714 = vmatmul.mubr.msk.f32.gmra.mrb[18].mxu0 %vm345_vm5, %v14476_v53 }
 0x33d   : > { %11716 = vmatprep.mubr.msk.f32.mxu0 %vm345_vm5, %v14509_v38 }
 0x340   : > { %11717 = vmatmul.mubr.msk.f32.gmra.mrb[20].mxu0 %vm345_vm5, %v14514_v51 }
 0x341   : > { %11719 = vmatprep.mubr.msk.f32.mxu0 %vm345_vm5, %v14539_v17 }
 0x344   : > { %11720 = vmatmul.mubr.msk.f32.gmra.mrb[22].mxu0 %vm345_vm5, %v14544_v22 }
 0x345   : > { %11722 = vmatprep.mubr.msk.f32.mxu0 %vm345_vm5, %v14559_v24 }
 0x348   : > { %11723 = vmatmul.mubr.msk.f32.gmra.mrb[24].mxu0 %vm345_vm5, %v14564_v25 }
 0x349   : > { %11725 = vmatprep.mubr.msk.f32.mxu0 %vm345_vm5, %v14716_v40 }
 0x34c   : > { %11726 = vmatmul.mubr.msk.f32.gmra.mrb[26].mxu0 %vm345_vm5, %v14721_v49 }
 0x34d   : > { %11728 = vmatprep.mubr.msk.f32.mxu0 %vm345_vm5, %v14816_v59 }
 0x350   : > { %11729 = vmatmul.mubr.msk.f32.gmra.mrb[28].mxu0 %vm345_vm5, %v14820_v61 }
 0x351   : > { %11731 = vmatprep.mubr.msk.f32.mxu0 %vm345_vm5, %v14910_v31 }
 0x354   : > { %11732 = vmatmul.mubr.msk.f32.gmra.mrb[30].mxu0 %vm345_vm5, %v14914_v20 }
 0x355   : > { %11746 = vmatprep.mubr.msk.f32.mxu0 %vm345_vm5, %v14752_v36  ;;  %v12732_v36 = vpack.c.bf16 %v10591_v8, %v10590_v44  ;;  %v10630_v44 = vld [vmem:[%s19034_s3 + $0x3e0] sm:$0xff]  ;;  %v10631_v8 = vld [vmem:[%s19034_s3 + $0x3e8] sm:$0xff] }
 0x358   : > { %11747 = vmatmul.mubr.msk.f32.vlgmr.msra.gmra.mrb[0].mxu0 %vm345_vm5, %v14758_v9  ;;  %v10593_v9 = vld [vmem:[%s19034_s3 + $0x3b8] sm:$0xff] }
 0x359   : > { %12523 = vmatpush3.bf16.msra.mxu0 %v12520_v16  ;;  %11749 = vmatprep.mubr.msk.f32.mxu0 %vm345_vm5, %v14762_v7  ;;  %v4968_v16 = vld [vmem:[%s19034_s3 + $0x38] sm:$0xff] }
 0x35a   : > { %12525 = vmatprep.subr.bf16.mxu0 %v12524_v14 }
 0x35c   : > { %11750 = vmatmul.mubr.msk.f32.gmra.mrb[2].mxu0 %vm345_vm5, %v14768_v13 }
 0x35d   : > { %11752 = vmatprep.mubr.msk.f32.mxu0 %vm345_vm5, %v14856_v5  ;;  %12527 = vmatpush3.bf16.msra.mxu0 %v12524_v14  ;;  %v12564_v14 = vpack.c.bf16 %v4972_v55, %v4971_v56 }
 0x35e   : > { %12530 = vmatprep.subr.msk.bf16.mxu0 %vm13562_vm8, %v12528_v58 }
 0x360   : > { %11753 = vmatmul.mubr.msk.f32.gmra.mrb[4].mxu0 %vm345_vm5, %v14862_v37 }
 0x361   : > { %11755 = vmatprep.mubr.msk.f32.mxu0 %vm345_vm5, %v14950_v62  ;;  %12533 = vmatpush3.bf16.msk.msra.mxu0 %vm13562_vm8, %v12528_v58  ;;  %v12567_v58 = vpack.c.bf16 %v4974_v57, %v4973_v39 }
 0x362   : > { %12535 = vmatprep.subr.bf16.mxu0 %v12534_v29 }
 0x364   : > { %11756 = vmatmul.mubr.msk.f32.gmra.mrb[6].mxu0 %vm345_vm5, %v14956_v50 }
 0x365   : > { %11758 = vmatprep.mubr.msk.f32.mxu0 %vm345_vm5, %v14960_v4 }
 0x368   : > { %11759 = vmatmul.mubr.msk.f32.gmra.mrb[8].mxu0 %vm345_vm5, %v14964_v27 }
 0x369   : > { %11761 = vmatprep.mubr.msk.f32.mxu0 %vm345_vm5, %v14968_v26 }
 0x36c   : > { %11762 = vmatmul.mubr.msk.f32.gmra.mrb[10].mxu0 %vm345_vm5, %v14318_v34  ;;  %v15008_v34 = vld [vmem:[#allocation2 + $0x130] sm:$0xff] }
 0x36d   : > { %11764 = vmatprep.mubr.msk.f32.mxu0 %vm345_vm5, %v14373_v11  ;;  %v15014_v11 = vld [vmem:[#allocation2 + $0x138] sm:$0xff] }
 0x370   : > { %11765 = vmatmul.mubr.msk.f32.gmra.mrb[12].mxu0 %vm345_vm5, %v14380_v60  ;;  %v10412_v60 = vld [vmem:[%s19032_s1 + $0x130] sm:$0xff] }
 0x371   : > { %11767 = vmatprep.mubr.msk.f32.mxu0 %vm345_vm5, %v14426_v54  ;;  %v10413_v54 = vld [vmem:[%s19032_s1 + $0x138] sm:$0xff] }
 0x374   : > { %11768 = vmatmul.mubr.msk.f32.gmra.mrb[14].mxu0 %vm345_vm5, %v14433_v41  ;;  %v12538_v41 = vpack.c.bf16 %v10413_v54, %v10412_v60  ;;  %v4982_v60 = vld [vmem:[%s19034_s3 + $0xa8] sm:$0xff] }
 0x375   : > { %11770 = vmatprep.mubr.msk.f32.mxu0 %vm345_vm5, %v14471_v1 }
 0x378   : > { %11771 = vmatmul.mubr.msk.f32.gmra.mrb[16].mxu0 %vm345_vm5, %v14476_v53 }
 0x379   : > { %11773 = vmatprep.mubr.msk.f32.mxu0 %vm345_vm5, %v14509_v38 }
 0x37c   : > { %11774 = vmatmul.mubr.msk.f32.gmra.mrb[18].mxu0 %vm345_vm5, %v14514_v51 }
 0x37d   : > { %11776 = vmatprep.mubr.msk.f32.mxu0 %vm345_vm5, %v14539_v17 }
 0x380   : > { %11777 = vmatmul.mubr.msk.f32.gmra.mrb[20].mxu0 %vm345_vm5, %v14544_v22 }
 0x381   : > { %11779 = vmatprep.mubr.msk.f32.mxu0 %vm345_vm5, %v14559_v24 }
 0x384   : > { %11780 = vmatmul.mubr.msk.f32.gmra.mrb[22].mxu0 %vm345_vm5, %v14564_v25 }
 0x385   : > { %11782 = vmatprep.mubr.msk.f32.mxu0 %vm345_vm5, %v14716_v40 }
 0x388   : > { %11783 = vmatmul.mubr.msk.f32.gmra.mrb[24].mxu0 %vm345_vm5, %v14721_v49 }
 0x389   : > { %11785 = vmatprep.mubr.msk.f32.mxu0 %vm345_vm5, %v14816_v59 }
 0x38c   : > { %11786 = vmatmul.mubr.msk.f32.gmra.mrb[26].mxu0 %vm345_vm5, %v14820_v61 }
 0x38d   : > { %11788 = vmatprep.mubr.msk.f32.mxu0 %vm345_vm5, %v14910_v31 }
 0x390   : > { %11789 = vmatmul.mubr.msk.f32.gmra.mrb[28].mxu0 %vm345_vm5, %v14914_v20 }
 0x391   : > { %11791 = vmatprep.mubr.msk.f32.mxu0 %vm345_vm5, %v15008_v34 }
 0x394   : > { %11792 = vmatmul.mubr.msk.f32.gmra.mrb[30].mxu0 %vm345_vm5, %v15014_v11 }
 0x395   : > { %11806 = vmatprep.mubr.msk.f32.mxu0 %vm345_vm5, %v14762_v7  ;;  %v12736_v7 = vpack.c.bf16 %v10593_v9, %v10592_v45  ;;  %v10633_v45 = vld [vmem:[%s19034_s3 + $0x3f8] sm:$0xff]  ;;  %v10634_v9 = vld [vmem:[%s19034_s3 + $0x400] sm:$0xff] }
 0x398   : > { %11807 = vmatmul.mubr.msk.f32.vlgmr.msra.gmra.mrb[0].mxu0 %vm345_vm5, %v14768_v13  ;;  %v4961_v13 = vld [vmem:[%s19034_s3] sm:$0xff] }
 0x399   : > { %12537 = vmatpush3.bf16.msra.mxu0 %v12534_v29  ;;  %11809 = vmatprep.mubr.msk.f32.mxu0 %vm345_vm5, %v14856_v5  ;;  %v12570_v29 = vpack.c.bf16 %v4976_v30, %v4975_v28  ;;  %v15481_v28 = vpack.c.bf16 %v10639_v63, %v10638_v12 }
 0x39a   : > { %12539 = vmatprep.subr.bf16.mxu0 %v12538_v41 }
 0x39b   : > { %19100 = vst [vmem:[#allocation11_spill] sm:$0xff] %v15481_v28 }
 0x39c   : > { %11810 = vmatmul.mubr.msk.f32.gmra.mrb[2].mxu0 %vm345_vm5, %v14862_v37 }
 0x39d   : > { %11812 = vmatprep.mubr.msk.f32.mxu0 %vm345_vm5, %v14950_v62  ;;  %12541 = vmatpush3.bf16.msra.mxu0 %v12538_v41  ;;  %v4983_v41 = vld [vmem:[%s19034_s3 + $0xb0] sm:$0xff] }
 0x39e   : > { %12544 = vmatprep.subr.msk.bf16.mxu0 %vm13562_vm8, %v12542_v48  ;;  %v12582_v32 = vpack.c.bf16 %v4984_v33, %v4983_v41 }
 0x3a0   : > { %11813 = vmatmul.mubr.msk.f32.gmra.mrb[4].mxu0 %vm345_vm5, %v14956_v50 }
 0x3a1   : > { %11815 = vmatprep.mubr.msk.f32.mxu0 %vm345_vm5, %v14960_v4  ;;  %12547 = vmatpush3.bf16.msk.msra.mxu0 %vm13562_vm8, %v12542_v48  ;;  %v4985_v48 = vld [vmem:[%s19034_s3 + $0xc0] sm:$0xff]  ;;  %vm4143_vm8 = vcmask 517120  }
 0x3a2   : > { %4144 = vst.msk [vmem:[#allocation3 + $0x60] sm:$0x3] %vm4143_vm8, %v15154_v0  ;;  %4145 = vst.msk [vmem:[#allocation3 + $0x90] sm:$0x3] %vm4143_vm8, %v15154_v0 }
 0x3a3   : > { %4146 = vst.msk [vmem:[#allocation3 + $0xc0] sm:$0x3] %vm4143_vm8, %v15154_v0  ;;  %4147 = vst.msk [vmem:[#allocation3 + $0xf0] sm:$0x3] %vm4143_vm8, %v15154_v0 }
 0x3a4   : > { %11816 = vmatmul.mubr.msk.f32.gmra.mrb[6].mxu0 %vm345_vm5, %v14964_v27  ;;  %4148 = vst.msk [vmem:[#allocation3 + $0x120] sm:$0x3] %vm4143_vm8, %v15154_v0  ;;  %4149 = vst.msk [vmem:[#allocation3 + $0x150] sm:$0x3] %vm4143_vm8, %v15154_v0 }
 0x3a5   : > { %11818 = vmatprep.mubr.msk.f32.mxu0 %vm345_vm5, %v14968_v26  ;;  %4150 = vst.msk [vmem:[#allocation3 + $0x180] sm:$0x3] %vm4143_vm8, %v15154_v0  ;;  %4151 = vst.msk [vmem:[#allocation3 + $0x1b0] sm:$0x3] %vm4143_vm8, %v15154_v0 }
 0x3a6   : > { %4152 = vst.msk [vmem:[#allocation3 + $0x1e0] sm:$0x3] %vm4143_vm8, %v15154_v0  ;;  %4153 = vst.msk [vmem:[#allocation3 + $0x210] sm:$0x3] %vm4143_vm8, %v15154_v0 }
 0x3a7   : > { %4154 = vst.msk [vmem:[#allocation3 + $0x240] sm:$0x3] %vm4143_vm8, %v15154_v0  ;;  %4155 = vst.msk [vmem:[#allocation3 + $0x270] sm:$0x3] %vm4143_vm8, %v15154_v0 }
 0x3a8   : > { %11819 = vmatmul.mubr.msk.f32.gmra.mrb[8].mxu0 %vm345_vm5, %v3302_v52  ;;  %4156 = vst.msk [vmem:[#allocation3 + $0x2a0] sm:$0x3] %vm4143_vm8, %v15154_v0  ;;  %4157 = vst.msk [vmem:[#allocation3 + $0x2d0] sm:$0x3] %vm4143_vm8, %v15154_v0 }
 0x3a9   : > { %11821 = vmatprep.mubr.msk.f32.mxu0 %vm345_vm5, %v3303_v43  ;;  %4158 = vst.msk [vmem:[#allocation3 + $0x300] sm:$0x3] %vm4143_vm8, %v15154_v0  ;;  %4159 = vst.msk [vmem:[#allocation3 + $0x330] sm:$0x3] %vm4143_vm8, %v15154_v0 }
 0x3aa   : > { %4306 = vst.msk [vmem:[#allocation3 + $0x60] sm:$0x1] %vm4305_vm9, %v15154_v0  ;;  %4307 = vst.msk [vmem:[#allocation3 + $0x90] sm:$0x1] %vm4305_vm9, %v15154_v0 }
 0x3ab   : > { %4308 = vst.msk [vmem:[#allocation3 + $0xc0] sm:$0x1] %vm4305_vm9, %v15154_v0  ;;  %4309 = vst.msk [vmem:[#allocation3 + $0xf0] sm:$0x1] %vm4305_vm9, %v15154_v0 }
 0x3ac   : > { %11822 = vmatmul.mubr.msk.f32.gmra.mrb[10].mxu0 %vm345_vm5, %v3304_v46  ;;  %4310 = vst.msk [vmem:[#allocation3 + $0x120] sm:$0x1] %vm4305_vm9, %v15154_v0  ;;  %4311 = vst.msk [vmem:[#allocation3 + $0x150] sm:$0x1] %vm4305_vm9, %v15154_v0 }
 0x3ad   : > { %11824 = vmatprep.mubr.msk.f32.mxu0 %vm345_vm5, %v3305_v35  ;;  %4312 = vst.msk [vmem:[#allocation3 + $0x180] sm:$0x1] %vm4305_vm9, %v15154_v0  ;;  %4313 = vst.msk [vmem:[#allocation3 + $0x1b0] sm:$0x1] %vm4305_vm9, %v15154_v0 }
 0x3ae   : > { %4314 = vst.msk [vmem:[#allocation3 + $0x1e0] sm:$0x1] %vm4305_vm9, %v15154_v0  ;;  %4315 = vst.msk [vmem:[#allocation3 + $0x210] sm:$0x1] %vm4305_vm9, %v15154_v0 }
 0x3af   : > { %4316 = vst.msk [vmem:[#allocation3 + $0x240] sm:$0x1] %vm4305_vm9, %v15154_v0  ;;  %4317 = vst.msk [vmem:[#allocation3 + $0x270] sm:$0x1] %vm4305_vm9, %v15154_v0 }
 0x3b0   : > { %11825 = vmatmul.mubr.msk.f32.gmra.mrb[12].mxu0 %vm345_vm5, %v3306_v19  ;;  %4318 = vst.msk [vmem:[#allocation3 + $0x2a0] sm:$0x1] %vm4305_vm9, %v15154_v0  ;;  %4319 = vst.msk [vmem:[#allocation3 + $0x2d0] sm:$0x1] %vm4305_vm9, %v15154_v0 }
 0x3b1   : > { %11827 = vmatprep.mubr.msk.f32.mxu0 %vm345_vm5, %v14471_v1  ;;  %v3323_v1 = vld [vmem:[#allocation2 + $0x140] sm:$0xff]  ;;  %4320 = vst.msk [vmem:[#allocation3 + $0x300] sm:$0x1] %vm4305_vm9, %v15154_v0  ;;  %4321 = vst.msk [vmem:[#allocation3 + $0x330] sm:$0x1] %vm4305_vm9, %v15154_v0 }
 0x3b2   : > { %vm19113_vm8 = vmmov %vm19106_vm0 }
 0x3b4   : > { %11828 = vmatmul.mubr.msk.f32.gmra.mrb[14].mxu0 %vm345_vm5, %v14476_v53  ;;  %v3324_v53 = vld [vmem:[#allocation2 + $0x148] sm:$0xff] }
 0x3b5   : > { %11830 = vmatprep.mubr.msk.f32.mxu0 %vm345_vm5, %v14509_v38  ;;  %v3701_v38 = vld [vmem:[#allocation2 + $0xc0] sm:$0xff] }
 0x3b8   : > { %11831 = vmatmul.mubr.msk.f32.gmra.mrb[16].mxu0 %vm345_vm5, %v14514_v51  ;;  %v3702_v51 = vld [vmem:[#allocation2 + $0xc8] sm:$0xff] }
 0x3b9   : > { %11833 = vmatprep.mubr.msk.f32.mxu0 %vm345_vm5, %v14539_v17 }
 0x3bc   : > { %11834 = vmatmul.mubr.msk.f32.gmra.mrb[18].mxu0 %vm345_vm5, %v14544_v22 }
 0x3bd   : > { %11836 = vmatprep.mubr.msk.f32.mxu0 %vm345_vm5, %v14559_v24 }
 0x3c0   : > { %11837 = vmatmul.mubr.msk.f32.gmra.mrb[20].mxu0 %vm345_vm5, %v14564_v25 }
 0x3c1   : > { %11839 = vmatprep.mubr.msk.f32.mxu0 %vm345_vm5, %v14716_v40 }
 0x3c4   : > { %11840 = vmatmul.mubr.msk.f32.gmra.mrb[22].mxu0 %vm345_vm5, %v14721_v49 }
 0x3c5   : > { %11842 = vmatprep.mubr.msk.f32.mxu0 %vm345_vm5, %v14816_v59 }
 0x3c8   : > { %11843 = vmatmul.mubr.msk.f32.gmra.mrb[24].mxu0 %vm345_vm5, %v14820_v61 }
 0x3c9   : > { %11845 = vmatprep.mubr.msk.f32.mxu0 %vm345_vm5, %v14910_v31 }
 0x3cc   : > { %11846 = vmatmul.mubr.msk.f32.gmra.mrb[26].mxu0 %vm345_vm5, %v14914_v20 }
 0x3cd   : > { %11848 = vmatprep.mubr.msk.f32.mxu0 %vm345_vm5, %v15008_v34 }
 0x3d0   : > { %11849 = vmatmul.mubr.msk.f32.gmra.mrb[28].mxu0 %vm345_vm5, %v15014_v11 }
 0x3d1   : > { %11851 = vmatprep.mubr.msk.f32.mxu0 %vm345_vm5, %v3323_v1 }
 0x3d4   : > { %11852 = vmatmul.mubr.msk.f32.gmra.mrb[30].mxu0 %vm345_vm5, %v3324_v53 }
 0x3d5   : > { %11866 = vmatprep.mubr.msk.f32.mxu0 %vm345_vm5, %v14856_v5  ;;  %v12558_v5 = vpack.c.bf16 %v4968_v16, %v4967_v6  ;;  %v10642_v6 = vld [vmem:[%s19034_s3 + $0x440] sm:$0xff]  ;;  %v10643_v16 = vld [vmem:[%s19034_s3 + $0x448] sm:$0xff] }
 0x3d8   : > { %11867 = vmatmul.mubr.msk.f32.vlgmr.msra.gmra.mrb[0].mxu0 %vm345_vm5, %v14862_v37  ;;  %v4969_v37 = vld [vmem:[%s19034_s3 + $0x40] sm:$0xff] }
 0x3d9   : > { %11869 = vmatprep.mubr.msk.f32.mxu0 %vm345_vm5, %v14950_v62  ;;  %v4977_v62 = vld [vmem:[%s19034_s3 + $0x80] sm:$0xff] }
 0x3dc   : > { %11870 = vmatmul.mubr.msk.f32.gmra.mrb[2].mxu0 %vm345_vm5, %v14956_v50  ;;  %v4978_v50 = vld [vmem:[%s19034_s3 + $0x88] sm:$0xff] }
 0x3dd   : > { %11872 = vmatprep.mubr.msk.f32.mxu0 %vm345_vm5, %v14960_v4  ;;  %v12573_v4 = vpack.c.bf16 %v4978_v50, %v4977_v62  ;;  %v10644_v62 = vld [vmem:[%s19034_s3 + $0x450] sm:$0xff]  ;;  %v10645_v50 = vld [vmem:[%s19034_s3 + $0x458] sm:$0xff] }
 0x3e0   : > { %11873 = vmatmul.mubr.msk.f32.gmra.mrb[4].mxu0 %vm345_vm5, %v14964_v27  ;;  %v4979_v27 = vld [vmem:[%s19034_s3 + $0x90] sm:$0xff] }
 0x3e1   : > { %11875 = vmatprep.mubr.msk.f32.mxu0 %vm345_vm5, %v14968_v26  ;;  %v4980_v26 = vld [vmem:[%s19034_s3 + $0x98] sm:$0xff] }
 0x3e4   : > { %11876 = vmatmul.mubr.msk.f32.gmra.mrb[6].mxu0 %vm345_vm5, %v3302_v52  ;;  %v4986_v52 = vld [vmem:[%s19034_s3 + $0xc8] sm:$0xff] }
 0x3e5   : > { %11878 = vmatprep.mubr.msk.f32.mxu0 %vm345_vm5, %v3303_v43  ;;  %v12585_v43 = vpack.c.bf16 %v4986_v52, %v4985_v48  ;;  %v15506_v48 = vpack.c.bf16 %v10645_v50, %v10644_v62 }
 0x3e7   : > { %19103 = vst [vmem:[#allocation14_spill] sm:$0xff] %v15506_v48 }
 0x3e8   : > { %11879 = vmatmul.mubr.msk.f32.gmra.mrb[8].mxu0 %vm345_vm5, %v3304_v46  ;;  %v4987_v46 = vld [vmem:[%s19034_s3 + $0xd0] sm:$0xff] }
 0x3e9   : > { %11881 = vmatprep.mubr.msk.f32.mxu0 %vm345_vm5, %v3305_v35  ;;  %v4988_v35 = vld [vmem:[%s19034_s3 + $0xd8] sm:$0xff] }
 0x3ec   : > { %11882 = vmatmul.mubr.msk.f32.gmra.mrb[10].mxu0 %vm345_vm5, %v3306_v19  ;;  %v12588_v19 = vpack.c.bf16 %v4988_v35, %v4987_v46 }
 0x3ed   : > { %11884 = vmatprep.mubr.msk.f32.mxu0 %vm345_vm5, %v3701_v38 }
 0x3f0   : > { %11885 = vmatmul.mubr.msk.f32.gmra.mrb[12].mxu0 %vm345_vm5, %v3702_v51  ;;  %v4991_v51 = vld [vmem:[%s19034_s3 + $0xf0] sm:$0xff] }
 0x3f1   : > { %11887 = vmatprep.mubr.msk.f32.mxu0 %vm345_vm5, %v3703_v10  ;;  %v4992_v10 = vld [vmem:[%s19034_s3 + $0xf8] sm:$0xff] }
 0x3f4   : > { %11888 = vmatmul.mubr.msk.f32.gmra.mrb[14].mxu0 %vm345_vm5, %v3704_v23  ;;  %v12594_v23 = vpack.c.bf16 %v4992_v10, %v4991_v51 }
 0x3f5   : > { %11890 = vmatprep.mubr.msk.f32.mxu0 %vm345_vm5, %v14539_v17  ;;  %v3719_v17 = vld [vmem:[#allocation2 + $0x150] sm:$0xff] }
 0x3f8   : > { %11891 = vmatmul.mubr.msk.f32.gmra.mrb[16].mxu0 %vm345_vm5, %v14544_v22  ;;  %v3720_v22 = vld [vmem:[#allocation2 + $0x158] sm:$0xff] }
 0x3f9   : > { %11893 = vmatprep.mubr.msk.f32.mxu0 %vm345_vm5, %v14559_v24  ;;  %v10586_v24 = vld [vmem:[%s19034_s3 + $0x380] sm:$0xff] }
 0x3fc   : > { %11894 = vmatmul.mubr.msk.f32.gmra.mrb[18].mxu0 %vm345_vm5, %v14564_v25  ;;  %v10587_v25 = vld [vmem:[%s19034_s3 + $0x388] sm:$0xff] }
 0x3fd   : > { %11896 = vmatprep.mubr.msk.f32.mxu0 %vm345_vm5, %v14716_v40  ;;  %v12724_v40 = vpack.c.bf16 %v10587_v25, %v10586_v24  ;;  %v15406_v25 = vld [vmem:[%s19033_s2] ss:$0 sm:$0xff] }
 0x3ff   : > { %12725 = vmatprep.subr.bf16.mxu0 %v12724_v40 }
 0x400   : > { %11897 = vmatmul.mubr.msk.f32.gmra.mrb[20].mxu0 %vm345_vm5, %v14721_v49  ;;  %v10588_v49 = vld [vmem:[%s19034_s3 + $0x390] sm:$0xff] }
 0x401   : > { %11899 = vmatprep.mubr.msk.f32.mxu0 %vm345_vm5, %v14816_v59  ;;  %12727 = vmatpush3.bf16.msra.mxu0 %v12724_v40  ;;  %v12728_v42 = vpack.c.bf16 %v10589_v18, %v10588_v49  ;;  %v4962_v59 = vld [vmem:[%s19034_s3 + $0x8] sm:$0xff]  ;;  %v10626_v40 = vld [vmem:[%s19034_s3 + $0x3c0] sm:$0xff]  ;;  %v10628_v18 = vld [vmem:[%s19034_s3 + $0x3d0] sm:$0xff] }
 0x402   : > { %v10627_v49 = vld [vmem:[%s19034_s3 + $0x3c8] sm:$0xff] }
 0x403   : > { %12729 = vmatprep.subr.bf16.mxu0 %v12728_v42 }
 0x404   : > { %11900 = vmatmul.mubr.msk.f32.gmra.mrb[22].mxu0 %vm345_vm5, %v14820_v61  ;;  %v12549_v61 = vpack.c.bf16 %v4962_v59, %v4961_v13  ;;  %v10636_v13 = vld [vmem:[%s19034_s3 + $0x410] sm:$0xff]  ;;  %v10637_v59 = vld [vmem:[%s19034_s3 + $0x418] sm:$0xff] }
 0x405   : > { %11902 = vmatprep.mubr.msk.f32.mxu0 %vm345_vm5, %v14910_v31  ;;  %12731 = vmatpush3.bf16.msra.mxu0 %v12728_v42  ;;  %v4970_v31 = vld [vmem:[%s19034_s3 + $0x48] sm:$0xff]  ;;  %v10629_v42 = vld [vmem:[%s19034_s3 + $0x3d8] sm:$0xff]  ;;  %v15479_v39 = vpack.c.bf16 %v10637_v59, %v10636_v13  ;;  %v10646_v59 = vld [vmem:[%s19034_s3 + $0x460] sm:$0xff] }
 0x406   : > { %12733 = vmatprep.subr.bf16.mxu0 %v12732_v36  ;;  %12550 = vmatpush1.bf16.msra.mxu1 %v12549_v61 }
 0x407   : > { %12551 = vmatprep.subr.bf16.mxu1 %v19055_v15  ;;  %19099 = vst [vmem:[#allocation10_spill] sm:$0xff] %v15479_v39 }
 0x408   : > { %11903 = vmatmul.mubr.msk.f32.gmra.mrb[24].mxu0 %vm345_vm5, %v14914_v20  ;;  %v12561_v20 = vpack.c.bf16 %v4970_v31, %v4969_v37  ;;  %v15467_v37 = vpack.c.bf16 %v10627_v49, %v10626_v40  ;;  %v15469_v31 = vpack.c.bf16 %v10629_v42, %v10628_v18 }
 0x409   : > { %11905 = vmatprep.mubr.msk.f32.mxu0 %vm345_vm5, %v15008_v34  ;;  %12735 = vmatpush3.bf16.msra.mxu0 %v12732_v36  ;;  %v12576_v34 = vpack.c.bf16 %v4980_v26, %v4979_v27  ;;  %v10632_v36 = vld [vmem:[%s19034_s3 + $0x3f0] sm:$0xff] }
 0x40a   : > { %12737 = vmatprep.subr.bf16.mxu0 %v12736_v7  ;;  %12553 = vmatpush1.bf16.msra.mxu1 %v12552_v2  ;;  %v10640_v2 = vld [vmem:[%s19034_s3 + $0x430] sm:$0xff]  ;;  %19094 = vst [vmem:[#allocation5_spill] sm:$0xff] %v15467_v37  ;;  %19095 = vst [vmem:[#allocation6_spill] sm:$0xff] %v15469_v31  ;;  %v15475_v55 = vpack.c.bf16 %v10633_v45, %v10632_v36 }
 0x40b   : > { %12554 = vmatprep.subr.bf16.mxu1 %v19055_v15 }
 0x40c   : > { %11906 = vmatmul.mubr.msk.f32.gmra.mrb[26].mxu0 %vm345_vm5, %v15014_v11  ;;  %v4981_v11 = vld [vmem:[%s19034_s3 + $0xa0] sm:$0xff]  ;;  %19097 = vst [vmem:[#allocation8_spill] sm:$0xff] %v15475_v55 }
 0x40d   : > { %11908 = vmatprep.mubr.msk.f32.mxu0 %vm345_vm5, %v3323_v1  ;;  %12739 = vmatpush3.bf16.msra.mxu0 %v12736_v7  ;;  %v12579_v54 = vpack.c.bf16 %v4982_v60, %v4981_v11  ;;  %v4989_v1 = vld [vmem:[%s19034_s3 + $0xe0] sm:$0xff]  ;;  %v10635_v7 = vld [vmem:[%s19034_s3 + $0x408] sm:$0xff] }
 0x40e   : > { %12740 = vmatprep.subr.bf16.mxu0 %v19055_v15  ;;  %12556 = vmatpush1.bf16.msra.mxu1 %v12555_v3  ;;  %v10641_v3 = vld [vmem:[%s19034_s3 + $0x438] sm:$0xff] }
 0x40f   : > { %12557 = vmatprep.subr.bf16.mxu1 %v19055_v15  ;;  %v15483_v30 = vpack.c.bf16 %v10641_v3, %v10640_v2 }
 0x410   : > { %11909 = vmatmul.mubr.msk.f32.gmra.mrb[28].mxu0 %vm345_vm5, %v3324_v53  ;;  %v4990_v53 = vld [vmem:[%s19034_s3 + $0xe8] sm:$0xff] }
 0x411   : > { %11911 = vmatprep.mubr.msk.f32.mxu0 %vm345_vm5, %v3719_v17  ;;  %v12591_v38 = vpack.c.bf16 %v4990_v53, %v4989_v1  ;;  %v4993_v17 = vld [vmem:[%s19034_s3 + $0x100] sm:$0xff]  ;;  %19101 = vst [vmem:[#allocation12_spill] sm:$0xff] %v15483_v30 }
 0x412   : > { %12559 = vmatpush1.bf16.msra.mxu1 %v12558_v5 }
 0x413   : > { %12560 = vmatprep.subr.bf16.mxu1 %v19055_v15 }
 0x414   : > { %11912 = vmatmul.mubr.msk.f32.gmra.mrb[30].mxu0 %vm345_vm5, %v3720_v22  ;;  %vm4118_vm5 = vcmask 523264   ;;  %v4994_v22 = vld [vmem:[%s19034_s3 + $0x108] sm:$0xff] }
 0x415   : > { %4119 = vst.msk [vmem:[#allocation3 + $0x10] sm:$0xff] %vm4118_vm5, %v15154_v0  ;;  %4122 = vst.msk [vmem:[#allocation3 + $0x28] sm:$0xff] %vm4118_vm5, %v15154_v0  ;;  %v12596_v24 = vpack.c.bf16 %v4994_v22, %v4993_v17 }
 0x416   : > { %4125 = vst.msk [vmem:[#allocation3 + $0x40] sm:$0xff] %vm4118_vm5, %v15154_v0  ;;  %4128 = vst.msk [vmem:[#allocation3 + $0x58] sm:$0xff] %vm4118_vm5, %v15154_v0  ;;  %12562 = vmatpush1.bf16.msra.mxu1 %v12561_v20  ;;  %v15471_v20 = vpack.c.bf16 %v10631_v8, %v10630_v44 }
 0x417   : > { %4132 = vst.msk [vmem:[#allocation3 + $0x370] sm:$0xff] %vm4118_vm5, %v15154_v0  ;;  %4135 = vst.msk [vmem:[#allocation3 + $0x388] sm:$0xff] %vm4118_vm5, %v15154_v0  ;;  %12563 = vmatprep.subr.bf16.mxu1 %v19055_v15 }
 0x418   : > { %4138 = vst.msk [vmem:[#allocation3 + $0x3a0] sm:$0xff] %vm4118_vm5, %v15154_v0  ;;  %4141 = vst.msk [vmem:[#allocation3 + $0x3b8] sm:$0xff] %vm4118_vm5, %v15154_v0 }
 0x419   : > { %19096 = vst [vmem:[#allocation7_spill] sm:$0xff] %v15471_v20 }
 0x41a   : > { %12565 = vmatpush1.bf16.msra.mxu1 %v12564_v14  ;;  %v15477_v14 = vpack.c.bf16 %v10635_v7, %v10634_v9 }
 0x41b   : > { %12566 = vmatprep.subr.bf16.mxu1 %v19055_v15 }
 0x41c   : > { %19098 = vst [vmem:[#allocation9_spill] sm:$0xff] %v15477_v14 }
 0x41e   : > { %12568 = vmatpush1.bf16.msra.mxu1 %v12567_v58 }
 0x41f   : > { %12569 = vmatprep.subr.bf16.mxu1 %v19055_v15 }
 0x422   : > { %12571 = vmatpush1.bf16.msra.mxu1 %v12570_v29  ;;  %v15485_v29 = vpack.c.bf16 %v10643_v16, %v10642_v6 }
 0x423   : > { %12572 = vmatprep.subr.bf16.mxu1 %v19055_v15 }
 0x424   : > { %19102 = vst [vmem:[#allocation13_spill] sm:$0xff] %v15485_v29 }
 0x426   : > { %12574 = vmatpush1.bf16.msra.mxu1 %v12573_v4 }
 0x427   : > { %12575 = vmatprep.subr.bf16.mxu1 %v19055_v15 }
 0x42a   : > { %12577 = vmatpush1.bf16.msra.mxu1 %v12576_v34 }
 0x42b   : > { %12578 = vmatprep.subr.bf16.mxu1 %v19055_v15 }
 0x42e   : > { %12580 = vmatpush1.bf16.msra.mxu1 %v12579_v54 }
 0x42f   : > { %12581 = vmatprep.subr.bf16.mxu1 %v19055_v15 }
 0x432   : > { %12583 = vmatpush1.bf16.msra.mxu1 %v12582_v32 }
 0x433   : > { %12584 = vmatprep.subr.bf16.mxu1 %v19055_v15 }
 0x436   : > { %12586 = vmatpush1.bf16.msra.mxu1 %v12585_v43 }
 0x437   : > { %12587 = vmatprep.subr.bf16.mxu1 %v19055_v15 }
 0x43a   : > { %12589 = vmatpush1.bf16.msra.mxu1 %v12588_v19 }
 0x43b   : > { %12590 = vmatprep.subr.bf16.mxu1 %v19055_v15 }
 0x43e   : > { %12592 = vmatpush1.bf16.msra.mxu1 %v12591_v38 }
 0x43f   : > { %12593 = vmatprep.subr.bf16.mxu1 %v19055_v15 }
 0x442   : > { %12595 = vmatpush1.bf16.msra.mxu1 %v12594_v23 }
 0x443   : > { %12597 = vmatprep.subr.bf16.mxu1 %v12596_v24 }
 0x445   : > { %5162 = vmatmul.mubr.f32.vlgmr.msra.gmra.mrb[0].mxu1 %v15154_v0 }
 0x446   : > { %12599 = vmatpush3.bf16.msra.mxu1 %v12596_v24  ;;  %5166 = vmatprep.mubr.f32.mxu1 %v15154_v0 }
 0x449   : > { %5167 = vmatmul.mubr.f32.gmra.mrb[2].mxu1 %v15154_v0 }
 0x44a   : > { %5171 = vmatprep.mubr.f32.mxu1 %v15154_v0 }
 0x44d   : > { %5172 = vmatmul.mubr.f32.gmra.mrb[4].mxu1 %v15154_v0 }
 0x44e   : > { %5176 = vmatprep.mubr.f32.mxu1 %v15154_v0 }
 0x451   : > { %5177 = vmatmul.mubr.f32.gmra.mrb[6].mxu1 %v15154_v0 }
 0x4ab   : > { %v11868_v61 = vpop.f32.mrb[0].mxu0 }
 0x4ac   : > { %v12972_v21 = vadd.f32 %v11868_v61, %v15406_v25  ;;  %v3893_v47 = vpop.f32.mrb[1].mxu0  ;;  %v10647_v61 = vld [vmem:[%s19034_s3 + $0x468] sm:$0xff] }
 0x4ad   : > { %v12973_v5 = vadd.f32 %v15406_v25, %v3893_v47 }
 0x4ae   : > { %v15473_v56 = vmax.f32 %v12972_v21, 0.0 }
 0x4af   : > { %v4084_v57 = vmax.f32 %v12973_v5, 0.0  ;;  %v11871_v58 = vpop.f32.mrb[2].mxu0 }
 0x4b0   : > { %v4746_v4 = vrot.slane %v15473_v56, 2  ;;  %4502 = vst.msk [vmem:[#allocation3 + $0x80] sm:$0xff] %vm4118_vm5, %v15473_v56  ;;  %v12974_v27 = vadd.f32 %v11871_v58, %v15406_v25  ;;  %v3903_v26 = vpop.f32.mrb[3].mxu0  ;;  %v4551_v34 = vrot.slane %v15473_v56, 1  ;;  %v4324_v11 = vrot.slane %v15473_v56, 7 }
 0x4b1   : > { %v4745_v60 = vrot.slane %v4084_v57, 2  ;;  %4501 = vst.msk [vmem:[#allocation3 + $0x68] sm:$0xff] %vm4118_vm5, %v4084_v57  ;;  %v12975_v54 = vadd.f32 %v15406_v25, %v3903_v26  ;;  %v4323_v41 = vrot.slane %v4084_v57, 7  ;;  %v4550_v33 = vrot.slane %v4084_v57, 1 }
 0x4b2   : > { %4533 = vst.msk [vmem:[#allocation3 + $0x87] sm:$0x1] %vm4305_vm9, %v15154_v0  ;;  %v15504_v32 = vmax.f32 %v12974_v27, 0.0  ;;  %v4192_v52 = vrot.slane %v4084_v57, 6  ;;  %v4193_v43 = vrot.slane %v15473_v56, 6  ;;  %v15566_v57 = vpack.c.bf16 %v10647_v61, %v10646_v59 }
 0x4b3   : > { %4827 = vst.msk [vmem:[#allocation3 + $0x88] sm:$0x3f] %vm4826_vm10, %v4746_v4  ;;  %v4747_v46 = vsel %vm4744_vm11, %v4745_v60, %v4746_v4  ;;  %v4086_v35 = vmax.f32 %v12975_v54, 0.0  ;;  %4371 = vrot.lane.b32.xlu0 %v4323_v41, %s13336_s18  ;;  %v11874_v19 = vpop.f32.mrb[4].mxu0  ;;  %v4552_v1 = vsel %vm4549_vm12, %v4550_v33, %v4551_v34  ;;  %v4325_v53 = vsel %vm4322_vm13, %v4323_v41, %v4324_v11 }
 0x4b4   : > { %4825 = vst.msk [vmem:[#allocation3 + $0x70] sm:$0xff] %vm4118_vm5, %v4747_v46  ;;  %v4749_v38 = vrot.slane %v15504_v32, 2  ;;  %4504 = vst.msk [vmem:[#allocation3 + $0xb0] sm:$0xff] %vm4118_vm5, %v15504_v32  ;;  %v12976_v51 = vadd.f32 %v11874_v19, %v15406_v25  ;;  %4598 = vrot.lane.b32.xlu1 %v4552_v1, %s13336_s18  ;;  %v3913_v10 = vpop.f32.mrb[5].mxu0  ;;  %v4554_v23 = vrot.slane %v15504_v32, 1  ;;  %v4327_v17 = vrot.slane %v15504_v32, 7 }
 0x4b5   : > { %4273 = vst.msk [vmem:[#allocation3 + $0x60] sm:$0xfc] %vm4272_vm14, %v4192_v52  ;;  %v4748_v22 = vrot.slane %v4086_v35, 2  ;;  %v12977_v24 = vadd.f32 %v15406_v25, %v3913_v10  ;;  %v4326_v40 = vrot.slane %v4086_v35, 7  ;;  %v4553_v49 = vrot.slane %v4086_v35, 1  ;;  %19105 = vst [vmem:[#allocation15_spill] sm:$0xff] %v15566_v57 }
 0x4b6   : > { %4503 = vst.msk [vmem:[#allocation3 + $0x98] sm:$0xff] %vm4118_vm5, %v4086_v35  ;;  %v15527_v18 = vmax.f32 %v12976_v51, 0.0  ;;  %v4194_v42 = vsel %vm19104_vm15, %v4192_v52, %v4193_v43  ;;  %v4195_v44 = vrot.slane %v4086_v35, 6  ;;  %v4196_v8 = vrot.slane %v15504_v32, 6  ;;  %vm19114_vm15 = vmmov %vm19106_vm0 }
 0x4b7   : > { %4534 = vst.msk [vmem:[#allocation3 + $0xb7] sm:$0x1] %vm4305_vm9, %v15154_v0  ;;  %v4750_v36 = vsel %vm4744_vm11, %v4748_v22, %v4749_v38  ;;  %v15532_v45 = vmax.f32 %v12977_v24, 0.0  ;;  %4373 = vrot.lane.b32.xlu0 %v4325_v53, %s13336_s18  ;;  %v11877_v9 = vpop.f32.mrb[6].mxu0  ;;  %v4555_v7 = vsel %vm4549_vm12, %v4553_v49, %v4554_v23  ;;  %v4328_v13 = vsel %vm4322_vm13, %v4326_v40, %v4327_v17 }
 0x4b8   : > { %4829 = vst.msk [vmem:[#allocation3 + $0xb8] sm:$0x3f] %vm4826_vm10, %v4749_v38  ;;  %v4752_v12 = vrot.slane %v15527_v18, 2  ;;  %v12978_v63 = vadd.f32 %v11877_v9, %v15406_v25  ;;  %4600 = vrot.lane.b32.xlu1 %v4551_v34, %s13336_s18  ;;  %v3923_v2 = vpop.f32.mrb[7].mxu0  ;;  %v4557_v21 = vrot.slane %v15527_v18, 1  ;;  %v4330_v47 = vrot.slane %v15527_v18, 7 }
 0x4b9   : > { %4274 = vst.msk [vmem:[#allocation3 + $0x78] sm:$0xff] %vm4118_vm5, %v4194_v42  ;;  %4828 = vst.msk [vmem:[#allocation3 + $0xa0] sm:$0xff] %vm4118_vm5, %v4750_v36  ;;  %v4751_v3 = vrot.slane %v15532_v45, 2  ;;  %v12979_v6 = vadd.f32 %v15406_v25, %v3923_v2  ;;  %v4329_v16 = vrot.slane %v15532_v45, 7  ;;  %v4556_v5 = vrot.slane %v15532_v45, 1 }
 0x4ba   : > { %4506 = vst.msk [vmem:[#allocation3 + $0xe0] sm:$0xff] %vm4118_vm5, %v15527_v18  ;;  %4505 = vst.msk [vmem:[#allocation3 + $0xc8] sm:$0xff] %vm4118_vm5, %v15532_v45  ;;  %v15564_v56 = vmax.f32 %v12978_v63, 0.0  ;;  %v4197_v58 = vsel %vm19106_vm0, %v4195_v44, %v4196_v8  ;;  %v4198_v62 = vrot.slane %v15532_v45, 6  ;;  %v6300_v33 = vld [vmem:[#allocation3 + $0x88] sm:$0xff]  ;;  %v4199_v38 = vrot.slane %v15527_v18, 6 }
 0x4bb   : > { %4275 = vst.msk [vmem:[#allocation3 + $0x90] sm:$0xfc] %vm4272_vm14, %v4195_v44  ;;  %v4753_v50 = vsel %vm4744_vm11, %v4751_v3, %v4752_v12  ;;  %v15571_v4 = vmax.f32 %v12979_v6, 0.0  ;;  %4375 = vrot.lane.b32.xlu0 %v4326_v40, %s13336_s18  ;;  %v11880_v27 = vpop.f32.mrb[8].mxu0  ;;  %v6297_v26 = vld [vmem:[#allocation3 + $0x70] sm:$0xff]  ;;  %v15577_v34 = vsel %vm4549_vm12, %v4556_v5, %v4557_v21  ;;  %v15582_v11 = vsel %vm4322_vm13, %v4329_v16, %v4330_v47  ;;  %v4996_v8 = vld [vmem:[%s19034_s3 + $0x118] sm:$0xff] }
 0x4bc   : > { %4535 = vst.msk [vmem:[#allocation3 + $0xe7] sm:$0x1] %vm4305_vm9, %v15154_v0  ;;  %v4755_v60 = vrot.slane %v15564_v56, 2  ;;  %v12980_v54 = vadd.f32 %v11880_v27, %v15406_v25  ;;  %12058 = vmatprep.mubr.msk.f32.mxu0 %vm4118_vm5, %v6297_v26  ;;  %4602 = vrot.lane.b32.xlu1 %v4555_v7, %s13336_s18  ;;  %v3933_v41 = vpop.f32.mrb[9].mxu0  ;;  %v4560_v52 = vrot.slane %v15564_v56, 1  ;;  %v4333_v43 = vrot.slane %v15564_v56, 7 }
 0x4bd   : > { %4831 = vst.msk [vmem:[#allocation3 + $0xe8] sm:$0x3f] %vm4826_vm10, %v4752_v12  ;;  %v4754_v46 = vrot.slane %v15571_v4, 2  ;;  %v12981_v35 = vadd.f32 %v15406_v25, %v3933_v41  ;;  %12059 = vmatmul.mubr.msk.f32.vlgmr.msra.gmra.mrb[32].mxu0 %vm4118_vm5, %v6300_v33  ;;  %v4332_v19 = vrot.slane %v15571_v4, 7  ;;  %v4559_v1 = vrot.slane %v15571_v4, 1  ;;  %v4995_v44 = vld [vmem:[%s19034_s3 + $0x110] sm:$0xff] }
 0x4be   : > { %4276 = vst.msk [vmem:[#allocation3 + $0xa8] sm:$0xff] %vm4118_vm5, %v4197_v58  ;;  %4830 = vst.msk [vmem:[#allocation3 + $0xd0] sm:$0xff] %vm4118_vm5, %v4753_v50  ;;  %v15607_v53 = vmax.f32 %v12980_v54, 0.0  ;;  %12742 = vmatpush1.bf16.msra.mxu0 %v15467_v37  ;;  %v4201_v51 = vrot.slane %v15571_v4, 6  ;;  %v4202_v10 = vrot.slane %v15564_v56, 6  ;;  %v4200_v47 = vsel %vm19107_vm1, %v4198_v62, %v4199_v38 }
 0x4bf   : > { %4508 = vst.msk [vmem:[#allocation3 + $0x110] sm:$0xff] %vm4118_vm5, %v15564_v56  ;;  %4507 = vst.msk [vmem:[#allocation3 + $0xf8] sm:$0xff] %vm4118_vm5, %v15571_v4  ;;  %v4756_v17 = vsel %vm4744_vm11, %v4754_v46, %v4755_v60  ;;  %v15614_v22 = vmax.f32 %v12981_v35, 0.0  ;;  %4377 = vrot.lane.b32.xlu0 %v4328_v13, %s13336_s18  ;;  %v11883_v24 = vpop.f32.mrb[10].mxu0  ;;  %v15620_v49 = vsel %vm4549_vm12, %v4559_v1, %v4560_v52  ;;  %12743 = vmatprep.subr.bf16.mxu0 %v19055_v15  ;;  %v6306_v13 = vld [vmem:[#allocation3 + $0xb8] sm:$0xff] }
 0x4c0   : > { %4277 = vst.msk [vmem:[#allocation3 + $0xc0] sm:$0xfc] %vm4272_vm14, %v4198_v62  ;;  %v6303_v40 = vld [vmem:[#allocation3 + $0xa0] sm:$0xff]  ;;  %v15625_v42 = vsel %vm4322_vm13, %v4332_v19, %v4333_v43  ;;  %v4758_v36 = vrot.slane %v15607_v53, 2  ;;  %v12982_v9 = vadd.f32 %v11883_v24, %v15406_v25  ;;  %4604 = vrot.lane.b32.xlu1 %v4554_v23, %s13336_s18  ;;  %v3943_v7 = vpop.f32.mrb[11].mxu0  ;;  %v4563_v59 = vrot.slane %v15607_v53, 1  ;;  %vm19116_vm1 = vmmov %vm19106_vm0 }
 0x4c1   : > { %4536 = vst.msk [vmem:[#allocation3 + $0x117] sm:$0x1] %vm4305_vm9, %v15154_v0  ;;  %12061 = vmatprep.mubr.msk.f32.mxu0 %vm4118_vm5, %v6303_v40  ;;  %v4336_v61 = vrot.slane %v15607_v53, 7  ;;  %v4757_v12 = vrot.slane %v15614_v22, 2  ;;  %v12983_v63 = vadd.f32 %v15406_v25, %v3943_v7  ;;  %v4335_v32 = vrot.slane %v15614_v22, 7 }
 0x4c2   : > { %4833 = vst.msk [vmem:[#allocation3 + $0x118] sm:$0x3f] %vm4826_vm10, %v4755_v60  ;;  %12062 = vmatmul.mubr.msk.f32.gmra.mrb[34].mxu0 %vm4118_vm5, %v6306_v13  ;;  %v4562_v23 = vrot.slane %v15614_v22, 1  ;;  %4835 = vst.msk [vmem:[#allocation3 + $0x148] sm:$0x3f] %vm4826_vm10, %v4758_v36  ;;  %v15656_v2 = vmax.f32 %v12982_v9, 0.0  ;;  %v12600_v3 = vpack.c.bf16 %v4996_v8, %v4995_v44  ;;  %v4203_v6 = vsel %vm19108_vm2, %v4201_v51, %v4202_v10 }
 0x4c3   : > { %4832 = vst.msk [vmem:[#allocation3 + $0x100] sm:$0xff] %vm4118_vm5, %v4756_v17  ;;  %4510 = vst.msk [vmem:[#allocation3 + $0x140] sm:$0xff] %vm4118_vm5, %v15607_v53  ;;  %12745 = vmatpush1.bf16.msra.mxu0 %v15469_v31  ;;  %v4759_v5 = vsel %vm4744_vm11, %v4757_v12, %v4758_v36  ;;  %v15664_v58 = vmax.f32 %v12983_v63, 0.0  ;;  %4379 = vrot.lane.b32.xlu0 %v4329_v16, %s13336_s18  ;;  %v11886_v50 = vpop.f32.mrb[12].mxu0  ;;  %v15677_v62 = vsel %vm4322_vm13, %v4335_v32, %v4336_v61  ;;  %v16660_v31 = vld [vmem:[#allocation3 + $0x58] sm:$0xff] }
 0x4c4   : > { %4279 = vst.msk [vmem:[#allocation3 + $0xf0] sm:$0xfc] %vm4272_vm14, %v4201_v51  ;;  %v15672_v26 = vsel %vm4549_vm12, %v4562_v23, %v4563_v59  ;;  %12746 = vmatprep.subr.bf16.mxu0 %v19055_v15  ;;  %v4761_v45 = vrot.slane %v15656_v2, 2  ;;  %v12984_v16 = vadd.f32 %v11886_v50, %v15406_v25  ;;  %4606 = vrot.lane.b32.xlu1 %v15577_v34, %s13336_s18  ;;  %v3953_v60 = vpop.f32.mrb[13].mxu0  ;;  %v6312_v54 = vld [vmem:[#allocation3 + $0xe8] sm:$0xff]  ;;  %v4566_v41 = vrot.slane %v15656_v2, 1  ;;  %vm19118_vm2 = vmmov %vm19106_vm0 }
 0x4c5   : > { %4509 = vst.msk [vmem:[#allocation3 + $0x128] sm:$0xff] %vm4118_vm5, %v15614_v22  ;;  %v6309_v27 = vld [vmem:[#allocation3 + $0xd0] sm:$0xff]  ;;  %4278 = vst.msk [vmem:[#allocation3 + $0xd8] sm:$0xff] %vm4118_vm5, %v4200_v47  ;;  %v4339_v33 = vrot.slane %v15656_v2, 7  ;;  %v4760_v43 = vrot.slane %v15664_v58, 2  ;;  %v12985_v46 = vadd.f32 %v15406_v25, %v3953_v60  ;;  %v4338_v35 = vrot.slane %v15664_v58, 7  ;;  %12601 = vmatprep.subr.bf16.mxu1 %v12600_v3 }
 0x4c6   : > { %4537 = vst.msk [vmem:[#allocation3 + $0x147] sm:$0x1] %vm4305_vm9, %v15154_v0  ;;  %12064 = vmatprep.mubr.msk.f32.mxu0 %vm4118_vm5, %v6309_v27  ;;  %v4565_v1 = vrot.slane %v15664_v58, 1  ;;  %v15702_v34 = vmax.f32 %v12984_v16, 0.0  ;;  %12603 = vmatpush3.bf16.msra.mxu1 %v12600_v3  ;;  %v4204_v38 = vrot.slane %v15614_v22, 6  ;;  %v4205_v51 = vrot.slane %v15607_v53, 6 }
 0x4c7   : > { %4280 = vst.msk [vmem:[#allocation3 + $0x108] sm:$0xff] %vm4118_vm5, %v4203_v6  ;;  %4834 = vst.msk [vmem:[#allocation3 + $0x130] sm:$0xff] %vm4118_vm5, %v4759_v5  ;;  %12065 = vmatmul.mubr.msk.f32.gmra.mrb[36].mxu0 %vm4118_vm5, %v6312_v54  ;;  %v4207_v10 = vrot.slane %v15664_v58, 6  ;;  %v4762_v17 = vsel %vm4744_vm11, %v4760_v43, %v4761_v45  ;;  %v15709_v24 = vmax.f32 %v12985_v46, 0.0  ;;  %4381 = vrot.lane.b32.xlu0 %v15582_v11, %s13336_s18  ;;  %v11889_v40 = vpop.f32.mrb[14].mxu0  ;;  %v4208_v6 = vrot.slane %v15656_v2, 6 }
 0x4c8   : > { %4512 = vst.msk [vmem:[#allocation3 + $0x170] sm:$0xff] %vm4118_vm5, %v15656_v2  ;;  %4511 = vst.msk [vmem:[#allocation3 + $0x158] sm:$0xff] %vm4118_vm5, %v15664_v58  ;;  %12748 = vmatpush1.bf16.msra.mxu0 %v15471_v20  ;;  %v15716_v8 = vsel %vm4549_vm12, %v4565_v1, %v4566_v41  ;;  %v15721_v36 = vsel %vm4322_vm13, %v4338_v35, %v4339_v33  ;;  %v4764_v9 = vrot.slane %v15702_v34, 2  ;;  %4608 = vrot.lane.b32.xlu1 %v4557_v21, %s13336_s18  ;;  %v3963_v7 = vpop.f32.mrb[15].mxu0  ;;  %v16650_v20 = vld [vmem:[#allocation3 + $0x40] sm:$0xff] }
 0x4c9   : > { %4538 = vst.msk [vmem:[#allocation3 + $0x177] sm:$0x1] %vm4305_vm9, %v15154_v0  ;;  %12749 = vmatprep.subr.bf16.mxu0 %v19055_v15  ;;  %v12986_v11 = vadd.f32 %v11889_v40, %v15406_v25  ;;  %v6318_v13 = vld [vmem:[#allocation3 + $0x118] sm:$0xff]  ;;  %v4569_v61 = vrot.slane %v15702_v34, 1  ;;  %v4342_v12 = vrot.slane %v15702_v34, 7  ;;  %v4763_v63 = vrot.slane %v15709_v24, 2 }
 0x4ca   : > { %4837 = vst.msk [vmem:[#allocation3 + $0x178] sm:$0x3f] %vm4826_vm10, %v4761_v45  ;;  %v6315_v44 = vld [vmem:[#allocation3 + $0x100] sm:$0xff]  ;;  %v12987_v18 = vadd.f32 %v15406_v25, %v3963_v7  ;;  %v4341_v21 = vrot.slane %v15709_v24, 7  ;;  %v4568_v23 = vrot.slane %v15709_v24, 1  ;;  %v4206_v3 = vsel %vm19109_vm3, %v4204_v38, %v4205_v51  ;;  %v6324_v43 = vld [vmem:[#allocation3 + $0x148] sm:$0xff] }
 0x4cb   : > { %4836 = vst.msk [vmem:[#allocation3 + $0x160] sm:$0xff] %vm4118_vm5, %v4762_v17  ;;  %4514 = vst.msk [vmem:[#allocation3 + $0x1a0] sm:$0xff] %vm4118_vm5, %v15702_v34  ;;  %12067 = vmatprep.mubr.msk.f32.mxu0 %vm4118_vm5, %v6315_v44  ;;  %v15749_v47 = vmax.f32 %v12986_v11, 0.0  ;;  %v4210_v5 = vrot.slane %v15709_v24, 6  ;;  %v4765_v50 = vsel %vm4744_vm11, %v4763_v63, %v4764_v9  ;;  %4383 = vrot.lane.b32.xlu0 %v4332_v19, %s13336_s18  ;;  %v11892_v45 = vpop.f32.mrb[16].mxu0  ;;  %vm8498_vm3 = vcmask 261120  }
 0x4cc   : > { %4281 = vst.msk [vmem:[#allocation3 + $0x120] sm:$0xfc] %vm4272_vm14, %v4204_v38  ;;  %4283 = vst.msk [vmem:[#allocation3 + $0x150] sm:$0xfc] %vm4272_vm14, %v4207_v10  ;;  %12068 = vmatmul.mubr.msk.f32.gmra.mrb[38].mxu0 %vm4118_vm5, %v6318_v13  ;;  %v15756_v27 = vmax.f32 %v12987_v18, 0.0  ;;  %v15764_v60 = vsel %vm4549_vm12, %v4568_v23, %v4569_v61  ;;  %v15769_v54 = vsel %vm4322_vm13, %v4341_v21, %v4342_v12  ;;  %4610 = vrot.lane.b32.xlu1 %v15620_v49, %s13336_s18  ;;  %v3973_v33 = vpop.f32.mrb[17].mxu0 }
 0x4cd   : > { %4513 = vst.msk [vmem:[#allocation3 + $0x188] sm:$0xff] %vm4118_vm5, %v15709_v24  ;;  %12751 = vmatpush1.bf16.msra.mxu0 %v15475_v55  ;;  %4282 = vst.msk [vmem:[#allocation3 + $0x138] sm:$0xff] %vm4118_vm5, %v4206_v3  ;;  %v4767_v4 = vrot.slane %v15749_v47, 2  ;;  %v12988_v19 = vadd.f32 %v11892_v45, %v15406_v25  ;;  %v19050_v46 = vrot.slane %v15749_v47, 1  ;;  %v4345_v1 = vrot.slane %v15749_v47, 7  ;;  %v10649_v24 = vld [vmem:[%s19034_s3 + $0x478] sm:$0xff] }
 0x4ce   : > { %4539 = vst.msk [vmem:[#allocation3 + $0x1a7] sm:$0x1] %vm4305_vm9, %v15154_v0  ;;  %v6321_v16 = vld [vmem:[#allocation3 + $0x130] sm:$0xff]  ;;  %12752 = vmatprep.subr.bf16.mxu0 %v19055_v15  ;;  %v4766_v38 = vrot.slane %v15756_v27, 2  ;;  %v12989_v51 = vadd.f32 %v15406_v25, %v3973_v33  ;;  %v4344_v49 = vrot.slane %v15756_v27, 7  ;;  %v4571_v17 = vrot.slane %v15756_v27, 1 }
 0x4cf   : > { %4839 = vst.msk [vmem:[#allocation3 + $0x1a8] sm:$0x3f] %vm4826_vm10, %v4764_v9  ;;  %12070 = vmatprep.mubr.msk.f32.mxu0 %vm4118_vm5, %v6321_v16  ;;  %4841 = vst.msk [vmem:[#allocation3 + $0x1d8] sm:$0x3f] %vm4826_vm10, %v4767_v4  ;;  %v15796_v40 = vmax.f32 %v12988_v19, 0.0  ;;  %v4209_v44 = vsel %vm19110_vm4, %v4207_v10, %v4208_v6  ;;  %v4211_v9 = vrot.slane %v15702_v34, 6  ;;  %4385 = vrot.lane.b32.xlu0 %v15625_v42, %s13336_s18 }
 0x4d0   : > { %4838 = vst.msk [vmem:[#allocation3 + $0x190] sm:$0xff] %vm4118_vm5, %v4765_v50  ;;  %4516 = vst.msk [vmem:[#allocation3 + $0x1d0] sm:$0xff] %vm4118_vm5, %v15749_v47  ;;  %12071 = vmatmul.mubr.msk.f32.gmra.mrb[40].mxu0 %vm4118_vm5, %v6324_v43  ;;  %v4213_v11 = vrot.slane %v15756_v27, 6  ;;  %v4768_v7 = vsel %vm4744_vm11, %v4766_v38, %v4767_v4  ;;  %v15805_v13 = vmax.f32 %v12989_v51, 0.0  ;;  %v11895_v12 = vpop.f32.mrb[18].mxu0  ;;  %v15812_v18 = vsel %vm4549_vm12, %v4571_v17, %v19050_v46  ;;  %v10485_v55 = vld [vmem:[%s19034_s3 + $0x158] sm:$0xff] }
 0x4d1   : > { %4285 = vst.msk [vmem:[#allocation3 + $0x180] sm:$0xfc] %vm4272_vm14, %v4210_v5  ;;  %12754 = vmatpush1.bf16.msra.mxu0 %v15477_v14  ;;  %v15817_v10 = vsel %vm4322_vm13, %v4344_v49, %v4345_v1  ;;  %v4770_v42 = vrot.slane %v15796_v40, 2  ;;  %v12990_v23 = vadd.f32 %v11895_v12, %v15406_v25  ;;  %4612 = vrot.lane.b32.xlu1 %v4560_v52, %s13336_s18  ;;  %v3983_v3 = vpop.f32.mrb[19].mxu0  ;;  %v6330_v6 = vld [vmem:[#allocation3 + $0x178] sm:$0xff]  ;;  %v19046_v50 = vrot.slane %v15796_v40, 1 }
 0x4d2   : > { %4515 = vst.msk [vmem:[#allocation3 + $0x1b8] sm:$0xff] %vm4118_vm5, %v15756_v27  ;;  %v6327_v63 = vld [vmem:[#allocation3 + $0x160] sm:$0xff]  ;;  %12755 = vmatprep.subr.bf16.mxu0 %v19055_v15  ;;  %4284 = vst.msk [vmem:[#allocation3 + $0x168] sm:$0xff] %vm4118_vm5, %v4209_v44  ;;  %v4348_v45 = vrot.slane %v15796_v40, 7  ;;  %v4769_v16 = vrot.slane %v15805_v13, 2  ;;  %v12991_v56 = vadd.f32 %v15406_v25, %v3983_v3  ;;  %v19047_v52 = vrot.slane %v15805_v13, 7 }
 0x4d3   : > { %4540 = vst.msk [vmem:[#allocation3 + $0x1d7] sm:$0x1] %vm4305_vm9, %v15154_v0  ;;  %12073 = vmatprep.mubr.msk.f32.mxu0 %vm4118_vm5, %v6327_v63  ;;  %v4574_v4 = vrot.slane %v15805_v13, 1  ;;  %v15845_v19 = vmax.f32 %v12990_v23, 0.0  ;;  %v4212_v33 = vsel %vm19111_vm7, %v4210_v5, %v4211_v9  ;;  %v4214_v43 = vrot.slane %v15749_v47, 6  ;;  %4387 = vrot.lane.b32.xlu0 %v4335_v32, %s13336_s18  ;;  %v11898_v17 = vpop.f32.mrb[20].mxu0 }
 0x4d4   : > { %4840 = vst.msk [vmem:[#allocation3 + $0x1c0] sm:$0xff] %vm4118_vm5, %v4768_v7  ;;  %4518 = vst.msk [vmem:[#allocation3 + $0x200] sm:$0xff] %vm4118_vm5, %v15796_v40  ;;  %12074 = vmatmul.mubr.msk.f32.gmra.mrb[42].mxu0 %vm4118_vm5, %v6330_v6  ;;  %v4216_v1 = vrot.slane %v15805_v13, 6  ;;  %v4771_v38 = vsel %vm4744_vm11, %v4769_v16, %v4770_v42  ;;  %v15854_v51 = vmax.f32 %v12991_v56, 0.0  ;;  %v15867_v5 = vsel %vm4322_vm13, %v19047_v52, %v4348_v45  ;;  %v3993_v9 = vpop.f32.mrb[21].mxu0 }
 0x4d5   : > { %4287 = vst.msk [vmem:[#allocation3 + $0x1b0] sm:$0xfc] %vm4272_vm14, %v4213_v11  ;;  %12757 = vmatpush1.bf16.msra.mxu0 %v15479_v39  ;;  %v15862_v7 = vsel %vm4549_vm12, %v4574_v4, %v19046_v50  ;;  %v4773_v22 = vrot.slane %v15845_v19, 2  ;;  %v12992_v32 = vadd.f32 %v11898_v17, %v15406_v25  ;;  %4614 = vrot.lane.b32.xlu1 %v15672_v26, %s13336_s18  ;;  %v19040_v63 = vrot.slane %v15845_v19, 1 }
 0x4d6   : > { %4517 = vst.msk [vmem:[#allocation3 + $0x1e8] sm:$0xff] %vm4118_vm5, %v15805_v13  ;;  %12758 = vmatprep.subr.bf16.mxu0 %v19055_v15  ;;  %4286 = vst.msk [vmem:[#allocation3 + $0x198] sm:$0xff] %vm4118_vm5, %v4212_v33  ;;  %v6336_v12 = vld [vmem:[#allocation3 + $0x1a8] sm:$0xff]  ;;  %v4772_v23 = vrot.slane %v15854_v51, 2  ;;  %v12993_v3 = vadd.f32 %v15406_v25, %v3993_v9  ;;  %v19043_v26 = vrot.slane %v15854_v51, 7  ;;  %v4577_v6 = vrot.slane %v15854_v51, 1 }
 0x4d7   : > { %4541 = vst.msk [vmem:[#allocation3 + $0x207] sm:$0x1] %vm4305_vm9, %v15154_v0  ;;  %v6333_v44 = vld [vmem:[#allocation3 + $0x190] sm:$0xff]  ;;  %v15894_v45 = vmax.f32 %v12992_v32, 0.0  ;;  %v4215_v16 = vsel %vm19112_vm6, %v4213_v11, %v4214_v43  ;;  %v4217_v56 = vrot.slane %v15796_v40, 6  ;;  %v4219_v4 = vrot.slane %v15854_v51, 6  ;;  %4389 = vrot.lane.b32.xlu0 %v15677_v62, %s13336_s18 }
 0x4d8   : > { %4843 = vst.msk [vmem:[#allocation3 + $0x208] sm:$0x3f] %vm4826_vm10, %v4770_v42  ;;  %12076 = vmatprep.mubr.msk.f32.mxu0 %vm4118_vm5, %v6333_v44  ;;  %v4351_v42 = vrot.slane %v15845_v19, 7  ;;  %4845 = vst.msk [vmem:[#allocation3 + $0x238] sm:$0x3f] %vm4826_vm10, %v4773_v22  ;;  %v4774_v33 = vsel %vm4744_vm11, %v4772_v23, %v4773_v22  ;;  %v15910_v44 = vsel %vm4549_vm12, %v4577_v6, %v19040_v63  ;;  %v6342_v32 = vld [vmem:[#allocation3 + $0x1d8] sm:$0xff] }
 0x4d9   : > { %4842 = vst.msk [vmem:[#allocation3 + $0x1f0] sm:$0xff] %vm4118_vm5, %v4771_v38  ;;  %4520 = vst.msk [vmem:[#allocation3 + $0x230] sm:$0xff] %vm4118_vm5, %v15845_v19  ;;  %12077 = vmatmul.mubr.msk.f32.gmra.mrb[44].mxu0 %vm4118_vm5, %v6336_v12  ;;  %v15903_v38 = vmax.f32 %v12993_v3, 0.0  ;;  %v4776_v62 = vrot.slane %v15894_v45, 2  ;;  %4616 = vrot.lane.b32.xlu1 %v4563_v59, %s13336_s18  ;;  %v19041_v9 = vrot.slane %v15894_v45, 1  ;;  %v4354_v12 = vrot.slane %v15894_v45, 7 }
 0x4da   : > { %4289 = vst.msk [vmem:[#allocation3 + $0x1e0] sm:$0xfc] %vm4272_vm14, %v4216_v1  ;;  %12760 = vmatpush1.bf16.msra.mxu0 %v15481_v28  ;;  %v15915_v11 = vsel %vm4322_vm13, %v19043_v26, %v4351_v42  ;;  %4291 = vst.msk [vmem:[#allocation3 + $0x210] sm:$0xfc] %vm4272_vm14, %v4219_v4  ;;  %v15940_v3 = vld [vmem:[#allocation3] sm:$0xff]  ;;  %v4870_v28 = vld [vmem:[#allocation3 + $0x28] sm:$0xff] }
 0x4db   : > { %4519 = vst.msk [vmem:[#allocation3 + $0x218] sm:$0xff] %vm4118_vm5, %v15854_v51  ;;  %v6339_v17 = vld [vmem:[#allocation3 + $0x1c0] sm:$0xff]  ;;  %12761 = vmatprep.subr.bf16.mxu0 %v19055_v15  ;;  %4288 = vst.msk [vmem:[#allocation3 + $0x1c8] sm:$0xff] %vm4118_vm5, %v4215_v16  ;;  %v4775_v42 = vrot.slane %v15903_v38, 2  ;;  %v19042_v59 = vrot.slane %v15903_v38, 7  ;;  %v4580_v23 = vrot.slane %v15903_v38, 1  ;;  %v4218_v16 = vsel %vm19113_vm8, %v4216_v1, %v4217_v56  ;;  %4391 = vrot.lane.b32.xlu0 %v4338_v35, %s13336_s18 }
 0x4dc   : > { %4542 = vst.msk [vmem:[#allocation3 + $0x237] sm:$0x1] %vm4305_vm9, %v15154_v0  ;;  %v11901_v0 = vpop.f32.mrb[22].mxu0  ;;  %12079 = vmatprep.mubr.msk.f32.mxu0 %vm4118_vm5, %v6339_v17  ;;  %vm8474_vm4 = vcmask 785408   ;;  %vm8500_vm7 = vcmask 260096   ;;  %vm8660_vm6 = vcmask 523520  }
 0x4dd   : > { %4844 = vst.msk [vmem:[#allocation3 + $0x220] sm:$0xff] %vm4118_vm5, %v4774_v33  ;;  %4522 = vst.msk [vmem:[#allocation3 + $0x260] sm:$0xff] %vm4118_vm5, %v15894_v45  ;;  %v12994_v43 = vadd.f32 %v11901_v0, %v15406_v25  ;;  %v4003_v22 = vpop.f32.mrb[23].mxu0  ;;  %12080 = vmatmul.mubr.msk.f32.gmra.mrb[46].mxu0 %vm4118_vm5, %v6342_v32  ;;  %v4220_v33 = vrot.slane %v15845_v19, 6  ;;  %v4222_v0 = vrot.slane %v15903_v38, 6  ;;  %v4777_v17 = vsel %vm4744_vm11, %v4775_v42, %v4776_v62 }
 0x4de   : > { %4521 = vst.msk [vmem:[#allocation3 + $0x248] sm:$0xff] %vm4118_vm5, %v15903_v38  ;;  %v12995_v53 = vadd.f32 %v15406_v25, %v4003_v22  ;;  %12763 = vmatpush1.bf16.msra.mxu0 %v15483_v30  ;;  %v15962_v63 = vsel %vm4549_vm12, %v4580_v23, %v19041_v9  ;;  %v15967_v1 = vsel %vm4322_vm13, %v19042_v59, %v4354_v12  ;;  %4290 = vst.msk [vmem:[#allocation3 + $0x1f8] sm:$0xff] %vm4118_vm5, %v4218_v16  ;;  %vm8806_vm8 = vcmask 785921  }
 0x4df   : > { %4543 = vst.msk [vmem:[#allocation3 + $0x267] sm:$0x1] %vm4305_vm9, %v15940_v3  ;;  %v15945_v6 = vmax.f32 %v12994_v43, 0.0  ;;  %v11904_v43 = vpop.f32.mrb[24].mxu0  ;;  %12764 = vmatprep.subr.bf16.mxu0 %v19055_v15  ;;  %4618 = vrot.lane.b32.xlu1 %v15716_v8, %s13336_s18 }
 0x4e0   : > { %4847 = vst.msk [vmem:[#allocation3 + $0x268] sm:$0x3f] %vm4826_vm10, %v4776_v62  ;;  %v15954_v22 = vmax.f32 %v12995_v53, 0.0  ;;  %v6345_v32 = vld [vmem:[#allocation3 + $0x1f0] sm:$0xff]  ;;  %v12996_v35 = vadd.f32 %v11904_v43, %v15406_v25  ;;  %v4013_v56 = vpop.f32.mrb[25].mxu0  ;;  %v6348_v62 = vld [vmem:[#allocation3 + $0x208] sm:$0xff]  ;;  %v4221_v43 = vsel %vm19114_vm15, %v4219_v4, %v4220_v33  ;;  %4393 = vrot.lane.b32.xlu0 %v15721_v36, %s13336_s18 }
 0x4e1   : > { %4846 = vst.msk [vmem:[#allocation3 + $0x250] sm:$0xff] %vm4118_vm5, %v4777_v17  ;;  %v4779_v58 = vrot.slane %v15945_v6, 2  ;;  %4524 = vst.msk [vmem:[#allocation3 + $0x290] sm:$0xff] %vm4118_vm5, %v15945_v6  ;;  %12082 = vmatprep.mubr.msk.f32.mxu0 %vm4118_vm5, %v6345_v32  ;;  %v19044_v12 = vrot.slane %v15945_v6, 1  ;;  %v4357_v42 = vrot.slane %v15945_v6, 7  ;;  %v12997_v23 = vadd.f32 %v15406_v25, %v4013_v56  ;;  %v11907_v59 = vpop.f32.mrb[26].mxu0 }
 0x4e2   : > { %4293 = vst.msk [vmem:[#allocation3 + $0x240] sm:$0xfc] %vm4272_vm14, %v4222_v0  ;;  %v4778_v53 = vrot.slane %v15954_v22, 2  ;;  %12083 = vmatmul.mubr.msk.f32.gmra.mrb[48].mxu0 %vm4118_vm5, %v6348_v62  ;;  %v19045_v8 = vrot.slane %v15954_v22, 7  ;;  %v4583_v16 = vrot.slane %v15954_v22, 1  ;;  %v15994_v17 = vmax.f32 %v12996_v35, 0.0 }
 0x4e3   : > { %4523 = vst.msk [vmem:[#allocation3 + $0x278] sm:$0xff] %vm4118_vm5, %v15954_v22  ;;  %12766 = vmatpush1.bf16.msra.mxu0 %v15485_v29  ;;  %v4223_v32 = vrot.slane %v15894_v45, 6  ;;  %v4225_v56 = vrot.slane %v15954_v22, 6  ;;  %v16003_v9 = vmax.f32 %v12997_v23, 0.0  ;;  %v4997_v33 = vld [vmem:[%s19034_s3 + $0x120] sm:$0xff]  ;;  %v4998_v36 = vld [vmem:[%s19034_s3 + $0x128] sm:$0xff]  ;;  %4620 = vrot.lane.b32.xlu1 %v4566_v41, %s13336_s18 }
 0x4e4   : > { %4544 = vst.msk [vmem:[#allocation3 + $0x297] sm:$0x1] %vm4305_vm9, %v15940_v3  ;;  %v4780_v62 = vsel %vm4744_vm11, %v4778_v53, %v4779_v58  ;;  %v6351_v35 = vld [vmem:[#allocation3 + $0x220] sm:$0xff]  ;;  %v16010_v26 = vsel %vm4549_vm12, %v4583_v16, %v19044_v12  ;;  %v16015_v4 = vsel %vm4322_vm13, %v19045_v8, %v4357_v42  ;;  %12767 = vmatprep.subr.bf16.mxu0 %v19055_v15  ;;  %v4023_v53 = vpop.f32.mrb[27].mxu0  ;;  %v6354_v23 = vld [vmem:[#allocation3 + $0x238] sm:$0xff]  ;;  %v19048_v16 = vrot.slane %v15994_v17, 1 }
 0x4e5   : > { %4849 = vst.msk [vmem:[#allocation3 + $0x298] sm:$0x3f] %vm4826_vm10, %v4779_v58  ;;  %v4782_v58 = vrot.slane %v15994_v17, 2  ;;  %v12998_v42 = vadd.f32 %v11907_v59, %v15406_v25  ;;  %12085 = vmatprep.mubr.msk.f32.mxu0 %vm4118_vm5, %v6351_v35  ;;  %v12999_v2 = vadd.f32 %v15406_v25, %v4023_v53  ;;  %v19049_v41 = vrot.slane %v16003_v9, 7  ;;  %4395 = vrot.lane.b32.xlu0 %v4341_v21, %s13336_s18  ;;  %v11910_v52 = vpop.f32.mrb[28].mxu0 }
 0x4e6   : > { %4292 = vst.msk [vmem:[#allocation3 + $0x228] sm:$0xff] %vm4118_vm5, %v4221_v43  ;;  %4848 = vst.msk [vmem:[#allocation3 + $0x280] sm:$0xff] %vm4118_vm5, %v4780_v62  ;;  %v4360_v43 = vrot.slane %v15994_v17, 7  ;;  %v4781_v62 = vrot.slane %v16003_v9, 2  ;;  %12086 = vmatmul.mubr.msk.f32.gmra.mrb[50].mxu0 %vm4118_vm5, %v6354_v23  ;;  %v4586_v59 = vrot.slane %v16003_v9, 1  ;;  %v12604_v12 = vpack.c.bf16 %v4998_v36, %v4997_v33 }
 0x4e7   : > { %4526 = vst.msk [vmem:[#allocation3 + $0x2c0] sm:$0xff] %vm4118_vm5, %v15994_v17  ;;  %4525 = vst.msk [vmem:[#allocation3 + $0x2a8] sm:$0xff] %vm4118_vm5, %v16003_v9  ;;  %v16049_v35 = vmax.f32 %v12998_v42, 0.0  ;;  %12769 = vmatpush1.bf16.msra.mxu0 %v15506_v48  ;;  %v4224_v53 = vsel %vm19106_vm0, %v4222_v0, %v4223_v32  ;;  %v4226_v23 = vrot.slane %v15945_v6, 6  ;;  %v16057_v50 = vmax.f32 %v12999_v2, 0.0  ;;  %v10648_v32 = vld [vmem:[%s19034_s3 + $0x470] sm:$0xff]  ;;  %4622 = vrot.lane.b32.xlu1 %v15764_v60, %s13336_s18 }
 0x4e8   : > { %4295 = vst.msk [vmem:[#allocation3 + $0x270] sm:$0xfc] %vm4272_vm14, %v4225_v56  ;;  %v4783_v8 = vsel %vm4744_vm11, %v4781_v62, %v4782_v58  ;;  %v6357_v42 = vld [vmem:[#allocation3 + $0x250] sm:$0xff]  ;;  %v16065_v33 = vsel %vm4549_vm12, %v4586_v59, %v19048_v16  ;;  %v16070_v0 = vsel %vm4322_vm13, %v19049_v41, %v4360_v43  ;;  %12770 = vmatprep.subr.bf16.mxu0 %v19055_v15  ;;  %v6360_v43 = vld [vmem:[#allocation3 + $0x268] sm:$0xff]  ;;  %vm8693_vm15 = vcmask 778752  }
 0x4e9   : > { %4545 = vst.msk [vmem:[#allocation3 + $0x2c7] sm:$0x1] %vm4305_vm9, %v15940_v3  ;;  %v4785_v21 = vrot.slane %v16049_v35, 2  ;;  %v13000_v36 = vadd.f32 %v11910_v52, %v15406_v25  ;;  %12088 = vmatprep.mubr.msk.f32.mxu0 %vm4118_vm5, %v6357_v42  ;;  %v19051_v62 = vrot.slane %v16049_v35, 1  ;;  %v4363_v2 = vrot.slane %v16049_v35, 7  ;;  %12605 = vmatprep.subr.bf16.mxu1 %v12604_v12 }
 0x4ea   : > { %4851 = vst.msk [vmem:[#allocation3 + $0x2c8] sm:$0x3f] %vm4826_vm10, %v4782_v58  ;;  %v4033_v58 = vpop.f32.mrb[29].mxu0  ;;  %12089 = vmatmul.mubr.msk.f32.gmra.mrb[52].mxu0 %vm4118_vm5, %v6360_v43  ;;  %v19052_v52 = vrot.slane %v16057_v50, 7  ;;  %v4589_v60 = vrot.slane %v16057_v50, 1  ;;  %v16103_v42 = vpack.c.bf16 %v10649_v24, %v10648_v32  ;;  %12607 = vmatpush3.bf16.msra.mxu1 %v12604_v12  ;;  %v4228_v43 = vrot.slane %v16003_v9, 6 }
 0x4eb   : > { %4294 = vst.msk [vmem:[#allocation3 + $0x258] sm:$0xff] %vm4118_vm5, %v4224_v53  ;;  %4850 = vst.msk [vmem:[#allocation3 + $0x2b0] sm:$0xff] %vm4118_vm5, %v4783_v8  ;;  %v4784_v8 = vrot.slane %v16057_v50, 2  ;;  %v13001_v59 = vadd.f32 %v15406_v25, %v4033_v58  ;;  %v16100_v53 = vmax.f32 %v13000_v36, 0.0  ;;  %12772 = vmatpush1.bf16.msra.mxu0 %v15566_v57  ;;  %v4227_v58 = vsel %vm19116_vm1, %v4225_v56, %v4226_v23  ;;  %v11913_v36 = vpop.f32.mrb[30].mxu0  ;;  %v10650_v56 = vld [vmem:[%s19034_s3 + $0x480] sm:$0xff] }
 0x4ec   : > { %4528 = vst.msk [vmem:[#allocation3 + $0x2f0] sm:$0xff] %vm4118_vm5, %v16049_v35  ;;  %4527 = vst.msk [vmem:[#allocation3 + $0x2d8] sm:$0xff] %vm4118_vm5, %v16057_v50  ;;  %4397 = vrot.lane.b32.xlu0 %v15769_v54, %s13336_s18  ;;  %v16117_v32 = vsel %vm4549_vm12, %v4589_v60, %v19051_v62  ;;  %v16122_v12 = vsel %vm4322_vm13, %v19052_v52, %v4363_v2  ;;  %12773 = vmatprep.subr.bf16.mxu0 %v19055_v15  ;;  %v10651_v54 = vld [vmem:[%s19034_s3 + $0x488] sm:$0xff]  ;;  %v6366_v2 = vld [vmem:[#allocation3 + $0x298] sm:$0xff] }
 0x4ed   : > { %4546 = vst.msk [vmem:[#allocation3 + $0x2f7] sm:$0x1] %vm4305_vm9, %v15940_v3  ;;  %19115 = vst [vmem:[#allocation16_spill] sm:$0xff] %v16103_v42  ;;  %v4786_v16 = vsel %vm4744_vm11, %v4784_v8, %v4785_v21  ;;  %v16110_v41 = vmax.f32 %v13001_v59, 0.0  ;;  %v6363_v46 = vld [vmem:[#allocation3 + $0x280] sm:$0xff]  ;;  %v4788_v23 = vrot.slane %v16100_v53, 2  ;;  %v13002_v24 = vadd.f32 %v11913_v36, %v15406_v25  ;;  %4624 = vrot.lane.b32.xlu1 %v4569_v61, %s13336_s18 }
 0x4ee   : > { %4853 = vst.msk [vmem:[#allocation3 + $0x2f8] sm:$0x3f] %vm4826_vm10, %v4785_v21  ;;  %v4043_v21 = vpop.f32.mrb[31].mxu0  ;;  %12091 = vmatprep.mubr.msk.f32.mxu0 %vm4118_vm5, %v6363_v46  ;;  %v4593_v8 = vrot.slane %v16100_v53, 1  ;;  %v4366_v59 = vrot.slane %v16100_v53, 7  ;;  %v10652_v36 = vld [vmem:[%s19034_s3 + $0x490] sm:$0xff] }
 0x4ef   : > { %4296 = vst.msk [vmem:[#allocation3 + $0x288] sm:$0xff] %vm4118_vm5, %v4227_v58  ;;  %4852 = vst.msk [vmem:[#allocation3 + $0x2e0] sm:$0xff] %vm4118_vm5, %v4786_v16  ;;  %v4787_v16 = vrot.slane %v16110_v41, 2  ;;  %v13314_v25 = vld [vmem:[%s19033_s2] ss:$0 sm:$0xff]  ;;  %12092 = vmatmul.mubr.msk.f32.gmra.mrb[54].mxu0 %vm4118_vm5, %v6366_v2  ;;  %v4365_v61 = vrot.slane %v16110_v41, 7  ;;  %v16159_v58 = vpack.c.bf16 %v10651_v54, %v10650_v56 }
 0x4f0   : > { %4530 = vst.msk [vmem:[#allocation3 + $0x320] sm:$0xff] %vm4118_vm5, %v16100_v53  ;;  %4529 = vst.msk [vmem:[#allocation3 + $0x308] sm:$0xff] %vm4118_vm5, %v16110_v41  ;;  %v13003_v34 = vadd.f32 %v13314_v25, %v4043_v21  ;;  %v4592_v46 = vrot.slane %v16110_v41, 1  ;;  %v16156_v60 = vmax.f32 %v13002_v24, 0.0  ;;  %12775 = vmatpush1.bf16.msra.mxu0 %v16103_v42  ;;  %v10653_v21 = vld [vmem:[%s19034_s3 + $0x498] sm:$0xff]  ;;  %v4229_v2 = vrot.slane %v15994_v17, 6  ;;  %4399 = vrot.lane.b32.xlu0 %v4344_v49, %s13336_s18 }
 0x4f1   : > { %4297 = vst.msk [vmem:[#allocation3 + $0x2a0] sm:$0xfc] %vm4272_vm14, %v4228_v43  ;;  %19117 = vst [vmem:[#allocation17_spill] sm:$0xff] %v16159_v58  ;;  %v4231_v25 = vrot.slane %v16057_v50, 6  ;;  %v4789_v62 = vsel %vm4744_vm11, %v4787_v16, %v4788_v23  ;;  %v16183_v52 = vsel %vm4322_vm13, %v4365_v61, %v4366_v59  ;;  %12776 = vmatprep.subr.bf16.mxu0 %v19055_v15  ;;  %4626 = vrot.lane.b32.xlu1 %v15812_v18, %s13336_s18  ;;  %v6372_v27 = vld [vmem:[#allocation3 + $0x2c8] sm:$0xff] }
 0x4f2   : > { %4547 = vst.msk [vmem:[#allocation3 + $0x327] sm:$0x1] %vm4305_vm9, %v15940_v3  ;;  %v16170_v24 = vmax.f32 %v13003_v34, 0.0  ;;  %v6369_v56 = vld [vmem:[#allocation3 + $0x2b0] sm:$0xff]  ;;  %v16178_v54 = vsel %vm4549_vm12, %v4592_v46, %v4593_v8  ;;  %v19053_v49 = vrot.slane %v16156_v60, 1  ;;  %v4369_v59 = vrot.slane %v16156_v60, 7 }
 0x4f3   : > { %4855 = vst.msk [vmem:[#allocation3 + $0x328] sm:$0x3f] %vm4826_vm10, %v4788_v23  ;;  %v4791_v23 = vrot.slane %v16156_v60, 2  ;;  %12094 = vmatprep.mubr.msk.f32.mxu0 %vm4118_vm5, %v6369_v56  ;;  %v4230_v16 = vsel %vm19118_vm2, %v4228_v43, %v4229_v2  ;;  %v16205_v46 = vpack.c.bf16 %v10653_v21, %v10652_v36  ;;  %v4232_v43 = vrot.slane %v16049_v35, 6  ;;  %v10483_v57 = vld [vmem:[%s19034_s3 + $0x148] sm:$0xff] }
 0x4f4   : > { %4854 = vst.msk [vmem:[#allocation3 + $0x310] sm:$0xff] %vm4118_vm5, %v4789_v62  ;;  %4532 = vst.msk [vmem:[#allocation3 + $0x350] sm:$0xff] %vm4118_vm5, %v16156_v60  ;;  %v4790_v62 = vrot.slane %v16170_v24, 2  ;;  %12095 = vmatmul.mubr.msk.f32.gmra.mrb[56].mxu0 %vm4118_vm5, %v6372_v27  ;;  %v19054_v18 = vrot.slane %v16170_v24, 7  ;;  %v4595_v34 = vrot.slane %v16170_v24, 1  ;;  %v4234_v2 = vrot.slane %v16110_v41, 6  ;;  %4401 = vrot.lane.b32.xlu0 %v15817_v10, %s13336_s18 }
 0x4f5   : > { %4299 = vst.msk [vmem:[#allocation3 + $0x2d0] sm:$0xfc] %vm4272_vm14, %v4231_v25  ;;  %19119 = vst [vmem:[#allocation18_spill] sm:$0xff] %v16205_v46  ;;  %12778 = vmatpush1.bf16.msra.mxu0 %v16159_v58  ;;  %v4235_v56 = vrot.slane %v16100_v53, 6  ;;  %v10655_v10 = vld [vmem:[%s19034_s3 + $0x4a8] sm:$0xff] }
 0x4f6   : > { %4531 = vst.msk [vmem:[#allocation3 + $0x338] sm:$0xff] %vm4118_vm5, %v16170_v24  ;;  %4298 = vst.msk [vmem:[#allocation3 + $0x2b8] sm:$0xff] %vm4118_vm5, %v4230_v16  ;;  %v4792_v27 = vsel %vm4744_vm11, %v4790_v62, %v4791_v23  ;;  %v6375_v36 = vld [vmem:[#allocation3 + $0x2e0] sm:$0xff]  ;;  %12779 = vmatprep.subr.bf16.mxu0 %v19055_v15  ;;  %v16221_v21 = vsel %vm4549_vm12, %v4595_v34, %v19053_v49  ;;  %v16226_v16 = vsel %vm4322_vm13, %v19054_v18, %v4369_v59  ;;  %v6378_v59 = vld [vmem:[#allocation3 + $0x2f8] sm:$0xff]  ;;  %vm4467_vm12 = vcmask 1048065  }
 0x4f7   : > { %4548 = vst.msk [vmem:[#allocation3 + $0x357] sm:$0x1] %vm4305_vm9, %v15940_v3  ;;  %v4237_v3 = vrot.slane %v16170_v24, 6  ;;  %v4238_v62 = vrot.slane %v16156_v60, 6  ;;  %v19120_v34 = vrot.slane %v15749_v47, 1  ;;  %12097 = vmatprep.mubr.msk.f32.mxu0 %vm4118_vm5, %v6375_v36  ;;  %vm19121_vm9 = vmmov %vm19106_vm0  ;;  %vm4469_vm13 = vcmask 1048064  }
 0x4f8   : > { %4857 = vst.msk [vmem:[#allocation3 + $0x358] sm:$0x3f] %vm4826_vm10, %v4791_v23  ;;  %v10654_v23 = vld [vmem:[%s19034_s3 + $0x4a0] sm:$0xff]  ;;  %v4233_v49 = vsel %vm19121_vm9, %v4231_v25, %v4232_v43  ;;  %vm19122_vm10 = vmmov %vm19106_vm0  ;;  %12098 = vmatmul.mubr.msk.f32.gmra.mrb[58].mxu0 %vm4118_vm5, %v6378_v59  ;;  %v19125_v25 = vrot.slane %v15805_v13, 7  ;;  %v16626_v48 = vld [vmem:[#allocation3 + $0x2c8] sm:$0xff] }
 0x4f9   : > { %4856 = vst.msk [vmem:[#allocation3 + $0x340] sm:$0xff] %vm4118_vm5, %v4792_v27  ;;  %4628 = vrot.lane.b32.xlu1 %v19120_v34, %s13336_s18  ;;  %v4236_v18 = vsel %vm19122_vm10, %v4234_v2, %v4235_v56  ;;  %4300 = vst.msk [vmem:[#allocation3 + $0x2e8] sm:$0xff] %vm4118_vm5, %v4233_v49  ;;  %12781 = vmatpush1.bf16.msra.mxu0 %v16205_v46  ;;  %v16249_v27 = vpack.c.bf16 %v10655_v10, %v10654_v23  ;;  %v10656_v49 = vld [vmem:[%s19034_s3 + $0x4b0] sm:$0xff]  ;;  %v10730_v13 = vld [vmem:[%s19034_s3 + $0x600] sm:$0xff]  ;;  %v19127_v23 = vrot.slane %v15796_v40, 1 }
 0x4fa   : > { %4301 = vst.msk [vmem:[#allocation3 + $0x300] sm:$0xfc] %vm4272_vm14, %v4234_v2  ;;  %4303 = vst.msk [vmem:[#allocation3 + $0x330] sm:$0xfc] %vm4272_vm14, %v4237_v3  ;;  %4403 = vrot.lane.b32.xlu0 %v19125_v25, %s13336_s18  ;;  %12782 = vmatprep.subr.bf16.mxu0 %v19055_v15  ;;  %v6384_v2 = vld [vmem:[#allocation3 + $0x328] sm:$0xff]  ;;  %v4999_v40 = vld [vmem:[%s19034_s3 + $0x130] sm:$0xff] }
 0x4fb   : > { %4302 = vst.msk [vmem:[#allocation3 + $0x318] sm:$0xff] %vm4118_vm5, %v4236_v18  ;;  %vm19123_vm11 = vmmov %vm19106_vm0  ;;  %v6381_v43 = vld [vmem:[#allocation3 + $0x310] sm:$0xff]  ;;  %v10657_v18 = vld [vmem:[%s19034_s3 + $0x4b8] sm:$0xff]  ;;  %vm4695_vm14 = vcmask 1047040   ;;  %vm8808_vm0 = vcmask 785920  }
 0x4fc   : > { %v4239_v47 = vsel %vm19123_vm11, %v4237_v3, %v4238_v62  ;;  %19124 = vst [vmem:[#allocation19_spill] sm:$0xff] %v16249_v27  ;;  %12100 = vmatprep.mubr.msk.f32.mxu0 %vm4118_vm5, %v6381_v43  ;;  %v10731_v56 = vld [vmem:[%s19034_s3 + $0x608] sm:$0xff]  ;;  %v16273_v3 = vpack.c.bf16 %v10657_v18, %v10656_v49  ;;  %v19128_v62 = vrot.slane %v15854_v51, 7  ;;  %v19129_v51 = vrot.slane %v15845_v19, 1  ;;  %v10734_v59 = vld [vmem:[%s19034_s3 + $0x620] sm:$0xff] }
 0x4fd   : > { %4304 = vst.msk [vmem:[#allocation3 + $0x348] sm:$0xff] %vm4118_vm5, %v4239_v47  ;;  %4630 = vrot.lane.b32.xlu1 %v15862_v7, %s13336_s18  ;;  %12101 = vmatmul.mubr.msk.f32.gmra.mrb[60].mxu0 %vm4118_vm5, %v6384_v2  ;;  %v16278_v36 = vpack.c.bf16 %v10731_v56, %v10730_v13  ;;  %v19132_v19 = vrot.slane %v15954_v22, 7  ;;  %v10735_v47 = vld [vmem:[%s19034_s3 + $0x628] sm:$0xff]  ;;  %v10736_v13 = vld [vmem:[%s19034_s3 + $0x630] sm:$0xff]  ;;  %v10737_v56 = vld [vmem:[%s19034_s3 + $0x638] sm:$0xff] }
 0x4fe   : > { %12784 = vmatpush1.bf16.msra.mxu0 %v16249_v27  ;;  %19126 = vst [vmem:[#allocation20_spill] sm:$0xff] %v16273_v3  ;;  %4405 = vrot.lane.b32.xlu0 %v15867_v5, %s13336_s18  ;;  %v5000_v5 = vld [vmem:[%s19034_s3 + $0x138] sm:$0xff]  ;;  %v12860_v18 = vpack.c.bf16 %v10735_v47, %v10734_v59  ;;  %v16633_v29 = vld [vmem:[#allocation3 + $0x2e0] sm:$0xff] }
 0x4ff   : > { %12785 = vmatprep.subr.bf16.mxu0 %v19055_v15  ;;  %v6390_v10 = vld [vmem:[#allocation3 + $0x358] sm:$0xff]  ;;  %v12608_v34 = vpack.c.bf16 %v5000_v5, %v4999_v40 }
 0x500   : > { %v6387_v7 = vld [vmem:[#allocation3 + $0x340] sm:$0xff] }
 0x501   : > { %4632 = vrot.lane.b32.xlu1 %v19127_v23, %s13336_s18  ;;  %12103 = vmatprep.mubr.msk.f32.mxu0 %vm4118_vm5, %v6387_v7 }
 0x502   : > { %12104 = vmatmul.mubr.msk.f32.gmra.mrb[62].mxu0 %vm4118_vm5, %v6390_v10  ;;  %4407 = vrot.lane.b32.xlu0 %v19128_v62, %s13336_s18  ;;  %v12864_v10 = vpack.c.bf16 %v10737_v56, %v10736_v13 }
 0x503   : > { %12787 = vmatpush1.bf16.msra.mxu0 %v16273_v3  ;;  %12609 = vmatprep.subr.bf16.mxu1 %v12608_v34  ;;  %v16600_v3 = vld [vmem:[#allocation3 + $0x298] sm:$0xff] }
 0x504   : > { %12853 = vmatprep.subr.bf16.mxu0 %v16278_v36  ;;  %12611 = vmatpush3.bf16.msra.mxu1 %v12608_v34 }
 0x505   : > { %4634 = vrot.lane.b32.xlu1 %v15910_v44, %s13336_s18  ;;  %v19130_v44 = vrot.slane %v15903_v38, 7  ;;  %12612 = vmatprep.subr.bf16.mxu1 %v19055_v15  ;;  %v19134_v38 = vrot.slane %v16003_v9, 7  ;;  %v19137_v9 = vrot.slane %v16049_v35, 1  ;;  %v16587_v15 = vld [vmem:[#allocation3 + $0x280] sm:$0xff] }
 0x506   : > { %4409 = vrot.lane.b32.xlu0 %v15915_v11, %s13336_s18  ;;  %v19131_v11 = vrot.slane %v15894_v45, 1  ;;  %v19136_v45 = vrot.slane %v16057_v50, 7 }
 0x509   : > { %4636 = vrot.lane.b32.xlu1 %v19129_v51, %s13336_s18 }
 0x50a   : > { %4411 = vrot.lane.b32.xlu0 %v19130_v44, %s13336_s18 }
 0x50d   : > { %4638 = vrot.lane.b32.xlu1 %v15962_v63, %s13336_s18  ;;  %v19133_v63 = vrot.slane %v15945_v6, 1 }
 0x50e   : > { %4413 = vrot.lane.b32.xlu0 %v15967_v1, %s13336_s18 }
 0x511   : > { %4640 = vrot.lane.b32.xlu1 %v19131_v11, %s13336_s18 }
 0x512   : > { %4415 = vrot.lane.b32.xlu0 %v19132_v19, %s13336_s18 }
 0x515   : > { %4642 = vrot.lane.b32.xlu1 %v16010_v26, %s13336_s18  ;;  %v19135_v26 = vrot.slane %v15994_v17, 1  ;;  %v19138_v17 = vrot.slane %v16170_v24, 7 }
 0x516   : > { %4417 = vrot.lane.b32.xlu0 %v16015_v4, %s13336_s18 }
 0x519   : > { %4644 = vrot.lane.b32.xlu1 %v19133_v63, %s13336_s18 }
 0x51a   : > { %4419 = vrot.lane.b32.xlu0 %v19134_v38, %s13336_s18 }
 0x51d   : > { %4646 = vrot.lane.b32.xlu1 %v16065_v33, %s13336_s18 }
 0x51e   : > { %4421 = vrot.lane.b32.xlu0 %v16070_v0, %s13336_s18  ;;  %v19139_v0 = vrot.slane %v16156_v60, 1 }
 0x521   : > { %4648 = vrot.lane.b32.xlu1 %v19135_v26, %s13336_s18 }
 0x522   : > { %4423 = vrot.lane.b32.xlu0 %v19136_v45, %s13336_s18 }
 0x525   : > { %4650 = vrot.lane.b32.xlu1 %v16117_v32, %s13336_s18  ;;  %v4372_v50 = vpop.permute.xlu0 %4371 }
 0x526   : > { %4425 = vrot.lane.b32.xlu0 %v16122_v12, %s13336_s18  ;;  %4468 = vst.msk [vmem:[#allocation3 + $0x60] sm:$0xfe] %vm4467_vm12, %v4372_v50  ;;  %v4599_v6 = vpop.permute.xlu1 %4598 }
 0x527   : > { %4694 = vst.msk [vmem:[#allocation3 + $0x68] sm:$0xff] %vm4469_vm13, %v4599_v6 }
 0x529   : > { %4652 = vrot.lane.b32.xlu1 %v19137_v9, %s13336_s18  ;;  %v4374_v22 = vpop.permute.xlu0 %4373 }
 0x52a   : > { %4427 = vrot.lane.b32.xlu0 %v4365_v61, %s13336_s18  ;;  %4470 = vst.msk [vmem:[#allocation3 + $0x78] sm:$0xff] %vm4469_vm13, %v4374_v22  ;;  %v4601_v1 = vpop.permute.xlu1 %4600  ;;  %v10733_v61 = vld [vmem:[%s19034_s3 + $0x618] sm:$0xff] }
 0x52b   : > { %4696 = vst.msk [vmem:[#allocation3 + $0x80] sm:$0x7f] %vm4695_vm14, %v4601_v1 }
 0x52d   : > { %4654 = vrot.lane.b32.xlu1 %v16178_v54, %s13336_s18  ;;  %v4376_v4 = vpop.permute.xlu0 %4375  ;;  %v4877_v33 = vld [vmem:[#allocation3 + $0x60] sm:$0xff] }
 0x52e   : > { %4429 = vrot.lane.b32.xlu0 %v16183_v52, %s13336_s18  ;;  %4471 = vst.msk [vmem:[#allocation3 + $0x90] sm:$0xfe] %vm4467_vm12, %v4376_v4  ;;  %v4603_v41 = vpop.permute.xlu1 %4602  ;;  %v4878_v35 = vld [vmem:[#allocation3 + $0x68] sm:$0xff] }
 0x52f   : > { %4697 = vst.msk [vmem:[#allocation3 + $0x98] sm:$0xff] %vm4469_vm13, %v4603_v41  ;;  %5181 = vmatprep.mubr.f32.mxu1 %v4878_v35 }
 0x530   : > { %5182 = vmatmul.mubr.f32.gmra.mrb[8].mxu1 %v4877_v33 }
 0x531   : > { %4656 = vrot.lane.b32.xlu1 %v4593_v8, %s13336_s18  ;;  %v4378_v52 = vpop.permute.xlu0 %4377  ;;  %v4880_v12 = vld [vmem:[#allocation3 + $0x78] sm:$0xff]  ;;  %v10732_v8 = vld [vmem:[%s19034_s3 + $0x610] sm:$0xff] }
 0x532   : > { %4431 = vrot.lane.b32.xlu0 %v19138_v17, %s13336_s18  ;;  %4472 = vst.msk [vmem:[#allocation3 + $0xa8] sm:$0xff] %vm4469_vm13, %v4378_v52  ;;  %v4605_v53 = vpop.permute.xlu1 %4604  ;;  %v4881_v32 = vld [vmem:[#allocation3 + $0x80] sm:$0xff] }
 0x533   : > { %4698 = vst.msk [vmem:[#allocation3 + $0xb0] sm:$0x7f] %vm4695_vm14, %v4605_v53  ;;  %5186 = vmatprep.mubr.f32.mxu1 %v4881_v32 }
 0x534   : > { %5187 = vmatmul.mubr.f32.gmra.mrb[10].mxu1 %v4880_v12 }
 0x535   : > { %4658 = vrot.lane.b32.xlu1 %v16221_v21, %s13336_s18  ;;  %v4380_v60 = vpop.permute.xlu0 %4379  ;;  %v12856_v21 = vpack.c.bf16 %v10733_v61, %v10732_v8 }
 0x536   : > { %4433 = vrot.lane.b32.xlu0 %v16226_v16, %s13336_s18  ;;  %4473 = vst.msk [vmem:[#allocation3 + $0xc0] sm:$0xfe] %vm4467_vm12, %v4380_v60  ;;  %v4607_v24 = vpop.permute.xlu1 %4606  ;;  %v4884_v54 = vld [vmem:[#allocation3 + $0x98] sm:$0xff]  ;;  %v4883_v16 = vld [vmem:[#allocation3 + $0x90] sm:$0xff] }
 0x537   : > { %4699 = vst.msk [vmem:[#allocation3 + $0xc8] sm:$0xff] %vm4469_vm13, %v4607_v24  ;;  %5191 = vmatprep.mubr.f32.mxu1 %v4884_v54  ;;  %7308 = vmatprep.mubr.f32.mxu0 %v4884_v54 }
 0x538   : > { %5192 = vmatmul.mubr.f32.gmra.mrb[12].mxu1 %v4883_v16  ;;  %7309 = vmatmul.mubr.f32.vlgmr.msra.gmra.mrb[64].mxu0 %v4883_v16 }
 0x539   : > { %4660 = vrot.lane.b32.xlu1 %v19139_v0, %s13336_s18  ;;  %v4382_v25 = vpop.permute.xlu0 %4381  ;;  %12855 = vmatpush3.bf16.msra.mxu0 %v16278_v36  ;;  %v4886_v2 = vld [vmem:[#allocation3 + $0xa8] sm:$0xff] }
 0x53a   : > { %4474 = vst.msk [vmem:[#allocation3 + $0xd8] sm:$0xff] %vm4469_vm13, %v4382_v25  ;;  %v4609_v43 = vpop.permute.xlu1 %4608  ;;  %v4887_v49 = vld [vmem:[#allocation3 + $0xb0] sm:$0xff]  ;;  %12857 = vmatprep.subr.bf16.mxu0 %v12856_v21 }
 0x53b   : > { %4700 = vst.msk [vmem:[#allocation3 + $0xe0] sm:$0x7f] %vm4695_vm14, %v4609_v43  ;;  %5196 = vmatprep.mubr.f32.mxu1 %v4887_v49  ;;  %7313 = vmatprep.mubr.f32.mxu0 %v4887_v49 }
 0x53c   : > { %5197 = vmatmul.mubr.f32.gmra.mrb[14].mxu1 %v4886_v2  ;;  %7314 = vmatmul.mubr.f32.gmra.mrb[66].mxu0 %v4886_v2 }
 0x53d   : > { %v4384_v7 = vpop.permute.xlu0 %4383  ;;  %12859 = vmatpush3.bf16.msra.mxu0 %v12856_v21  ;;  %v4889_v62 = vld [vmem:[#allocation3 + $0xc0] sm:$0xff] }
 0x53e   : > { %4475 = vst.msk [vmem:[#allocation3 + $0xf0] sm:$0xfe] %vm4467_vm12, %v4384_v7  ;;  %v4611_v36 = vpop.permute.xlu1 %4610  ;;  %v4890_v23 = vld [vmem:[#allocation3 + $0xc8] sm:$0xff]  ;;  %12861 = vmatprep.subr.bf16.mxu0 %v12860_v18 }
 0x53f   : > { %4701 = vst.msk [vmem:[#allocation3 + $0xf8] sm:$0xff] %vm4469_vm13, %v4611_v36  ;;  %5201 = vmatprep.mubr.f32.mxu1 %v4890_v23  ;;  %7318 = vmatprep.mubr.f32.mxu0 %v4890_v23 }
 0x540   : > { %5202 = vmatmul.mubr.f32.gmra.mrb[16].mxu1 %v4889_v62  ;;  %7319 = vmatmul.mubr.f32.gmra.mrb[68].mxu0 %v4889_v62 }
 0x541   : > { %v4386_v40 = vpop.permute.xlu0 %4385  ;;  %12863 = vmatpush3.bf16.msra.mxu0 %v12860_v18  ;;  %v4892_v34 = vld [vmem:[#allocation3 + $0xd8] sm:$0xff] }
 0x542   : > { %4476 = vst.msk [vmem:[#allocation3 + $0x108] sm:$0xff] %vm4469_vm13, %v4386_v40  ;;  %v4893_v51 = vld [vmem:[#allocation3 + $0xe0] sm:$0xff]  ;;  %12865 = vmatprep.subr.bf16.mxu0 %v12864_v10 }
 0x543   : > { %v4613_v5 = vpop.permute.xlu1 %4612  ;;  %5206 = vmatprep.mubr.f32.mxu1 %v4893_v51  ;;  %7323 = vmatprep.mubr.f32.mxu0 %v4893_v51 }
 0x544   : > { %4702 = vst.msk [vmem:[#allocation3 + $0x110] sm:$0x7f] %vm4695_vm14, %v4613_v5  ;;  %5207 = vmatmul.mubr.f32.gmra.mrb[18].mxu1 %v4892_v34  ;;  %7324 = vmatmul.mubr.f32.gmra.mrb[70].mxu0 %v4892_v34  ;;  %v16429_v5 = vld [vmem:[#allocation3 + $0xd0] sm:$0xff] }
 0x545   : > { %v4388_v44 = vpop.permute.xlu0 %4387  ;;  %12867 = vmatpush3.bf16.msra.mxu0 %v12864_v10  ;;  %v4895_v63 = vld [vmem:[#allocation3 + $0xf0] sm:$0xff] }
 0x546   : > { %4477 = vst.msk [vmem:[#allocation3 + $0x120] sm:$0xfe] %vm4467_vm12, %v4388_v44  ;;  %v4896_v19 = vld [vmem:[#allocation3 + $0xf8] sm:$0xff] }
 0x547   : > { %v4615_v11 = vpop.permute.xlu1 %4614  ;;  %5211 = vmatprep.mubr.f32.mxu1 %v4896_v19  ;;  %7328 = vmatprep.mubr.f32.mxu0 %v4896_v19  ;;  %v16440_v19 = vld [vmem:[#allocation3 + $0xe8] sm:$0xff] }
 0x548   : > { %4703 = vst.msk [vmem:[#allocation3 + $0x128] sm:$0xff] %vm4469_vm13, %v4615_v11  ;;  %5212 = vmatmul.mubr.f32.gmra.mrb[20].mxu1 %v4895_v63  ;;  %7329 = vmatmul.mubr.f32.gmra.mrb[72].mxu0 %v4895_v63  ;;  %v16442_v63 = vpop.f32.mrb[0].mxu1 }
 0x549   : > { %v4390_v38 = vpop.permute.xlu0 %4389  ;;  %v4898_v9 = vld [vmem:[#allocation3 + $0x108] sm:$0xff]  ;;  %19140 = vst [vmem:[#allocation21_spill] sm:$0xff] %v16442_v63  ;;  %v10493_v63 = vld [vmem:[%s19034_s3 + $0x198] sm:$0xff] }
 0x54a   : > { %4478 = vst.msk [vmem:[#allocation3 + $0x138] sm:$0xff] %vm4469_vm13, %v4390_v38  ;;  %v16447_v38 = vld [vmem:[#allocation3 + $0x100] sm:$0xff] }
 0x54b   : > { %v4617_v26 = vpop.permute.xlu1 %4616  ;;  %v4899_v45 = vld [vmem:[#allocation3 + $0x110] sm:$0xff] }
 0x54c   : > { %4704 = vst.msk [vmem:[#allocation3 + $0x140] sm:$0x7f] %vm4695_vm14, %v4617_v26  ;;  %5216 = vmatprep.mubr.f32.mxu1 %v4899_v45  ;;  %7333 = vmatprep.mubr.f32.mxu0 %v4899_v45  ;;  %v5165_v26 = vpop.f32.mrb[1].mxu1 }
 0x54d   : > { %5217 = vmatmul.mubr.f32.gmra.mrb[22].mxu1 %v4898_v9  ;;  %7334 = vmatmul.mubr.f32.gmra.mrb[74].mxu0 %v4898_v9  ;;  %v4392_v50 = vpop.permute.xlu0 %4391  ;;  %v4901_v1 = vld [vmem:[#allocation3 + $0x120] sm:$0xff] }
 0x54e   : > { %4479 = vst.msk [vmem:[#allocation3 + $0x150] sm:$0xfe] %vm4467_vm12, %v4392_v50 }
 0x54f   : > { %v4902_v22 = vld [vmem:[#allocation3 + $0x128] sm:$0xff] }
 0x550   : > { %5221 = vmatprep.mubr.f32.mxu1 %v4902_v22  ;;  %7338 = vmatprep.mubr.f32.mxu0 %v4902_v22  ;;  %v16458_v22 = vld [vmem:[#allocation3 + $0x118] sm:$0xff] }
 0x551   : > { %v4619_v6 = vpop.permute.xlu1 %4618  ;;  %5222 = vmatmul.mubr.f32.gmra.mrb[24].mxu1 %v4901_v1  ;;  %7339 = vmatmul.mubr.f32.gmra.mrb[76].mxu0 %v4901_v1  ;;  %v4904_v35 = vld [vmem:[#allocation3 + $0x138] sm:$0xff]  ;;  %v16460_v1 = vpop.f32.mrb[2].mxu1 }
 0x552   : > { %4705 = vst.msk [vmem:[#allocation3 + $0x158] sm:$0xff] %vm4469_vm13, %v4619_v6  ;;  %v4394_v17 = vpop.permute.xlu0 %4393 }
 0x553   : > { %4480 = vst.msk [vmem:[#allocation3 + $0x168] sm:$0xff] %vm4469_vm13, %v4394_v17  ;;  %v4905_v41 = vld [vmem:[#allocation3 + $0x140] sm:$0xff]  ;;  %v16465_v17 = vld [vmem:[#allocation3 + $0x130] sm:$0xff] }
 0x554   : > { %5226 = vmatprep.mubr.f32.mxu1 %v4905_v41  ;;  %7343 = vmatprep.mubr.f32.mxu0 %v4905_v41 }
 0x555   : > { %v4621_v4 = vpop.permute.xlu1 %4620  ;;  %5227 = vmatmul.mubr.f32.gmra.mrb[26].mxu1 %v4904_v35  ;;  %7344 = vmatmul.mubr.f32.gmra.mrb[78].mxu0 %v4904_v35  ;;  %v4907_v53 = vld [vmem:[#allocation3 + $0x150] sm:$0xff] }
 0x556   : > { %4706 = vst.msk [vmem:[#allocation3 + $0x170] sm:$0x7f] %vm4695_vm14, %v4621_v4  ;;  %v5170_v4 = vpop.f32.mrb[3].mxu1 }
 0x557   : > { %v4396_v33 = vpop.permute.xlu0 %4395  ;;  %v16549_v4 = vld [vmem:[#allocation3 + $0x220] sm:$0xff] }
 0x558   : > { %4481 = vst.msk [vmem:[#allocation3 + $0x180] sm:$0xfe] %vm4467_vm12, %v4396_v33 }
 0x559   : > { %v4623_v0 = vpop.permute.xlu1 %4622  ;;  %v4908_v52 = vld [vmem:[#allocation3 + $0x158] sm:$0xff] }
 0x55a   : > { %4707 = vst.msk [vmem:[#allocation3 + $0x188] sm:$0xff] %vm4469_vm13, %v4623_v0  ;;  %5231 = vmatprep.mubr.f32.mxu1 %v4908_v52  ;;  %7348 = vmatprep.mubr.f32.mxu0 %v4908_v52  ;;  %v4910_v61 = vld [vmem:[#allocation3 + $0x168] sm:$0xff] }
 0x55b   : > { %5232 = vmatmul.mubr.f32.gmra.mrb[28].mxu1 %v4907_v53  ;;  %7349 = vmatmul.mubr.f32.gmra.mrb[80].mxu0 %v4907_v53  ;;  %v16476_v52 = vld [vmem:[#allocation3 + $0x148] sm:$0xff]  ;;  %v16478_v53 = vpop.f32.mrb[4].mxu1 }
 0x55c   : > { %19141 = vst [vmem:[#allocation22_spill] sm:$0xff] %v16478_v53 }
 0x55d   : > { %v4911_v8 = vld [vmem:[#allocation3 + $0x170] sm:$0xff] }
 0x55e   : > { %v4398_v32 = vpop.permute.xlu0 %4397  ;;  %5236 = vmatprep.mubr.f32.mxu1 %v4911_v8  ;;  %7353 = vmatprep.mubr.f32.mxu0 %v4911_v8 }
 0x55f   : > { %4482 = vst.msk [vmem:[#allocation3 + $0x198] sm:$0xff] %vm4469_vm13, %v4398_v32  ;;  %v4625_v12 = vpop.permute.xlu1 %4624  ;;  %5237 = vmatmul.mubr.f32.gmra.mrb[30].mxu1 %v4910_v61  ;;  %7354 = vmatmul.mubr.f32.gmra.mrb[82].mxu0 %v4910_v61  ;;  %v4913_v21 = vld [vmem:[#allocation3 + $0x180] sm:$0xff] }
 0x560   : > { %4708 = vst.msk [vmem:[#allocation3 + $0x1a0] sm:$0x7f] %vm4695_vm14, %v4625_v12  ;;  %v16483_v32 = vld [vmem:[#allocation3 + $0x160] sm:$0xff]  ;;  %v5175_v12 = vpop.f32.mrb[5].mxu1 }
 0x561   : > { %v4914_v54 = vld [vmem:[#allocation3 + $0x188] sm:$0xff] }
 0x562   : > { %v4400_v60 = vpop.permute.xlu0 %4399  ;;  %5241 = vmatprep.mubr.f32.mxu1 %v4914_v54  ;;  %7358 = vmatprep.mubr.f32.mxu0 %v4914_v54  ;;  %v16494_v54 = vld [vmem:[#allocation3 + $0x178] sm:$0xff] }
 0x563   : > { %4483 = vst.msk [vmem:[#allocation3 + $0x1b0] sm:$0xfe] %vm4467_vm12, %v4400_v60  ;;  %v4627_v24 = vpop.permute.xlu1 %4626  ;;  %5242 = vmatmul.mubr.f32.gmra.mrb[32].mxu1 %v4913_v21  ;;  %7359 = vmatmul.mubr.f32.gmra.mrb[84].mxu0 %v4913_v21  ;;  %v16496_v21 = vpop.f32.mrb[6].mxu1 }
 0x564   : > { %4709 = vst.msk [vmem:[#allocation3 + $0x1b8] sm:$0xff] %vm4469_vm13, %v4627_v24  ;;  %19142 = vst [vmem:[#allocation23_spill] sm:$0xff] %v16496_v21  ;;  %v10490_v21 = vld [vmem:[%s19034_s3 + $0x180] sm:$0xff] }
 0x566   : > { %v4402_v16 = vpop.permute.xlu0 %4401  ;;  %v4916_v25 = vld [vmem:[#allocation3 + $0x198] sm:$0xff] }
 0x567   : > { %4484 = vst.msk [vmem:[#allocation3 + $0x1c8] sm:$0xff] %vm4469_vm13, %v4402_v16  ;;  %v4917_v47 = vld [vmem:[#allocation3 + $0x1a0] sm:$0xff]  ;;  %v16501_v16 = vld [vmem:[#allocation3 + $0x190] sm:$0xff] }
 0x568   : > { %5246 = vmatprep.mubr.f32.mxu1 %v4917_v47  ;;  %7363 = vmatprep.mubr.f32.mxu0 %v4917_v47 }
 0x569   : > { %5247 = vmatmul.mubr.f32.gmra.mrb[34].mxu1 %v4916_v25  ;;  %7364 = vmatmul.mubr.f32.gmra.mrb[86].mxu0 %v4916_v25 }
 0x56a   : > { %v4919_v2 = vld [vmem:[#allocation3 + $0x1b0] sm:$0xff] }
 0x56b   : > { %v4629_v59 = vpop.permute.xlu1 %4628  ;;  %v4920_v18 = vld [vmem:[#allocation3 + $0x1b8] sm:$0xff] }
 0x56c   : > { %4710 = vst.msk [vmem:[#allocation3 + $0x1d0] sm:$0x7f] %vm4695_vm14, %v4629_v59  ;;  %v4404_v43 = vpop.permute.xlu0 %4403  ;;  %5251 = vmatprep.mubr.f32.mxu1 %v4920_v18  ;;  %7368 = vmatprep.mubr.f32.mxu0 %v4920_v18  ;;  %v5180_v59 = vpop.f32.mrb[7].mxu1  ;;  %v16512_v18 = vld [vmem:[#allocation3 + $0x1a8] sm:$0xff] }
 0x56d   : > { %4485 = vst.msk [vmem:[#allocation3 + $0x1e0] sm:$0xfe] %vm4467_vm12, %v4404_v43  ;;  %5252 = vmatmul.mubr.f32.gmra.mrb[36].mxu1 %v4919_v2  ;;  %7369 = vmatmul.mubr.f32.gmra.mrb[88].mxu0 %v4919_v2  ;;  %v16517_v2 = vld [vmem:[#allocation3 + $0x1c0] sm:$0xff] }
 0x56e   : > { %v4922_v36 = vld [vmem:[#allocation3 + $0x1c8] sm:$0xff] }
 0x56f   : > { %v4631_v49 = vpop.permute.xlu1 %4630 }
 0x570   : > { %4711 = vst.msk [vmem:[#allocation3 + $0x1e8] sm:$0xff] %vm4469_vm13, %v4631_v49  ;;  %v4406_v13 = vpop.permute.xlu0 %4405 }
 0x571   : > { %4486 = vst.msk [vmem:[#allocation3 + $0x1f8] sm:$0xff] %vm4469_vm13, %v4406_v13 }
 0x573   : > { %v4633_v56 = vpop.permute.xlu1 %4632  ;;  %v4923_v7 = vld [vmem:[#allocation3 + $0x1d0] sm:$0xff] }
 0x574   : > { %4712 = vst.msk [vmem:[#allocation3 + $0x200] sm:$0x7f] %vm4695_vm14, %v4633_v56  ;;  %5256 = vmatprep.mubr.f32.mxu1 %v4923_v7  ;;  %7373 = vmatprep.mubr.f32.mxu0 %v4923_v7  ;;  %v4408_v23 = vpop.permute.xlu0 %4407  ;;  %v16425_v40 = vld [vmem:[#allocation3 + $0x1e0] sm:$0xff] }
 0x575   : > { %5257 = vmatmul.mubr.f32.gmra.mrb[38].mxu1 %v4922_v36  ;;  %7374 = vmatmul.mubr.f32.gmra.mrb[90].mxu0 %v4922_v36  ;;  %4487 = vst.msk [vmem:[#allocation3 + $0x210] sm:$0xfe] %vm4467_vm12, %v4408_v23  ;;  %v16528_v23 = vld [vmem:[#allocation3 + $0x1d8] sm:$0xff] }
 0x577   : > { %v4635_v10 = vpop.permute.xlu1 %4634  ;;  %v16420_v62 = vld [vmem:[#allocation3 + $0x1e8] sm:$0xff] }
 0x578   : > { %4713 = vst.msk [vmem:[#allocation3 + $0x218] sm:$0xff] %vm4469_vm13, %v4635_v10  ;;  %5261 = vmatprep.mubr.f32.mxu1 %v16420_v62  ;;  %7378 = vmatprep.mubr.f32.mxu0 %v16420_v62  ;;  %v4410_v51 = vpop.permute.xlu0 %4409  ;;  %v16438_v11 = vld [vmem:[#allocation3 + $0x1f8] sm:$0xff]  ;;  %v16533_v10 = vld [vmem:[#allocation3 + $0x1f0] sm:$0xff] }
 0x579   : > { %5262 = vmatmul.mubr.f32.gmra.mrb[40].mxu1 %v16425_v40  ;;  %7379 = vmatmul.mubr.f32.gmra.mrb[92].mxu0 %v16425_v40  ;;  %4488 = vst.msk [vmem:[#allocation3 + $0x228] sm:$0xff] %vm4469_vm13, %v4410_v51 }
 0x57a   : > { %12186 = vmatprep.mubr.msk.f32.mxu0 %vm4118_vm5, %v16429_v5 }
 0x57b   : > { %v4637_v34 = vpop.permute.xlu1 %4636  ;;  %v16434_v44 = vld [vmem:[#allocation3 + $0x200] sm:$0xff] }
 0x57c   : > { %4714 = vst.msk [vmem:[#allocation3 + $0x230] sm:$0x7f] %vm4695_vm14, %v4637_v34  ;;  %5266 = vmatprep.mubr.f32.mxu1 %v16434_v44  ;;  %v4412_v45 = vpop.permute.xlu0 %4411  ;;  %v16456_v6 = vld [vmem:[#allocation3 + $0x210] sm:$0xff] }
 0x57d   : > { %5267 = vmatmul.mubr.f32.gmra.mrb[42].mxu1 %v16438_v11  ;;  %12187 = vmatmul.mubr.msk.f32.vlgmr.msra.gmra.mrb[94].mxu0 %vm4118_vm5, %v16440_v19  ;;  %4489 = vst.msk [vmem:[#allocation3 + $0x240] sm:$0xfe] %vm4467_vm12, %v4412_v45 }
 0x57e   : > { %12189 = vmatprep.mubr.msk.f32.mxu0 %vm4118_vm5, %v16447_v38 }
 0x57f   : > { %v4639_v9 = vpop.permute.xlu1 %4638  ;;  %v16452_v50 = vld [vmem:[#allocation3 + $0x218] sm:$0xff] }
 0x580   : > { %4715 = vst.msk [vmem:[#allocation3 + $0x248] sm:$0xff] %vm4469_vm13, %v4639_v9  ;;  %5271 = vmatprep.mubr.f32.mxu1 %v16452_v50  ;;  %v4414_v41 = vpop.permute.xlu0 %4413  ;;  %v16474_v0 = vld [vmem:[#allocation3 + $0x228] sm:$0xff] }
 0x581   : > { %5272 = vmatmul.mubr.f32.gmra.mrb[44].mxu1 %v16456_v6  ;;  %12190 = vmatmul.mubr.msk.f32.gmra.mrb[96].mxu0 %vm4118_vm5, %v16458_v22  ;;  %4490 = vst.msk [vmem:[#allocation3 + $0x258] sm:$0xff] %vm4469_vm13, %v4414_v41  ;;  %v16544_v9 = vld [vmem:[#allocation3 + $0x208] sm:$0xff] }
 0x582   : > { %12192 = vmatprep.mubr.msk.f32.mxu0 %vm4118_vm5, %v16465_v17 }
 0x583   : > { %v4641_v35 = vpop.permute.xlu1 %4640  ;;  %v16470_v33 = vld [vmem:[#allocation3 + $0x230] sm:$0xff] }
 0x584   : > { %4716 = vst.msk [vmem:[#allocation3 + $0x260] sm:$0x7f] %vm4695_vm14, %v4641_v35  ;;  %5276 = vmatprep.mubr.f32.mxu1 %v16470_v33  ;;  %v4416_v8 = vpop.permute.xlu0 %4415  ;;  %v16492_v24 = vld [vmem:[#allocation3 + $0x240] sm:$0xff] }
 0x585   : > { %5277 = vmatmul.mubr.f32.gmra.mrb[46].mxu1 %v16474_v0  ;;  %12193 = vmatmul.mubr.msk.f32.gmra.mrb[98].mxu0 %vm4118_vm5, %v16476_v52  ;;  %4491 = vst.msk [vmem:[#allocation3 + $0x270] sm:$0xfe] %vm4467_vm12, %v4416_v8 }
 0x586   : > { %12195 = vmatprep.mubr.msk.f32.mxu0 %vm4118_vm5, %v16483_v32 }
 0x587   : > { %v4643_v61 = vpop.permute.xlu1 %4642  ;;  %v16488_v60 = vld [vmem:[#allocation3 + $0x248] sm:$0xff] }
 0x588   : > { %4717 = vst.msk [vmem:[#allocation3 + $0x278] sm:$0xff] %vm4469_vm13, %v4643_v61  ;;  %5281 = vmatprep.mubr.f32.mxu1 %v16488_v60  ;;  %v4418_v47 = vpop.permute.xlu0 %4417  ;;  %v16510_v49 = vld [vmem:[#allocation3 + $0x258] sm:$0xff] }
 0x589   : > { %5282 = vmatmul.mubr.f32.gmra.mrb[48].mxu1 %v16492_v24  ;;  %12196 = vmatmul.mubr.msk.f32.gmra.mrb[100].mxu0 %vm4118_vm5, %v16494_v54  ;;  %4492 = vst.msk [vmem:[#allocation3 + $0x288] sm:$0xff] %vm4469_vm13, %v4418_v47  ;;  %v16560_v61 = vld [vmem:[#allocation3 + $0x238] sm:$0xff]  ;;  %v16567_v47 = vld [vmem:[#allocation3 + $0x250] sm:$0xff] }
 0x58a   : > { %12198 = vmatprep.mubr.msk.f32.mxu0 %vm4118_vm5, %v16501_v16 }
 0x58b   : > { %v4645_v25 = vpop.permute.xlu1 %4644  ;;  %v16506_v43 = vld [vmem:[#allocation3 + $0x260] sm:$0xff] }
 0x58c   : > { %4718 = vst.msk [vmem:[#allocation3 + $0x290] sm:$0x7f] %vm4695_vm14, %v4645_v25  ;;  %5286 = vmatprep.mubr.f32.mxu1 %v16506_v43  ;;  %v4420_v13 = vpop.permute.xlu0 %4419  ;;  %v16526_v36 = vld [vmem:[#allocation3 + $0x270] sm:$0xff] }
 0x58d   : > { %5287 = vmatmul.mubr.f32.gmra.mrb[50].mxu1 %v16510_v49  ;;  %12199 = vmatmul.mubr.msk.f32.gmra.mrb[102].mxu0 %vm4118_vm5, %v16512_v18  ;;  %4493 = vst.msk [vmem:[#allocation3 + $0x2a0] sm:$0xfe] %vm4467_vm12, %v4420_v13 }
 0x58e   : > { %12201 = vmatprep.mubr.msk.f32.mxu0 %vm4118_vm5, %v16517_v2 }
 0x58f   : > { %v4647_v56 = vpop.permute.xlu1 %4646  ;;  %v16522_v7 = vld [vmem:[#allocation3 + $0x278] sm:$0xff] }
 0x590   : > { %4719 = vst.msk [vmem:[#allocation3 + $0x2a8] sm:$0xff] %vm4469_vm13, %v4647_v56  ;;  %5291 = vmatprep.mubr.f32.mxu1 %v16522_v7  ;;  %v4422_v51 = vpop.permute.xlu0 %4421  ;;  %v16542_v45 = vld [vmem:[#allocation3 + $0x288] sm:$0xff]  ;;  %v16563_v59 = vpop.f32.mrb[32].mxu0 }
 0x591   : > { %5292 = vmatmul.mubr.f32.gmra.mrb[52].mxu1 %v16526_v36  ;;  %12202 = vmatmul.mubr.msk.f32.gmra.mrb[104].mxu0 %vm4118_vm5, %v16528_v23  ;;  %4494 = vst.msk [vmem:[#allocation3 + $0x2b8] sm:$0xff] %vm4469_vm13, %v4422_v51  ;;  %19143 = vst [vmem:[#allocation24_spill] sm:$0xff] %v16563_v59  ;;  %v16569_v13 = vpop.f32.mrb[33].mxu0 }
 0x592   : > { %12204 = vmatprep.mubr.msk.f32.mxu0 %vm4118_vm5, %v16533_v10  ;;  %19144 = vst [vmem:[#allocation25_spill] sm:$0xff] %v16569_v13 }
 0x593   : > { %v4649_v34 = vpop.permute.xlu1 %4648  ;;  %v16538_v26 = vld [vmem:[#allocation3 + $0x290] sm:$0xff] }
 0x594   : > { %4720 = vst.msk [vmem:[#allocation3 + $0x2c0] sm:$0x7f] %vm4695_vm14, %v4649_v34  ;;  %5296 = vmatprep.mubr.f32.mxu1 %v16538_v26  ;;  %v4424_v41 = vpop.permute.xlu0 %4423  ;;  %v16558_v8 = vld [vmem:[#allocation3 + $0x2a0] sm:$0xff] }
 0x595   : > { %5297 = vmatmul.mubr.f32.gmra.mrb[54].mxu1 %v16542_v45  ;;  %12205 = vmatmul.mubr.msk.f32.gmra.mrb[106].mxu0 %vm4118_vm5, %v16544_v9  ;;  %4495 = vst.msk [vmem:[#allocation3 + $0x2d0] sm:$0xfe] %vm4467_vm12, %v4424_v41  ;;  %v16580_v41 = vld [vmem:[#allocation3 + $0x268] sm:$0xff] }
 0x596   : > { %12207 = vmatprep.mubr.msk.f32.mxu0 %vm4118_vm5, %v16549_v4 }
 0x597   : > { %v4651_v35 = vpop.permute.xlu1 %4650  ;;  %v16554_v12 = vld [vmem:[#allocation3 + $0x2a8] sm:$0xff] }
 0x598   : > { %4721 = vst.msk [vmem:[#allocation3 + $0x2d8] sm:$0xff] %vm4469_vm13, %v4651_v35  ;;  %5301 = vmatprep.mubr.f32.mxu1 %v16554_v12  ;;  %v4426_v25 = vpop.permute.xlu0 %4425  ;;  %v16578_v34 = vld [vmem:[#allocation3 + $0x2b8] sm:$0xff]  ;;  %v16583_v35 = vpop.f32.mrb[34].mxu0 }
 0x599   : > { %5302 = vmatmul.mubr.f32.gmra.mrb[56].mxu1 %v16558_v8  ;;  %12208 = vmatmul.mubr.msk.f32.gmra.mrb[108].mxu0 %vm4118_vm5, %v16560_v61  ;;  %4496 = vst.msk [vmem:[#allocation3 + $0x2e8] sm:$0xff] %vm4469_vm13, %v4426_v25  ;;  %19145 = vst [vmem:[#allocation26_spill] sm:$0xff] %v16583_v35  ;;  %v16589_v59 = vpop.f32.mrb[35].mxu0 }
 0x59a   : > { %12210 = vmatprep.mubr.msk.f32.mxu0 %vm4118_vm5, %v16567_v47  ;;  %19146 = vst [vmem:[#allocation27_spill] sm:$0xff] %v16589_v59  ;;  %v16603_v27 = vpop.f32.mrb[36].mxu0  ;;  %v16607_v59 = vld [vmem:[#allocation3 + $0x2b0] sm:$0xff] }
 0x59b   : > { %v4653_v56 = vpop.permute.xlu1 %4652  ;;  %v16574_v51 = vld [vmem:[#allocation3 + $0x2c0] sm:$0xff]  ;;  %19147 = vst [vmem:[#allocation28_spill] sm:$0xff] %v16603_v27  ;;  %v16609_v46 = vpop.f32.mrb[37].mxu0 }
 0x59c   : > { %4722 = vst.msk [vmem:[#allocation3 + $0x2f0] sm:$0x7f] %vm4695_vm14, %v4653_v56  ;;  %5306 = vmatprep.mubr.f32.mxu1 %v16574_v51  ;;  %v4428_v25 = vpop.permute.xlu0 %4427  ;;  %v16598_v35 = vld [vmem:[#allocation3 + $0x2d0] sm:$0xff]  ;;  %19148 = vst [vmem:[#allocation29_spill] sm:$0xff] %v16609_v46  ;;  %v10482_v27 = vld [vmem:[%s19034_s3 + $0x140] sm:$0xff] }
 0x59d   : > { %5307 = vmatmul.mubr.f32.gmra.mrb[58].mxu1 %v16578_v34  ;;  %12211 = vmatmul.mubr.msk.f32.gmra.mrb[110].mxu0 %vm4118_vm5, %v16580_v41  ;;  %4497 = vst.msk [vmem:[#allocation3 + $0x300] sm:$0xfe] %vm4467_vm12, %v4428_v25  ;;  %v12613_v39 = vpack.c.bf16 %v10483_v57, %v10482_v27  ;;  %v7801_v27 = vld [vmem:[#allocation3 + $0x310] sm:$0xff] }
 0x59e   : > { %12213 = vmatprep.mubr.msk.f32.mxu0 %vm4118_vm5, %v16587_v15 }
 0x59f   : > { %v4655_v56 = vpop.permute.xlu1 %4654  ;;  %v16594_v13 = vld [vmem:[#allocation3 + $0x2d8] sm:$0xff] }
 0x5a0   : > { %4723 = vst.msk [vmem:[#allocation3 + $0x308] sm:$0xff] %vm4469_vm13, %v4655_v56  ;;  %5311 = vmatprep.mubr.f32.mxu1 %v16594_v13  ;;  %v4430_v25 = vpop.permute.xlu0 %4429  ;;  %v4867_v56 = vld [vmem:[#allocation3 + $0x10] sm:$0xff]  ;;  %v16624_v46 = vld [vmem:[#allocation3 + $0x2e8] sm:$0xff] }
 0x5a1   : > { %5312 = vmatmul.mubr.f32.gmra.mrb[60].mxu1 %v16598_v35  ;;  %12214 = vmatmul.mubr.msk.f32.gmra.mrb[112].mxu0 %vm4118_vm5, %v16600_v3  ;;  %4498 = vst.msk [vmem:[#allocation3 + $0x318] sm:$0xff] %vm4469_vm13, %v4430_v25  ;;  %v16629_v25 = vpop.f32.mrb[38].mxu0 }
 0x5a2   : > { %12216 = vmatprep.mubr.msk.f32.mxu0 %vm4118_vm5, %v16607_v59  ;;  %19149 = vst [vmem:[#allocation30_spill] sm:$0xff] %v16629_v25  ;;  %v16635_v30 = vpop.f32.mrb[39].mxu0  ;;  %v10484_v25 = vld [vmem:[%s19034_s3 + $0x150] sm:$0xff] }
 0x5a3   : > { %v4657_v58 = vpop.permute.xlu1 %4656  ;;  %v16614_v42 = vld [vmem:[#allocation3 + $0x2f0] sm:$0xff]  ;;  %19150 = vst [vmem:[#allocation31_spill] sm:$0xff] %v16635_v30  ;;  %v16648_v30 = vld [vmem:[#allocation3 + $0x2f8] sm:$0xff]  ;;  %v16653_v57 = vpop.f32.mrb[40].mxu0 }
 0x5a4   : > { %4724 = vst.msk [vmem:[#allocation3 + $0x320] sm:$0x7f] %vm4695_vm14, %v4657_v58  ;;  %5316 = vmatprep.mubr.f32.mxu1 %v16614_v42  ;;  %v4432_v58 = vpop.permute.xlu0 %4431  ;;  %19151 = vst [vmem:[#allocation32_spill] sm:$0xff] %v16653_v57  ;;  %v7804_v57 = vld [vmem:[#allocation3 + $0x328] sm:$0xff] }
 0x5a5   : > { %5317 = vmatmul.mubr.f32.gmra.mrb[62].mxu1 %v16624_v46  ;;  %12217 = vmatmul.mubr.msk.f32.gmra.mrb[114].mxu0 %vm4118_vm5, %v16626_v48  ;;  %4499 = vst.msk [vmem:[#allocation3 + $0x330] sm:$0xfe] %vm4467_vm12, %v4432_v58 }
 0x5a6   : > { %12219 = vmatprep.mubr.msk.f32.mxu0 %vm4118_vm5, %v16633_v29  ;;  %11930 = vmatprep.mubr.msk.f32.mxu1 %vm4118_vm5, %v4867_v56  ;;  %v16657_v56 = vpop.f32.mrb[41].mxu0 }
 0x5a7   : > { %v4659_v14 = vpop.permute.xlu1 %4658  ;;  %19152 = vst [vmem:[#allocation33_spill] sm:$0xff] %v16657_v56  ;;  %v7807_v56 = vld [vmem:[#allocation3 + $0x340] sm:$0xff] }
 0x5a8   : > { %4725 = vst.msk [vmem:[#allocation3 + $0x338] sm:$0xff] %vm4469_vm13, %v4659_v14  ;;  %v4434_v58 = vpop.permute.xlu0 %4433  ;;  %v12616_v14 = vpack.c.bf16 %v10485_v55, %v10484_v25  ;;  %v16675_v55 = vpop.f32.mrb[42].mxu0  ;;  %v16678_v25 = vld [vmem:[#allocation3 + $0x70] sm:$0xff] }
 0x5a9   : > { %11931 = vmatmul.mubr.msk.f32.vlgmr.msra.gmra.mrb[64].mxu1 %vm4118_vm5, %v4870_v28  ;;  %12220 = vmatmul.mubr.msk.f32.gmra.mrb[116].mxu0 %vm4118_vm5, %v16648_v30  ;;  %4500 = vst.msk [vmem:[#allocation3 + $0x348] sm:$0xff] %vm4469_vm13, %v4434_v58  ;;  %v19153_v28 = vmov 0.0|0.0   ;;  %19154 = vst [vmem:[#allocation34_spill] sm:$0xff] %v16675_v55  ;;  %v16682_v58 = vpop.f32.mrb[43].mxu0  ;;  %v7810_v55 = vld [vmem:[#allocation3 + $0x358] sm:$0xff] }
 0x5aa   : > { %12614 = vmatpush1.bf16.msra.mxu1 %v12613_v39  ;;  %12222 = vmatprep.mubr.msk.f32.mxu0 %vm4118_vm5, %v7801_v27  ;;  %v10486_v39 = vld [vmem:[%s19034_s3 + $0x160] sm:$0xff]  ;;  %v10487_v27 = vld [vmem:[%s19034_s3 + $0x168] sm:$0xff]  ;;  %19155 = vst [vmem:[#allocation35_spill] sm:$0xff] %v16682_v58 }
 0x5ab   : > { %v4661_v37 = vpop.permute.xlu1 %4660  ;;  %11933 = vmatprep.mubr.msk.f32.mxu1 %vm4118_vm5, %v16650_v20  ;;  %12615 = vmatprep.subr.bf16.mxu1 %v19153_v28  ;;  %v12619_v53 = vpack.c.bf16 %v10487_v27, %v10486_v39 }
 0x5ac   : > { %4726 = vst.msk [vmem:[#allocation3 + $0x350] sm:$0x7f] %vm4695_vm14, %v4661_v37  ;;  %v10488_v37 = vld [vmem:[%s19034_s3 + $0x170] sm:$0xff]  ;;  %v16696_v58 = vpop.f32.mrb[44].mxu0 }
 0x5ad   : > { %11934 = vmatmul.mubr.msk.f32.gmra.mrb[66].mxu1 %vm4118_vm5, %v16660_v31  ;;  %12223 = vmatmul.mubr.msk.f32.gmra.mrb[118].mxu0 %vm4118_vm5, %v7804_v57  ;;  %v10489_v57 = vld [vmem:[%s19034_s3 + $0x178] sm:$0xff]  ;;  %19156 = vst [vmem:[#allocation36_spill] sm:$0xff] %v16696_v58  ;;  %v16703_v39 = vpop.f32.mrb[45].mxu0  ;;  %v10491_v58 = vld [vmem:[%s19034_s3 + $0x188] sm:$0xff] }
 0x5ae   : > { %12617 = vmatpush1.bf16.msra.mxu1 %v12616_v14  ;;  %11936 = vmatprep.mubr.msk.f32.mxu1 %vm4118_vm5, %v16678_v25  ;;  %v16692_v14 = vld [vmem:[#allocation3 + $0x88] sm:$0xff]  ;;  %19157 = vst [vmem:[#allocation37_spill] sm:$0xff] %v16703_v39  ;;  %v12622_v27 = vpack.c.bf16 %v10489_v57, %v10488_v37  ;;  %v12625_v57 = vpack.c.bf16 %v10491_v58, %v10490_v21  ;;  %v10492_v39 = vld [vmem:[%s19034_s3 + $0x190] sm:$0xff]  ;;  %v10494_v58 = vld [vmem:[%s19034_s3 + $0x1a0] sm:$0xff] }
 0x5af   : > { %12225 = vmatprep.mubr.msk.f32.mxu0 %vm4118_vm5, %v7807_v56  ;;  %12618 = vmatprep.subr.bf16.mxu1 %v19153_v28  ;;  %v16699_v56 = vld [vmem:[#allocation3 + $0xa0] sm:$0xff]  ;;  %v12628_v21 = vpack.c.bf16 %v10493_v63, %v10492_v39  ;;  %v10496_v39 = vld [vmem:[%s19034_s3 + $0x1b0] sm:$0xff] }
 0x5b1   : > { %11937 = vmatmul.mubr.msk.f32.gmra.mrb[68].mxu1 %vm4118_vm5, %v16692_v14  ;;  %12226 = vmatmul.mubr.msk.f32.gmra.mrb[120].mxu0 %vm4118_vm5, %v7810_v55  ;;  %v16712_v55 = vld [vmem:[#allocation3 + $0xb8] sm:$0xff] }
 0x5b2   : > { %12620 = vmatpush1.bf16.msra.mxu1 %v12619_v53  ;;  %11939 = vmatprep.mubr.msk.f32.mxu1 %vm4118_vm5, %v16699_v56  ;;  %v16716_v53 = vpop.f32.mrb[46].mxu0 }
 0x5b3   : > { %12621 = vmatprep.subr.bf16.mxu1 %v19153_v28  ;;  %19158 = vst [vmem:[#allocation38_spill] sm:$0xff] %v16716_v53  ;;  %v16720_v37 = vpop.f32.mrb[47].mxu0  ;;  %v10495_v53 = vld [vmem:[%s19034_s3 + $0x1a8] sm:$0xff] }
 0x5b4   : > { %19159 = vst [vmem:[#allocation39_spill] sm:$0xff] %v16720_v37  ;;  %v16981_v37 = vld [vmem:[#allocation3 + $0x170] sm:$0xff] }
 0x5b5   : > { %11940 = vmatmul.mubr.msk.f32.gmra.mrb[70].mxu1 %vm4118_vm5, %v16712_v55  ;;  %19186 = vst [vmem:[#allocation66_spill] sm:$0xff] %v16981_v37 }
 0x5b6   : > { %12623 = vmatpush1.bf16.msra.mxu1 %v12622_v27  ;;  %11942 = vmatprep.mubr.msk.f32.mxu1 %vm4118_vm5, %v16429_v5  ;;  %v16731_v27 = vpop.f32.mrb[48].mxu0 }
 0x5b7   : > { %12624 = vmatprep.subr.bf16.mxu1 %v19153_v28  ;;  %19160 = vst [vmem:[#allocation40_spill] sm:$0xff] %v16731_v27  ;;  %v16735_v5 = vpop.f32.mrb[49].mxu0  ;;  %v16978_v27 = vld [vmem:[#allocation3 + $0x150] sm:$0xff] }
 0x5b8   : > { %19161 = vst [vmem:[#allocation41_spill] sm:$0xff] %v16735_v5  ;;  %19185 = vst [vmem:[#allocation65_spill] sm:$0xff] %v16978_v27 }
 0x5b9   : > { %11943 = vmatmul.mubr.msk.f32.gmra.mrb[72].mxu1 %vm4118_vm5, %v16440_v19  ;;  %v16746_v19 = vpop.f32.mrb[50].mxu0 }
 0x5ba   : > { %12626 = vmatpush1.bf16.msra.mxu1 %v12625_v57  ;;  %11945 = vmatprep.mubr.msk.f32.mxu1 %vm4118_vm5, %v16447_v38  ;;  %19162 = vst [vmem:[#allocation42_spill] sm:$0xff] %v16746_v19  ;;  %v16750_v63 = vpop.f32.mrb[51].mxu0  ;;  %v12631_v38 = vpack.c.bf16 %v10495_v53, %v10494_v58  ;;  %v10497_v57 = vld [vmem:[%s19034_s3 + $0x1b8] sm:$0xff]  ;;  %v10499_v58 = vld [vmem:[%s19034_s3 + $0x1c8] sm:$0xff] }
 0x5bb   : > { %12627 = vmatprep.subr.bf16.mxu1 %v19153_v28  ;;  %19163 = vst [vmem:[#allocation43_spill] sm:$0xff] %v16750_v63  ;;  %v12634_v53 = vpack.c.bf16 %v10497_v57, %v10496_v39  ;;  %v10500_v39 = vld [vmem:[%s19034_s3 + $0x1d0] sm:$0xff]  ;;  %v10501_v57 = vld [vmem:[%s19034_s3 + $0x1d8] sm:$0xff] }
 0x5bc   : > { %v16971_v19 = vld [vmem:[#allocation3 + $0x158] sm:$0xff] }
 0x5bd   : > { %11946 = vmatmul.mubr.msk.f32.gmra.mrb[74].mxu1 %vm4118_vm5, %v16458_v22  ;;  %v16761_v22 = vpop.f32.mrb[52].mxu0  ;;  %19183 = vst [vmem:[#allocation63_spill] sm:$0xff] %v16971_v19 }
 0x5be   : > { %12629 = vmatpush1.bf16.msra.mxu1 %v12628_v21  ;;  %11948 = vmatprep.mubr.msk.f32.mxu1 %vm4118_vm5, %v16465_v17  ;;  %19164 = vst [vmem:[#allocation44_spill] sm:$0xff] %v16761_v22  ;;  %v16765_v17 = vpop.f32.mrb[53].mxu0  ;;  %v10498_v21 = vld [vmem:[%s19034_s3 + $0x1c0] sm:$0xff] }
 0x5bf   : > { %12630 = vmatprep.subr.bf16.mxu1 %v19153_v28  ;;  %19165 = vst [vmem:[#allocation45_spill] sm:$0xff] %v16765_v17 }
 0x5c1   : > { %11949 = vmatmul.mubr.msk.f32.gmra.mrb[76].mxu1 %vm4118_vm5, %v16476_v52 }
 0x5c2   : > { %12632 = vmatpush1.bf16.msra.mxu1 %v12631_v38  ;;  %11951 = vmatprep.mubr.msk.f32.mxu1 %vm4118_vm5, %v16483_v32  ;;  %v16776_v52 = vpop.f32.mrb[54].mxu0  ;;  %v12637_v38 = vpack.c.bf16 %v10499_v58, %v10498_v21  ;;  %v10502_v21 = vld [vmem:[%s19034_s3 + $0x1e0] sm:$0xff]  ;;  %v10503_v58 = vld [vmem:[%s19034_s3 + $0x1e8] sm:$0xff] }
 0x5c3   : > { %12633 = vmatprep.subr.bf16.mxu1 %v19153_v28  ;;  %19166 = vst [vmem:[#allocation46_spill] sm:$0xff] %v16776_v52  ;;  %v16780_v32 = vpop.f32.mrb[55].mxu0 }
 0x5c4   : > { %19167 = vst [vmem:[#allocation47_spill] sm:$0xff] %v16780_v32  ;;  %v16968_v32 = vld [vmem:[#allocation3 + $0x138] sm:$0xff] }
 0x5c5   : > { %11952 = vmatmul.mubr.msk.f32.gmra.mrb[78].mxu1 %vm4118_vm5, %v16494_v54  ;;  %19182 = vst [vmem:[#allocation62_spill] sm:$0xff] %v16968_v32 }
 0x5c6   : > { %12635 = vmatpush1.bf16.msra.mxu1 %v12634_v53  ;;  %11954 = vmatprep.mubr.msk.f32.mxu1 %vm4118_vm5, %v16501_v16  ;;  %v12640_v53 = vpack.c.bf16 %v10501_v57, %v10500_v39  ;;  %v10504_v39 = vld [vmem:[%s19034_s3 + $0x1f0] sm:$0xff]  ;;  %v10505_v57 = vld [vmem:[%s19034_s3 + $0x1f8] sm:$0xff] }
 0x5c7   : > { %12636 = vmatprep.subr.bf16.mxu1 %v19153_v28  ;;  %v16791_v54 = vpop.f32.mrb[56].mxu0 }
 0x5c8   : > { %19168 = vst [vmem:[#allocation48_spill] sm:$0xff] %v16791_v54  ;;  %v16795_v16 = vpop.f32.mrb[57].mxu0 }
 0x5c9   : > { %11955 = vmatmul.mubr.msk.f32.gmra.mrb[80].mxu1 %vm4118_vm5, %v16512_v18  ;;  %19169 = vst [vmem:[#allocation49_spill] sm:$0xff] %v16795_v16  ;;  %v16961_v16 = vld [vmem:[#allocation3 + $0x140] sm:$0xff] }
 0x5ca   : > { %12638 = vmatpush1.bf16.msra.mxu1 %v12637_v38  ;;  %11957 = vmatprep.mubr.msk.f32.mxu1 %vm4118_vm5, %v16517_v2  ;;  %v12643_v38 = vpack.c.bf16 %v10503_v58, %v10502_v21  ;;  %v10506_v21 = vld [vmem:[%s19034_s3 + $0x200] sm:$0xff]  ;;  %v10507_v58 = vld [vmem:[%s19034_s3 + $0x208] sm:$0xff]  ;;  %19180 = vst [vmem:[#allocation60_spill] sm:$0xff] %v16961_v16 }
 0x5cb   : > { %12639 = vmatprep.subr.bf16.mxu1 %v19153_v28  ;;  %v16806_v18 = vpop.f32.mrb[58].mxu0 }
 0x5cc   : > { %19170 = vst [vmem:[#allocation50_spill] sm:$0xff] %v16806_v18  ;;  %v16810_v2 = vpop.f32.mrb[59].mxu0 }
 0x5cd   : > { %11958 = vmatmul.mubr.msk.f32.gmra.mrb[82].mxu1 %vm4118_vm5, %v16528_v23  ;;  %19171 = vst [vmem:[#allocation51_spill] sm:$0xff] %v16810_v2  ;;  %v16958_v2 = vld [vmem:[#allocation3 + $0x120] sm:$0xff] }
 0x5ce   : > { %12641 = vmatpush1.bf16.msra.mxu1 %v12640_v53  ;;  %11960 = vmatprep.mubr.msk.f32.mxu1 %vm4118_vm5, %v16533_v10  ;;  %v12646_v53 = vpack.c.bf16 %v10505_v57, %v10504_v39  ;;  %v10508_v39 = vld [vmem:[%s19034_s3 + $0x210] sm:$0xff]  ;;  %v10509_v57 = vld [vmem:[%s19034_s3 + $0x218] sm:$0xff]  ;;  %19179 = vst [vmem:[#allocation59_spill] sm:$0xff] %v16958_v2 }
 0x5cf   : > { %12642 = vmatprep.subr.bf16.mxu1 %v19153_v28 }
 0x5d0   : > { %v16821_v23 = vpop.f32.mrb[60].mxu0 }
 0x5d1   : > { %11961 = vmatmul.mubr.msk.f32.gmra.mrb[84].mxu1 %vm4118_vm5, %v16544_v9  ;;  %19172 = vst [vmem:[#allocation52_spill] sm:$0xff] %v16821_v23  ;;  %v16825_v10 = vpop.f32.mrb[61].mxu0 }
 0x5d2   : > { %12644 = vmatpush1.bf16.msra.mxu1 %v12643_v38  ;;  %11963 = vmatprep.mubr.msk.f32.mxu1 %vm4118_vm5, %v16549_v4  ;;  %19173 = vst [vmem:[#allocation53_spill] sm:$0xff] %v16825_v10  ;;  %v12649_v38 = vpack.c.bf16 %v10507_v58, %v10506_v21  ;;  %v10513_v21 = vld [vmem:[%s19034_s3 + $0x238] sm:$0xff]  ;;  %v10514_v58 = vld [vmem:[%s19034_s3 + $0x240] sm:$0xff]  ;;  %v16953_v10 = vld [vmem:[#allocation3 + $0x128] sm:$0xff] }
 0x5d3   : > { %12645 = vmatprep.subr.bf16.mxu1 %v19153_v28  ;;  %19178 = vst [vmem:[#allocation58_spill] sm:$0xff] %v16953_v10 }
 0x5d5   : > { %11964 = vmatmul.mubr.msk.f32.gmra.mrb[86].mxu1 %vm4118_vm5, %v16560_v61  ;;  %v16836_v9 = vpop.f32.mrb[62].mxu0  ;;  %v12652_v61 = vpack.c.bf16 %v10509_v57, %v10508_v39  ;;  %v10516_v39 = vld [vmem:[%s19034_s3 + $0x250] sm:$0xff]  ;;  %v10517_v57 = vld [vmem:[%s19034_s3 + $0x258] sm:$0xff] }
 0x5d6   : > { %19174 = vst [vmem:[#allocation54_spill] sm:$0xff] %v16836_v9  ;;  %12647 = vmatpush1.bf16.msra.mxu1 %v12646_v53  ;;  %11966 = vmatprep.mubr.msk.f32.mxu1 %vm4118_vm5, %v16567_v47  ;;  %v16840_v4 = vpop.f32.mrb[63].mxu0  ;;  %v10510_v47 = vld [vmem:[%s19034_s3 + $0x220] sm:$0xff]  ;;  %v10511_v53 = vld [vmem:[%s19034_s3 + $0x228] sm:$0xff] }
 0x5d7   : > { %19175 = vst [vmem:[#allocation55_spill] sm:$0xff] %v16840_v4  ;;  %12648 = vmatprep.subr.bf16.mxu1 %v19153_v28  ;;  %v16950_v4 = vld [vmem:[#allocation3 + $0x108] sm:$0xff] }
 0x5d8   : > { %19177 = vst [vmem:[#allocation57_spill] sm:$0xff] %v16950_v4 }
 0x5d9   : > { %11967 = vmatmul.mubr.msk.f32.gmra.mrb[88].mxu1 %vm4118_vm5, %v16580_v41  ;;  %v12655_v41 = vpack.c.bf16 %v10511_v53, %v10510_v47  ;;  %v10519_v47 = vld [vmem:[%s19034_s3 + $0x268] sm:$0xff] }
 0x5da   : > { %12650 = vmatpush1.bf16.msra.mxu1 %v12649_v38  ;;  %11969 = vmatprep.mubr.msk.f32.mxu1 %vm4118_vm5, %v16587_v15  ;;  %v10512_v15 = vld [vmem:[%s19034_s3 + $0x230] sm:$0xff] }
 0x5db   : > { %12651 = vmatprep.subr.bf16.mxu1 %v19153_v28 }
 0x5dd   : > { %11970 = vmatmul.mubr.msk.f32.gmra.mrb[90].mxu1 %vm4118_vm5, %v16600_v3  ;;  %v10515_v3 = vld [vmem:[%s19034_s3 + $0x248] sm:$0xff] }
 0x5de   : > { %12653 = vmatpush1.bf16.msra.mxu1 %v12652_v61  ;;  %11972 = vmatprep.mubr.msk.f32.mxu1 %vm4118_vm5, %v16607_v59  ;;  %v12658_v59 = vpack.c.bf16 %v10513_v21, %v10512_v15  ;;  %v12660_v38 = vpack.c.bf16 %v10515_v3, %v10514_v58  ;;  %v10518_v61 = vld [vmem:[%s19034_s3 + $0x260] sm:$0xff]  ;;  %v16902_v15 = vld [vmem:[#allocation3 + $0x68] sm:$0xff] }
 0x5df   : > { %12654 = vmatprep.subr.bf16.mxu1 %v19153_v28  ;;  %v12668_v53 = vpack.c.bf16 %v10519_v47, %v10518_v61  ;;  %v16905_v58 = vld [vmem:[#allocation3 + $0x60] sm:$0xff] }
 0x5e0   : > { %v16908_v3 = vld [vmem:[#allocation3 + $0x80] sm:$0xff] }
 0x5e1   : > { %11973 = vmatmul.mubr.msk.f32.gmra.mrb[92].mxu1 %vm4118_vm5, %v16626_v48  ;;  %v13315_v48 = vld [vmem:[#allocation3] sm:$0xff] }
 0x5e2   : > { %12656 = vmatpush1.bf16.msra.mxu1 %v12655_v41  ;;  %11975 = vmatprep.mubr.msk.f32.mxu1 %vm4118_vm5, %v16633_v29  ;;  %v12664_v29 = vpack.c.bf16 %v10517_v57, %v10516_v39  ;;  %v10521_v41 = vld [vmem:[%s19034_s3 + $0x278] sm:$0xff]  ;;  %v16918_v39 = vld [vmem:[#allocation3 + $0x90] sm:$0xff]  ;;  %v16930_v61 = vld [vmem:[#allocation3 + $0xc0] sm:$0xff] }
 0x5e3   : > { %12657 = vmatprep.subr.bf16.mxu1 %v19153_v28  ;;  %v16921_v57 = vld [vmem:[#allocation3 + $0xb0] sm:$0xff]  ;;  %v16933_v47 = vld [vmem:[#allocation3 + $0xe0] sm:$0xff] }
 0x5e5   : > { %11976 = vmatmul.mubr.msk.f32.gmra.mrb[94].mxu1 %vm4118_vm5, %v16648_v30  ;;  %v10520_v30 = vld [vmem:[%s19034_s3 + $0x270] sm:$0xff] }
 0x5e6   : > { %12659 = vmatpush1.bf16.msra.mxu1 %v12658_v59  ;;  %5877 = vmatprep.mubr.f32.mxu1 %v13315_v48  ;;  %v12672_v21 = vpack.c.bf16 %v10521_v41, %v10520_v30  ;;  %v16911_v59 = vld [vmem:[#allocation3 + $0x78] sm:$0xff]  ;;  %v16942_v41 = vld [vmem:[#allocation3 + $0xf0] sm:$0xff] }
 0x5e7   : > { %12661 = vmatprep.subr.bf16.mxu1 %v12660_v38  ;;  %v16939_v30 = vld [vmem:[#allocation3 + $0xf8] sm:$0xff] }
 0x5e9   : > { %5878 = vmatmul.mubr.f32.vlgmr.msra.gmra.mrb[96].mxu1 %v13315_v48 }
 0x5ea   : > { %12663 = vmatpush3.bf16.msra.mxu1 %v12660_v38  ;;  %5882 = vmatprep.mubr.f32.mxu1 %v13315_v48  ;;  %v16914_v38 = vld [vmem:[#allocation3 + $0x98] sm:$0xff] }
 0x5eb   : > { %12665 = vmatprep.subr.bf16.mxu1 %v12664_v29 }
 0x5ed   : > { %5883 = vmatmul.mubr.f32.gmra.mrb[98].mxu1 %v13315_v48  ;;  %v16924_v48 = vld [vmem:[#allocation3 + $0xa8] sm:$0xff] }
 0x5ee   : > { %5887 = vmatprep.mubr.f32.mxu1 %v16902_v15  ;;  %12667 = vmatpush3.bf16.msra.mxu1 %v12664_v29  ;;  %v16927_v29 = vld [vmem:[#allocation3 + $0xc8] sm:$0xff] }
 0x5ef   : > { %12669 = vmatprep.subr.bf16.mxu1 %v12668_v53 }
 0x5f1   : > { %5888 = vmatmul.mubr.f32.gmra.mrb[100].mxu1 %v16905_v58 }
 0x5f2   : > { %5892 = vmatprep.mubr.f32.mxu1 %v16908_v3  ;;  %12671 = vmatpush3.bf16.msra.mxu1 %v12668_v53  ;;  %v16936_v53 = vld [vmem:[#allocation3 + $0xd8] sm:$0xff] }
 0x5f3   : > { %12673 = vmatprep.subr.bf16.mxu1 %v12672_v21 }
 0x5f5   : > { %5893 = vmatmul.mubr.f32.gmra.mrb[102].mxu1 %v16911_v59 }
 0x5f6   : > { %5897 = vmatprep.mubr.f32.mxu1 %v16914_v38  ;;  %12675 = vmatpush3.bf16.msra.mxu1 %v12672_v21  ;;  %v16945_v21 = vld [vmem:[#allocation3 + $0x110] sm:$0xff] }
 0x5f7   : > { %12676 = vmatprep.subr.bf16.mxu1 %v19153_v28  ;;  %19176 = vst [vmem:[#allocation56_spill] sm:$0xff] %v16945_v21 }
 0x5f9   : > { %5898 = vmatmul.mubr.f32.gmra.mrb[104].mxu1 %v16918_v39 }
 0x5fa   : > { %5902 = vmatprep.mubr.f32.mxu1 %v16921_v57 }
 0x5fd   : > { %5903 = vmatmul.mubr.f32.gmra.mrb[106].mxu1 %v16924_v48 }
 0x5fe   : > { %5907 = vmatprep.mubr.f32.mxu1 %v16927_v29 }
 0x601   : > { %5908 = vmatmul.mubr.f32.gmra.mrb[108].mxu1 %v16930_v61 }
 0x602   : > { %5912 = vmatprep.mubr.f32.mxu1 %v16933_v47 }
 0x603   : > { %v16948_v9 = vpop.f32.mrb[8].mxu1 }
 0x604   : > { %v5185_v23 = vpop.f32.mrb[9].mxu1 }
 0x605   : > { %5913 = vmatmul.mubr.f32.gmra.mrb[110].mxu1 %v16936_v53 }
 0x606   : > { %5917 = vmatprep.mubr.f32.mxu1 %v16939_v30 }
 0x607   : > { %v16956_v18 = vpop.f32.mrb[10].mxu1 }
 0x608   : > { %v5190_v54 = vpop.f32.mrb[11].mxu1 }
 0x609   : > { %5918 = vmatmul.mubr.f32.gmra.mrb[112].mxu1 %v16942_v41 }
 0x60a   : > { %5922 = vmatprep.mubr.f32.mxu1 %v16945_v21 }
 0x60b   : > { %v16964_v52 = vpop.f32.mrb[12].mxu1  ;;  %v16966_v23 = vpop.f32.mrb[64].mxu0 }
 0x60c   : > { %19181 = vst [vmem:[#allocation61_spill] sm:$0xff] %v16966_v23  ;;  %v5195_v22 = vpop.f32.mrb[13].mxu1  ;;  %v7312_v17 = vpop.f32.mrb[65].mxu0 }
 0x60d   : > { %5923 = vmatmul.mubr.f32.gmra.mrb[114].mxu1 %v16950_v4  ;;  %v17021_v4 = vld [vmem:[#allocation3 + $0x1d0] sm:$0xff] }
 0x60e   : > { %5927 = vmatprep.mubr.f32.mxu1 %v16953_v10  ;;  %v17011_v10 = vld [vmem:[#allocation3 + $0x1b8] sm:$0xff]  ;;  %19198 = vst [vmem:[#allocation78_spill] sm:$0xff] %v17021_v4 }
 0x60f   : > { %v16974_v54 = vpop.f32.mrb[14].mxu1  ;;  %v16976_v63 = vpop.f32.mrb[66].mxu0  ;;  %19195 = vst [vmem:[#allocation75_spill] sm:$0xff] %v17011_v10 }
 0x610   : > { %19184 = vst [vmem:[#allocation64_spill] sm:$0xff] %v16976_v63  ;;  %v5200_v5 = vpop.f32.mrb[15].mxu1  ;;  %v7317_v23 = vpop.f32.mrb[67].mxu0 }
 0x611   : > { %5928 = vmatmul.mubr.f32.gmra.mrb[116].mxu1 %v16958_v2  ;;  %v17001_v2 = vld [vmem:[#allocation3 + $0x1a0] sm:$0xff] }
 0x612   : > { %5932 = vmatprep.mubr.f32.mxu1 %v16961_v16  ;;  %v16991_v16 = vld [vmem:[#allocation3 + $0x188] sm:$0xff]  ;;  %19192 = vst [vmem:[#allocation72_spill] sm:$0xff] %v17001_v2 }
 0x613   : > { %v16984_v22 = vpop.f32.mrb[16].mxu1  ;;  %v16986_v17 = vpop.f32.mrb[68].mxu0  ;;  %19189 = vst [vmem:[#allocation69_spill] sm:$0xff] %v16991_v16 }
 0x614   : > { %19187 = vst [vmem:[#allocation67_spill] sm:$0xff] %v16986_v17  ;;  %v7322_v63 = vpop.f32.mrb[69].mxu0 }
 0x615   : > { %5933 = vmatmul.mubr.f32.gmra.mrb[118].mxu1 %v16968_v32  ;;  %v16988_v32 = vld [vmem:[#allocation3 + $0x168] sm:$0xff] }
 0x616   : > { %5937 = vmatprep.mubr.f32.mxu1 %v16971_v19  ;;  %19188 = vst [vmem:[#allocation68_spill] sm:$0xff] %v16988_v32  ;;  %v5205_v19 = vpop.f32.mrb[17].mxu1 }
 0x617   : > { %v16994_v5 = vpop.f32.mrb[18].mxu1  ;;  %v16996_v23 = vpop.f32.mrb[70].mxu0 }
 0x618   : > { %19190 = vst [vmem:[#allocation70_spill] sm:$0xff] %v16996_v23  ;;  %v7327_v17 = vpop.f32.mrb[71].mxu0 }
 0x619   : > { %5938 = vmatmul.mubr.f32.gmra.mrb[120].mxu1 %v16978_v27  ;;  %v16998_v27 = vld [vmem:[#allocation3 + $0x180] sm:$0xff] }
 0x61a   : > { %5942 = vmatprep.mubr.f32.mxu1 %v16981_v37  ;;  %19191 = vst [vmem:[#allocation71_spill] sm:$0xff] %v16998_v27  ;;  %v5210_v37 = vpop.f32.mrb[19].mxu1 }
 0x61b   : > { %v17004_v19 = vpop.f32.mrb[20].mxu1  ;;  %v17006_v63 = vpop.f32.mrb[72].mxu0 }
 0x61c   : > { %19193 = vst [vmem:[#allocation73_spill] sm:$0xff] %v17006_v63  ;;  %v7332_v23 = vpop.f32.mrb[73].mxu0 }
 0x61d   : > { %5943 = vmatmul.mubr.f32.gmra.mrb[122].mxu1 %v16988_v32  ;;  %v17008_v32 = vld [vmem:[#allocation3 + $0x198] sm:$0xff] }
 0x61e   : > { %5947 = vmatprep.mubr.f32.mxu1 %v16991_v16  ;;  %19194 = vst [vmem:[#allocation74_spill] sm:$0xff] %v17008_v32  ;;  %v5215_v16 = vpop.f32.mrb[21].mxu1 }
 0x620   : > { %v17014_v37 = vpop.f32.mrb[22].mxu1  ;;  %v17016_v17 = vpop.f32.mrb[74].mxu0 }
 0x621   : > { %5948 = vmatmul.mubr.f32.gmra.mrb[124].mxu1 %v16998_v27  ;;  %19196 = vst [vmem:[#allocation76_spill] sm:$0xff] %v17016_v17  ;;  %v17018_v27 = vld [vmem:[#allocation3 + $0x1b0] sm:$0xff]  ;;  %v7337_v63 = vpop.f32.mrb[75].mxu0 }
 0x622   : > { %5952 = vmatprep.mubr.f32.mxu1 %v17001_v2  ;;  %19197 = vst [vmem:[#allocation77_spill] sm:$0xff] %v17018_v27  ;;  %v5220_v2 = vpop.f32.mrb[23].mxu1 }
 0x624   : > { %v17024_v16 = vpop.f32.mrb[24].mxu1  ;;  %v17026_v23 = vpop.f32.mrb[76].mxu0 }
 0x625   : > { %5953 = vmatmul.mubr.f32.gmra.mrb[126].mxu1 %v17008_v32  ;;  %19199 = vst [vmem:[#allocation79_spill] sm:$0xff] %v17026_v23  ;;  %v17028_v32 = vld [vmem:[#allocation3 + $0x1c8] sm:$0xff]  ;;  %v7342_v17 = vpop.f32.mrb[77].mxu0 }
 0x626   : > { %5957 = vmatprep.mubr.f32.mxu1 %v17011_v10  ;;  %19200 = vst [vmem:[#allocation80_spill] sm:$0xff] %v17028_v32  ;;  %v5225_v10 = vpop.f32.mrb[25].mxu1 }
 0x628   : > { %v17032_v2 = vpop.f32.mrb[26].mxu1 }
 0x629   : > { %5958 = vmatmul.mubr.f32.gmra.mrb[128].mxu1 %v17018_v27  ;;  %v17034_v27 = vpop.f32.mrb[78].mxu0  ;;  %v5230_v63 = vpop.f32.mrb[27].mxu1 }
 0x62a   : > { %5962 = vmatprep.mubr.f32.mxu1 %v17021_v4  ;;  %19201 = vst [vmem:[#allocation81_spill] sm:$0xff] %v17034_v27  ;;  %v7347_v4 = vpop.f32.mrb[79].mxu0 }
 0x62d   : > { %5963 = vmatmul.mubr.f32.gmra.mrb[130].mxu1 %v17028_v32 }
 0x62e   : > { %5967 = vmatprep.mubr.f32.mxu1 %v16420_v62  ;;  %v17038_v21 = vpop.f32.mrb[28].mxu1  ;;  %v17040_v23 = vpop.f32.mrb[80].mxu0 }
 0x62f   : > { %19202 = vst [vmem:[#allocation82_spill] sm:$0xff] %v17040_v23  ;;  %v5235_v10 = vpop.f32.mrb[29].mxu1  ;;  %v7352_v17 = vpop.f32.mrb[81].mxu0 }
 0x631   : > { %5968 = vmatmul.mubr.f32.gmra.mrb[132].mxu1 %v16425_v40 }
 0x632   : > { %5972 = vmatprep.mubr.f32.mxu1 %v16434_v44  ;;  %v17044_v62 = vpop.f32.mrb[30].mxu1  ;;  %v17046_v32 = vpop.f32.mrb[82].mxu0 }
 0x633   : > { %19203 = vst [vmem:[#allocation83_spill] sm:$0xff] %v17046_v32  ;;  %v5240_v63 = vpop.f32.mrb[31].mxu1  ;;  %v7357_v40 = vpop.f32.mrb[83].mxu0 }
 0x635   : > { %5973 = vmatmul.mubr.f32.gmra.mrb[134].mxu1 %v16438_v11 }
 0x636   : > { %5977 = vmatprep.mubr.f32.mxu1 %v16452_v50  ;;  %v17050_v44 = vpop.f32.mrb[32].mxu1  ;;  %v17052_v4 = vpop.f32.mrb[84].mxu0 }
 0x637   : > { %19204 = vst [vmem:[#allocation84_spill] sm:$0xff] %v17052_v4  ;;  %v5245_v10 = vpop.f32.mrb[33].mxu1  ;;  %v7362_v11 = vpop.f32.mrb[85].mxu0 }
 0x639   : > { %5978 = vmatmul.mubr.f32.gmra.mrb[136].mxu1 %v16456_v6 }
 0x63a   : > { %5982 = vmatprep.mubr.f32.mxu1 %v16470_v33 }
 0x63c   : > { %v17056_v50 = vpop.f32.mrb[34].mxu1  ;;  %v17058_v17 = vpop.f32.mrb[86].mxu0 }
 0x63d   : > { %5983 = vmatmul.mubr.f32.gmra.mrb[138].mxu1 %v16474_v0  ;;  %19205 = vst [vmem:[#allocation85_spill] sm:$0xff] %v17058_v17  ;;  %v5250_v63 = vpop.f32.mrb[35].mxu1  ;;  %v7367_v6 = vpop.f32.mrb[87].mxu0 }
 0x63e   : > { %5987 = vmatprep.mubr.f32.mxu1 %v16488_v60 }
 0x640   : > { %v17062_v33 = vpop.f32.mrb[36].mxu1  ;;  %v17064_v40 = vpop.f32.mrb[88].mxu0 }
 0x641   : > { %5988 = vmatmul.mubr.f32.gmra.mrb[140].mxu1 %v16492_v24  ;;  %19206 = vst [vmem:[#allocation86_spill] sm:$0xff] %v17064_v40  ;;  %v5255_v10 = vpop.f32.mrb[37].mxu1  ;;  %v7372_v0 = vpop.f32.mrb[89].mxu0 }
 0x642   : > { %5992 = vmatprep.mubr.f32.mxu1 %v16506_v43 }
 0x645   : > { %5993 = vmatmul.mubr.f32.gmra.mrb[142].mxu1 %v16510_v49 }
 0x646   : > { %5997 = vmatprep.mubr.f32.mxu1 %v16522_v7 }
 0x648   : > { %v17068_v60 = vpop.f32.mrb[38].mxu1  ;;  %v17070_v11 = vpop.f32.mrb[90].mxu0 }
 0x649   : > { %19207 = vst [vmem:[#allocation87_spill] sm:$0xff] %v17070_v11  ;;  %v5260_v63 = vpop.f32.mrb[39].mxu1  ;;  %5998 = vmatmul.mubr.f32.gmra.mrb[144].mxu1 %v16526_v36  ;;  %v7377_v24 = vpop.f32.mrb[91].mxu0 }
 0x64a   : > { %6002 = vmatprep.mubr.f32.mxu1 %v16538_v26 }
 0x64c   : > { %v17074_v43 = vpop.f32.mrb[40].mxu1  ;;  %v17076_v6 = vpop.f32.mrb[92].mxu0 }
 0x64d   : > { %19208 = vst [vmem:[#allocation88_spill] sm:$0xff] %v17076_v6  ;;  %v5265_v10 = vpop.f32.mrb[41].mxu1  ;;  %6003 = vmatmul.mubr.f32.gmra.mrb[146].mxu1 %v16542_v45  ;;  %v7382_v49 = vpop.f32.mrb[93].mxu0  ;;  %v10557_v6 = vld [vmem:[%s19034_s3 + $0x298] sm:$0xff] }
 0x64e   : > { %6007 = vmatprep.mubr.f32.mxu1 %v16554_v12 }
 0x650   : > { %v17080_v7 = vpop.f32.mrb[42].mxu1  ;;  %v17082_v0 = vpop.f32.mrb[94].mxu0 }
 0x651   : > { %19209 = vst [vmem:[#allocation89_spill] sm:$0xff] %v17082_v0  ;;  %v5270_v63 = vpop.f32.mrb[43].mxu1  ;;  %6008 = vmatmul.mubr.f32.gmra.mrb[148].mxu1 %v16558_v8  ;;  %v17085_v36 = vpop.f32.mrb[95].mxu0 }
 0x652   : > { %19210 = vst [vmem:[#allocation90_spill] sm:$0xff] %v17085_v36  ;;  %6012 = vmatprep.mubr.f32.mxu1 %v16574_v51  ;;  %v10556_v36 = vld [vmem:[%s19034_s3 + $0x290] sm:$0xff] }
 0x654   : > { %v17088_v26 = vpop.f32.mrb[44].mxu1  ;;  %v17090_v24 = vpop.f32.mrb[96].mxu0 }
 0x655   : > { %19211 = vst [vmem:[#allocation91_spill] sm:$0xff] %v17090_v24  ;;  %v5275_v10 = vpop.f32.mrb[45].mxu1  ;;  %6013 = vmatmul.mubr.f32.gmra.mrb[150].mxu1 %v16578_v34  ;;  %v17093_v45 = vpop.f32.mrb[97].mxu0 }
 0x656   : > { %19212 = vst [vmem:[#allocation92_spill] sm:$0xff] %v17093_v45  ;;  %6017 = vmatprep.mubr.f32.mxu1 %v16594_v13  ;;  %v17111_v13 = vld [vmem:[#allocation3 + $0x308] sm:$0xff] }
 0x658   : > { %v17096_v12 = vpop.f32.mrb[46].mxu1  ;;  %v17098_v49 = vpop.f32.mrb[98].mxu0 }
 0x659   : > { %19213 = vst [vmem:[#allocation93_spill] sm:$0xff] %v17098_v49  ;;  %v5280_v8 = vpop.f32.mrb[47].mxu1  ;;  %6018 = vmatmul.mubr.f32.gmra.mrb[152].mxu1 %v16598_v35  ;;  %v17101_v63 = vpop.f32.mrb[99].mxu0  ;;  %v17118_v49 = vld [vmem:[#allocation3 + $0x300] sm:$0xff] }
 0x65a   : > { %19214 = vst [vmem:[#allocation94_spill] sm:$0xff] %v17101_v63  ;;  %6022 = vmatprep.mubr.f32.mxu1 %v16614_v42 }
 0x65c   : > { %v17104_v51 = vpop.f32.mrb[48].mxu1  ;;  %v17106_v10 = vpop.f32.mrb[100].mxu0 }
 0x65d   : > { %19215 = vst [vmem:[#allocation95_spill] sm:$0xff] %v17106_v10  ;;  %v5285_v34 = vpop.f32.mrb[49].mxu1  ;;  %6023 = vmatmul.mubr.f32.gmra.mrb[154].mxu1 %v16624_v46  ;;  %v17109_v24 = vpop.f32.mrb[101].mxu0  ;;  %v10554_v46 = vld [vmem:[%s19034_s3 + $0x280] sm:$0xff]  ;;  %v10555_v10 = vld [vmem:[%s19034_s3 + $0x288] sm:$0xff] }
 0x65e   : > { %19216 = vst [vmem:[#allocation96_spill] sm:$0xff] %v17109_v24  ;;  %6027 = vmatprep.mubr.f32.mxu1 %v17111_v13  ;;  %v17123_v34 = vld [vmem:[#allocation3 + $0x320] sm:$0xff]  ;;  %v12677_v0 = vpack.c.bf16 %v10555_v10, %v10554_v46  ;;  %v10559_v46 = vld [vmem:[%s19034_s3 + $0x2a8] sm:$0xff] }
 0x65f   : > { %v10558_v10 = vld [vmem:[%s19034_s3 + $0x2a0] sm:$0xff] }
 0x660   : > { %v17114_v8 = vpop.f32.mrb[50].mxu1  ;;  %v17116_v35 = vpop.f32.mrb[102].mxu0 }
 0x661   : > { %19217 = vst [vmem:[#allocation97_spill] sm:$0xff] %v17116_v35  ;;  %v5290_v42 = vpop.f32.mrb[51].mxu1  ;;  %6028 = vmatmul.mubr.f32.gmra.mrb[156].mxu1 %v17118_v49  ;;  %v17121_v63 = vpop.f32.mrb[103].mxu0 }
 0x662   : > { %19218 = vst [vmem:[#allocation98_spill] sm:$0xff] %v17121_v63  ;;  %6032 = vmatprep.mubr.f32.mxu1 %v17123_v34  ;;  %v17136_v42 = vld [vmem:[#allocation3 + $0x318] sm:$0xff] }
 0x664   : > { %v17132_v35 = vpop.f32.mrb[52].mxu1  ;;  %v17134_v24 = vpop.f32.mrb[104].mxu0 }
 0x665   : > { %19219 = vst [vmem:[#allocation99_spill] sm:$0xff] %v17134_v24  ;;  %v5295_v45 = vpop.f32.mrb[53].mxu1  ;;  %6033 = vmatmul.mubr.f32.gmra.mrb[158].mxu1 %v17136_v42  ;;  %v17139_v63 = vpop.f32.mrb[105].mxu0 }
 0x666   : > { %19220 = vst [vmem:[#allocation100_spill] sm:$0xff] %v17139_v63  ;;  %11994 = vmatprep.mubr.msk.f32.mxu1 %vm4118_vm5, %v16650_v20  ;;  %v12680_v20 = vpack.c.bf16 %v10557_v6, %v10556_v36  ;;  %v12683_v6 = vpack.c.bf16 %v10559_v46, %v10558_v10  ;;  %v10562_v46 = vld [vmem:[%s19034_s3 + $0x2c0] sm:$0xff] }
 0x668   : > { %v17149_v24 = vpop.f32.mrb[54].mxu1  ;;  %v17151_v40 = vpop.f32.mrb[106].mxu0 }
 0x669   : > { %19221 = vst [vmem:[#allocation101_spill] sm:$0xff] %v17151_v40  ;;  %v5300_v45 = vpop.f32.mrb[55].mxu1  ;;  %11995 = vmatmul.mubr.msk.f32.vlgmr.msra.gmra.mrb[160].mxu1 %vm4118_vm5, %v16660_v31  ;;  %v17155_v63 = vpop.f32.mrb[107].mxu0 }
 0x66a   : > { %19222 = vst [vmem:[#allocation102_spill] sm:$0xff] %v17155_v63  ;;  %12678 = vmatpush1.bf16.msra.mxu1 %v12677_v0  ;;  %11997 = vmatprep.mubr.msk.f32.mxu1 %vm4118_vm5, %v16678_v25  ;;  %v10560_v0 = vld [vmem:[%s19034_s3 + $0x2b0] sm:$0xff] }
 0x66b   : > { %12679 = vmatprep.subr.bf16.mxu1 %v19153_v28 }
 0x66c   : > { %v17166_v45 = vpop.f32.mrb[56].mxu1  ;;  %v17168_v31 = vpop.f32.mrb[108].mxu0 }
 0x66d   : > { %19223 = vst [vmem:[#allocation103_spill] sm:$0xff] %v17168_v31  ;;  %v5305_v40 = vpop.f32.mrb[57].mxu1  ;;  %11998 = vmatmul.mubr.msk.f32.gmra.mrb[162].mxu1 %vm4118_vm5, %v16692_v14  ;;  %v17172_v25 = vpop.f32.mrb[109].mxu0 }
 0x66e   : > { %19224 = vst [vmem:[#allocation104_spill] sm:$0xff] %v17172_v25  ;;  %12681 = vmatpush1.bf16.msra.mxu1 %v12680_v20  ;;  %12000 = vmatprep.mubr.msk.f32.mxu1 %vm4118_vm5, %v16699_v56  ;;  %v10561_v40 = vld [vmem:[%s19034_s3 + $0x2b8] sm:$0xff]  ;;  %v5600_v20 = vld [vmem:[#allocation3 + $0xd0] sm:$0xff] }
 0x66f   : > { %12682 = vmatprep.subr.bf16.mxu1 %v19153_v28  ;;  %v12686_v10 = vpack.c.bf16 %v10561_v40, %v10560_v0  ;;  %v5606_v0 = vld [vmem:[#allocation3 + $0x100] sm:$0xff] }
 0x670   : > { %v17183_v36 = vpop.f32.mrb[58].mxu1  ;;  %v17185_v14 = vpop.f32.mrb[110].mxu0 }
 0x671   : > { %19225 = vst [vmem:[#allocation105_spill] sm:$0xff] %v17185_v14  ;;  %v5310_v31 = vpop.f32.mrb[59].mxu1  ;;  %12001 = vmatmul.mubr.msk.f32.gmra.mrb[164].mxu1 %vm4118_vm5, %v16712_v55  ;;  %v17189_v56 = vpop.f32.mrb[111].mxu0 }
 0x672   : > { %19226 = vst [vmem:[#allocation106_spill] sm:$0xff] %v17189_v56  ;;  %12684 = vmatpush1.bf16.msra.mxu1 %v12683_v6  ;;  %12003 = vmatprep.mubr.msk.f32.mxu1 %vm4118_vm5, %v5600_v20  ;;  %v10563_v31 = vld [vmem:[%s19034_s3 + $0x2c8] sm:$0xff]  ;;  %v10564_v20 = vld [vmem:[%s19034_s3 + $0x2d0] sm:$0xff] }
 0x673   : > { %12685 = vmatprep.subr.bf16.mxu1 %v19153_v28  ;;  %v5603_v56 = vld [vmem:[#allocation3 + $0xe8] sm:$0xff]  ;;  %v12689_v40 = vpack.c.bf16 %v10563_v31, %v10562_v46  ;;  %v5612_v46 = vld [vmem:[#allocation3 + $0x130] sm:$0xff] }
 0x674   : > { %v17199_v14 = vpop.f32.mrb[60].mxu1  ;;  %v17201_v55 = vpop.f32.mrb[112].mxu0 }
 0x675   : > { %19227 = vst [vmem:[#allocation107_spill] sm:$0xff] %v17201_v55  ;;  %v5315_v25 = vpop.f32.mrb[61].mxu1  ;;  %12004 = vmatmul.mubr.msk.f32.gmra.mrb[166].mxu1 %vm4118_vm5, %v5603_v56  ;;  %v17204_v6 = vpop.f32.mrb[113].mxu0  ;;  %v10565_v55 = vld [vmem:[%s19034_s3 + $0x2d8] sm:$0xff] }
 0x676   : > { %19228 = vst [vmem:[#allocation108_spill] sm:$0xff] %v17204_v6  ;;  %12687 = vmatpush1.bf16.msra.mxu1 %v12686_v10  ;;  %12006 = vmatprep.mubr.msk.f32.mxu1 %vm4118_vm5, %v5606_v0  ;;  %v5609_v6 = vld [vmem:[#allocation3 + $0x118] sm:$0xff]  ;;  %v12692_v31 = vpack.c.bf16 %v10565_v55, %v10564_v20  ;;  %v10566_v0 = vld [vmem:[%s19034_s3 + $0x2e0] sm:$0xff] }
 0x677   : > { %12688 = vmatprep.subr.bf16.mxu1 %v19153_v28  ;;  %v5618_v20 = vld [vmem:[#allocation3 + $0x160] sm:$0xff] }
 0x678   : > { %v17214_v25 = vpop.f32.mrb[62].mxu1  ;;  %v17216_v56 = vpop.f32.mrb[114].mxu0 }
 0x679   : > { %19229 = vst [vmem:[#allocation109_spill] sm:$0xff] %v17216_v56  ;;  %v5320_v63 = vpop.f32.mrb[63].mxu1  ;;  %12007 = vmatmul.mubr.msk.f32.gmra.mrb[168].mxu1 %vm4118_vm5, %v5609_v6  ;;  %v17219_v10 = vpop.f32.mrb[115].mxu0  ;;  %v10567_v56 = vld [vmem:[%s19034_s3 + $0x2e8] sm:$0xff] }
 0x67a   : > { %19230 = vst [vmem:[#allocation110_spill] sm:$0xff] %v17219_v10  ;;  %12690 = vmatpush1.bf16.msra.mxu1 %v12689_v40  ;;  %12009 = vmatprep.mubr.msk.f32.mxu1 %vm4118_vm5, %v5612_v46  ;;  %v5615_v6 = vld [vmem:[#allocation3 + $0x148] sm:$0xff]  ;;  %v19233_v46 = vld [vmem:[#allocation21_spill] sm:$0xff]  ;;  %v12695_v17 = vpack.c.bf16 %v10567_v56, %v10566_v0  ;;  %v5624_v0 = vld [vmem:[#allocation3 + $0x190] sm:$0xff] }
 0x67b   : > { %12691 = vmatprep.subr.bf16.mxu1 %v19153_v28 }
 0x67c   : > { %v11932_v63 = vpop.f32.mrb[64].mxu1  ;;  %v17229_v11 = vpop.f32.mrb[116].mxu0 }
 0x67d   : > { %19231 = vst [vmem:[#allocation111_spill] sm:$0xff] %v17229_v11  ;;  %v17232_v10 = vadd.f32 %v11932_v63, %v16460_v1  ;;  %v5388_v40 = vpop.f32.mrb[65].mxu1  ;;  %12010 = vmatmul.mubr.msk.f32.gmra.mrb[170].mxu1 %vm4118_vm5, %v5615_v6  ;;  %v17235_v55 = vpop.f32.mrb[117].mxu0  ;;  %v10568_v1 = vld [vmem:[%s19034_s3 + $0x2f0] sm:$0xff]  ;;  %v10569_v63 = vld [vmem:[%s19034_s3 + $0x2f8] sm:$0xff] }
 0x67e   : > { %19232 = vst [vmem:[#allocation112_spill] sm:$0xff] %v17235_v55  ;;  %v17238_v4 = vadd.f32 %v5388_v40, %v19233_v46  ;;  %12693 = vmatpush1.bf16.msra.mxu1 %v12692_v31  ;;  %12012 = vmatprep.mubr.msk.f32.mxu1 %vm4118_vm5, %v5618_v20  ;;  %v5621_v55 = vld [vmem:[#allocation3 + $0x178] sm:$0xff]  ;;  %v19235_v40 = vld [vmem:[#allocation23_spill] sm:$0xff]  ;;  %v19237_v20 = vld [vmem:[#allocation22_spill] sm:$0xff]  ;;  %v12698_v32 = vpack.c.bf16 %v10569_v63, %v10568_v1 }
 0x67f   : > { %12694 = vmatprep.subr.bf16.mxu1 %v19153_v28  ;;  %v5630_v63 = vld [vmem:[#allocation3 + $0x1c0] sm:$0xff] }
 0x680   : > { %v11935_v6 = vpop.f32.mrb[66].mxu1  ;;  %v17248_v11 = vpop.f32.mrb[118].mxu0 }
 0x681   : > { %19234 = vst [vmem:[#allocation21_spill] sm:$0xff] %v17248_v11  ;;  %v17251_v46 = vadd.f32 %v11935_v6, %v19235_v40  ;;  %v5398_v31 = vpop.f32.mrb[67].mxu1  ;;  %12013 = vmatmul.mubr.msk.f32.gmra.mrb[172].mxu1 %vm4118_vm5, %v5621_v55  ;;  %v17254_v56 = vpop.f32.mrb[119].mxu0  ;;  %v10570_v6 = vld [vmem:[%s19034_s3 + $0x300] sm:$0xff]  ;;  %v10571_v55 = vld [vmem:[%s19034_s3 + $0x308] sm:$0xff] }
 0x682   : > { %19236 = vst [vmem:[#allocation23_spill] sm:$0xff] %v17254_v56  ;;  %v17257_v23 = vadd.f32 %v5398_v31, %v19237_v20  ;;  %12696 = vmatpush1.bf16.msra.mxu1 %v12695_v17  ;;  %12015 = vmatprep.mubr.msk.f32.mxu1 %vm4118_vm5, %v5624_v0  ;;  %v5627_v56 = vld [vmem:[#allocation3 + $0x1a8] sm:$0xff]  ;;  %v12701_v20 = vpack.c.bf16 %v10571_v55, %v10570_v6 }
 0x683   : > { %12697 = vmatprep.subr.bf16.mxu1 %v19153_v28 }
 0x684   : > { %v11938_v40 = vpop.f32.mrb[68].mxu1  ;;  %v17267_v11 = vpop.f32.mrb[120].mxu0 }
 0x685   : > { %19238 = vst [vmem:[#allocation22_spill] sm:$0xff] %v17267_v11  ;;  %v17270_v31 = vadd.f32 %v11938_v40, %v16956_v18  ;;  %v5408_v17 = vpop.f32.mrb[69].mxu1  ;;  %12016 = vmatmul.mubr.msk.f32.gmra.mrb[174].mxu1 %vm4118_vm5, %v5627_v56  ;;  %v17273_v1 = vpop.f32.mrb[121].mxu0  ;;  %v10572_v18 = vld [vmem:[%s19034_s3 + $0x310] sm:$0xff]  ;;  %v10573_v56 = vld [vmem:[%s19034_s3 + $0x318] sm:$0xff] }
 0x686   : > { %19239 = vst [vmem:[#allocation113_spill] sm:$0xff] %v17273_v1  ;;  %v17276_v0 = vadd.f32 %v5408_v17, %v16948_v9  ;;  %12699 = vmatpush1.bf16.msra.mxu1 %v12698_v32  ;;  %12018 = vmatprep.mubr.msk.f32.mxu1 %vm4118_vm5, %v5630_v63  ;;  %v5633_v11 = vld [vmem:[#allocation3 + $0x1d8] sm:$0xff]  ;;  %v5636_v32 = vld [vmem:[#allocation3 + $0x1f0] sm:$0xff]  ;;  %v12704_v55 = vpack.c.bf16 %v10573_v56, %v10572_v18  ;;  %v10574_v17 = vld [vmem:[%s19034_s3 + $0x320] sm:$0xff] }
 0x687   : > { %12700 = vmatprep.subr.bf16.mxu1 %v19153_v28 }
 0x688   : > { %v11941_v40 = vpop.f32.mrb[70].mxu1 }
 0x689   : > { %v17287_v1 = vadd.f32 %v11941_v40, %v16974_v54  ;;  %v5418_v9 = vpop.f32.mrb[71].mxu1  ;;  %12019 = vmatmul.mubr.msk.f32.gmra.mrb[176].mxu1 %vm4118_vm5, %v5633_v11  ;;  %v10575_v54 = vld [vmem:[%s19034_s3 + $0x328] sm:$0xff] }
 0x68a   : > { %v17291_v6 = vadd.f32 %v5418_v9, %v16964_v52  ;;  %12702 = vmatpush1.bf16.msra.mxu1 %v12701_v20  ;;  %12021 = vmatprep.mubr.msk.f32.mxu1 %vm4118_vm5, %v5636_v32  ;;  %v5639_v11 = vld [vmem:[#allocation3 + $0x208] sm:$0xff]  ;;  %v5642_v20 = vld [vmem:[#allocation3 + $0x220] sm:$0xff]  ;;  %v12707_v56 = vpack.c.bf16 %v10575_v54, %v10574_v17  ;;  %v10576_v9 = vld [vmem:[%s19034_s3 + $0x330] sm:$0xff] }
 0x68b   : > { %12703 = vmatprep.subr.bf16.mxu1 %v19153_v28 }
 0x68c   : > { %v11944_v63 = vpop.f32.mrb[72].mxu1 }
 0x68d   : > { %v17302_v40 = vadd.f32 %v11944_v63, %v16994_v5  ;;  %v5428_v52 = vpop.f32.mrb[73].mxu1  ;;  %12022 = vmatmul.mubr.msk.f32.gmra.mrb[178].mxu1 %vm4118_vm5, %v5639_v11  ;;  %v10577_v5 = vld [vmem:[%s19034_s3 + $0x338] sm:$0xff] }
 0x68e   : > { %v17306_v18 = vadd.f32 %v5428_v52, %v16984_v22  ;;  %12705 = vmatpush1.bf16.msra.mxu1 %v12704_v55  ;;  %12024 = vmatprep.mubr.msk.f32.mxu1 %vm4118_vm5, %v5642_v20  ;;  %v5645_v63 = vld [vmem:[#allocation3 + $0x238] sm:$0xff]  ;;  %v5648_v55 = vld [vmem:[#allocation3 + $0x250] sm:$0xff]  ;;  %v12710_v54 = vpack.c.bf16 %v10577_v5, %v10576_v9  ;;  %v10578_v52 = vld [vmem:[%s19034_s3 + $0x340] sm:$0xff] }
 0x68f   : > { %12706 = vmatprep.subr.bf16.mxu1 %v19153_v28 }
 0x690   : > { %v11947_v32 = vpop.f32.mrb[74].mxu1 }
 0x691   : > { %v17317_v11 = vadd.f32 %v11947_v32, %v17014_v37  ;;  %v5438_v22 = vpop.f32.mrb[75].mxu1  ;;  %12025 = vmatmul.mubr.msk.f32.gmra.mrb[180].mxu1 %vm4118_vm5, %v5645_v63  ;;  %v10579_v37 = vld [vmem:[%s19034_s3 + $0x348] sm:$0xff] }
 0x692   : > { %v17321_v17 = vadd.f32 %v5438_v22, %v17004_v19  ;;  %12708 = vmatpush1.bf16.msra.mxu1 %v12707_v56  ;;  %12027 = vmatprep.mubr.msk.f32.mxu1 %vm4118_vm5, %v5648_v55  ;;  %v5651_v32 = vld [vmem:[#allocation3 + $0x268] sm:$0xff]  ;;  %v5654_v56 = vld [vmem:[#allocation3 + $0x280] sm:$0xff]  ;;  %v12713_v5 = vpack.c.bf16 %v10579_v37, %v10578_v52  ;;  %v10580_v22 = vld [vmem:[%s19034_s3 + $0x350] sm:$0xff] }
 0x693   : > { %12709 = vmatprep.subr.bf16.mxu1 %v19153_v28 }
 0x694   : > { %v11950_v20 = vpop.f32.mrb[76].mxu1 }
 0x695   : > { %v17332_v63 = vadd.f32 %v11950_v20, %v17032_v2  ;;  %v5448_v19 = vpop.f32.mrb[77].mxu1  ;;  %12028 = vmatmul.mubr.msk.f32.gmra.mrb[182].mxu1 %vm4118_vm5, %v5651_v32  ;;  %v10581_v2 = vld [vmem:[%s19034_s3 + $0x358] sm:$0xff] }
 0x696   : > { %v17336_v9 = vadd.f32 %v5448_v19, %v17024_v16  ;;  %12711 = vmatpush1.bf16.msra.mxu1 %v12710_v54  ;;  %12030 = vmatprep.mubr.msk.f32.mxu1 %vm4118_vm5, %v5654_v56  ;;  %v5657_v20 = vld [vmem:[#allocation3 + $0x298] sm:$0xff]  ;;  %v5660_v54 = vld [vmem:[#allocation3 + $0x2b0] sm:$0xff]  ;;  %v12716_v37 = vpack.c.bf16 %v10581_v2, %v10580_v22  ;;  %v10582_v19 = vld [vmem:[%s19034_s3 + $0x360] sm:$0xff] }
 0x697   : > { %12712 = vmatprep.subr.bf16.mxu1 %v19153_v28 }
 0x698   : > { %v11953_v55 = vpop.f32.mrb[78].mxu1 }
 0x699   : > { %v17347_v32 = vadd.f32 %v11953_v55, %v17044_v62  ;;  %v5458_v16 = vpop.f32.mrb[79].mxu1  ;;  %12031 = vmatmul.mubr.msk.f32.gmra.mrb[184].mxu1 %vm4118_vm5, %v5657_v20  ;;  %v10583_v62 = vld [vmem:[%s19034_s3 + $0x368] sm:$0xff] }
 0x69a   : > { %v17351_v52 = vadd.f32 %v5458_v16, %v17038_v21  ;;  %12714 = vmatpush1.bf16.msra.mxu1 %v12713_v5  ;;  %12033 = vmatprep.mubr.msk.f32.mxu1 %vm4118_vm5, %v5660_v54  ;;  %v5663_v55 = vld [vmem:[#allocation3 + $0x2c8] sm:$0xff]  ;;  %v5666_v5 = vld [vmem:[#allocation3 + $0x2e0] sm:$0xff]  ;;  %v12719_v2 = vpack.c.bf16 %v10583_v62, %v10582_v19  ;;  %v10585_v54 = vld [vmem:[%s19034_s3 + $0x378] sm:$0xff] }
 0x69b   : > { %19240 = vst [vmem:[#allocation114_spill] sm:$0xff] %v17347_v32  ;;  %12715 = vmatprep.subr.bf16.mxu1 %v19153_v28  ;;  %v17368_v16 = vld [vmem:[%s19035_s4] ss:$0 sm:$0xff]  ;;  %v5669_v19 = vld [vmem:[#allocation3 + $0x2f8] sm:$0xff]  ;;  %v17641_v32 = vld [vmem:[#allocation3 + $0x330] sm:$0xff] }
 0x69c   : > { %19241 = vst [vmem:[#allocation115_spill] sm:$0xff] %v17351_v52  ;;  %v11956_v56 = vpop.f32.mrb[80].mxu1 }
 0x69d   : > { %v5474_v20 = vadd.f32 %v11956_v56, %v17056_v50  ;;  %v5468_v21 = vpop.f32.mrb[81].mxu1  ;;  %12034 = vmatmul.mubr.msk.f32.gmra.mrb[186].mxu1 %vm4118_vm5, %v5663_v55  ;;  %v10584_v50 = vld [vmem:[%s19034_s3 + $0x370] sm:$0xff] }
 0x69e   : > { %v5469_v22 = vadd.f32 %v5468_v21, %v17050_v44  ;;  %12717 = vmatpush1.bf16.msra.mxu1 %v12716_v37  ;;  %12036 = vmatprep.mubr.msk.f32.mxu1 %vm4118_vm5, %v5666_v5  ;;  %v5672_v21 = vld [vmem:[#allocation3 + $0x310] sm:$0xff]  ;;  %v12722_v27 = vpack.c.bf16 %v10585_v54, %v10584_v50 }
 0x69f   : > { %12718 = vmatprep.subr.bf16.mxu1 %v19153_v28  ;;  %v17378_v44 = vadd.f32 %v17368_v16, %v5474_v20 }
 0x6a0   : > { %v11959_v37 = vpop.f32.mrb[82].mxu1  ;;  %v17381_v62 = vadd.f32 %v17368_v16, %v5469_v22  ;;  %v5675_v22 = vld [vmem:[#allocation3 + $0x328] sm:$0xff] }
 0x6a1   : > { %19242 = vst [vmem:[#allocation116_spill] sm:$0xff] %v17378_v44  ;;  %v5484_v56 = vadd.f32 %v11959_v37, %v17068_v60  ;;  %v5478_v55 = vpop.f32.mrb[83].mxu1  ;;  %12037 = vmatmul.mubr.msk.f32.gmra.mrb[188].mxu1 %vm4118_vm5, %v5669_v19 }
 0x6a2   : > { %19243 = vst [vmem:[#allocation117_spill] sm:$0xff] %v17381_v62  ;;  %v5479_v5 = vadd.f32 %v5478_v55, %v17062_v33  ;;  %12720 = vmatpush1.bf16.msra.mxu1 %v12719_v2  ;;  %12039 = vmatprep.mubr.msk.f32.mxu1 %vm4118_vm5, %v5672_v21 }
 0x6a3   : > { %12721 = vmatprep.subr.bf16.mxu1 %v19153_v28  ;;  %v17389_v20 = vadd.f32 %v17368_v16, %v5484_v56 }
 0x6a4   : > { %v11962_v44 = vpop.f32.mrb[84].mxu1  ;;  %v17392_v62 = vadd.f32 %v17368_v16, %v5479_v5 }
 0x6a5   : > { %19244 = vst [vmem:[#allocation118_spill] sm:$0xff] %v17389_v20  ;;  %v5494_v60 = vadd.f32 %v11962_v44, %v17080_v7  ;;  %v5488_v37 = vpop.f32.mrb[85].mxu1  ;;  %12040 = vmatmul.mubr.msk.f32.gmra.mrb[190].mxu1 %vm4118_vm5, %v5675_v22 }
 0x6a6   : > { %19245 = vst [vmem:[#allocation119_spill] sm:$0xff] %v17392_v62  ;;  %v5489_v33 = vadd.f32 %v5488_v37, %v17074_v43  ;;  %12723 = vmatpush1.bf16.msra.mxu1 %v12722_v27  ;;  %6592 = vmatprep.mubr.f32.mxu1 %v16902_v15  ;;  %v19248_v43 = vld [vmem:[#allocation5_spill] sm:$0xff] }
 0x6a7   : > { %12940 = vmatprep.subr.bf16.mxu1 %v19153_v28  ;;  %v17400_v2 = vadd.f32 %v17368_v16, %v5494_v60 }
 0x6a8   : > { %v11965_v50 = vpop.f32.mrb[86].mxu1  ;;  %v17403_v54 = vadd.f32 %v17368_v16, %v5489_v33 }
 0x6a9   : > { %19246 = vst [vmem:[#allocation120_spill] sm:$0xff] %v17400_v2  ;;  %v5504_v19 = vadd.f32 %v11965_v50, %v17096_v12  ;;  %v5498_v7 = vpop.f32.mrb[87].mxu1  ;;  %6593 = vmatmul.mubr.f32.vlgmr.msra.gmra.mrb[192].mxu1 %v16905_v58  ;;  %v17604_v2 = vld [vmem:[#allocation3 + $0x2c0] sm:$0xff] }
 0x6aa   : > { %19247 = vst [vmem:[#allocation121_spill] sm:$0xff] %v17403_v54  ;;  %v5499_v44 = vadd.f32 %v5498_v7, %v17088_v26  ;;  %12956 = vmatpush1.bf16.msra.mxu1 %v19248_v43  ;;  %6597 = vmatprep.mubr.f32.mxu1 %v16908_v3  ;;  %v19251_v26 = vld [vmem:[#allocation6_spill] sm:$0xff] }
 0x6ab   : > { %12941 = vmatprep.subr.bf16.mxu1 %v19153_v28  ;;  %v17412_v27 = vadd.f32 %v17368_v16, %v5504_v19 }
 0x6ac   : > { %v11968_v15 = vpop.f32.mrb[88].mxu1  ;;  %v17415_v56 = vadd.f32 %v17368_v16, %v5499_v44 }
 0x6ad   : > { %19249 = vst [vmem:[#allocation5_spill] sm:$0xff] %v17412_v27  ;;  %v5514_v12 = vadd.f32 %v11968_v15, %v17114_v8  ;;  %v5508_v55 = vpop.f32.mrb[89].mxu1  ;;  %6598 = vmatmul.mubr.f32.gmra.mrb[194].mxu1 %v16911_v59  ;;  %v19264_v15 = vld [vmem:[#allocation56_spill] sm:$0xff] }
 0x6ae   : > { %19250 = vst [vmem:[#allocation122_spill] sm:$0xff] %v17415_v56  ;;  %v5509_v58 = vadd.f32 %v5508_v55, %v17104_v51  ;;  %6602 = vmatprep.mubr.f32.mxu1 %v16914_v38  ;;  %12957 = vmatpush1.bf16.msra.mxu1 %v19251_v26  ;;  %v19254_v38 = vld [vmem:[#allocation7_spill] sm:$0xff]  ;;  %v19268_v26 = vld [vmem:[#allocation12_spill] sm:$0xff]  ;;  %v17596_v56 = vld [vmem:[#allocation3 + $0x2a8] sm:$0xff] }
 0x6af   : > { %12942 = vmatprep.subr.bf16.mxu1 %v19153_v28  ;;  %v17424_v3 = vadd.f32 %v17368_v16, %v5514_v12  ;;  %v19265_v12 = vld [vmem:[#allocation11_spill] sm:$0xff] }
 0x6b0   : > { %v11971_v21 = vpop.f32.mrb[90].mxu1  ;;  %v17427_v5 = vadd.f32 %v17368_v16, %v5509_v58  ;;  %v19266_v58 = vld [vmem:[#allocation57_spill] sm:$0xff] }
 0x6b1   : > { %19252 = vst [vmem:[#allocation6_spill] sm:$0xff] %v17424_v3  ;;  %v5524_v8 = vadd.f32 %v11971_v21, %v17149_v24  ;;  %v5518_v22 = vpop.f32.mrb[91].mxu1  ;;  %6603 = vmatmul.mubr.f32.gmra.mrb[196].mxu1 %v16918_v39 }
 0x6b2   : > { %19253 = vst [vmem:[#allocation123_spill] sm:$0xff] %v17427_v5  ;;  %v5519_v59 = vadd.f32 %v5518_v22, %v17132_v35  ;;  %6607 = vmatprep.mubr.f32.mxu1 %v16921_v57  ;;  %12958 = vmatpush1.bf16.msra.mxu1 %v19254_v38  ;;  %v19257_v57 = vld [vmem:[#allocation8_spill] sm:$0xff] }
 0x6b3   : > { %12943 = vmatprep.subr.bf16.mxu1 %v19153_v28  ;;  %v17436_v51 = vadd.f32 %v17368_v16, %v5524_v8  ;;  %v19269_v8 = vld [vmem:[#allocation59_spill] sm:$0xff]  ;;  %v19270_v22 = vld [vmem:[#allocation60_spill] sm:$0xff] }
 0x6b4   : > { %v11974_v60 = vpop.f32.mrb[92].mxu1  ;;  %v17439_v37 = vadd.f32 %v17368_v16, %v5519_v59  ;;  %v19271_v59 = vld [vmem:[#allocation13_spill] sm:$0xff] }
 0x6b5   : > { %19255 = vst [vmem:[#allocation7_spill] sm:$0xff] %v17436_v51  ;;  %v5534_v24 = vadd.f32 %v11974_v60, %v17183_v36  ;;  %v5528_v33 = vpop.f32.mrb[93].mxu1  ;;  %6608 = vmatmul.mubr.f32.gmra.mrb[198].mxu1 %v16924_v48  ;;  %v17588_v51 = vld [vmem:[#allocation3 + $0x290] sm:$0xff] }
 0x6b6   : > { %19256 = vst [vmem:[#allocation124_spill] sm:$0xff] %v17439_v37  ;;  %v5529_v39 = vadd.f32 %v5528_v33, %v17166_v45  ;;  %6612 = vmatprep.mubr.f32.mxu1 %v16927_v29  ;;  %12959 = vmatpush1.bf16.msra.mxu1 %v19257_v57  ;;  %v19260_v29 = vld [vmem:[#allocation9_spill] sm:$0xff]  ;;  %v19273_v33 = vld [vmem:[#allocation63_spill] sm:$0xff] }
 0x6b7   : > { %12944 = vmatprep.subr.bf16.mxu1 %v19153_v28  ;;  %v17448_v35 = vadd.f32 %v17368_v16, %v5534_v24  ;;  %v19272_v24 = vld [vmem:[#allocation62_spill] sm:$0xff] }
 0x6b8   : > { %v11977_v50 = vpop.f32.mrb[94].mxu1  ;;  %v17451_v19 = vadd.f32 %v17368_v16, %v5529_v39  ;;  %v19274_v39 = vld [vmem:[#allocation14_spill] sm:$0xff] }
 0x6b9   : > { %19258 = vst [vmem:[#allocation8_spill] sm:$0xff] %v17448_v35  ;;  %v5544_v36 = vadd.f32 %v11977_v50, %v17214_v25  ;;  %v5538_v7 = vpop.f32.mrb[95].mxu1  ;;  %6613 = vmatmul.mubr.f32.gmra.mrb[200].mxu1 %v16930_v61  ;;  %v19263_v61 = vld [vmem:[#allocation10_spill] sm:$0xff] }
 0x6ba   : > { %19259 = vst [vmem:[#allocation125_spill] sm:$0xff] %v17451_v19  ;;  %v5539_v48 = vadd.f32 %v5538_v7, %v17199_v14  ;;  %6617 = vmatprep.mubr.f32.mxu1 %v16933_v47  ;;  %12960 = vmatpush1.bf16.msra.mxu1 %v19260_v29  ;;  %v19276_v7 = vld [vmem:[#allocation66_spill] sm:$0xff]  ;;  %v17580_v19 = vld [vmem:[#allocation3 + $0x278] sm:$0xff] }
 0x6bb   : > { %12945 = vmatprep.subr.bf16.mxu1 %v19153_v28  ;;  %v17460_v45 = vadd.f32 %v17368_v16, %v5544_v36  ;;  %v19275_v36 = vld [vmem:[#allocation65_spill] sm:$0xff] }
 0x6bc   : > { %v17462_v44 = vpop.f32.mrb[96].mxu1  ;;  %v17465_v43 = vadd.f32 %v17368_v16, %v5539_v48  ;;  %v19277_v48 = vld [vmem:[#allocation15_spill] sm:$0xff] }
 0x6bd   : > { %19261 = vst [vmem:[#allocation9_spill] sm:$0xff] %v17460_v45  ;;  %v5881_v25 = vpop.f32.mrb[97].mxu1  ;;  %6618 = vmatmul.mubr.f32.gmra.mrb[202].mxu1 %v16936_v53 }
 0x6be   : > { %19262 = vst [vmem:[#allocation126_spill] sm:$0xff] %v17465_v43  ;;  %6622 = vmatprep.mubr.f32.mxu1 %v16939_v30  ;;  %12961 = vmatpush1.bf16.msra.mxu1 %v19263_v61  ;;  %v19267_v30 = vld [vmem:[#allocation58_spill] sm:$0xff]  ;;  %v19278_v61 = vld [vmem:[#allocation68_spill] sm:$0xff] }
 0x6bf   : > { %12946 = vmatprep.subr.bf16.mxu1 %v19153_v28 }
 0x6c0   : > { %v17471_v47 = vpop.f32.mrb[98].mxu1 }
 0x6c1   : > { %v5886_v14 = vpop.f32.mrb[99].mxu1  ;;  %6623 = vmatmul.mubr.f32.gmra.mrb[204].mxu1 %v16942_v41 }
 0x6c2   : > { %6627 = vmatprep.mubr.f32.mxu1 %v19264_v15  ;;  %12962 = vmatpush1.bf16.msra.mxu1 %v19265_v12  ;;  %v19279_v14 = vld [vmem:[#allocation69_spill] sm:$0xff]  ;;  %v19280_v15 = vld [vmem:[#allocation16_spill] sm:$0xff] }
 0x6c3   : > { %12947 = vmatprep.subr.bf16.mxu1 %v19153_v28 }
 0x6c4   : > { %v17477_v55 = vpop.f32.mrb[100].mxu1 }
 0x6c5   : > { %v5891_v53 = vpop.f32.mrb[101].mxu1  ;;  %6628 = vmatmul.mubr.f32.gmra.mrb[206].mxu1 %v19266_v58  ;;  %v19281_v58 = vld [vmem:[#allocation71_spill] sm:$0xff] }
 0x6c6   : > { %6632 = vmatprep.mubr.f32.mxu1 %v19267_v30  ;;  %12963 = vmatpush1.bf16.msra.mxu1 %v19268_v26  ;;  %v19282_v30 = vld [vmem:[#allocation72_spill] sm:$0xff]  ;;  %v19283_v26 = vld [vmem:[#allocation17_spill] sm:$0xff] }
 0x6c7   : > { %12948 = vmatprep.subr.bf16.mxu1 %v19153_v28 }
 0x6c8   : > { %v17483_v21 = vpop.f32.mrb[102].mxu1 }
 0x6c9   : > { %v5896_v41 = vpop.f32.mrb[103].mxu1  ;;  %6633 = vmatmul.mubr.f32.gmra.mrb[208].mxu1 %v19269_v8 }
 0x6ca   : > { %6637 = vmatprep.mubr.f32.mxu1 %v19270_v22  ;;  %12964 = vmatpush1.bf16.msra.mxu1 %v19271_v59  ;;  %v19284_v22 = vld [vmem:[#allocation74_spill] sm:$0xff]  ;;  %v19285_v59 = vld [vmem:[#allocation75_spill] sm:$0xff] }
 0x6cb   : > { %12949 = vmatprep.subr.bf16.mxu1 %v19153_v28 }
 0x6cc   : > { %v17489_v38 = vpop.f32.mrb[104].mxu1 }
 0x6cd   : > { %v5901_v60 = vpop.f32.mrb[105].mxu1  ;;  %6638 = vmatmul.mubr.f32.gmra.mrb[210].mxu1 %v19272_v24 }
 0x6ce   : > { %6642 = vmatprep.mubr.f32.mxu1 %v19273_v33  ;;  %12965 = vmatpush1.bf16.msra.mxu1 %v19274_v39  ;;  %v19286_v60 = vld [vmem:[#allocation18_spill] sm:$0xff]  ;;  %v10658_v33 = vld [vmem:[%s19034_s3 + $0x4c0] sm:$0xff] }
 0x6cf   : > { %12950 = vmatprep.subr.bf16.mxu1 %v19153_v28  ;;  %v10659_v39 = vld [vmem:[%s19034_s3 + $0x4c8] sm:$0xff] }
 0x6d0   : > { %v17495_v57 = vpop.f32.mrb[106].mxu1 }
 0x6d1   : > { %v5906_v50 = vpop.f32.mrb[107].mxu1  ;;  %6643 = vmatmul.mubr.f32.gmra.mrb[212].mxu1 %v19275_v36  ;;  %v19287_v36 = vld [vmem:[#allocation77_spill] sm:$0xff] }
 0x6d2   : > { %6647 = vmatprep.mubr.f32.mxu1 %v19276_v7  ;;  %12966 = vmatpush1.bf16.msra.mxu1 %v19277_v48  ;;  %v19288_v7 = vld [vmem:[#allocation78_spill] sm:$0xff]  ;;  %v19289_v48 = vld [vmem:[#allocation19_spill] sm:$0xff] }
 0x6d3   : > { %12951 = vmatprep.subr.bf16.mxu1 %v19153_v28 }
 0x6d4   : > { %v17501_v29 = vpop.f32.mrb[108].mxu1 }
 0x6d5   : > { %v5911_v25 = vpop.f32.mrb[109].mxu1  ;;  %6648 = vmatmul.mubr.f32.gmra.mrb[214].mxu1 %v19278_v61 }
 0x6d6   : > { %6652 = vmatprep.mubr.f32.mxu1 %v19279_v14  ;;  %12967 = vmatpush1.bf16.msra.mxu1 %v19280_v15  ;;  %v17531_v25 = vpack.c.bf16 %v10659_v39, %v10658_v33  ;;  %v19290_v15 = vld [vmem:[#allocation80_spill] sm:$0xff] }
 0x6d7   : > { %12952 = vmatprep.subr.bf16.mxu1 %v19153_v28  ;;  %v17548_v39 = vld [vmem:[#allocation3 + $0x218] sm:$0xff] }
 0x6d8   : > { %v17507_v12 = vpop.f32.mrb[110].mxu1 }
 0x6d9   : > { %v5916_v53 = vpop.f32.mrb[111].mxu1  ;;  %6653 = vmatmul.mubr.f32.gmra.mrb[216].mxu1 %v19281_v58  ;;  %v19291_v58 = vld [vmem:[#allocation20_spill] sm:$0xff] }
 0x6da   : > { %6657 = vmatprep.mubr.f32.mxu1 %v19282_v30  ;;  %12968 = vmatpush1.bf16.msra.mxu1 %v19283_v26  ;;  %v6344_v53 = vld [vmem:[#allocation3 + $0x1e8] sm:$0xff]  ;;  %v6343_v26 = vld [vmem:[#allocation3 + $0x1e0] sm:$0xff] }
 0x6db   : > { %12953 = vmatprep.subr.bf16.mxu1 %v19153_v28 }
 0x6dc   : > { %v17513_v41 = vpop.f32.mrb[112].mxu1 }
 0x6dd   : > { %v5921_v8 = vpop.f32.mrb[113].mxu1  ;;  %6658 = vmatmul.mubr.f32.gmra.mrb[218].mxu1 %v19284_v22  ;;  %v17540_v22 = vld [vmem:[#allocation3 + $0x200] sm:$0xff] }
 0x6de   : > { %6662 = vmatprep.mubr.f32.mxu1 %v19285_v59  ;;  %12969 = vmatpush1.bf16.msra.mxu1 %v19286_v60  ;;  %v17545_v60 = vld [vmem:[#allocation3 + $0x1f8] sm:$0xff] }
 0x6df   : > { %12954 = vmatprep.subr.bf16.mxu1 %v19153_v28 }
 0x6e0   : > { %v17519_v24 = vpop.f32.mrb[114].mxu1 }
 0x6e1   : > { %v5926_v50 = vpop.f32.mrb[115].mxu1  ;;  %6663 = vmatmul.mubr.f32.gmra.mrb[220].mxu1 %v19287_v36  ;;  %v17553_v36 = vld [vmem:[#allocation3 + $0x210] sm:$0xff] }
 0x6e2   : > { %6667 = vmatprep.mubr.f32.mxu1 %v19288_v7  ;;  %12970 = vmatpush1.bf16.msra.mxu1 %v19289_v48  ;;  %v17556_v48 = vld [vmem:[#allocation3 + $0x230] sm:$0xff] }
 0x6e3   : > { %12955 = vmatprep.subr.bf16.mxu1 %v19153_v28 }
 0x6e4   : > { %v17533_v61 = vpop.f32.mrb[116].mxu1 }
 0x6e5   : > { %v5931_v14 = vpop.f32.mrb[117].mxu1  ;;  %6668 = vmatmul.mubr.f32.gmra.mrb[222].mxu1 %v19290_v15  ;;  %v17561_v15 = vld [vmem:[#allocation3 + $0x228] sm:$0xff] }
 0x6e6   : > { %6672 = vmatprep.mubr.f32.mxu1 %v6344_v53  ;;  %12971 = vmatpush1.bf16.msra.mxu1 %v19291_v58  ;;  %v17564_v58 = vld [vmem:[#allocation3 + $0x248] sm:$0xff] }
 0x6e7   : > { %12789 = vmatprep.subr.bf16.mxu1 %v17531_v25 }
 0x6e8   : > { %v17538_v30 = vpop.f32.mrb[118].mxu1 }
 0x6e9   : > { %v5936_v8 = vpop.f32.mrb[119].mxu1  ;;  %6673 = vmatmul.mubr.f32.gmra.mrb[224].mxu1 %v6343_v26 }
 0x6ea   : > { %6677 = vmatprep.mubr.f32.mxu1 %v17540_v22  ;;  %v17569_v8 = vld [vmem:[#allocation3 + $0x240] sm:$0xff] }
 0x6ec   : > { %v17543_v59 = vpop.f32.mrb[120].mxu1 }
 0x6ed   : > { %v5941_v33 = vpop.f32.mrb[121].mxu1  ;;  %6678 = vmatmul.mubr.f32.gmra.mrb[226].mxu1 %v17545_v60 }
 0x6ee   : > { %6682 = vmatprep.mubr.f32.mxu1 %v17548_v39 }
 0x6f0   : > { %v17551_v50 = vpop.f32.mrb[122].mxu1 }
 0x6f1   : > { %v5946_v7 = vpop.f32.mrb[123].mxu1  ;;  %6683 = vmatmul.mubr.f32.gmra.mrb[228].mxu1 %v17553_v36 }
 0x6f2   : > { %6687 = vmatprep.mubr.f32.mxu1 %v17556_v48  ;;  %v17572_v7 = vld [vmem:[#allocation3 + $0x260] sm:$0xff] }
 0x6f4   : > { %v17559_v14 = vpop.f32.mrb[124].mxu1 }
 0x6f5   : > { %19292 = vst [vmem:[#allocation10_spill] sm:$0xff] %v17559_v14  ;;  %v5951_v53 = vpop.f32.mrb[125].mxu1  ;;  %6688 = vmatmul.mubr.f32.gmra.mrb[230].mxu1 %v17561_v15 }
 0x6f6   : > { %6692 = vmatprep.mubr.f32.mxu1 %v17564_v58  ;;  %v17577_v53 = vld [vmem:[#allocation3 + $0x258] sm:$0xff] }
 0x6f8   : > { %v17567_v26 = vpop.f32.mrb[126].mxu1 }
 0x6f9   : > { %19293 = vst [vmem:[#allocation56_spill] sm:$0xff] %v17567_v26  ;;  %v5956_v33 = vpop.f32.mrb[127].mxu1  ;;  %6693 = vmatmul.mubr.f32.gmra.mrb[232].mxu1 %v17569_v8 }
 0x6fa   : > { %6697 = vmatprep.mubr.f32.mxu1 %v17572_v7  ;;  %v17585_v33 = vld [vmem:[#allocation3 + $0x270] sm:$0xff] }
 0x6fc   : > { %v17575_v43 = vpop.f32.mrb[128].mxu1 }
 0x6fd   : > { %19294 = vst [vmem:[#allocation11_spill] sm:$0xff] %v17575_v43  ;;  %v5961_v45 = vpop.f32.mrb[129].mxu1  ;;  %6698 = vmatmul.mubr.f32.gmra.mrb[234].mxu1 %v17577_v53 }
 0x6fe   : > { %6702 = vmatprep.mubr.f32.mxu1 %v17580_v19  ;;  %v17593_v45 = vld [vmem:[#allocation3 + $0x288] sm:$0xff] }
 0x700   : > { %v17583_v35 = vpop.f32.mrb[130].mxu1 }
 0x701   : > { %19295 = vst [vmem:[#allocation57_spill] sm:$0xff] %v17583_v35  ;;  %v5966_v37 = vpop.f32.mrb[131].mxu1  ;;  %6703 = vmatmul.mubr.f32.gmra.mrb[236].mxu1 %v17585_v33  ;;  %v17620_v35 = vld [vmem:[#allocation3 + $0x2f0] sm:$0xff] }
 0x702   : > { %6707 = vmatprep.mubr.f32.mxu1 %v17588_v51  ;;  %v17601_v37 = vld [vmem:[#allocation3 + $0x2a0] sm:$0xff] }
 0x704   : > { %v17591_v5 = vpop.f32.mrb[132].mxu1 }
 0x705   : > { %19296 = vst [vmem:[#allocation58_spill] sm:$0xff] %v17591_v5  ;;  %v5971_v3 = vpop.f32.mrb[133].mxu1  ;;  %6708 = vmatmul.mubr.f32.gmra.mrb[238].mxu1 %v17593_v45  ;;  %v17612_v5 = vld [vmem:[#allocation3 + $0x2d8] sm:$0xff] }
 0x706   : > { %6712 = vmatprep.mubr.f32.mxu1 %v17596_v56  ;;  %v17609_v3 = vld [vmem:[#allocation3 + $0x2b8] sm:$0xff] }
 0x708   : > { %v17599_v27 = vpop.f32.mrb[134].mxu1 }
 0x709   : > { %19297 = vst [vmem:[#allocation12_spill] sm:$0xff] %v17599_v27  ;;  %v5976_v54 = vpop.f32.mrb[135].mxu1  ;;  %6713 = vmatmul.mubr.f32.gmra.mrb[240].mxu1 %v17601_v37 }
 0x70a   : > { %6717 = vmatprep.mubr.f32.mxu1 %v17604_v2  ;;  %v17617_v54 = vld [vmem:[#allocation3 + $0x2d0] sm:$0xff] }
 0x70c   : > { %v17607_v62 = vpop.f32.mrb[136].mxu1 }
 0x70d   : > { %19298 = vst [vmem:[#allocation59_spill] sm:$0xff] %v17607_v62  ;;  %v5981_v20 = vpop.f32.mrb[137].mxu1  ;;  %6718 = vmatmul.mubr.f32.gmra.mrb[242].mxu1 %v17609_v3 }
 0x70e   : > { %6722 = vmatprep.mubr.f32.mxu1 %v17612_v5  ;;  %v17625_v20 = vld [vmem:[#allocation3 + $0x2e8] sm:$0xff] }
 0x710   : > { %v17615_v27 = vpop.f32.mrb[138].mxu1 }
 0x711   : > { %19299 = vst [vmem:[#allocation60_spill] sm:$0xff] %v17615_v27  ;;  %v5986_v43 = vpop.f32.mrb[139].mxu1  ;;  %6723 = vmatmul.mubr.f32.gmra.mrb[244].mxu1 %v17617_v54 }
 0x712   : > { %6727 = vmatprep.mubr.f32.mxu1 %v17620_v35 }
 0x714   : > { %v17623_v62 = vpop.f32.mrb[140].mxu1 }
 0x715   : > { %19300 = vst [vmem:[#allocation13_spill] sm:$0xff] %v17623_v62  ;;  %v5991_v14 = vpop.f32.mrb[141].mxu1  ;;  %6728 = vmatmul.mubr.f32.gmra.mrb[246].mxu1 %v17625_v20  ;;  %v17636_v62 = vld [vmem:[#allocation3 + $0x338] sm:$0xff] }
 0x716   : > { %6732 = vmatprep.mubr.f32.mxu1 %v17111_v13 }
 0x718   : > { %v17629_v52 = vpop.f32.mrb[142].mxu1 }
 0x719   : > { %19301 = vst [vmem:[#allocation62_spill] sm:$0xff] %v17629_v52  ;;  %v5996_v27 = vpop.f32.mrb[143].mxu1  ;;  %6733 = vmatmul.mubr.f32.gmra.mrb[248].mxu1 %v17118_v49  ;;  %v10663_v52 = vld [vmem:[%s19034_s3 + $0x4e8] sm:$0xff] }
 0x71a   : > { %6737 = vmatprep.mubr.f32.mxu1 %v17123_v34  ;;  %v17644_v27 = vld [vmem:[#allocation3 + $0x350] sm:$0xff]  ;;  %v17649_v34 = vld [vmem:[#allocation3 + $0x348] sm:$0xff] }
 0x71b   : > { %19304 = vst [vmem:[#allocation65_spill] sm:$0xff] %v17644_v27 }
 0x71c   : > { %v17633_v43 = vpop.f32.mrb[144].mxu1 }
 0x71d   : > { %19302 = vst [vmem:[#allocation63_spill] sm:$0xff] %v17633_v43  ;;  %v6001_v26 = vpop.f32.mrb[145].mxu1  ;;  %6738 = vmatmul.mubr.f32.gmra.mrb[250].mxu1 %v17136_v42  ;;  %v10660_v42 = vld [vmem:[%s19034_s3 + $0x4d0] sm:$0xff] }
 0x71e   : > { %6742 = vmatprep.mubr.f32.mxu1 %v17636_v62  ;;  %v10661_v26 = vld [vmem:[%s19034_s3 + $0x4d8] sm:$0xff] }
 0x720   : > { %v17639_v14 = vpop.f32.mrb[146].mxu1 }
 0x721   : > { %19303 = vst [vmem:[#allocation14_spill] sm:$0xff] %v17639_v14  ;;  %v6006_v13 = vpop.f32.mrb[147].mxu1  ;;  %6743 = vmatmul.mubr.f32.gmra.mrb[252].mxu1 %v17641_v32 }
 0x722   : > { %6747 = vmatprep.mubr.f32.mxu1 %v17644_v27  ;;  %v12792_v13 = vpack.c.bf16 %v10661_v26, %v10660_v42  ;;  %v10664_v26 = vld [vmem:[%s19034_s3 + $0x4f0] sm:$0xff] }
 0x724   : > { %v17647_v49 = vpop.f32.mrb[148].mxu1 }
 0x725   : > { %19305 = vst [vmem:[#allocation66_spill] sm:$0xff] %v17647_v49  ;;  %v6011_v43 = vpop.f32.mrb[149].mxu1  ;;  %6748 = vmatmul.mubr.f32.gmra.mrb[254].mxu1 %v17649_v34  ;;  %v10662_v49 = vld [vmem:[%s19034_s3 + $0x4e0] sm:$0xff] }
 0x726   : > { %7383 = vmatprep.mubr.f32.mxu1 %v17540_v22  ;;  %v12796_v22 = vpack.c.bf16 %v10663_v52, %v10662_v49  ;;  %v17670_v43 = vld [vmem:[#allocation3 + $0x370] sm:$0xff] }
 0x727   : > { %12228 = vmatprep.mubr.msk.f32.mxu0 %vm4118_vm5, %v17670_v43 }
 0x728   : > { %v17659_v14 = vpop.f32.mrb[150].mxu1 }
 0x729   : > { %19306 = vst [vmem:[#allocation15_spill] sm:$0xff] %v17659_v14  ;;  %v6016_v27 = vpop.f32.mrb[151].mxu1  ;;  %7384 = vmatmul.mubr.f32.vlgmr.msra.gmra.mrb[0].mxu1 %v17545_v60  ;;  %v17680_v14 = vld [vmem:[#allocation3 + $0x388] sm:$0xff] }
 0x72a   : > { %12791 = vmatpush3.bf16.msra.mxu1 %v17531_v25  ;;  %7388 = vmatprep.mubr.f32.mxu1 %v17548_v39  ;;  %v10665_v27 = vld [vmem:[%s19034_s3 + $0x4f8] sm:$0xff] }
 0x72b   : > { %12793 = vmatprep.subr.bf16.mxu1 %v12792_v13  ;;  %12229 = vmatmul.mubr.msk.f32.gmra.mrb[122].mxu0 %vm4118_vm5, %v17680_v14  ;;  %v12800_v52 = vpack.c.bf16 %v10665_v27, %v10664_v26 }
 0x72c   : > { %v17672_v42 = vpop.f32.mrb[152].mxu1 }
 0x72d   : > { %v6021_v25 = vpop.f32.mrb[153].mxu1  ;;  %7389 = vmatmul.mubr.f32.gmra.mrb[2].mxu1 %v17553_v36 }
 0x72e   : > { %7393 = vmatprep.mubr.f32.mxu1 %v17556_v48  ;;  %12795 = vmatpush3.bf16.msra.mxu1 %v12792_v13 }
 0x72f   : > { %12797 = vmatprep.subr.bf16.mxu1 %v12796_v22 }
 0x730   : > { %v17688_v60 = vpop.f32.mrb[154].mxu1 }
 0x731   : > { %v6026_v39 = vpop.f32.mrb[155].mxu1  ;;  %7394 = vmatmul.mubr.f32.gmra.mrb[4].mxu1 %v17561_v15 }
 0x732   : > { %7398 = vmatprep.mubr.f32.mxu1 %v17564_v58  ;;  %12799 = vmatpush3.bf16.msra.mxu1 %v12796_v22  ;;  %v5548_v58 = vadd.f32 %v17368_v16, %v17232_v10  ;;  %v5550_v10 = vadd.f32 %v17368_v16, %v17251_v46  ;;  %v5552_v46 = vadd.f32 %v17368_v16, %v17270_v31 }
 0x733   : > { %12801 = vmatprep.subr.bf16.mxu1 %v12800_v52  ;;  %v5554_v31 = vadd.f32 %v17368_v16, %v17287_v1  ;;  %v5556_v1 = vadd.f32 %v17368_v16, %v17302_v40  ;;  %v5558_v40 = vadd.f32 %v17368_v16, %v17317_v11  ;;  %v17775_v11 = vld [vmem:[#allocation3 + $0x300] sm:$0xff] }
 0x734   : > { %v17692_v49 = vpop.f32.mrb[156].mxu1 }
 0x735   : > { %v6031_v36 = vpop.f32.mrb[157].mxu1  ;;  %7399 = vmatmul.mubr.f32.gmra.mrb[6].mxu1 %v17569_v8  ;;  %v5547_v8 = vadd.f32 %v17368_v16, %v17238_v4  ;;  %v5549_v4 = vadd.f32 %v17368_v16, %v17257_v23  ;;  %v5551_v23 = vadd.f32 %v17368_v16, %v17276_v0  ;;  %v5553_v0 = vadd.f32 %v17368_v16, %v17291_v6 }
 0x736   : > { %7403 = vmatprep.mubr.f32.mxu1 %v17572_v7  ;;  %12803 = vmatpush3.bf16.msra.mxu1 %v12800_v52  ;;  %v5555_v6 = vadd.f32 %v17368_v16, %v17306_v18  ;;  %v5557_v18 = vadd.f32 %v17368_v16, %v17321_v17  ;;  %v17781_v17 = vld [vmem:[#allocation3 + $0x320] sm:$0xff] }
 0x737   : > { %12804 = vmatprep.subr.bf16.mxu1 %v19153_v28 }
 0x738   : > { %v17697_v48 = vpop.f32.mrb[158].mxu1 }
 0x739   : > { %v6036_v13 = vpop.f32.mrb[159].mxu1  ;;  %7404 = vmatmul.mubr.f32.gmra.mrb[8].mxu1 %v17577_v53 }
 0x73a   : > { %7408 = vmatprep.mubr.f32.mxu1 %v17580_v19 }
 0x73c   : > { %v11996_v15 = vpop.f32.mrb[160].mxu1 }
 0x73d   : > { %v6110_v22 = vadd.f32 %v11996_v15, %v17471_v47  ;;  %v6104_v26 = vpop.f32.mrb[161].mxu1  ;;  %7409 = vmatmul.mubr.f32.gmra.mrb[10].mxu1 %v17585_v33 }
 0x73e   : > { %v6105_v7 = vadd.f32 %v6104_v26, %v17462_v44  ;;  %7413 = vmatprep.mubr.f32.mxu1 %v17588_v51 }
 0x73f   : > { %v17709_v27 = vadd.f32 %v6110_v22, %v5548_v58 }
 0x740   : > { %v17711_v53 = vadd.f32 %v6105_v7, %v5547_v8  ;;  %v11999_v19 = vpop.f32.mrb[162].mxu1 }
 0x741   : > { %v6120_v47 = vadd.f32 %v11999_v19, %v17483_v21  ;;  %v6114_v25 = vpop.f32.mrb[163].mxu1  ;;  %7414 = vmatmul.mubr.f32.gmra.mrb[12].mxu1 %v17593_v45 }
 0x742   : > { %v6115_v44 = vadd.f32 %v6114_v25, %v17477_v55  ;;  %7418 = vmatprep.mubr.f32.mxu1 %v17596_v56 }
 0x743   : > { %v17721_v51 = vadd.f32 %v6120_v47, %v5550_v10 }
 0x744   : > { %v17723_v33 = vadd.f32 %v6115_v44, %v5549_v4  ;;  %v12002_v52 = vpop.f32.mrb[164].mxu1 }
 0x745   : > { %v6130_v21 = vadd.f32 %v12002_v52, %v17495_v57  ;;  %v6124_v39 = vpop.f32.mrb[165].mxu1  ;;  %7419 = vmatmul.mubr.f32.gmra.mrb[14].mxu1 %v17601_v37  ;;  %v19308_v52 = vld [vmem:[#allocation56_spill] sm:$0xff] }
 0x746   : > { %v6125_v55 = vadd.f32 %v6124_v39, %v17489_v38  ;;  %7423 = vmatprep.mubr.f32.mxu1 %v17604_v2  ;;  %v19310_v39 = vld [vmem:[#allocation10_spill] sm:$0xff] }
 0x747   : > { %v17733_v56 = vadd.f32 %v6130_v21, %v5552_v46 }
 0x748   : > { %v17735_v45 = vadd.f32 %v6125_v55, %v5551_v23  ;;  %v12005_v36 = vpop.f32.mrb[166].mxu1 }
 0x749   : > { %v6140_v57 = vadd.f32 %v12005_v36, %v17507_v12  ;;  %v6134_v13 = vpop.f32.mrb[167].mxu1  ;;  %7424 = vmatmul.mubr.f32.gmra.mrb[16].mxu1 %v17609_v3 }
 0x74a   : > { %v6135_v38 = vadd.f32 %v6134_v13, %v17501_v29  ;;  %7428 = vmatprep.mubr.f32.mxu1 %v17612_v5 }
 0x74b   : > { %v17745_v2 = vadd.f32 %v6140_v57, %v5554_v31  ;;  %v19311_v57 = vld [vmem:[#allocation57_spill] sm:$0xff] }
 0x74c   : > { %v17747_v37 = vadd.f32 %v6135_v38, %v5553_v0  ;;  %v12008_v15 = vpop.f32.mrb[168].mxu1  ;;  %v19312_v38 = vld [vmem:[#allocation11_spill] sm:$0xff] }
 0x74d   : > { %v6150_v12 = vadd.f32 %v12008_v15, %v17519_v24  ;;  %v6144_v58 = vpop.f32.mrb[169].mxu1  ;;  %7429 = vmatmul.mubr.f32.gmra.mrb[18].mxu1 %v17617_v54  ;;  %v17765_v54 = vld [vmem:[#allocation3 + $0x308] sm:$0xff] }
 0x74e   : > { %v6145_v29 = vadd.f32 %v6144_v58, %v17513_v41  ;;  %7433 = vmatprep.mubr.f32.mxu1 %v17620_v35  ;;  %v19315_v58 = vld [vmem:[#allocation117_spill] sm:$0xff] }
 0x74f   : > { %v17757_v5 = vadd.f32 %v6150_v12, %v5556_v1  ;;  %v19313_v1 = vld [vmem:[#allocation65_spill] sm:$0xff]  ;;  %v19314_v12 = vld [vmem:[#allocation116_spill] sm:$0xff] }
 0x750   : > { %v17759_v3 = vadd.f32 %v6145_v29, %v5555_v6  ;;  %v12011_v22 = vpop.f32.mrb[170].mxu1  ;;  %v19316_v29 = vld [vmem:[#allocation12_spill] sm:$0xff] }
 0x751   : > { %v6160_v24 = vadd.f32 %v12011_v22, %v17538_v30  ;;  %v6154_v26 = vpop.f32.mrb[171].mxu1  ;;  %7434 = vmatmul.mubr.f32.gmra.mrb[20].mxu1 %v17625_v20  ;;  %v5560_v30 = vadd.f32 %v17368_v16, %v17332_v63  ;;  %v17791_v63 = vld [vmem:[#allocation3 + $0x318] sm:$0xff] }
 0x752   : > { %v6155_v35 = vadd.f32 %v6154_v26, %v17533_v61  ;;  %7438 = vmatprep.mubr.f32.mxu1 %v17765_v54  ;;  %v5559_v61 = vadd.f32 %v17368_v16, %v17336_v9  ;;  %v19309_v9 = vld [vmem:[#allocation115_spill] sm:$0xff] }
 0x753   : > { %v17771_v41 = vadd.f32 %v6160_v24, %v5558_v40  ;;  %v19317_v24 = vld [vmem:[#allocation58_spill] sm:$0xff] }
 0x754   : > { %v17773_v8 = vadd.f32 %v6155_v35, %v5557_v18  ;;  %v12014_v7 = vpop.f32.mrb[172].mxu1  ;;  %v17818_v18 = vld [vmem:[#allocation3] sm:$0xff] }
 0x755   : > { %v6170_v20 = vadd.f32 %v12014_v7, %v17551_v50  ;;  %v6164_v19 = vpop.f32.mrb[173].mxu1  ;;  %7439 = vmatmul.mubr.f32.gmra.mrb[22].mxu1 %v17775_v11  ;;  %v19307_v50 = vld [vmem:[#allocation114_spill] sm:$0xff]  ;;  %v19319_v7 = vld [vmem:[#allocation119_spill] sm:$0xff] }
 0x756   : > { %v6165_v10 = vadd.f32 %v6164_v19, %v17543_v59  ;;  %7443 = vmatprep.mubr.f32.mxu1 %v17781_v17  ;;  %v5562_v44 = vadd.f32 %v17368_v16, %v19307_v50  ;;  %v5561_v59 = vadd.f32 %v17368_v16, %v19309_v9  ;;  %v19320_v19 = vld [vmem:[#allocation60_spill] sm:$0xff] }
 0x757   : > { %v17787_v47 = vadd.f32 %v6170_v20, %v5560_v30  ;;  %v19322_v50 = vld [vmem:[#allocation120_spill] sm:$0xff] }
 0x758   : > { %v17789_v25 = vadd.f32 %v6165_v10, %v5559_v61  ;;  %v12017_v4 = vpop.f32.mrb[174].mxu1 }
 0x759   : > { %v6180_v46 = vadd.f32 %v12017_v4, %v19308_v52  ;;  %v6174_v21 = vpop.f32.mrb[175].mxu1  ;;  %7444 = vmatmul.mubr.f32.gmra.mrb[24].mxu1 %v17791_v63  ;;  %v19321_v4 = vld [vmem:[#allocation59_spill] sm:$0xff]  ;;  %v10698_v52 = vld [vmem:[%s19034_s3 + $0x500] sm:$0xff] }
 0x75a   : > { %v6175_v23 = vadd.f32 %v6174_v21, %v19310_v39  ;;  %7448 = vmatprep.mubr.f32.mxu1 %v17636_v62  ;;  %v19323_v21 = vld [vmem:[#allocation121_spill] sm:$0xff]  ;;  %v19324_v39 = vld [vmem:[#allocation62_spill] sm:$0xff] }
 0x75b   : > { %v17801_v55 = vadd.f32 %v6180_v46, %v5562_v44  ;;  %v10699_v46 = vld [vmem:[%s19034_s3 + $0x508] sm:$0xff] }
 0x75c   : > { %v17803_v36 = vadd.f32 %v6175_v23, %v5561_v59  ;;  %v12020_v31 = vpop.f32.mrb[176].mxu1 }
 0x75d   : > { %v6190_v13 = vadd.f32 %v12020_v31, %v19311_v57  ;;  %v6184_v0 = vpop.f32.mrb[177].mxu1  ;;  %7449 = vmatmul.mubr.f32.gmra.mrb[26].mxu1 %v17641_v32  ;;  %v19318_v32 = vld [vmem:[#allocation118_spill] sm:$0xff]  ;;  %v7013_v57 = vld [vmem:[#allocation3 + $0xa0] sm:$0xff] }
 0x75e   : > { %v6185_v15 = vadd.f32 %v6184_v0, %v19312_v38  ;;  %7453 = vmatprep.mubr.f32.mxu1 %v19313_v1  ;;  %v12805_v38 = vpack.c.bf16 %v10699_v46, %v10698_v52  ;;  %v19331_v52 = vld [vmem:[#allocation123_spill] sm:$0xff] }
 0x75f   : > { %v17810_v16 = vadd.f32 %v6190_v13, %v19314_v12  ;;  %v19325_v13 = vld [vmem:[#allocation13_spill] sm:$0xff]  ;;  %v10700_v12 = vld [vmem:[%s19034_s3 + $0x510] sm:$0xff] }
 0x760   : > { %v17813_v6 = vadd.f32 %v6185_v15, %v19315_v58  ;;  %v12023_v62 = vpop.f32.mrb[178].mxu1  ;;  %v19326_v15 = vld [vmem:[#allocation5_spill] sm:$0xff]  ;;  %v10701_v58 = vld [vmem:[%s19034_s3 + $0x518] sm:$0xff] }
 0x761   : > { %v6200_v22 = vadd.f32 %v12023_v62, %v19316_v29  ;;  %v6194_v40 = vpop.f32.mrb[179].mxu1  ;;  %7454 = vmatmul.mubr.f32.gmra.mrb[28].mxu1 %v17649_v34  ;;  %v19327_v62 = vld [vmem:[#allocation122_spill] sm:$0xff] }
 0x762   : > { %v6195_v26 = vadd.f32 %v6194_v40, %v19317_v24  ;;  %7458 = vmatprep.mubr.f32.mxu1 %v17818_v18  ;;  %v7016_v40 = vld [vmem:[#allocation3 + $0xb8] sm:$0xff]  ;;  %v19328_v24 = vld [vmem:[#allocation14_spill] sm:$0xff] }
 0x763   : > { %v17822_v35 = vadd.f32 %v6200_v22, %v19318_v32 }
 0x764   : > { %v17825_v30 = vadd.f32 %v6195_v26, %v19319_v7  ;;  %v12026_v20 = vpop.f32.mrb[180].mxu1  ;;  %v7019_v7 = vld [vmem:[#allocation3 + $0xd0] sm:$0xff] }
 0x765   : > { %v6210_v61 = vadd.f32 %v12026_v20, %v19320_v19  ;;  %v6204_v10 = vpop.f32.mrb[181].mxu1  ;;  %7459 = vmatmul.mubr.f32.gmra.mrb[30].mxu1 %v17818_v18  ;;  %v19329_v20 = vld [vmem:[#allocation63_spill] sm:$0xff] }
 0x766   : > { %v6205_v34 = vadd.f32 %v6204_v10, %v19321_v4  ;;  %7463 = vmatprep.mubr.f32.mxu1 %v17818_v18  ;;  %v19330_v10 = vld [vmem:[#allocation6_spill] sm:$0xff] }
 0x767   : > { %v17832_v44 = vadd.f32 %v6210_v61, %v19322_v50  ;;  %v12808_v61 = vpack.c.bf16 %v10701_v58, %v10700_v12  ;;  %v10703_v50 = vld [vmem:[%s19034_s3 + $0x528] sm:$0xff]  ;;  %v10704_v58 = vld [vmem:[%s19034_s3 + $0x530] sm:$0xff] }
 0x768   : > { %v17841_v9 = vadd.f32 %v6205_v34, %v19323_v21  ;;  %v12029_v59 = vpop.f32.mrb[182].mxu1  ;;  %v10702_v34 = vld [vmem:[%s19034_s3 + $0x520] sm:$0xff] }
 0x769   : > { %v6220_v23 = vadd.f32 %v12029_v59, %v19324_v39  ;;  %v6214_v31 = vpop.f32.mrb[183].mxu1  ;;  %7464 = vmatmul.mubr.f32.gmra.mrb[32].mxu1 %v17818_v18  ;;  %v7022_v59 = vld [vmem:[#allocation3 + $0xe8] sm:$0xff]  ;;  %v19332_v39 = vld [vmem:[#allocation15_spill] sm:$0xff] }
 0x76a   : > { %v6215_v0 = vadd.f32 %v6214_v31, %v19325_v13  ;;  %12122 = vmatprep.mubr.msk.f32.mxu1 %vm4118_vm5, %v7013_v57  ;;  %v7025_v57 = vld [vmem:[#allocation3 + $0x100] sm:$0xff]  ;;  %v19333_v13 = vld [vmem:[#allocation66_spill] sm:$0xff] }
 0x76b   : > { %v17848_v1 = vadd.f32 %v6220_v23, %v19326_v15  ;;  %v19334_v15 = vld [vmem:[#allocation7_spill] sm:$0xff] }
 0x76c   : > { %v17857_v29 = vadd.f32 %v6215_v0, %v19327_v62  ;;  %v12032_v22 = vpop.f32.mrb[184].mxu1  ;;  %v10705_v62 = vld [vmem:[%s19034_s3 + $0x538] sm:$0xff] }
 0x76d   : > { %v6230_v26 = vadd.f32 %v12032_v22, %v19328_v24  ;;  %v6224_v32 = vpop.f32.mrb[185].mxu1  ;;  %12123 = vmatmul.mubr.msk.f32.vlgmr.msra.gmra.mrb[34].mxu1 %vm4118_vm5, %v7016_v40  ;;  %v19335_v22 = vld [vmem:[#allocation124_spill] sm:$0xff] }
 0x76e   : > { %v6225_v19 = vadd.f32 %v6224_v32, %v19329_v20  ;;  %12806 = vmatpush1.bf16.msra.mxu1 %v12805_v38  ;;  %12125 = vmatprep.mubr.msk.f32.mxu1 %vm4118_vm5, %v7019_v7  ;;  %v12811_v38 = vpack.c.bf16 %v10703_v50, %v10702_v34  ;;  %v7031_v20 = vld [vmem:[#allocation3 + $0x130] sm:$0xff]  ;;  %v10706_v50 = vld [vmem:[%s19034_s3 + $0x540] sm:$0xff] }
 0x76f   : > { %v17864_v4 = vadd.f32 %v6230_v26, %v19330_v10  ;;  %12807 = vmatprep.subr.bf16.mxu1 %v19153_v28  ;;  %v7028_v26 = vld [vmem:[#allocation3 + $0x118] sm:$0xff] }
 0x770   : > { %v17874_v46 = vadd.f32 %v6225_v19, %v19331_v52  ;;  %v12035_v21 = vpop.f32.mrb[186].mxu1  ;;  %v19336_v10 = vld [vmem:[#allocation8_spill] sm:$0xff]  ;;  %v19337_v52 = vld [vmem:[#allocation125_spill] sm:$0xff] }
 0x771   : > { %v6240_v23 = vadd.f32 %v12035_v21, %v19332_v39  ;;  %v6234_v31 = vpop.f32.mrb[187].mxu1  ;;  %12126 = vmatmul.mubr.msk.f32.gmra.mrb[36].mxu1 %vm4118_vm5, %v7022_v59  ;;  %v7034_v59 = vld [vmem:[#allocation3 + $0x148] sm:$0xff] }
 0x772   : > { %v6235_v0 = vadd.f32 %v6234_v31, %v19333_v13  ;;  %12809 = vmatpush1.bf16.msra.mxu1 %v12808_v61  ;;  %12128 = vmatprep.mubr.msk.f32.mxu1 %vm4118_vm5, %v7025_v57  ;;  %v12814_v61 = vpack.c.bf16 %v10705_v62, %v10704_v58  ;;  %v7037_v31 = vld [vmem:[#allocation3 + $0x160] sm:$0xff]  ;;  %v19339_v58 = vld [vmem:[#allocation126_spill] sm:$0xff] }
 0x773   : > { %v17881_v12 = vadd.f32 %v6240_v23, %v19334_v15  ;;  %12810 = vmatprep.subr.bf16.mxu1 %v19153_v28  ;;  %v10708_v15 = vld [vmem:[%s19034_s3 + $0x550] sm:$0xff] }
 0x774   : > { %v17891_v40 = vadd.f32 %v6235_v0, %v19335_v22  ;;  %v12038_v24 = vpop.f32.mrb[188].mxu1  ;;  %v19338_v0 = vld [vmem:[#allocation9_spill] sm:$0xff]  ;;  %v7040_v22 = vld [vmem:[#allocation3 + $0x178] sm:$0xff] }
 0x775   : > { %v6250_v32 = vadd.f32 %v12038_v24, %v17688_v60  ;;  %v6244_v7 = vpop.f32.mrb[189].mxu1  ;;  %12129 = vmatmul.mubr.msk.f32.gmra.mrb[38].mxu1 %vm4118_vm5, %v7028_v26  ;;  %v10707_v60 = vld [vmem:[%s19034_s3 + $0x548] sm:$0xff]  ;;  %v19340_v24 = vld [vmem:[#allocation25_spill] sm:$0xff] }
 0x776   : > { %v6245_v19 = vadd.f32 %v6244_v7, %v17672_v42  ;;  %12812 = vmatpush1.bf16.msra.mxu1 %v12811_v38  ;;  %12131 = vmatprep.mubr.msk.f32.mxu1 %vm4118_vm5, %v7031_v20  ;;  %v12817_v13 = vpack.c.bf16 %v10707_v60, %v10706_v50  ;;  %v7043_v7 = vld [vmem:[#allocation3 + $0x190] sm:$0xff]  ;;  %v7046_v60 = vld [vmem:[#allocation3 + $0x1a8] sm:$0xff] }
 0x777   : > { %v17898_v34 = vadd.f32 %v6250_v32, %v19336_v10  ;;  %12813 = vmatprep.subr.bf16.mxu1 %v19153_v28  ;;  %v10711_v10 = vld [vmem:[%s19034_s3 + $0x568] sm:$0xff] }
 0x778   : > { %v17908_v21 = vadd.f32 %v6245_v19, %v19337_v52  ;;  %v12041_v42 = vpop.f32.mrb[190].mxu1  ;;  %v19341_v52 = vld [vmem:[#allocation24_spill] sm:$0xff] }
 0x779   : > { %v6260_v39 = vadd.f32 %v12041_v42, %v17697_v48  ;;  %v6254_v23 = vpop.f32.mrb[191].mxu1  ;;  %12132 = vmatmul.mubr.msk.f32.gmra.mrb[40].mxu1 %vm4118_vm5, %v7034_v59  ;;  %v10709_v48 = vld [vmem:[%s19034_s3 + $0x558] sm:$0xff] }
 0x77a   : > { %v6255_v57 = vadd.f32 %v6254_v23, %v17692_v49  ;;  %12815 = vmatpush1.bf16.msra.mxu1 %v12814_v61  ;;  %12134 = vmatprep.mubr.msk.f32.mxu1 %vm4118_vm5, %v7037_v31  ;;  %v12820_v20 = vpack.c.bf16 %v10709_v48, %v10708_v15  ;;  %v10710_v61 = vld [vmem:[%s19034_s3 + $0x560] sm:$0xff]  ;;  %v10712_v31 = vld [vmem:[%s19034_s3 + $0x570] sm:$0xff] }
 0x77b   : > { %v17915_v38 = vadd.f32 %v6260_v39, %v19338_v0  ;;  %12816 = vmatprep.subr.bf16.mxu1 %v19153_v28  ;;  %v7049_v39 = vld [vmem:[#allocation3 + $0x1c0] sm:$0xff]  ;;  %v7052_v0 = vld [vmem:[#allocation3 + $0x1d8] sm:$0xff]  ;;  %v19342_v15 = vld [vmem:[#allocation27_spill] sm:$0xff] }
 0x77c   : > { %v17925_v62 = vadd.f32 %v6255_v57, %v19339_v58  ;;  %v6594_v49 = vpop.f32.mrb[192].mxu1  ;;  %v10713_v57 = vld [vmem:[%s19034_s3 + $0x578] sm:$0xff] }
 0x77d   : > { %v6820_v26 = vadd.f32 %v19340_v24, %v6594_v49  ;;  %v6596_v32 = vpop.f32.mrb[193].mxu1  ;;  %12135 = vmatmul.mubr.msk.f32.gmra.mrb[42].mxu1 %vm4118_vm5, %v7040_v22  ;;  %v7055_v49 = vld [vmem:[#allocation3 + $0x1f0] sm:$0xff]  ;;  %v10714_v24 = vld [vmem:[%s19034_s3 + $0x580] sm:$0xff] }
 0x77e   : > { %12818 = vmatpush1.bf16.msra.mxu1 %v12817_v13  ;;  %12137 = vmatprep.mubr.msk.f32.mxu1 %vm4118_vm5, %v7043_v7  ;;  %v7058_v7 = vld [vmem:[#allocation3 + $0x208] sm:$0xff] }
 0x77f   : > { %v17931_v19 = vadd.f32 %v6820_v26, %v17711_v53  ;;  %12819 = vmatprep.subr.bf16.mxu1 %v19153_v28  ;;  %v12823_v53 = vpack.c.bf16 %v10711_v10, %v10710_v61  ;;  %v10715_v26 = vld [vmem:[%s19034_s3 + $0x588] sm:$0xff] }
 0x780   : > { %v6599_v50 = vpop.f32.mrb[194].mxu1 }
 0x781   : > { %v6825_v42 = vadd.f32 %v19341_v52, %v6599_v50  ;;  %v6601_v59 = vpop.f32.mrb[195].mxu1  ;;  %12138 = vmatmul.mubr.msk.f32.gmra.mrb[44].mxu1 %vm4118_vm5, %v7046_v60  ;;  %v7061_v50 = vld [vmem:[#allocation3 + $0x220] sm:$0xff]  ;;  %v10716_v52 = vld [vmem:[%s19034_s3 + $0x590] sm:$0xff] }
 0x782   : > { %12821 = vmatpush1.bf16.msra.mxu1 %v12820_v20  ;;  %12140 = vmatprep.mubr.msk.f32.mxu1 %vm4118_vm5, %v7049_v39  ;;  %v19343_v20 = vld [vmem:[#allocation26_spill] sm:$0xff]  ;;  %v7064_v39 = vld [vmem:[#allocation3 + $0x238] sm:$0xff] }
 0x783   : > { %v17944_v23 = vadd.f32 %v6825_v42, %v17709_v27  ;;  %12822 = vmatprep.subr.bf16.mxu1 %v19153_v28  ;;  %v12826_v27 = vpack.c.bf16 %v10713_v57, %v10712_v31  ;;  %v10717_v42 = vld [vmem:[%s19034_s3 + $0x598] sm:$0xff] }
 0x784   : > { %v6604_v13 = vpop.f32.mrb[196].mxu1 }
 0x785   : > { %v6830_v48 = vadd.f32 %v19342_v15, %v6604_v13  ;;  %v6606_v58 = vpop.f32.mrb[197].mxu1  ;;  %12141 = vmatmul.mubr.msk.f32.gmra.mrb[46].mxu1 %vm4118_vm5, %v7052_v0  ;;  %v7067_v13 = vld [vmem:[#allocation3 + $0x250] sm:$0xff]  ;;  %v10718_v15 = vld [vmem:[%s19034_s3 + $0x5a0] sm:$0xff] }
 0x786   : > { %12824 = vmatpush1.bf16.msra.mxu1 %v12823_v53  ;;  %12143 = vmatprep.mubr.msk.f32.mxu1 %vm4118_vm5, %v7055_v49  ;;  %v19344_v53 = vld [vmem:[#allocation29_spill] sm:$0xff]  ;;  %v7070_v49 = vld [vmem:[#allocation3 + $0x268] sm:$0xff] }
 0x787   : > { %v17957_v22 = vadd.f32 %v6830_v48, %v17723_v33  ;;  %12825 = vmatprep.subr.bf16.mxu1 %v19153_v28  ;;  %v12829_v33 = vpack.c.bf16 %v10715_v26, %v10714_v24  ;;  %v10719_v48 = vld [vmem:[%s19034_s3 + $0x5a8] sm:$0xff] }
 0x788   : > { %v6609_v32 = vpop.f32.mrb[198].mxu1 }
 0x789   : > { %v6835_v61 = vadd.f32 %v19343_v20, %v6609_v32  ;;  %v6611_v10 = vpop.f32.mrb[199].mxu1  ;;  %12144 = vmatmul.mubr.msk.f32.gmra.mrb[48].mxu1 %vm4118_vm5, %v7058_v7  ;;  %v7073_v32 = vld [vmem:[#allocation3 + $0x280] sm:$0xff]  ;;  %v10720_v20 = vld [vmem:[%s19034_s3 + $0x5b0] sm:$0xff] }
 0x78a   : > { %12827 = vmatpush1.bf16.msra.mxu1 %v12826_v27  ;;  %12146 = vmatprep.mubr.msk.f32.mxu1 %vm4118_vm5, %v7061_v50  ;;  %v19345_v27 = vld [vmem:[#allocation28_spill] sm:$0xff] }
 0x78b   : > { %v17970_v60 = vadd.f32 %v6835_v61, %v17721_v51  ;;  %12828 = vmatprep.subr.bf16.mxu1 %v19153_v28  ;;  %v12832_v51 = vpack.c.bf16 %v10717_v42, %v10716_v52  ;;  %v10721_v61 = vld [vmem:[%s19034_s3 + $0x5b8] sm:$0xff] }
 0x78c   : > { %v6614_v59 = vpop.f32.mrb[200].mxu1  ;;  %v7076_v50 = vld [vmem:[#allocation3 + $0x298] sm:$0xff] }
 0x78d   : > { %v6840_v31 = vadd.f32 %v19344_v53, %v6614_v59  ;;  %v6616_v57 = vpop.f32.mrb[201].mxu1  ;;  %12147 = vmatmul.mubr.msk.f32.gmra.mrb[50].mxu1 %vm4118_vm5, %v7064_v39  ;;  %v7079_v59 = vld [vmem:[#allocation3 + $0x2b0] sm:$0xff]  ;;  %v10722_v53 = vld [vmem:[%s19034_s3 + $0x5c0] sm:$0xff] }
 0x78e   : > { %12830 = vmatpush1.bf16.msra.mxu1 %v12829_v33  ;;  %12149 = vmatprep.mubr.msk.f32.mxu1 %vm4118_vm5, %v7067_v13  ;;  %v19346_v33 = vld [vmem:[#allocation31_spill] sm:$0xff]  ;;  %v7082_v13 = vld [vmem:[#allocation3 + $0x2c8] sm:$0xff] }
 0x78f   : > { %v17983_v0 = vadd.f32 %v6840_v31, %v17735_v45  ;;  %12831 = vmatprep.subr.bf16.mxu1 %v19153_v28  ;;  %v12835_v45 = vpack.c.bf16 %v10719_v48, %v10718_v15  ;;  %v10723_v31 = vld [vmem:[%s19034_s3 + $0x5c8] sm:$0xff] }
 0x790   : > { %v6619_v58 = vpop.f32.mrb[202].mxu1 }
 0x791   : > { %v6845_v24 = vadd.f32 %v19345_v27, %v6619_v58  ;;  %v6621_v26 = vpop.f32.mrb[203].mxu1  ;;  %12150 = vmatmul.mubr.msk.f32.gmra.mrb[52].mxu1 %vm4118_vm5, %v7070_v49  ;;  %v7085_v58 = vld [vmem:[#allocation3 + $0x2e0] sm:$0xff]  ;;  %v10724_v27 = vld [vmem:[%s19034_s3 + $0x5d0] sm:$0xff] }
 0x792   : > { %12833 = vmatpush1.bf16.msra.mxu1 %v12832_v51  ;;  %12152 = vmatprep.mubr.msk.f32.mxu1 %vm4118_vm5, %v7073_v32  ;;  %v19347_v51 = vld [vmem:[#allocation30_spill] sm:$0xff]  ;;  %v7088_v32 = vld [vmem:[#allocation3 + $0x2f8] sm:$0xff] }
 0x793   : > { %v17996_v7 = vadd.f32 %v6845_v24, %v17733_v56  ;;  %12834 = vmatprep.subr.bf16.mxu1 %v19153_v28  ;;  %v12838_v56 = vpack.c.bf16 %v10721_v61, %v10720_v20  ;;  %v10725_v24 = vld [vmem:[%s19034_s3 + $0x5d8] sm:$0xff] }
 0x794   : > { %v6624_v10 = vpop.f32.mrb[204].mxu1 }
 0x795   : > { %v6850_v52 = vadd.f32 %v19346_v33, %v6624_v10  ;;  %v6626_v42 = vpop.f32.mrb[205].mxu1  ;;  %12153 = vmatmul.mubr.msk.f32.gmra.mrb[54].mxu1 %vm4118_vm5, %v7076_v50  ;;  %v7091_v10 = vld [vmem:[#allocation3 + $0x310] sm:$0xff]  ;;  %v10726_v33 = vld [vmem:[%s19034_s3 + $0x5e0] sm:$0xff] }
 0x796   : > { %12836 = vmatpush1.bf16.msra.mxu1 %v12835_v45  ;;  %12155 = vmatprep.mubr.msk.f32.mxu1 %vm4118_vm5, %v7079_v59  ;;  %v19348_v45 = vld [vmem:[#allocation33_spill] sm:$0xff]  ;;  %v7094_v59 = vld [vmem:[#allocation3 + $0x328] sm:$0xff] }
 0x797   : > { %v18009_v39 = vadd.f32 %v6850_v52, %v17747_v37  ;;  %12837 = vmatprep.subr.bf16.mxu1 %v19153_v28  ;;  %v12841_v37 = vpack.c.bf16 %v10723_v31, %v10722_v53  ;;  %v10727_v52 = vld [vmem:[%s19034_s3 + $0x5e8] sm:$0xff] }
 0x798   : > { %v6629_v57 = vpop.f32.mrb[206].mxu1 }
 0x799   : > { %v6855_v15 = vadd.f32 %v19347_v51, %v6629_v57  ;;  %v6631_v48 = vpop.f32.mrb[207].mxu1  ;;  %12156 = vmatmul.mubr.msk.f32.gmra.mrb[56].mxu1 %vm4118_vm5, %v7082_v13  ;;  %v7097_v57 = vld [vmem:[#allocation3 + $0x340] sm:$0xff]  ;;  %v12847_v13 = vpack.c.bf16 %v10727_v52, %v10726_v33  ;;  %v7728_v33 = vld [vmem:[#allocation3 + $0xc8] sm:$0xff] }
 0x79a   : > { %12839 = vmatpush1.bf16.msra.mxu1 %v12838_v56  ;;  %12158 = vmatprep.mubr.msk.f32.mxu1 %vm4118_vm5, %v7085_v58  ;;  %v19349_v56 = vld [vmem:[#allocation32_spill] sm:$0xff] }
 0x79b   : > { %v18022_v49 = vadd.f32 %v6855_v15, %v17745_v2  ;;  %12840 = vmatprep.subr.bf16.mxu1 %v19153_v28  ;;  %v12844_v2 = vpack.c.bf16 %v10725_v24, %v10724_v27  ;;  %v10728_v15 = vld [vmem:[%s19034_s3 + $0x5f0] sm:$0xff]  ;;  %v10729_v48 = vld [vmem:[%s19034_s3 + $0x5f8] sm:$0xff] }
 0x79c   : > { %v6634_v26 = vpop.f32.mrb[208].mxu1  ;;  %v7822_v27 = vld [vmem:[#allocation3 + $0x3b8] sm:$0xff]  ;;  %v19350_v24 = vld [vmem:[#allocation35_spill] sm:$0xff] }
 0x79d   : > { %v6860_v20 = vadd.f32 %v19348_v45, %v6634_v26  ;;  %v6636_v61 = vpop.f32.mrb[209].mxu1  ;;  %12159 = vmatmul.mubr.msk.f32.gmra.mrb[58].mxu1 %vm4118_vm5, %v7088_v32 }
 0x79e   : > { %12842 = vmatpush1.bf16.msra.mxu1 %v12841_v37  ;;  %12161 = vmatprep.mubr.msk.f32.mxu1 %vm4118_vm5, %v7091_v10  ;;  %v7100_v37 = vld [vmem:[#allocation3 + $0x358] sm:$0xff]  ;;  %v19351_v61 = vld [vmem:[#allocation34_spill] sm:$0xff] }
 0x79f   : > { %v18035_v50 = vadd.f32 %v6860_v20, %v17759_v3  ;;  %12843 = vmatprep.subr.bf16.mxu1 %v19153_v28  ;;  %v7819_v3 = vld [vmem:[#allocation3 + $0x3a0] sm:$0xff] }
 0x7a0   : > { %v6639_v42 = vpop.f32.mrb[210].mxu1  ;;  %12231 = vmatprep.mubr.msk.f32.mxu0 %vm4118_vm5, %v7819_v3 }
 0x7a1   : > { %v6865_v53 = vadd.f32 %v19349_v56, %v6639_v42  ;;  %v6641_v31 = vpop.f32.mrb[211].mxu1  ;;  %12162 = vmatmul.mubr.msk.f32.gmra.mrb[60].mxu1 %vm4118_vm5, %v7094_v59  ;;  %12232 = vmatmul.mubr.msk.f32.gmra.mrb[124].mxu0 %vm4118_vm5, %v7822_v27  ;;  %v7727_v42 = vld [vmem:[#allocation3 + $0xc0] sm:$0xff] }
 0x7a2   : > { %12845 = vmatpush1.bf16.msra.mxu1 %v12844_v2  ;;  %12164 = vmatprep.mubr.msk.f32.mxu1 %vm4118_vm5, %v7097_v57  ;;  %v19352_v59 = vld [vmem:[#allocation37_spill] sm:$0xff]  ;;  %v7730_v57 = vld [vmem:[#allocation3 + $0xd8] sm:$0xff] }
 0x7a3   : > { %v18048_v51 = vadd.f32 %v6865_v53, %v17757_v5  ;;  %12846 = vmatprep.subr.bf16.mxu1 %v19153_v28  ;;  %v12850_v5 = vpack.c.bf16 %v10729_v48, %v10728_v15  ;;  %v7734_v15 = vld [vmem:[#allocation3 + $0xf8] sm:$0xff] }
 0x7a4   : > { %v6644_v58 = vpop.f32.mrb[212].mxu1 }
 0x7a5   : > { %v6870_v26 = vadd.f32 %v19350_v24, %v6644_v58  ;;  %v6646_v32 = vpop.f32.mrb[213].mxu1  ;;  %12165 = vmatmul.mubr.msk.f32.gmra.mrb[62].mxu1 %vm4118_vm5, %v7100_v37  ;;  %v7733_v58 = vld [vmem:[#allocation3 + $0xf0] sm:$0xff] }
 0x7a6   : > { %12848 = vmatpush1.bf16.msra.mxu1 %v12847_v13  ;;  %12167 = vmatprep.mubr.msk.f32.mxu1 %vm4118_vm5, %v17670_v43  ;;  %v19354_v37 = vld [vmem:[#allocation39_spill] sm:$0xff] }
 0x7a7   : > { %v18064_v45 = vadd.f32 %v6870_v26, %v17773_v8  ;;  %12849 = vmatprep.subr.bf16.mxu1 %v19153_v28  ;;  %v7731_v28 = vld [vmem:[#allocation3 + $0xe0] sm:$0xff]  ;;  %v7737_v26 = vld [vmem:[#allocation3 + $0x110] sm:$0xff] }
 0x7a8   : > { %v6649_v20 = vpop.f32.mrb[214].mxu1 }
 0x7a9   : > { %v6875_v10 = vadd.f32 %v19351_v61, %v6649_v20  ;;  %v6651_v2 = vpop.f32.mrb[215].mxu1  ;;  %12168 = vmatmul.mubr.msk.f32.gmra.mrb[64].mxu1 %vm4118_vm5, %v17680_v14  ;;  %v19353_v14 = vld [vmem:[#allocation36_spill] sm:$0xff]  ;;  %v19355_v20 = vld [vmem:[#allocation38_spill] sm:$0xff]  ;;  %vm8481_vm5 = vcmask 253952  }
 0x7aa   : > { %12851 = vmatpush1.bf16.msra.mxu1 %v12850_v5  ;;  %8024 = vmatprep.mubr.f32.mxu1 %v7728_v33  ;;  %v7736_v5 = vld [vmem:[#allocation3 + $0x108] sm:$0xff] }
 0x7ab   : > { %v18071_v52 = vadd.f32 %v6875_v10, %v17771_v41  ;;  %v7740_v2 = vld [vmem:[#allocation3 + $0x128] sm:$0xff] }
 0x7ac   : > { %v6654_v43 = vpop.f32.mrb[216].mxu1 }
 0x7ad   : > { %v6880_v8 = vadd.f32 %v19352_v59, %v6654_v43  ;;  %v6656_v56 = vpop.f32.mrb[217].mxu1  ;;  %8025 = vmatmul.mubr.f32.vlgmr.msra.gmra.mrb[66].mxu1 %v7727_v42  ;;  %v7739_v43 = vld [vmem:[#allocation3 + $0x120] sm:$0xff] }
 0x7ae   : > { %8029 = vmatprep.mubr.f32.mxu1 %v7731_v28  ;;  %v19356_v42 = vld [vmem:[#allocation41_spill] sm:$0xff] }
 0x7af   : > { %v18075_v53 = vadd.f32 %v6880_v8, %v17789_v25  ;;  %v7743_v56 = vld [vmem:[#allocation3 + $0x140] sm:$0xff] }
 0x7b0   : > { %v6659_v31 = vpop.f32.mrb[218].mxu1 }
 0x7b1   : > { %v6885_v3 = vadd.f32 %v19353_v14, %v6659_v31  ;;  %v6661_v13 = vpop.f32.mrb[219].mxu1  ;;  %8030 = vmatmul.mubr.f32.gmra.mrb[68].mxu1 %v7730_v57  ;;  %v7742_v31 = vld [vmem:[#allocation3 + $0x138] sm:$0xff] }
 0x7b2   : > { %8034 = vmatprep.mubr.f32.mxu1 %v7734_v15  ;;  %v19357_v57 = vld [vmem:[#allocation40_spill] sm:$0xff] }
 0x7b3   : > { %v18079_v41 = vadd.f32 %v6885_v3, %v17787_v47  ;;  %v7746_v13 = vld [vmem:[#allocation3 + $0x158] sm:$0xff] }
 0x7b4   : > { %v6664_v48 = vpop.f32.mrb[220].mxu1 }
 0x7b5   : > { %v6890_v27 = vadd.f32 %v19354_v37, %v6664_v48  ;;  %v6666_v24 = vpop.f32.mrb[221].mxu1  ;;  %8035 = vmatmul.mubr.f32.gmra.mrb[70].mxu1 %v7733_v58  ;;  %v7745_v48 = vld [vmem:[#allocation3 + $0x150] sm:$0xff] }
 0x7b6   : > { %8039 = vmatprep.mubr.f32.mxu1 %v7737_v26  ;;  %v19358_v58 = vld [vmem:[#allocation43_spill] sm:$0xff] }
 0x7b7   : > { %v18083_v25 = vadd.f32 %v6890_v27, %v17803_v36  ;;  %v7749_v24 = vld [vmem:[#allocation3 + $0x170] sm:$0xff] }
 0x7b8   : > { %v6669_v32 = vpop.f32.mrb[222].mxu1 }
 0x7b9   : > { %v6895_v61 = vadd.f32 %v19355_v20, %v6669_v32  ;;  %v6671_v10 = vpop.f32.mrb[223].mxu1  ;;  %8040 = vmatmul.mubr.f32.gmra.mrb[72].mxu1 %v7736_v5  ;;  %v7748_v32 = vld [vmem:[#allocation3 + $0x168] sm:$0xff] }
 0x7ba   : > { %8044 = vmatprep.mubr.f32.mxu1 %v7740_v2  ;;  %v19359_v5 = vld [vmem:[#allocation42_spill] sm:$0xff] }
 0x7bb   : > { %v18087_v47 = vadd.f32 %v6895_v61, %v17801_v55  ;;  %v7752_v10 = vld [vmem:[#allocation3 + $0x188] sm:$0xff] }
 0x7bc   : > { %v6674_v33 = vpop.f32.mrb[224].mxu1 }
 0x7bd   : > { %v6900_v59 = vadd.f32 %v19356_v42, %v6674_v33  ;;  %v6676_v8 = vpop.f32.mrb[225].mxu1  ;;  %8045 = vmatmul.mubr.f32.gmra.mrb[74].mxu1 %v7739_v43  ;;  %v7751_v33 = vld [vmem:[#allocation3 + $0x180] sm:$0xff] }
 0x7be   : > { %8049 = vmatprep.mubr.f32.mxu1 %v7743_v56  ;;  %v19360_v43 = vld [vmem:[#allocation45_spill] sm:$0xff] }
 0x7bf   : > { %v18091_v36 = vadd.f32 %v6900_v59, %v17813_v6  ;;  %v7755_v8 = vld [vmem:[#allocation3 + $0x1a0] sm:$0xff] }
 0x7c0   : > { %v6679_v28 = vpop.f32.mrb[226].mxu1 }
 0x7c1   : > { %v6905_v14 = vadd.f32 %v19357_v57, %v6679_v28  ;;  %v6681_v3 = vpop.f32.mrb[227].mxu1  ;;  %8050 = vmatmul.mubr.f32.gmra.mrb[76].mxu1 %v7742_v31  ;;  %v7754_v28 = vld [vmem:[#allocation3 + $0x198] sm:$0xff] }
 0x7c2   : > { %8054 = vmatprep.mubr.f32.mxu1 %v7746_v13  ;;  %v19361_v31 = vld [vmem:[#allocation44_spill] sm:$0xff] }
 0x7c3   : > { %v18095_v55 = vadd.f32 %v6905_v14, %v17810_v16  ;;  %v7758_v3 = vld [vmem:[#allocation3 + $0x1b8] sm:$0xff] }
 0x7c4   : > { %v6684_v15 = vpop.f32.mrb[228].mxu1 }
 0x7c5   : > { %v6910_v37 = vadd.f32 %v19358_v58, %v6684_v15  ;;  %v6686_v27 = vpop.f32.mrb[229].mxu1  ;;  %8055 = vmatmul.mubr.f32.gmra.mrb[78].mxu1 %v7745_v48  ;;  %v7757_v15 = vld [vmem:[#allocation3 + $0x1b0] sm:$0xff] }
 0x7c6   : > { %8059 = vmatprep.mubr.f32.mxu1 %v7749_v24  ;;  %v19362_v48 = vld [vmem:[#allocation47_spill] sm:$0xff] }
 0x7c7   : > { %v18099_v6 = vadd.f32 %v6910_v37, %v17825_v30  ;;  %v7761_v27 = vld [vmem:[#allocation3 + $0x1d0] sm:$0xff] }
 0x7c8   : > { %v6689_v26 = vpop.f32.mrb[230].mxu1 }
 0x7c9   : > { %v6915_v20 = vadd.f32 %v19359_v5, %v6689_v26  ;;  %v6691_v61 = vpop.f32.mrb[231].mxu1  ;;  %8060 = vmatmul.mubr.f32.gmra.mrb[80].mxu1 %v7748_v32  ;;  %v7760_v26 = vld [vmem:[#allocation3 + $0x1c8] sm:$0xff] }
 0x7ca   : > { %8064 = vmatprep.mubr.f32.mxu1 %v7752_v10  ;;  %v19363_v32 = vld [vmem:[#allocation46_spill] sm:$0xff] }
 0x7cb   : > { %v18103_v16 = vadd.f32 %v6915_v20, %v17822_v35  ;;  %v7764_v61 = vld [vmem:[#allocation3 + $0x1e8] sm:$0xff] }
 0x7cc   : > { %v6694_v2 = vpop.f32.mrb[232].mxu1 }
 0x7cd   : > { %v6920_v42 = vadd.f32 %v19360_v43, %v6694_v2  ;;  %v6696_v59 = vpop.f32.mrb[233].mxu1  ;;  %8065 = vmatmul.mubr.f32.gmra.mrb[82].mxu1 %v7751_v33  ;;  %v7763_v2 = vld [vmem:[#allocation3 + $0x1e0] sm:$0xff] }
 0x7ce   : > { %8069 = vmatprep.mubr.f32.mxu1 %v7755_v8  ;;  %v19364_v33 = vld [vmem:[#allocation49_spill] sm:$0xff] }
 0x7cf   : > { %v18107_v30 = vadd.f32 %v6920_v42, %v17841_v9  ;;  %v7767_v59 = vld [vmem:[#allocation3 + $0x200] sm:$0xff] }
 0x7d0   : > { %v6699_v56 = vpop.f32.mrb[234].mxu1 }
 0x7d1   : > { %v6925_v57 = vadd.f32 %v19361_v31, %v6699_v56  ;;  %v6701_v14 = vpop.f32.mrb[235].mxu1  ;;  %8070 = vmatmul.mubr.f32.gmra.mrb[84].mxu1 %v7754_v28  ;;  %v7766_v56 = vld [vmem:[#allocation3 + $0x1f8] sm:$0xff] }
 0x7d2   : > { %8074 = vmatprep.mubr.f32.mxu1 %v7758_v3  ;;  %v19365_v28 = vld [vmem:[#allocation48_spill] sm:$0xff] }
 0x7d3   : > { %v18111_v35 = vadd.f32 %v6925_v57, %v17832_v44  ;;  %v7770_v14 = vld [vmem:[#allocation3 + $0x218] sm:$0xff] }
 0x7d4   : > { %v6704_v13 = vpop.f32.mrb[236].mxu1 }
 0x7d5   : > { %v6930_v58 = vadd.f32 %v19362_v48, %v6704_v13  ;;  %v6706_v37 = vpop.f32.mrb[237].mxu1  ;;  %8075 = vmatmul.mubr.f32.gmra.mrb[86].mxu1 %v7757_v15  ;;  %v7769_v13 = vld [vmem:[#allocation3 + $0x210] sm:$0xff] }
 0x7d6   : > { %8079 = vmatprep.mubr.f32.mxu1 %v7761_v27  ;;  %v19366_v15 = vld [vmem:[#allocation51_spill] sm:$0xff] }
 0x7d7   : > { %v18115_v9 = vadd.f32 %v6930_v58, %v17857_v29  ;;  %v7773_v37 = vld [vmem:[#allocation3 + $0x230] sm:$0xff] }
 0x7d8   : > { %v6709_v24 = vpop.f32.mrb[238].mxu1 }
 0x7d9   : > { %v6935_v5 = vadd.f32 %v19363_v32, %v6709_v24  ;;  %v6711_v20 = vpop.f32.mrb[239].mxu1  ;;  %8080 = vmatmul.mubr.f32.gmra.mrb[88].mxu1 %v7760_v26  ;;  %v7772_v24 = vld [vmem:[#allocation3 + $0x228] sm:$0xff] }
 0x7da   : > { %8084 = vmatprep.mubr.f32.mxu1 %v7764_v61  ;;  %v19367_v26 = vld [vmem:[#allocation50_spill] sm:$0xff] }
 0x7db   : > { %v18119_v44 = vadd.f32 %v6935_v5, %v17848_v1  ;;  %v7776_v20 = vld [vmem:[#allocation3 + $0x248] sm:$0xff] }
 0x7dc   : > { %v6714_v10 = vpop.f32.mrb[240].mxu1 }
 0x7dd   : > { %v6940_v43 = vadd.f32 %v19364_v33, %v6714_v10  ;;  %v6716_v42 = vpop.f32.mrb[241].mxu1  ;;  %8085 = vmatmul.mubr.f32.gmra.mrb[90].mxu1 %v7763_v2  ;;  %v7775_v10 = vld [vmem:[#allocation3 + $0x240] sm:$0xff] }
 0x7de   : > { %8089 = vmatprep.mubr.f32.mxu1 %v7767_v59  ;;  %v19368_v2 = vld [vmem:[#allocation53_spill] sm:$0xff] }
 0x7df   : > { %v18123_v29 = vadd.f32 %v6940_v43, %v17874_v46  ;;  %v7779_v42 = vld [vmem:[#allocation3 + $0x260] sm:$0xff] }
 0x7e0   : > { %v6719_v8 = vpop.f32.mrb[242].mxu1 }
 0x7e1   : > { %v6945_v31 = vadd.f32 %v19365_v28, %v6719_v8  ;;  %v6721_v57 = vpop.f32.mrb[243].mxu1  ;;  %8090 = vmatmul.mubr.f32.gmra.mrb[92].mxu1 %v7766_v56  ;;  %v7778_v8 = vld [vmem:[#allocation3 + $0x258] sm:$0xff] }
 0x7e2   : > { %8094 = vmatprep.mubr.f32.mxu1 %v7770_v14  ;;  %v19369_v56 = vld [vmem:[#allocation52_spill] sm:$0xff] }
 0x7e3   : > { %v18127_v1 = vadd.f32 %v6945_v31, %v17864_v4  ;;  %v7782_v57 = vld [vmem:[#allocation3 + $0x278] sm:$0xff] }
 0x7e4   : > { %v6724_v3 = vpop.f32.mrb[244].mxu1 }
 0x7e5   : > { %v6950_v48 = vadd.f32 %v19366_v15, %v6724_v3  ;;  %v6726_v58 = vpop.f32.mrb[245].mxu1  ;;  %8095 = vmatmul.mubr.f32.gmra.mrb[94].mxu1 %v7769_v13  ;;  %v7781_v3 = vld [vmem:[#allocation3 + $0x270] sm:$0xff] }
 0x7e6   : > { %8099 = vmatprep.mubr.f32.mxu1 %v7773_v37  ;;  %v19370_v13 = vld [vmem:[#allocation55_spill] sm:$0xff] }
 0x7e7   : > { %v18131_v46 = vadd.f32 %v6950_v48, %v17891_v40  ;;  %v7785_v58 = vld [vmem:[#allocation3 + $0x290] sm:$0xff] }
 0x7e8   : > { %v6729_v27 = vpop.f32.mrb[246].mxu1 }
 0x7e9   : > { %v6955_v32 = vadd.f32 %v19367_v26, %v6729_v27  ;;  %v6731_v5 = vpop.f32.mrb[247].mxu1  ;;  %8100 = vmatmul.mubr.f32.gmra.mrb[96].mxu1 %v7772_v24  ;;  %v7784_v27 = vld [vmem:[#allocation3 + $0x288] sm:$0xff] }
 0x7ea   : > { %8104 = vmatprep.mubr.f32.mxu1 %v7776_v20  ;;  %v19371_v24 = vld [vmem:[#allocation54_spill] sm:$0xff] }
 0x7eb   : > { %v18135_v4 = vadd.f32 %v6955_v32, %v17881_v12  ;;  %v7788_v5 = vld [vmem:[#allocation3 + $0x2a8] sm:$0xff] }
 0x7ec   : > { %v6734_v61 = vpop.f32.mrb[248].mxu1 }
 0x7ed   : > { %v6960_v33 = vadd.f32 %v19368_v2, %v6734_v61  ;;  %v6736_v43 = vpop.f32.mrb[249].mxu1  ;;  %8105 = vmatmul.mubr.f32.gmra.mrb[98].mxu1 %v7775_v10  ;;  %v7787_v61 = vld [vmem:[#allocation3 + $0x2a0] sm:$0xff] }
 0x7ee   : > { %8109 = vmatprep.mubr.f32.mxu1 %v7779_v42  ;;  %v7791_v2 = vld [vmem:[#allocation3 + $0x2c0] sm:$0xff]  ;;  %v7794_v42 = vld [vmem:[#allocation3 + $0x2d8] sm:$0xff] }
 0x7ef   : > { %v18139_v40 = vadd.f32 %v6960_v33, %v17908_v21  ;;  %v7790_v33 = vld [vmem:[#allocation3 + $0x2b8] sm:$0xff] }
 0x7f0   : > { %v6739_v59 = vpop.f32.mrb[250].mxu1 }
 0x7f1   : > { %v6965_v28 = vadd.f32 %v19369_v56, %v6739_v59  ;;  %v6741_v31 = vpop.f32.mrb[251].mxu1  ;;  %8110 = vmatmul.mubr.f32.gmra.mrb[100].mxu1 %v7778_v8  ;;  %v7793_v8 = vld [vmem:[#allocation3 + $0x2d0] sm:$0xff] }
 0x7f2   : > { %8114 = vmatprep.mubr.f32.mxu1 %v7782_v57  ;;  %v7796_v31 = vld [vmem:[#allocation3 + $0x2e8] sm:$0xff] }
 0x7f3   : > { %v18143_v12 = vadd.f32 %v6965_v28, %v17898_v34 }
 0x7f4   : > { %v6744_v14 = vpop.f32.mrb[252].mxu1 }
 0x7f5   : > { %v6970_v15 = vadd.f32 %v19370_v13, %v6744_v14  ;;  %v6746_v48 = vpop.f32.mrb[253].mxu1  ;;  %8115 = vmatmul.mubr.f32.gmra.mrb[102].mxu1 %v7781_v3 }
 0x7f6   : > { %8119 = vmatprep.mubr.f32.mxu1 %v7785_v58  ;;  %v7806_v48 = vld [vmem:[#allocation3 + $0x338] sm:$0xff] }
 0x7f7   : > { %v18147_v21 = vadd.f32 %v6970_v15, %v17925_v62 }
 0x7f8   : > { %v6749_v37 = vpop.f32.mrb[254].mxu1 }
 0x7f9   : > { %v6975_v26 = vadd.f32 %v19371_v24, %v6749_v37  ;;  %v6751_v32 = vpop.f32.mrb[255].mxu1  ;;  %8120 = vmatmul.mubr.f32.gmra.mrb[104].mxu1 %v7784_v27  ;;  %v7805_v37 = vld [vmem:[#allocation3 + $0x330] sm:$0xff] }
 0x7fa   : > { %8124 = vmatprep.mubr.f32.mxu1 %v7788_v5 }
 0x7fb   : > { %v18151_v34 = vadd.f32 %v6975_v26, %v17915_v38  ;;  %v7797_v38 = vld [vmem:[#allocation3 + $0x2f0] sm:$0xff]  ;;  %v7808_v26 = vld [vmem:[#allocation3 + $0x348] sm:$0xff] }
 0x7fc   : > { %v18153_v20 = vpop.f32.mrb[0].mxu1 }
 0x7fd   : > { %v7387_v10 = vpop.f32.mrb[1].mxu1  ;;  %8125 = vmatmul.mubr.f32.gmra.mrb[106].mxu1 %v7787_v61 }
 0x7fe   : > { %8129 = vmatprep.mubr.f32.mxu1 %v7791_v2 }
 0x800   : > { %v18155_v62 = vpop.f32.mrb[2].mxu1 }
 0x801   : > { %v7392_v43 = vpop.f32.mrb[3].mxu1  ;;  %8130 = vmatmul.mubr.f32.gmra.mrb[108].mxu1 %v7790_v33 }
 0x802   : > { %8134 = vmatprep.mubr.f32.mxu1 %v7794_v42 }
 0x804   : > { %v18157_v59 = vpop.f32.mrb[4].mxu1 }
 0x805   : > { %v7397_v56 = vpop.f32.mrb[5].mxu1  ;;  %8135 = vmatmul.mubr.f32.gmra.mrb[110].mxu1 %v7793_v8 }
 0x806   : > { %8139 = vmatprep.mubr.f32.mxu1 %v7797_v38 }
 0x808   : > { %v18159_v28 = vpop.f32.mrb[6].mxu1 }
 0x809   : > { %v7402_v57 = vpop.f32.mrb[7].mxu1  ;;  %8140 = vmatmul.mubr.f32.gmra.mrb[112].mxu1 %v7796_v31 }
 0x80a   : > { %8144 = vmatprep.mubr.f32.mxu1 %v17765_v54  ;;  %v7809_v54 = vld [vmem:[#allocation3 + $0x350] sm:$0xff] }
 0x80c   : > { %v18162_v14 = vpop.f32.mrb[8].mxu1 }
 0x80d   : > { %v7407_v3 = vpop.f32.mrb[9].mxu1  ;;  %8145 = vmatmul.mubr.f32.gmra.mrb[114].mxu1 %v17775_v11 }
 0x80e   : > { %8149 = vmatprep.mubr.f32.mxu1 %v17781_v17 }
 0x810   : > { %v18166_v13 = vpop.f32.mrb[10].mxu1 }
 0x811   : > { %v7412_v15 = vpop.f32.mrb[11].mxu1  ;;  %8150 = vmatmul.mubr.f32.gmra.mrb[116].mxu1 %v17791_v63 }
 0x812   : > { %8154 = vmatprep.mubr.f32.mxu1 %v7806_v48 }
 0x814   : > { %v18169_v58 = vpop.f32.mrb[12].mxu1 }
 0x815   : > { %v7417_v27 = vpop.f32.mrb[13].mxu1  ;;  %8155 = vmatmul.mubr.f32.gmra.mrb[118].mxu1 %v7805_v37 }
 0x816   : > { %8159 = vmatprep.mubr.f32.mxu1 %v7809_v54  ;;  %v19372_v27 = vld [vmem:[#allocation64_spill] sm:$0xff] }
 0x818   : > { %v18171_v24 = vpop.f32.mrb[14].mxu1 }
 0x819   : > { %v7422_v11 = vpop.f32.mrb[15].mxu1  ;;  %8160 = vmatmul.mubr.f32.gmra.mrb[120].mxu1 %v7808_v26 }
 0x81a   : > { %8164 = vmatprep.mubr.f32.mxu1 %v17818_v18 }
 0x81c   : > { %v18174_v17 = vpop.f32.mrb[16].mxu1 }
 0x81d   : > { %v7427_v32 = vpop.f32.mrb[17].mxu1  ;;  %8165 = vmatmul.mubr.f32.gmra.mrb[122].mxu1 %v17818_v18 }
 0x81e   : > { %8169 = vmatprep.mubr.f32.mxu1 %v17818_v18 }
 0x820   : > { %v18178_v63 = vpop.f32.mrb[18].mxu1 }
 0x821   : > { %v7432_v5 = vpop.f32.mrb[19].mxu1  ;;  %8170 = vmatmul.mubr.f32.gmra.mrb[124].mxu1 %v17818_v18 }
 0x822   : > { %8174 = vmatprep.mubr.f32.mxu1 %v17818_v18 }
 0x824   : > { %v18182_v61 = vpop.f32.mrb[20].mxu1 }
 0x825   : > { %v7437_v10 = vpop.f32.mrb[21].mxu1  ;;  %8175 = vmatmul.mubr.f32.gmra.mrb[126].mxu1 %v17818_v18 }
 0x826   : > { %8179 = vmatprep.mubr.f32.mxu1 %v17818_v18 }
 0x828   : > { %v18186_v2 = vpop.f32.mrb[22].mxu1 }
 0x829   : > { %v7442_v33 = vpop.f32.mrb[23].mxu1  ;;  %8180 = vmatmul.mubr.f32.gmra.mrb[128].mxu1 %v17818_v18  ;;  %v19373_v18 = vld [vmem:[#allocation61_spill] sm:$0xff] }
 0x82a   : > { %v19375_v33 = vld [vmem:[#allocation70_spill] sm:$0xff] }
 0x82c   : > { %v18189_v43 = vpop.f32.mrb[24].mxu1 }
 0x82d   : > { %v7447_v42 = vpop.f32.mrb[25].mxu1 }
 0x830   : > { %v18191_v8 = vpop.f32.mrb[26].mxu1 }
 0x831   : > { %v7452_v56 = vpop.f32.mrb[27].mxu1 }
 0x834   : > { %v18193_v38 = vpop.f32.mrb[28].mxu1 }
 0x835   : > { %v7457_v31 = vpop.f32.mrb[29].mxu1 }
 0x836   : > { %v19376_v31 = vld [vmem:[#allocation67_spill] sm:$0xff] }
 0x838   : > { %v18195_v57 = vpop.f32.mrb[30].mxu1 }
 0x839   : > { %v7462_v3 = vpop.f32.mrb[31].mxu1 }
 0x83c   : > { %v18197_v15 = vpop.f32.mrb[32].mxu1 }
 0x83d   : > { %v7467_v48 = vpop.f32.mrb[33].mxu1 }
 0x840   : > { %v12124_v37 = vpop.f32.mrb[34].mxu1 }
 0x841   : > { %v7541_v54 = vadd.f32 %v12124_v37, %v19372_v27  ;;  %v7535_v26 = vpop.f32.mrb[35].mxu1 }
 0x842   : > { %v7536_v11 = vadd.f32 %v7535_v26, %v19373_v18  ;;  %v19377_v26 = vld [vmem:[#allocation76_spill] sm:$0xff] }
 0x843   : > { %v18202_v32 = vadd.f32 %v7541_v54, %v17944_v23  ;;  %v19378_v54 = vld [vmem:[#allocation73_spill] sm:$0xff] }
 0x844   : > { %v18205_v5 = vadd.f32 %v7536_v11, %v17931_v19  ;;  %v12127_v10 = vpop.f32.mrb[36].mxu1 }
 0x845   : > { %19374 = vst [vmem:[#allocation68_spill] sm:$0xff] %v18202_v32  ;;  %v7551_v42 = vadd.f32 %v12127_v10, %v19375_v33  ;;  %v7545_v56 = vpop.f32.mrb[37].mxu1  ;;  %v19379_v33 = vld [vmem:[#allocation81_spill] sm:$0xff] }
 0x846   : > { %v7546_v3 = vadd.f32 %v7545_v56, %v19376_v31 }
 0x847   : > { %v18210_v48 = vadd.f32 %v7551_v42, %v17970_v60  ;;  %v19380_v42 = vld [vmem:[#allocation79_spill] sm:$0xff] }
 0x848   : > { %v18213_v37 = vadd.f32 %v7546_v3, %v17957_v22  ;;  %v12130_v27 = vpop.f32.mrb[38].mxu1 }
 0x849   : > { %v7561_v18 = vadd.f32 %v12130_v27, %v19377_v26  ;;  %v7555_v23 = vpop.f32.mrb[39].mxu1  ;;  %v19381_v26 = vld [vmem:[#allocation83_spill] sm:$0xff] }
 0x84a   : > { %v7556_v32 = vadd.f32 %v7555_v23, %v19378_v54 }
 0x84b   : > { %v18218_v19 = vadd.f32 %v7561_v18, %v17996_v7  ;;  %v19382_v18 = vld [vmem:[#allocation82_spill] sm:$0xff] }
 0x84c   : > { %v18221_v11 = vadd.f32 %v7556_v32, %v17983_v0  ;;  %v12133_v10 = vpop.f32.mrb[40].mxu1 }
 0x84d   : > { %v7571_v56 = vadd.f32 %v12133_v10, %v19379_v33  ;;  %v7565_v60 = vpop.f32.mrb[41].mxu1  ;;  %v19383_v33 = vld [vmem:[#allocation85_spill] sm:$0xff] }
 0x84e   : > { %v7566_v31 = vadd.f32 %v7565_v60, %v19380_v42 }
 0x84f   : > { %v18226_v22 = vadd.f32 %v7571_v56, %v18022_v49  ;;  %v19384_v56 = vld [vmem:[#allocation84_spill] sm:$0xff] }
 0x850   : > { %v18229_v3 = vadd.f32 %v7566_v31, %v18009_v39  ;;  %v12136_v27 = vpop.f32.mrb[42].mxu1 }
 0x851   : > { %v7581_v23 = vadd.f32 %v12136_v27, %v19381_v26  ;;  %v7575_v7 = vpop.f32.mrb[43].mxu1  ;;  %v19385_v26 = vld [vmem:[#allocation87_spill] sm:$0xff] }
 0x852   : > { %v7576_v54 = vadd.f32 %v7575_v7, %v19382_v18 }
 0x853   : > { %v18234_v0 = vadd.f32 %v7581_v23, %v18048_v51  ;;  %v19386_v23 = vld [vmem:[#allocation86_spill] sm:$0xff] }
 0x854   : > { %v18237_v32 = vadd.f32 %v7576_v54, %v18035_v50  ;;  %v12139_v10 = vpop.f32.mrb[44].mxu1 }
 0x855   : > { %v7591_v60 = vadd.f32 %v12139_v10, %v19383_v33  ;;  %v7585_v49 = vpop.f32.mrb[45].mxu1 }
 0x856   : > { %v7586_v42 = vadd.f32 %v7585_v49, %v19384_v56 }
 0x857   : > { %v18242_v39 = vadd.f32 %v7591_v60, %v18071_v52  ;;  %v19387_v60 = vld [vmem:[#allocation88_spill] sm:$0xff] }
 0x858   : > { %v18245_v31 = vadd.f32 %v7586_v42, %v18064_v45  ;;  %v12142_v27 = vpop.f32.mrb[46].mxu1 }
 0x859   : > { %v7601_v7 = vadd.f32 %v12142_v27, %v19385_v26  ;;  %v7595_v51 = vpop.f32.mrb[47].mxu1 }
 0x85a   : > { %v7596_v18 = vadd.f32 %v7595_v51, %v19386_v23 }
 0x85b   : > { %v18250_v50 = vadd.f32 %v7601_v7, %v18079_v41 }
 0x85c   : > { %v18253_v54 = vadd.f32 %v7596_v18, %v18075_v53  ;;  %v12145_v10 = vpop.f32.mrb[48].mxu1 }
 0x85d   : > { %v7611_v33 = vadd.f32 %v12145_v10, %v18153_v20  ;;  %v7605_v52 = vpop.f32.mrb[49].mxu1 }
 0x85e   : > { %v7606_v49 = vadd.f32 %v7605_v52, %v19387_v60 }
 0x85f   : > { %v18258_v45 = vadd.f32 %v7611_v33, %v18087_v47 }
 0x860   : > { %v18261_v56 = vadd.f32 %v7606_v49, %v18083_v25  ;;  %v12148_v42 = vpop.f32.mrb[50].mxu1  ;;  %v18296_v49 = vpop.f32.mrb[122].mxu0 }
 0x861   : > { %v7621_v27 = vadd.f32 %v12148_v42, %v18157_v59  ;;  %v7615_v41 = vpop.f32.mrb[51].mxu1  ;;  %v18305_v42 = vpop.f32.mrb[123].mxu0 }
 0x862   : > { %v7616_v26 = vadd.f32 %v7615_v41, %v18155_v62 }
 0x863   : > { %v18266_v53 = vadd.f32 %v7621_v27, %v18095_v55 }
 0x864   : > { %v18269_v20 = vadd.f32 %v7616_v26, %v18091_v36  ;;  %v12151_v7 = vpop.f32.mrb[52].mxu1 }
 0x865   : > { %v7631_v51 = vadd.f32 %v12151_v7, %v18162_v14  ;;  %v7625_v47 = vpop.f32.mrb[53].mxu1  ;;  %v8881_v7 = vld [vmem:[%s19036_s5 + $0x10] sm:$0xff] }
 0x866   : > { %v7626_v23 = vadd.f32 %v7625_v47, %v18159_v28 }
 0x867   : > { %v18274_v25 = vadd.f32 %v7631_v51, %v18103_v16 }
 0x868   : > { %v18277_v59 = vadd.f32 %v7626_v23, %v18099_v6  ;;  %v12154_v18 = vpop.f32.mrb[54].mxu1 }
 0x869   : > { %v7641_v62 = vadd.f32 %v12154_v18, %v18169_v58  ;;  %v7635_v55 = vpop.f32.mrb[55].mxu1 }
 0x86a   : > { %v7636_v10 = vadd.f32 %v7635_v55, %v18166_v13  ;;  %v8883_v55 = vld [vmem:[%s19036_s5 + $0x20] sm:$0xff] }
 0x86b   : > { %v18282_v36 = vadd.f32 %v7641_v62, %v18111_v35 }
 0x86c   : > { %v18285_v14 = vadd.f32 %v7636_v10, %v18107_v30  ;;  %v12157_v33 = vpop.f32.mrb[56].mxu1  ;;  %v8879_v30 = vld [vmem:[%s19036_s5] sm:$0xff] }
 0x86d   : > { %v7651_v28 = vadd.f32 %v12157_v33, %v18174_v17  ;;  %v7645_v16 = vpop.f32.mrb[57].mxu1 }
 0x86e   : > { %v7646_v52 = vadd.f32 %v7645_v16, %v18171_v24  ;;  %v8880_v24 = vld [vmem:[%s19036_s5 + $0x8] sm:$0xff] }
 0x86f   : > { %v18290_v6 = vadd.f32 %v7651_v28, %v18119_v44  ;;  %v12868_v17 = vpack.c.bf16 %v8880_v24, %v8879_v30  ;;  %v19388_v30 = vld [vmem:[#allocation90_spill] sm:$0xff] }
 0x870   : > { %v18293_v58 = vadd.f32 %v7646_v52, %v18115_v9  ;;  %v12160_v60 = vpop.f32.mrb[58].mxu1 }
 0x871   : > { %v7661_v13 = vadd.f32 %v12160_v60, %v18182_v61  ;;  %v7655_v35 = vpop.f32.mrb[59].mxu1  ;;  %12869 = vmatprep.subr.bf16.mxu0 %v12868_v17 }
 0x872   : > { %v7656_v44 = vadd.f32 %v7655_v35, %v18178_v63  ;;  %12871 = vmatpush3.bf16.msra.mxu0 %v12868_v17  ;;  %v8882_v63 = vld [vmem:[%s19036_s5 + $0x18] sm:$0xff]  ;;  %v8887_v17 = vld [vmem:[%s19036_s5 + $0x40] sm:$0xff] }
 0x873   : > { %v18308_v9 = vadd.f32 %v7661_v13, %v18127_v1  ;;  %v12872_v51 = vpack.c.bf16 %v8882_v63, %v8881_v7  ;;  %v18347_v13 = vld [vmem:[#allocation3] sm:$0xff] }
 0x874   : > { %v18311_v61 = vadd.f32 %v7656_v44, %v18123_v29  ;;  %v12163_v27 = vpop.f32.mrb[60].mxu1  ;;  %v18328_v62 = vpop.f32.mrb[124].mxu0  ;;  %8482 = vst.msk [vmem:[#allocation4 + $0x10] sm:$0x1] %vm8481_vm5, %v18347_v13  ;;  %8483 = vst.msk [vmem:[#allocation4 + $0x20] sm:$0x1] %vm8481_vm5, %v18347_v13 }
 0x875   : > { %v7671_v41 = vadd.f32 %v12163_v27, %v18189_v43  ;;  %v7665_v26 = vpop.f32.mrb[61].mxu1  ;;  %12873 = vmatprep.subr.bf16.mxu0 %v12872_v51  ;;  %v18337_v10 = vpop.f32.mrb[125].mxu0  ;;  %8484 = vst.msk [vmem:[#allocation4 + $0x30] sm:$0x1] %vm8481_vm5, %v18347_v13  ;;  %8485 = vst.msk [vmem:[#allocation4 + $0x40] sm:$0x1] %vm8481_vm5, %v18347_v13 }
 0x876   : > { %v7666_v1 = vadd.f32 %v7665_v26, %v18186_v2  ;;  %12875 = vmatpush3.bf16.msra.mxu0 %v12872_v51  ;;  %8486 = vst.msk [vmem:[#allocation4 + $0x50] sm:$0x1] %vm8481_vm5, %v18347_v13  ;;  %8487 = vst.msk [vmem:[#allocation4 + $0x60] sm:$0x1] %vm8481_vm5, %v18347_v13  ;;  %v8888_v27 = vld [vmem:[%s19036_s5 + $0x48] sm:$0xff]  ;;  %v19389_v63 = vld [vmem:[#allocation89_spill] sm:$0xff] }
 0x877   : > { %v18322_v29 = vadd.f32 %v7671_v41, %v18135_v4  ;;  %v8884_v4 = vld [vmem:[%s19036_s5 + $0x28] sm:$0xff]  ;;  %8488 = vst.msk [vmem:[#allocation4 + $0x70] sm:$0x1] %vm8481_vm5, %v18347_v13  ;;  %8489 = vst.msk [vmem:[#allocation4 + $0x80] sm:$0x1] %vm8481_vm5, %v18347_v13  ;;  %v12884_v26 = vpack.c.bf16 %v8888_v27, %v8887_v17 }
 0x878   : > { %v18325_v47 = vadd.f32 %v7666_v1, %v18131_v46  ;;  %v12166_v43 = vpop.f32.mrb[62].mxu1  ;;  %v12876_v46 = vpack.c.bf16 %v8884_v4, %v8883_v55  ;;  %8490 = vst.msk [vmem:[#allocation4 + $0x90] sm:$0x1] %vm8481_vm5, %v18347_v13  ;;  %8491 = vst.msk [vmem:[#allocation4 + $0xa0] sm:$0x1] %vm8481_vm5, %v18347_v13 }
 0x879   : > { %v7681_v23 = vadd.f32 %v12166_v43, %v18193_v38  ;;  %v7675_v18 = vpop.f32.mrb[63].mxu1  ;;  %8492 = vst.msk [vmem:[#allocation4 + $0xb0] sm:$0x1] %vm8481_vm5, %v18347_v13  ;;  %8493 = vst.msk [vmem:[#allocation4 + $0xc0] sm:$0x1] %vm8481_vm5, %v18347_v13 }
 0x87a   : > { %v7676_v2 = vadd.f32 %v7675_v18, %v18191_v8  ;;  %12877 = vmatprep.subr.bf16.mxu0 %v12876_v46  ;;  %8494 = vst.msk [vmem:[#allocation4 + $0xd0] sm:$0x1] %vm8481_vm5, %v18347_v13  ;;  %8495 = vst.msk [vmem:[#allocation4 + $0xe0] sm:$0x1] %vm8481_vm5, %v18347_v13  ;;  %v8886_v8 = vld [vmem:[%s19036_s5 + $0x38] sm:$0xff] }
 0x87b   : > { %v18340_v33 = vadd.f32 %v7681_v23, %v18143_v12  ;;  %12879 = vmatpush3.bf16.msra.mxu0 %v12876_v46  ;;  %8496 = vst.msk [vmem:[#allocation4 + $0xf0] sm:$0x1] %vm8481_vm5, %v18347_v13  ;;  %8497 = vst.msk [vmem:[#allocation4 + $0x100] sm:$0x1] %vm8481_vm5, %v18347_v13  ;;  %v8885_v12 = vld [vmem:[%s19036_s5 + $0x30] sm:$0xff]  ;;  %v19390_v23 = vld [vmem:[#allocation68_spill] sm:$0xff] }
 0x87c   : > { %v18343_v38 = vadd.f32 %v7676_v2, %v18139_v40  ;;  %v12169_v28 = vpop.f32.mrb[64].mxu1  ;;  %v12880_v35 = vpack.c.bf16 %v8886_v8, %v8885_v12  ;;  %8475 = vst.msk [vmem:[#allocation4] sm:$0xff] %vm8474_vm4, %v18347_v13  ;;  %8476 = vst.msk [vmem:[#allocation4 + $0x8] sm:$0xff] %vm8474_vm4, %v18347_v13  ;;  %v19391_v2 = vld [vmem:[#allocation92_spill] sm:$0xff]  ;;  %v19392_v12 = vld [vmem:[#allocation91_spill] sm:$0xff] }
 0x87d   : > { %v7691_v16 = vadd.f32 %v12169_v28, %v18197_v15  ;;  %v7685_v52 = vpop.f32.mrb[65].mxu1  ;;  %8478 = vst.msk [vmem:[#allocation4 + $0x110] sm:$0xff] %vm8474_vm4, %v18347_v13  ;;  %8479 = vst.msk [vmem:[#allocation4 + $0x118] sm:$0xff] %vm8474_vm4, %v18347_v13 }
 0x87e   : > { %v7686_v60 = vadd.f32 %v7685_v52, %v18195_v57  ;;  %12881 = vmatprep.subr.bf16.mxu0 %v12880_v35 }
 0x87f   : > { %v18382_v40 = vadd.f32 %v7691_v16, %v18151_v34  ;;  %12883 = vmatpush3.bf16.msra.mxu0 %v12880_v35 }
 0x880   : > { %v18391_v57 = vadd.f32 %v7686_v60, %v18147_v21  ;;  %v8026_v15 = vpop.f32.mrb[66].mxu1  ;;  %v8889_v21 = vld [vmem:[%s19036_s5 + $0x50] sm:$0xff]  ;;  %12885 = vmatprep.subr.bf16.mxu0 %v12884_v26 }
 0x881   : > { %v8252_v24 = vadd.f32 %v19388_v30, %v8026_v15  ;;  %v8028_v44 = vpop.f32.mrb[67].mxu1 }
 0x883   : > { %v8410_v34 = vadd.f32 %v8252_v24, %v18205_v5  ;;  %v8890_v5 = vld [vmem:[%s19036_s5 + $0x58] sm:$0xff]  ;;  %12887 = vmatpush3.bf16.msra.mxu0 %v12884_v26  ;;  %v8848_v30 = vld [vmem:[#allocation4 + $0x8] sm:$0xff]  ;;  %v19394_v26 = vld [vmem:[#allocation93_spill] sm:$0xff] }
 0x884   : > { %v8031_v41 = vpop.f32.mrb[68].mxu1  ;;  %v12888_v43 = vpack.c.bf16 %v8890_v5, %v8889_v21 }
 0x885   : > { %v8442_v7 = vmax.f32 %v8410_v34, 0.0  ;;  %v8257_v1 = vadd.f32 %v19389_v63, %v8031_v41  ;;  %v8033_v51 = vpop.f32.mrb[69].mxu1  ;;  %v19393_v34 = vld [vmem:[#allocation94_spill] sm:$0xff] }
 0x886   : > { %12889 = vmatprep.subr.bf16.mxu0 %v12888_v43  ;;  %v19395_v51 = vld [vmem:[#allocation96_spill] sm:$0xff] }
 0x887   : > { %v8411_v18 = vadd.f32 %v8257_v1, %v19390_v23  ;;  %8564 = vrot.lane.b32.xlu1 %v8442_v7, %s13337_s26  ;;  %8499 = vst.msk [vmem:[#allocation4 + $0x11] sm:$0xff] %vm8498_vm3, %v8442_v7  ;;  %12891 = vmatpush3.bf16.msra.mxu0 %v12888_v43 }
 0x888   : > { %v8036_v55 = vpop.f32.mrb[70].mxu1 }
 0x889   : > { %v8443_v4 = vmax.f32 %v8411_v18, 0.0  ;;  %v8262_v46 = vadd.f32 %v19391_v2, %v8036_v55  ;;  %v8038_v28 = vpop.f32.mrb[71].mxu1 }
 0x88b   : > { %v8412_v16 = vadd.f32 %v8262_v46, %v18213_v37  ;;  %8566 = vrot.lane.b32.xlu0 %v8443_v4, %s13337_s26  ;;  %8710 = vrot.lane.b32.xlu1 %v8442_v7, %s13336_s18  ;;  %8501 = vst.msk [vmem:[#allocation4 + $0x19] sm:$0x7f] %vm8500_vm7, %v8443_v4  ;;  %v8847_v37 = vld [vmem:[#allocation4] sm:$0xff] }
 0x88c   : > { %v8041_v52 = vpop.f32.mrb[72].mxu1  ;;  %12258 = vmatprep.mubr.msk.f32.mxu0 %vm8474_vm4, %v8847_v37 }
 0x88d   : > { %v8444_v60 = vmax.f32 %v8412_v16, 0.0  ;;  %v8267_v8 = vadd.f32 %v19392_v12, %v8041_v52  ;;  %v8043_v15 = vpop.f32.mrb[73].mxu1  ;;  %12259 = vmatmul.mubr.msk.f32.vlgmr.msra.gmra.mrb[126].mxu0 %vm8474_vm4, %v8848_v30  ;;  %v19397_v52 = vld [vmem:[#allocation98_spill] sm:$0xff] }
 0x88f   : > { %v8413_v35 = vadd.f32 %v8267_v8, %v18210_v48  ;;  %8712 = vrot.lane.b32.xlu0 %v8443_v4, %s13336_s18  ;;  %8568 = vrot.lane.b32.xlu1 %v8444_v60, %s13337_s26  ;;  %8502 = vst.msk [vmem:[#allocation4 + $0x21] sm:$0xff] %vm8498_vm3, %v8444_v60  ;;  %v19396_v4 = vld [vmem:[#allocation95_spill] sm:$0xff] }
 0x890   : > { %v8046_v24 = vpop.f32.mrb[74].mxu1 }
 0x891   : > { %v8445_v44 = vmax.f32 %v8413_v35, 0.0  ;;  %v8272_v17 = vadd.f32 %v19393_v34, %v8046_v24  ;;  %v8048_v27 = vpop.f32.mrb[75].mxu1  ;;  %v19398_v35 = vld [vmem:[#allocation97_spill] sm:$0xff]  ;;  %v19399_v34 = vld [vmem:[#allocation100_spill] sm:$0xff] }
 0x893   : > { %v8414_v21 = vadd.f32 %v8272_v17, %v18221_v11  ;;  %8570 = vrot.lane.b32.xlu0 %v8445_v44, %s13337_s26  ;;  %8714 = vrot.lane.b32.xlu1 %v8444_v60, %s13336_s18  ;;  %8503 = vst.msk [vmem:[#allocation4 + $0x29] sm:$0x7f] %vm8500_vm7, %v8445_v44 }
 0x894   : > { %v8051_v48 = vpop.f32.mrb[76].mxu1 }
 0x895   : > { %v8446_v41 = vmax.f32 %v8414_v21, 0.0  ;;  %v8277_v5 = vadd.f32 %v19394_v26, %v8051_v48  ;;  %v8053_v7 = vpop.f32.mrb[77].mxu1 }
 0x897   : > { %v8415_v63 = vadd.f32 %v8277_v5, %v18218_v19  ;;  %8716 = vrot.lane.b32.xlu0 %v8445_v44, %s13336_s18  ;;  %8572 = vrot.lane.b32.xlu1 %v8446_v41, %s13337_s26  ;;  %8504 = vst.msk [vmem:[#allocation4 + $0x31] sm:$0xff] %vm8498_vm3, %v8446_v41 }
 0x898   : > { %v8056_v11 = vpop.f32.mrb[78].mxu1 }
 0x899   : > { %v8447_v1 = vmax.f32 %v8415_v63, 0.0  ;;  %v8282_v43 = vadd.f32 %v19395_v51, %v8056_v11  ;;  %v8058_v23 = vpop.f32.mrb[79].mxu1  ;;  %v19401_v11 = vld [vmem:[#allocation102_spill] sm:$0xff] }
 0x89b   : > { %v8416_v18 = vadd.f32 %v8282_v43, %v18229_v3  ;;  %8574 = vrot.lane.b32.xlu0 %v8447_v1, %s13337_s26  ;;  %8718 = vrot.lane.b32.xlu1 %v8446_v41, %s13336_s18  ;;  %8505 = vst.msk [vmem:[#allocation4 + $0x39] sm:$0x7f] %vm8500_vm7, %v8447_v1  ;;  %v19400_v41 = vld [vmem:[#allocation99_spill] sm:$0xff] }
 0x89c   : > { %v8061_v19 = vpop.f32.mrb[80].mxu1 }
 0x89d   : > { %v8448_v55 = vmax.f32 %v8416_v18, 0.0  ;;  %v8287_v2 = vadd.f32 %v19396_v4, %v8061_v19  ;;  %v8063_v46 = vpop.f32.mrb[81].mxu1  ;;  %v19402_v18 = vld [vmem:[#allocation101_spill] sm:$0xff] }
 0x89e   : > { %v19403_v46 = vld [vmem:[#allocation104_spill] sm:$0xff] }
 0x89f   : > { %v8417_v28 = vadd.f32 %v8287_v2, %v18226_v22  ;;  %8720 = vrot.lane.b32.xlu0 %v8447_v1, %s13336_s18  ;;  %8576 = vrot.lane.b32.xlu1 %v8448_v55, %s13337_s26  ;;  %8506 = vst.msk [vmem:[#allocation4 + $0x41] sm:$0xff] %vm8498_vm3, %v8448_v55 }
 0x8a0   : > { %v8066_v3 = vpop.f32.mrb[82].mxu1 }
 0x8a1   : > { %v8449_v16 = vmax.f32 %v8417_v28, 0.0  ;;  %v8292_v60 = vadd.f32 %v19397_v52, %v8066_v3  ;;  %v8068_v12 = vpop.f32.mrb[83].mxu1 }
 0x8a3   : > { %v8418_v8 = vadd.f32 %v8292_v60, %v18237_v32  ;;  %8578 = vrot.lane.b32.xlu0 %v8449_v16, %s13337_s26  ;;  %8722 = vrot.lane.b32.xlu1 %v8448_v55, %s13336_s18  ;;  %8507 = vst.msk [vmem:[#allocation4 + $0x49] sm:$0x7f] %vm8500_vm7, %v8449_v16  ;;  %v19404_v60 = vld [vmem:[#allocation103_spill] sm:$0xff] }
 0x8a4   : > { %v8071_v22 = vpop.f32.mrb[84].mxu1 }
 0x8a5   : > { %v8450_v15 = vmax.f32 %v8418_v8, 0.0  ;;  %v8297_v37 = vadd.f32 %v19398_v35, %v8071_v22  ;;  %v8073_v30 = vpop.f32.mrb[85].mxu1 }
 0x8a7   : > { %v8419_v24 = vadd.f32 %v8297_v37, %v18234_v0  ;;  %8724 = vrot.lane.b32.xlu0 %v8449_v16, %s13336_s18  ;;  %8580 = vrot.lane.b32.xlu1 %v8450_v15, %s13337_s26  ;;  %8508 = vst.msk [vmem:[#allocation4 + $0x51] sm:$0xff] %vm8498_vm3, %v8450_v15 }
 0x8a8   : > { %v8076_v32 = vpop.f32.mrb[86].mxu1 }
 0x8a9   : > { %v8451_v44 = vmax.f32 %v8419_v24, 0.0  ;;  %v8302_v17 = vadd.f32 %v19399_v34, %v8076_v32  ;;  %v8078_v27 = vpop.f32.mrb[87].mxu1  ;;  %v19405_v24 = vld [vmem:[#allocation106_spill] sm:$0xff] }
 0x8aa   : > { %v19406_v27 = vld [vmem:[#allocation105_spill] sm:$0xff] }
 0x8ab   : > { %v8420_v21 = vadd.f32 %v8302_v17, %v18245_v31  ;;  %8582 = vrot.lane.b32.xlu0 %v8451_v44, %s13337_s26  ;;  %8726 = vrot.lane.b32.xlu1 %v8450_v15, %s13336_s18  ;;  %8509 = vst.msk [vmem:[#allocation4 + $0x59] sm:$0x7f] %vm8500_vm7, %v8451_v44  ;;  %v10804_v15 = vld [vmem:[%s19036_s5 + $0x68] sm:$0xff] }
 0x8ac   : > { %v8081_v0 = vpop.f32.mrb[88].mxu1 }
 0x8ad   : > { %v8452_v48 = vmax.f32 %v8420_v21, 0.0  ;;  %v8307_v26 = vadd.f32 %v19400_v41, %v8081_v0  ;;  %v8083_v5 = vpop.f32.mrb[89].mxu1  ;;  %v10806_v41 = vld [vmem:[%s19036_s5 + $0x78] sm:$0xff] }
 0x8af   : > { %v8421_v7 = vadd.f32 %v8307_v26, %v18242_v39  ;;  %8728 = vrot.lane.b32.xlu0 %v8451_v44, %s13336_s18  ;;  %8584 = vrot.lane.b32.xlu1 %v8452_v48, %s13337_s26  ;;  %8510 = vst.msk [vmem:[#allocation4 + $0x61] sm:$0xff] %vm8498_vm3, %v8452_v48 }
 0x8b0   : > { %v8086_v31 = vpop.f32.mrb[90].mxu1 }
 0x8b1   : > { %v8453_v63 = vmax.f32 %v8421_v7, 0.0  ;;  %v8312_v1 = vadd.f32 %v19401_v11, %v8086_v31  ;;  %v8088_v51 = vpop.f32.mrb[91].mxu1  ;;  %v19407_v31 = vld [vmem:[#allocation108_spill] sm:$0xff] }
 0x8b3   : > { %v8422_v43 = vadd.f32 %v8312_v1, %v18253_v54  ;;  %8586 = vrot.lane.b32.xlu0 %v8453_v63, %s13337_s26  ;;  %8730 = vrot.lane.b32.xlu1 %v8452_v48, %s13336_s18  ;;  %8511 = vst.msk [vmem:[#allocation4 + $0x69] sm:$0x7f] %vm8500_vm7, %v8453_v63 }
 0x8b4   : > { %v8091_v39 = vpop.f32.mrb[92].mxu1 }
 0x8b5   : > { %v8454_v23 = vmax.f32 %v8422_v43, 0.0  ;;  %v8317_v19 = vadd.f32 %v19402_v18, %v8091_v39  ;;  %v8093_v55 = vpop.f32.mrb[93].mxu1  ;;  %v19408_v43 = vld [vmem:[#allocation107_spill] sm:$0xff] }
 0x8b6   : > { %v19409_v55 = vld [vmem:[#allocation110_spill] sm:$0xff] }
 0x8b7   : > { %v8423_v4 = vadd.f32 %v8317_v19, %v18250_v50  ;;  %8732 = vrot.lane.b32.xlu0 %v8453_v63, %s13336_s18  ;;  %8588 = vrot.lane.b32.xlu1 %v8454_v23, %s13337_s26  ;;  %8512 = vst.msk [vmem:[#allocation4 + $0x71] sm:$0xff] %vm8498_vm3, %v8454_v23 }
 0x8b8   : > { %v8096_v54 = vpop.f32.mrb[94].mxu1 }
 0x8b9   : > { %v8455_v2 = vmax.f32 %v8423_v4, 0.0  ;;  %v8322_v28 = vadd.f32 %v19403_v46, %v8096_v54  ;;  %v8098_v3 = vpop.f32.mrb[95].mxu1  ;;  %v10808_v46 = vld [vmem:[%s19036_s5 + $0x88] sm:$0xff] }
 0x8bb   : > { %v8424_v16 = vadd.f32 %v8322_v28, %v18261_v56  ;;  %8590 = vrot.lane.b32.xlu0 %v8455_v2, %s13337_s26  ;;  %8734 = vrot.lane.b32.xlu1 %v8454_v23, %s13336_s18  ;;  %8513 = vst.msk [vmem:[#allocation4 + $0x79] sm:$0x7f] %vm8500_vm7, %v8455_v2  ;;  %v10803_v56 = vld [vmem:[%s19036_s5 + $0x60] sm:$0xff] }
 0x8bc   : > { %v8101_v50 = vpop.f32.mrb[96].mxu1  ;;  %v12892_v37 = vpack.c.bf16 %v10804_v15, %v10803_v56 }
 0x8bd   : > { %v8456_v52 = vmax.f32 %v8424_v16, 0.0  ;;  %v8327_v12 = vadd.f32 %v19404_v60, %v8101_v50  ;;  %v8103_v8 = vpop.f32.mrb[97].mxu1  ;;  %v19410_v50 = vld [vmem:[#allocation109_spill] sm:$0xff] }
 0x8be   : > { %12893 = vmatprep.subr.bf16.mxu0 %v12892_v37 }
 0x8bf   : > { %v8425_v22 = vadd.f32 %v8327_v12, %v18258_v45  ;;  %8736 = vrot.lane.b32.xlu0 %v8455_v2, %s13336_s18  ;;  %8592 = vrot.lane.b32.xlu1 %v8456_v52, %s13337_s26  ;;  %8514 = vst.msk [vmem:[#allocation4 + $0x81] sm:$0xff] %vm8498_vm3, %v8456_v52 }
 0x8c0   : > { %v8106_v35 = vpop.f32.mrb[98].mxu1  ;;  %12895 = vmatpush3.bf16.msra.mxu0 %v12892_v37 }
 0x8c1   : > { %v8457_v30 = vmax.f32 %v8425_v22, 0.0  ;;  %v8332_v32 = vadd.f32 %v19405_v24, %v8106_v35  ;;  %v8108_v45 = vpop.f32.mrb[99].mxu1  ;;  %v19411_v22 = vld [vmem:[#allocation112_spill] sm:$0xff] }
 0x8c3   : > { %v8426_v44 = vadd.f32 %v8332_v32, %v18269_v20  ;;  %8594 = vrot.lane.b32.xlu0 %v8457_v30, %s13337_s26  ;;  %8738 = vrot.lane.b32.xlu1 %v8456_v52, %s13336_s18  ;;  %8515 = vst.msk [vmem:[#allocation4 + $0x89] sm:$0x7f] %vm8500_vm7, %v8457_v30  ;;  %v10805_v20 = vld [vmem:[%s19036_s5 + $0x70] sm:$0xff] }
 0x8c4   : > { %v8111_v34 = vpop.f32.mrb[100].mxu1  ;;  %v12896_v5 = vpack.c.bf16 %v10806_v41, %v10805_v20 }
 0x8c5   : > { %v8458_v17 = vmax.f32 %v8426_v44, 0.0  ;;  %v8337_v21 = vadd.f32 %v19406_v27, %v8111_v34  ;;  %v8113_v0 = vpop.f32.mrb[101].mxu1  ;;  %v10810_v44 = vld [vmem:[%s19036_s5 + $0x98] sm:$0xff] }
 0x8c6   : > { %12897 = vmatprep.subr.bf16.mxu0 %v12896_v5 }
 0x8c7   : > { %v8427_v48 = vadd.f32 %v8337_v21, %v18266_v53  ;;  %8740 = vrot.lane.b32.xlu0 %v8457_v30, %s13336_s18  ;;  %8596 = vrot.lane.b32.xlu1 %v8458_v17, %s13337_s26  ;;  %8516 = vst.msk [vmem:[#allocation4 + $0x91] sm:$0xff] %vm8498_vm3, %v8458_v17  ;;  %v19412_v30 = vld [vmem:[#allocation111_spill] sm:$0xff] }
 0x8c8   : > { %v8116_v26 = vpop.f32.mrb[102].mxu1  ;;  %12899 = vmatpush3.bf16.msra.mxu0 %v12896_v5  ;;  %v19413_v21 = vld [vmem:[#allocation23_spill] sm:$0xff] }
 0x8c9   : > { %v8459_v7 = vmax.f32 %v8427_v48, 0.0  ;;  %v8342_v63 = vadd.f32 %v19407_v31, %v8116_v26  ;;  %v8118_v53 = vpop.f32.mrb[103].mxu1  ;;  %v19414_v26 = vld [vmem:[#allocation21_spill] sm:$0xff] }
 0x8cb   : > { %v8428_v11 = vadd.f32 %v8342_v63, %v18277_v59  ;;  %8598 = vrot.lane.b32.xlu0 %v8459_v7, %s13337_s26  ;;  %8742 = vrot.lane.b32.xlu1 %v8458_v17, %s13336_s18  ;;  %8517 = vst.msk [vmem:[#allocation4 + $0x99] sm:$0x7f] %vm8500_vm7, %v8459_v7  ;;  %v10812_v63 = vld [vmem:[%s19036_s5 + $0xa8] sm:$0xff] }
 0x8cc   : > { %v8121_v1 = vpop.f32.mrb[104].mxu1 }
 0x8cd   : > { %v8460_v51 = vmax.f32 %v8428_v11, 0.0  ;;  %v8347_v39 = vadd.f32 %v19408_v43, %v8121_v1  ;;  %v8123_v23 = vpop.f32.mrb[105].mxu1 }
 0x8cf   : > { %v8429_v18 = vadd.f32 %v8347_v39, %v18274_v25  ;;  %8744 = vrot.lane.b32.xlu0 %v8459_v7, %s13336_s18  ;;  %8600 = vrot.lane.b32.xlu1 %v8460_v51, %s13337_s26  ;;  %8518 = vst.msk [vmem:[#allocation4 + $0xa1] sm:$0xff] %vm8498_vm3, %v8460_v51  ;;  %v10807_v25 = vld [vmem:[%s19036_s5 + $0x80] sm:$0xff] }
 0x8d0   : > { %v8126_v59 = vpop.f32.mrb[106].mxu1  ;;  %v12900_v3 = vpack.c.bf16 %v10808_v46, %v10807_v25 }
 0x8d1   : > { %v8461_v19 = vmax.f32 %v8429_v18, 0.0  ;;  %v8352_v4 = vadd.f32 %v19409_v55, %v8126_v59  ;;  %v8128_v54 = vpop.f32.mrb[107].mxu1  ;;  %v19416_v59 = vld [vmem:[#allocation22_spill] sm:$0xff] }
 0x8d2   : > { %12901 = vmatprep.subr.bf16.mxu0 %v12900_v3 }
 0x8d3   : > { %v8430_v2 = vadd.f32 %v8352_v4, %v18285_v14  ;;  %8602 = vrot.lane.b32.xlu0 %v8461_v19, %s13337_s26  ;;  %8746 = vrot.lane.b32.xlu1 %v8460_v51, %s13336_s18  ;;  %8519 = vst.msk [vmem:[#allocation4 + $0xa9] sm:$0x7f] %vm8500_vm7, %v8461_v19  ;;  %v19415_v51 = vld [vmem:[#allocation113_spill] sm:$0xff] }
 0x8d4   : > { %v8131_v28 = vpop.f32.mrb[108].mxu1  ;;  %12903 = vmatpush3.bf16.msra.mxu0 %v12900_v3 }
 0x8d5   : > { %v8462_v16 = vmax.f32 %v8430_v2, 0.0  ;;  %v8357_v52 = vadd.f32 %v19410_v50, %v8131_v28  ;;  %v8133_v14 = vpop.f32.mrb[109].mxu1  ;;  %v10814_v28 = vld [vmem:[%s19036_s5 + $0xb8] sm:$0xff] }
 0x8d7   : > { %v8431_v60 = vadd.f32 %v8357_v52, %v18282_v36  ;;  %8748 = vrot.lane.b32.xlu0 %v8461_v19, %s13336_s18  ;;  %8604 = vrot.lane.b32.xlu1 %v8462_v16, %s13337_s26  ;;  %8520 = vst.msk [vmem:[#allocation4 + $0xb1] sm:$0xff] %vm8498_vm3, %v8462_v16 }
 0x8d8   : > { %v8136_v12 = vpop.f32.mrb[110].mxu1 }
 0x8d9   : > { %v8463_v8 = vmax.f32 %v8431_v60, 0.0  ;;  %v8362_v56 = vadd.f32 %v19411_v22, %v8136_v12  ;;  %v8138_v15 = vpop.f32.mrb[111].mxu1 }
 0x8db   : > { %v8432_v35 = vadd.f32 %v8362_v56, %v18293_v58  ;;  %8606 = vrot.lane.b32.xlu0 %v8463_v8, %s13337_s26  ;;  %8750 = vrot.lane.b32.xlu1 %v8462_v16, %s13336_s18  ;;  %8521 = vst.msk [vmem:[#allocation4 + $0xb9] sm:$0x7f] %vm8500_vm7, %v8463_v8  ;;  %v10809_v58 = vld [vmem:[%s19036_s5 + $0x90] sm:$0xff]  ;;  %v10847_v56 = vld [vmem:[%s19036_s5 + $0xc0] sm:$0xff] }
 0x8dc   : > { %v8141_v36 = vpop.f32.mrb[112].mxu1  ;;  %v12904_v17 = vpack.c.bf16 %v10810_v44, %v10809_v58 }
 0x8dd   : > { %v8464_v37 = vmax.f32 %v8432_v35, 0.0  ;;  %v8367_v24 = vadd.f32 %v19412_v30, %v8141_v36  ;;  %v8143_v32 = vpop.f32.mrb[113].mxu1 }
 0x8de   : > { %12905 = vmatprep.subr.bf16.mxu0 %v12904_v17 }
 0x8df   : > { %v8433_v45 = vadd.f32 %v8367_v24, %v18290_v6  ;;  %8752 = vrot.lane.b32.xlu0 %v8463_v8, %s13336_s18  ;;  %8608 = vrot.lane.b32.xlu1 %v8464_v37, %s13337_s26  ;;  %8522 = vst.msk [vmem:[#allocation4 + $0xc1] sm:$0xff] %vm8498_vm3, %v8464_v37 }
 0x8e0   : > { %v8146_v34 = vpop.f32.mrb[114].mxu1  ;;  %12907 = vmatpush3.bf16.msra.mxu0 %v12904_v17 }
 0x8e1   : > { %v8465_v27 = vmax.f32 %v8433_v45, 0.0  ;;  %v8372_v0 = vadd.f32 %v19413_v21, %v8146_v34  ;;  %v8148_v6 = vpop.f32.mrb[115].mxu1 }
 0x8e3   : > { %v8434_v48 = vadd.f32 %v8372_v0, %v18311_v61  ;;  %8610 = vrot.lane.b32.xlu0 %v8465_v27, %s13337_s26  ;;  %8754 = vrot.lane.b32.xlu1 %v8464_v37, %s13336_s18  ;;  %8523 = vst.msk [vmem:[#allocation4 + $0xc9] sm:$0x7f] %vm8500_vm7, %v8465_v27  ;;  %v10811_v61 = vld [vmem:[%s19036_s5 + $0xa0] sm:$0xff] }
 0x8e4   : > { %v8151_v20 = vpop.f32.mrb[116].mxu1  ;;  %v12908_v11 = vpack.c.bf16 %v10812_v63, %v10811_v61 }
 0x8e5   : > { %v8466_v41 = vmax.f32 %v8434_v48, 0.0  ;;  %v8377_v5 = vadd.f32 %v19414_v26, %v8151_v20  ;;  %v8153_v7 = vpop.f32.mrb[117].mxu1 }
 0x8e6   : > { %12909 = vmatprep.subr.bf16.mxu0 %v12908_v11 }
 0x8e7   : > { %v8435_v31 = vadd.f32 %v8377_v5, %v18308_v9  ;;  %8756 = vrot.lane.b32.xlu0 %v8465_v27, %s13336_s18  ;;  %8612 = vrot.lane.b32.xlu1 %v8466_v41, %s13337_s26  ;;  %8524 = vst.msk [vmem:[#allocation4 + $0xd1] sm:$0xff] %vm8498_vm3, %v8466_v41 }
 0x8e8   : > { %v8156_v53 = vpop.f32.mrb[118].mxu1  ;;  %12911 = vmatpush3.bf16.msra.mxu0 %v12908_v11 }
 0x8e9   : > { %v8467_v1 = vmax.f32 %v8435_v31, 0.0  ;;  %v8382_v43 = vadd.f32 %v19415_v51, %v8156_v53  ;;  %v8158_v9 = vpop.f32.mrb[119].mxu1 }
 0x8eb   : > { %v8436_v39 = vadd.f32 %v8382_v43, %v18325_v47  ;;  %8614 = vrot.lane.b32.xlu0 %v8467_v1, %s13337_s26  ;;  %8758 = vrot.lane.b32.xlu1 %v8466_v41, %s13336_s18  ;;  %8525 = vst.msk [vmem:[#allocation4 + $0xd9] sm:$0x7f] %vm8500_vm7, %v8467_v1 }
 0x8ec   : > { %v8161_v23 = vpop.f32.mrb[120].mxu1 }
 0x8ed   : > { %v8468_v18 = vmax.f32 %v8436_v39, 0.0  ;;  %v8387_v19 = vadd.f32 %v19416_v59, %v8161_v23  ;;  %v8163_v55 = vpop.f32.mrb[121].mxu1 }
 0x8ef   : > { %v8437_v4 = vadd.f32 %v8387_v19, %v18322_v29  ;;  %8760 = vrot.lane.b32.xlu0 %v8467_v1, %s13336_s18  ;;  %8616 = vrot.lane.b32.xlu1 %v8468_v18, %s13337_s26  ;;  %8526 = vst.msk [vmem:[#allocation4 + $0xe1] sm:$0xff] %vm8498_vm3, %v8468_v18  ;;  %v10813_v29 = vld [vmem:[%s19036_s5 + $0xb0] sm:$0xff] }
 0x8f0   : > { %v8166_v47 = vpop.f32.mrb[122].mxu1  ;;  %v12912_v16 = vpack.c.bf16 %v10814_v28, %v10813_v29 }
 0x8f1   : > { %v8469_v54 = vmax.f32 %v8437_v4, 0.0  ;;  %v8392_v2 = vadd.f32 %v18305_v42, %v8166_v47  ;;  %v8168_v25 = vpop.f32.mrb[123].mxu1 }
 0x8f2   : > { %12913 = vmatprep.subr.bf16.mxu0 %v12912_v16 }
 0x8f3   : > { %v8438_v46 = vadd.f32 %v8392_v2, %v18343_v38  ;;  %8618 = vrot.lane.b32.xlu0 %v8469_v54, %s13337_s26  ;;  %8762 = vrot.lane.b32.xlu1 %v8468_v18, %s13336_s18  ;;  %8527 = vst.msk [vmem:[#allocation4 + $0xe9] sm:$0x7f] %vm8500_vm7, %v8469_v54 }
 0x8f4   : > { %v8171_v3 = vpop.f32.mrb[124].mxu1  ;;  %12915 = vmatpush3.bf16.msra.mxu0 %v12912_v16 }
 0x8f5   : > { %v8470_v42 = vmax.f32 %v8438_v46, 0.0  ;;  %v8397_v50 = vadd.f32 %v18296_v49, %v8171_v3  ;;  %v8173_v38 = vpop.f32.mrb[125].mxu1 }
 0x8f7   : > { %v8439_v52 = vadd.f32 %v8397_v50, %v18340_v33  ;;  %8764 = vrot.lane.b32.xlu0 %v8469_v54, %s13336_s18  ;;  %8620 = vrot.lane.b32.xlu1 %v8470_v42, %s13337_s26  ;;  %8528 = vst.msk [vmem:[#allocation4 + $0xf1] sm:$0xff] %vm8498_vm3, %v8470_v42 }
 0x8f8   : > { %v8176_v14 = vpop.f32.mrb[126].mxu1 }
 0x8f9   : > { %v8471_v60 = vmax.f32 %v8439_v52, 0.0  ;;  %v8402_v12 = vadd.f32 %v18337_v10, %v8176_v14  ;;  %v8565_v8 = vpop.permute.xlu1 %8564  ;;  %v8178_v22 = vpop.f32.mrb[127].mxu1  ;;  %v10848_v10 = vld [vmem:[%s19036_s5 + $0xc8] sm:$0xff] }
 0x8fa   : > { %8661 = vst.msk [vmem:[#allocation4 + $0x10] sm:$0xff] %vm8660_vm6, %v8565_v8  ;;  %v18610_v37 = vpack.c.bf16 %v10848_v10, %v10847_v56 }
 0x8fb   : > { %v8440_v49 = vadd.f32 %v8402_v12, %v18391_v57  ;;  %8622 = vrot.lane.b32.xlu0 %v8471_v60, %s13337_s26  ;;  %8766 = vrot.lane.b32.xlu1 %v8470_v42, %s13336_s18  ;;  %8529 = vst.msk [vmem:[#allocation4 + $0xf9] sm:$0x7f] %vm8500_vm7, %v8471_v60 }
 0x8fc   : > { %v8181_v33 = vpop.f32.mrb[128].mxu1  ;;  %12917 = vmatprep.subr.bf16.mxu0 %v18610_v37 }
 0x8fd   : > { %v8472_v15 = vmax.f32 %v8440_v49, 0.0  ;;  %v8407_v57 = vadd.f32 %v18328_v62, %v8181_v33  ;;  %v8567_v35 = vpop.permute.xlu0 %8566  ;;  %v8711_v36 = vpop.permute.xlu1 %8710 }
 0x8fe   : > { %8662 = vst.msk [vmem:[#allocation4 + $0x18] sm:$0xff] %vm8660_vm6, %v8567_v35  ;;  %v8183_v30 = vpop.f32.mrb[129].mxu1 }
 0x8ff   : > { %8807 = vst.msk [vmem:[#allocation4 + $0xf] sm:$0xfe] %vm8806_vm8, %v8711_v36  ;;  %v8441_v24 = vadd.f32 %v8407_v57, %v18382_v40  ;;  %8768 = vrot.lane.b32.xlu0 %v8471_v60, %s13336_s18  ;;  %8624 = vrot.lane.b32.xlu1 %v8472_v15, %s13337_s26 }
 0x900   : > { %8530 = vst.msk [vmem:[#allocation4 + $0x101] sm:$0xff] %vm8498_vm3, %v8472_v15 }
 0x901   : > { %8694 = vst.msk [vmem:[#allocation4 + $0x1f] sm:$0x1] %vm8693_vm15, %v18347_v13  ;;  %v8473_v62 = vmax.f32 %v8441_v24, 0.0  ;;  %v8713_v32 = vpop.permute.xlu0 %8712  ;;  %v8569_v45 = vpop.permute.xlu1 %8568 }
 0x902   : > { %8809 = vst.msk [vmem:[#allocation4 + $0x17] sm:$0xff] %vm8808_vm0, %v8713_v32 }
 0x903   : > { %8663 = vst.msk [vmem:[#allocation4 + $0x20] sm:$0xff] %vm8660_vm6, %v8569_v45  ;;  %8626 = vrot.lane.b32.xlu0 %v8473_v62, %s13337_s26  ;;  %8770 = vrot.lane.b32.xlu1 %v8472_v15, %s13336_s18  ;;  %s10895_s26 = sshll.u32 %s19418_s25, 2 }
 0x904   : > { %8531 = vst.msk [vmem:[#allocation4 + $0x109] sm:$0x7f] %vm8500_vm7, %v8473_v62  ;;  %s278_s13 = scalar_lea.vmem %s19038_s7, %s10895_s26 }
 0x905   : > { %v8571_v40 = vpop.permute.xlu0 %8570  ;;  %v8715_v58 = vpop.permute.xlu1 %8714 }
 0x906   : > { %8664 = vst.msk [vmem:[#allocation4 + $0x28] sm:$0xff] %vm8660_vm6, %v8571_v40 }
 0x907   : > { %8810 = vst.msk [vmem:[#allocation4 + $0x1f] sm:$0xfe] %vm8806_vm8, %v8715_v58  ;;  %8772 = vrot.lane.b32.xlu0 %v8473_v62, %s13336_s18 }
 0x908   : > { %8695 = vst.msk [vmem:[#allocation4 + $0x2f] sm:$0x1] %vm8693_vm15, %v18347_v13 }
 0x909   : > { %v8717_v44 = vpop.permute.xlu0 %8716  ;;  %v8573_v34 = vpop.permute.xlu1 %8572  ;;  %v18631_v17 = vld [vmem:[#allocation4 + $0x10] sm:$0xff]  ;;  %v18633_v27 = vld [vmem:[#allocation4 + $0x18] sm:$0xff] }
 0x90a   : > { %8811 = vst.msk [vmem:[#allocation4 + $0x27] sm:$0xff] %vm8808_vm0, %v8717_v44  ;;  %12261 = vmatprep.mubr.msk.f32.mxu0 %vm8474_vm4, %v18631_v17 }
 0x90b   : > { %8665 = vst.msk [vmem:[#allocation4 + $0x30] sm:$0xff] %vm8660_vm6, %v8573_v34  ;;  %12262 = vmatmul.mubr.msk.f32.gmra.mrb[128].mxu0 %vm8474_vm4, %v18633_v27 }
 0x90d   : > { %v8575_v21 = vpop.permute.xlu0 %8574  ;;  %v8719_v0 = vpop.permute.xlu1 %8718 }
 0x90e   : > { %8666 = vst.msk [vmem:[#allocation4 + $0x38] sm:$0xff] %vm8660_vm6, %v8575_v21 }
 0x90f   : > { %8812 = vst.msk [vmem:[#allocation4 + $0x2f] sm:$0xfe] %vm8806_vm8, %v8719_v0 }
 0x910   : > { %8696 = vst.msk [vmem:[#allocation4 + $0x3f] sm:$0x1] %vm8693_vm15, %v18347_v13 }
 0x911   : > { %v8721_v6 = vpop.permute.xlu0 %8720  ;;  %v8577_v48 = vpop.permute.xlu1 %8576  ;;  %v18645_v20 = vld [vmem:[#allocation4 + $0x20] sm:$0xff]  ;;  %v18647_v41 = vld [vmem:[#allocation4 + $0x28] sm:$0xff] }
 0x912   : > { %8813 = vst.msk [vmem:[#allocation4 + $0x37] sm:$0xff] %vm8808_vm0, %v8721_v6  ;;  %12264 = vmatprep.mubr.msk.f32.mxu0 %vm8474_vm4, %v18645_v20 }
 0x913   : > { %8667 = vst.msk [vmem:[#allocation4 + $0x40] sm:$0xff] %vm8660_vm6, %v8577_v48  ;;  %12265 = vmatmul.mubr.msk.f32.gmra.mrb[130].mxu0 %vm8474_vm4, %v18647_v41 }
 0x915   : > { %v8579_v26 = vpop.permute.xlu0 %8578  ;;  %v8723_v5 = vpop.permute.xlu1 %8722 }
 0x916   : > { %8668 = vst.msk [vmem:[#allocation4 + $0x48] sm:$0xff] %vm8660_vm6, %v8579_v26 }
 0x917   : > { %8814 = vst.msk [vmem:[#allocation4 + $0x3f] sm:$0xfe] %vm8806_vm8, %v8723_v5 }
 0x918   : > { %8697 = vst.msk [vmem:[#allocation4 + $0x4f] sm:$0x1] %vm8693_vm15, %v18347_v13 }
 0x919   : > { %v8725_v7 = vpop.permute.xlu0 %8724  ;;  %v8581_v31 = vpop.permute.xlu1 %8580  ;;  %v18659_v61 = vld [vmem:[#allocation4 + $0x30] sm:$0xff]  ;;  %v18661_v63 = vld [vmem:[#allocation4 + $0x38] sm:$0xff] }
 0x91a   : > { %8815 = vst.msk [vmem:[#allocation4 + $0x47] sm:$0xff] %vm8808_vm0, %v8725_v7  ;;  %12267 = vmatprep.mubr.msk.f32.mxu0 %vm8474_vm4, %v18659_v61 }
 0x91b   : > { %8669 = vst.msk [vmem:[#allocation4 + $0x50] sm:$0xff] %vm8660_vm6, %v8581_v31  ;;  %12268 = vmatmul.mubr.msk.f32.gmra.mrb[132].mxu0 %vm8474_vm4, %v18661_v63 }
 0x91d   : > { %v8583_v53 = vpop.permute.xlu0 %8582  ;;  %v8727_v11 = vpop.permute.xlu1 %8726 }
 0x91e   : > { %8670 = vst.msk [vmem:[#allocation4 + $0x58] sm:$0xff] %vm8660_vm6, %v8583_v53 }
 0x91f   : > { %8816 = vst.msk [vmem:[#allocation4 + $0x4f] sm:$0xfe] %vm8806_vm8, %v8727_v11 }
 0x920   : > { %8698 = vst.msk [vmem:[#allocation4 + $0x5f] sm:$0x1] %vm8693_vm15, %v18347_v13 }
 0x921   : > { %v8729_v1 = vpop.permute.xlu0 %8728  ;;  %v8585_v51 = vpop.permute.xlu1 %8584  ;;  %v18673_v43 = vld [vmem:[#allocation4 + $0x40] sm:$0xff]  ;;  %v18675_v9 = vld [vmem:[#allocation4 + $0x48] sm:$0xff] }
 0x922   : > { %8817 = vst.msk [vmem:[#allocation4 + $0x57] sm:$0xff] %vm8808_vm0, %v8729_v1  ;;  %12270 = vmatprep.mubr.msk.f32.mxu0 %vm8474_vm4, %v18673_v43 }
 0x923   : > { %8671 = vst.msk [vmem:[#allocation4 + $0x60] sm:$0xff] %vm8660_vm6, %v8585_v51  ;;  %12271 = vmatmul.mubr.msk.f32.gmra.mrb[134].mxu0 %vm8474_vm4, %v18675_v9 }
 0x925   : > { %v8587_v39 = vpop.permute.xlu0 %8586  ;;  %v8731_v23 = vpop.permute.xlu1 %8730 }
 0x926   : > { %8672 = vst.msk [vmem:[#allocation4 + $0x68] sm:$0xff] %vm8660_vm6, %v8587_v39 }
 0x927   : > { %8818 = vst.msk [vmem:[#allocation4 + $0x5f] sm:$0xfe] %vm8806_vm8, %v8731_v23 }
 0x928   : > { %8699 = vst.msk [vmem:[#allocation4 + $0x6f] sm:$0x1] %vm8693_vm15, %v18347_v13 }
 0x929   : > { %v8733_v18 = vpop.permute.xlu0 %8732  ;;  %v8589_v59 = vpop.permute.xlu1 %8588  ;;  %v18687_v19 = vld [vmem:[#allocation4 + $0x50] sm:$0xff]  ;;  %v18689_v55 = vld [vmem:[#allocation4 + $0x58] sm:$0xff] }
 0x92a   : > { %8819 = vst.msk [vmem:[#allocation4 + $0x67] sm:$0xff] %vm8808_vm0, %v8733_v18  ;;  %12273 = vmatprep.mubr.msk.f32.mxu0 %vm8474_vm4, %v18687_v19 }
 0x92b   : > { %8673 = vst.msk [vmem:[#allocation4 + $0x70] sm:$0xff] %vm8660_vm6, %v8589_v59  ;;  %12274 = vmatmul.mubr.msk.f32.gmra.mrb[136].mxu0 %vm8474_vm4, %v18689_v55 }
 0x92d   : > { %v8591_v4 = vpop.permute.xlu0 %8590  ;;  %v8735_v47 = vpop.permute.xlu1 %8734 }
 0x92e   : > { %8674 = vst.msk [vmem:[#allocation4 + $0x78] sm:$0xff] %vm8660_vm6, %v8591_v4 }
 0x92f   : > { %8820 = vst.msk [vmem:[#allocation4 + $0x6f] sm:$0xfe] %vm8806_vm8, %v8735_v47 }
 0x930   : > { %8700 = vst.msk [vmem:[#allocation4 + $0x7f] sm:$0x1] %vm8693_vm15, %v18347_v13 }
 0x931   : > { %v8737_v54 = vpop.permute.xlu0 %8736  ;;  %v8593_v2 = vpop.permute.xlu1 %8592  ;;  %v18701_v25 = vld [vmem:[#allocation4 + $0x60] sm:$0xff]  ;;  %v18703_v46 = vld [vmem:[#allocation4 + $0x68] sm:$0xff] }
 0x932   : > { %8821 = vst.msk [vmem:[#allocation4 + $0x77] sm:$0xff] %vm8808_vm0, %v8737_v54  ;;  %12276 = vmatprep.mubr.msk.f32.mxu0 %vm8474_vm4, %v18701_v25 }
 0x933   : > { %8675 = vst.msk [vmem:[#allocation4 + $0x80] sm:$0xff] %vm8660_vm6, %v8593_v2  ;;  %12277 = vmatmul.mubr.msk.f32.gmra.mrb[138].mxu0 %vm8474_vm4, %v18703_v46 }
 0x935   : > { %v8595_v29 = vpop.permute.xlu0 %8594  ;;  %v8739_v28 = vpop.permute.xlu1 %8738 }
 0x936   : > { %8676 = vst.msk [vmem:[#allocation4 + $0x88] sm:$0xff] %vm8660_vm6, %v8595_v29 }
 0x937   : > { %8822 = vst.msk [vmem:[#allocation4 + $0x7f] sm:$0xfe] %vm8806_vm8, %v8739_v28 }
 0x938   : > { %8701 = vst.msk [vmem:[#allocation4 + $0x8f] sm:$0x1] %vm8693_vm15, %v18347_v13 }
 0x939   : > { %v8741_v3 = vpop.permute.xlu0 %8740  ;;  %v8597_v16 = vpop.permute.xlu1 %8596  ;;  %v18715_v42 = vld [vmem:[#allocation4 + $0x70] sm:$0xff]  ;;  %v18717_v50 = vld [vmem:[#allocation4 + $0x78] sm:$0xff] }
 0x93a   : > { %8823 = vst.msk [vmem:[#allocation4 + $0x87] sm:$0xff] %vm8808_vm0, %v8741_v3  ;;  %12279 = vmatprep.mubr.msk.f32.mxu0 %vm8474_vm4, %v18715_v42 }
 0x93b   : > { %8677 = vst.msk [vmem:[#allocation4 + $0x90] sm:$0xff] %vm8660_vm6, %v8597_v16  ;;  %12280 = vmatmul.mubr.msk.f32.gmra.mrb[140].mxu0 %vm8474_vm4, %v18717_v50  ;;  %v10849_v16 = vld [vmem:[%s19036_s5 + $0xd0] sm:$0xff] }
 0x93d   : > { %v8599_v38 = vpop.permute.xlu0 %8598  ;;  %v8743_v52 = vpop.permute.xlu1 %8742 }
 0x93e   : > { %8678 = vst.msk [vmem:[#allocation4 + $0x98] sm:$0xff] %vm8660_vm6, %v8599_v38  ;;  %v10850_v38 = vld [vmem:[%s19036_s5 + $0xd8] sm:$0xff] }
 0x93f   : > { %8824 = vst.msk [vmem:[#allocation4 + $0x8f] sm:$0xfe] %vm8806_vm8, %v8743_v52  ;;  %v12920_v52 = vpack.c.bf16 %v10850_v38, %v10849_v16 }
 0x940   : > { %8702 = vst.msk [vmem:[#allocation4 + $0x9f] sm:$0x1] %vm8693_vm15, %v18347_v13 }
 0x941   : > { %v8745_v14 = vpop.permute.xlu0 %8744  ;;  %v8601_v60 = vpop.permute.xlu1 %8600  ;;  %v18729_v12 = vld [vmem:[#allocation4 + $0x80] sm:$0xff]  ;;  %v18731_v8 = vld [vmem:[#allocation4 + $0x88] sm:$0xff] }
 0x942   : > { %8825 = vst.msk [vmem:[#allocation4 + $0x97] sm:$0xff] %vm8808_vm0, %v8745_v14  ;;  %12282 = vmatprep.mubr.msk.f32.mxu0 %vm8474_vm4, %v18729_v12  ;;  %v10851_v14 = vld [vmem:[%s19036_s5 + $0xe0] sm:$0xff] }
 0x943   : > { %8679 = vst.msk [vmem:[#allocation4 + $0xa0] sm:$0xff] %vm8660_vm6, %v8601_v60  ;;  %12283 = vmatmul.mubr.msk.f32.gmra.mrb[142].mxu0 %vm8474_vm4, %v18731_v8  ;;  %v10852_v60 = vld [vmem:[%s19036_s5 + $0xe8] sm:$0xff] }
 0x945   : > { %v8603_v22 = vpop.permute.xlu0 %8602  ;;  %v8747_v49 = vpop.permute.xlu1 %8746 }
 0x946   : > { %8680 = vst.msk [vmem:[#allocation4 + $0xa8] sm:$0xff] %vm8660_vm6, %v8603_v22  ;;  %v12924_v22 = vpack.c.bf16 %v10852_v60, %v10851_v14 }
 0x947   : > { %8826 = vst.msk [vmem:[#allocation4 + $0x9f] sm:$0xfe] %vm8806_vm8, %v8747_v49  ;;  %v10854_v49 = vld [vmem:[%s19036_s5 + $0xf8] sm:$0xff] }
 0x948   : > { %8703 = vst.msk [vmem:[#allocation4 + $0xaf] sm:$0x1] %vm8693_vm15, %v18347_v13 }
 0x949   : > { %v8749_v33 = vpop.permute.xlu0 %8748  ;;  %v8605_v56 = vpop.permute.xlu1 %8604  ;;  %v18743_v10 = vld [vmem:[#allocation4 + $0x90] sm:$0xff]  ;;  %v18745_v15 = vld [vmem:[#allocation4 + $0x98] sm:$0xff] }
 0x94a   : > { %8827 = vst.msk [vmem:[#allocation4 + $0xa7] sm:$0xff] %vm8808_vm0, %v8749_v33  ;;  %12285 = vmatprep.mubr.msk.f32.mxu0 %vm8474_vm4, %v18743_v10  ;;  %v10856_v33 = vld [vmem:[%s19036_s5 + $0x108] sm:$0xff] }
 0x94b   : > { %8681 = vst.msk [vmem:[#allocation4 + $0xb0] sm:$0xff] %vm8660_vm6, %v8605_v56  ;;  %12286 = vmatmul.mubr.msk.f32.gmra.mrb[144].mxu0 %vm8474_vm4, %v18745_v15 }
 0x94d   : > { %v8607_v57 = vpop.permute.xlu0 %8606  ;;  %v8751_v35 = vpop.permute.xlu1 %8750 }
 0x94e   : > { %8682 = vst.msk [vmem:[#allocation4 + $0xb8] sm:$0xff] %vm8660_vm6, %v8607_v57  ;;  %v10857_v57 = vld [vmem:[%s19036_s5 + $0x110] sm:$0xff] }
 0x94f   : > { %8828 = vst.msk [vmem:[#allocation4 + $0xaf] sm:$0xfe] %vm8806_vm8, %v8751_v35  ;;  %v10858_v35 = vld [vmem:[%s19036_s5 + $0x118] sm:$0xff] }
 0x950   : > { %8704 = vst.msk [vmem:[#allocation4 + $0xbf] sm:$0x1] %vm8693_vm15, %v18347_v13 }
 0x951   : > { %v8753_v36 = vpop.permute.xlu0 %8752  ;;  %v8609_v30 = vpop.permute.xlu1 %8608  ;;  %v18757_v24 = vld [vmem:[#allocation4 + $0xa0] sm:$0xff]  ;;  %v18759_v62 = vld [vmem:[#allocation4 + $0xa8] sm:$0xff] }
 0x952   : > { %8829 = vst.msk [vmem:[#allocation4 + $0xb7] sm:$0xff] %vm8808_vm0, %v8753_v36  ;;  %12288 = vmatprep.mubr.msk.f32.mxu0 %vm8474_vm4, %v18757_v24  ;;  %v12936_v36 = vpack.c.bf16 %v10858_v35, %v10857_v57 }
 0x953   : > { %8683 = vst.msk [vmem:[#allocation4 + $0xc0] sm:$0xff] %vm8660_vm6, %v8609_v30  ;;  %12289 = vmatmul.mubr.msk.f32.gmra.mrb[146].mxu0 %vm8474_vm4, %v18759_v62 }
 0x955   : > { %v8611_v32 = vpop.permute.xlu0 %8610  ;;  %v8755_v45 = vpop.permute.xlu1 %8754 }
 0x956   : > { %8684 = vst.msk [vmem:[#allocation4 + $0xc8] sm:$0xff] %vm8660_vm6, %v8611_v32 }
 0x957   : > { %8830 = vst.msk [vmem:[#allocation4 + $0xbf] sm:$0xfe] %vm8806_vm8, %v8755_v45 }
 0x958   : > { %8705 = vst.msk [vmem:[#allocation4 + $0xcf] sm:$0x1] %vm8693_vm15, %v18347_v13 }
 0x959   : > { %v8757_v40 = vpop.permute.xlu0 %8756  ;;  %v8613_v58 = vpop.permute.xlu1 %8612  ;;  %v18771_v44 = vld [vmem:[#allocation4 + $0xb0] sm:$0xff]  ;;  %v18773_v34 = vld [vmem:[#allocation4 + $0xb8] sm:$0xff] }
 0x95a   : > { %8831 = vst.msk [vmem:[#allocation4 + $0xc7] sm:$0xff] %vm8808_vm0, %v8757_v40  ;;  %12291 = vmatprep.mubr.msk.f32.mxu0 %vm8474_vm4, %v18771_v44 }
 0x95b   : > { %8685 = vst.msk [vmem:[#allocation4 + $0xd0] sm:$0xff] %vm8660_vm6, %v8613_v58  ;;  %12292 = vmatmul.mubr.msk.f32.gmra.mrb[148].mxu0 %vm8474_vm4, %v18773_v34 }
 0x95d   : > { %v8615_v21 = vpop.permute.xlu0 %8614  ;;  %v8759_v0 = vpop.permute.xlu1 %8758 }
 0x95e   : > { %8686 = vst.msk [vmem:[#allocation4 + $0xd8] sm:$0xff] %vm8660_vm6, %v8615_v21 }
 0x95f   : > { %8832 = vst.msk [vmem:[#allocation4 + $0xcf] sm:$0xfe] %vm8806_vm8, %v8759_v0 }
 0x960   : > { %8706 = vst.msk [vmem:[#allocation4 + $0xdf] sm:$0x1] %vm8693_vm15, %v18347_v13 }
 0x961   : > { %v8761_v6 = vpop.permute.xlu0 %8760  ;;  %v8617_v48 = vpop.permute.xlu1 %8616  ;;  %v18785_v26 = vld [vmem:[#allocation4 + $0xc0] sm:$0xff]  ;;  %v18787_v5 = vld [vmem:[#allocation4 + $0xc8] sm:$0xff] }
 0x962   : > { %8833 = vst.msk [vmem:[#allocation4 + $0xd7] sm:$0xff] %vm8808_vm0, %v8761_v6  ;;  %12294 = vmatprep.mubr.msk.f32.mxu0 %vm8474_vm4, %v18785_v26 }
 0x963   : > { %8687 = vst.msk [vmem:[#allocation4 + $0xe0] sm:$0xff] %vm8660_vm6, %v8617_v48  ;;  %12295 = vmatmul.mubr.msk.f32.gmra.mrb[150].mxu0 %vm8474_vm4, %v18787_v5 }
 0x965   : > { %v8619_v7 = vpop.permute.xlu0 %8618  ;;  %v8763_v31 = vpop.permute.xlu1 %8762 }
 0x966   : > { %8688 = vst.msk [vmem:[#allocation4 + $0xe8] sm:$0xff] %vm8660_vm6, %v8619_v7 }
 0x967   : > { %8834 = vst.msk [vmem:[#allocation4 + $0xdf] sm:$0xfe] %vm8806_vm8, %v8763_v31 }
 0x968   : > { %8707 = vst.msk [vmem:[#allocation4 + $0xef] sm:$0x1] %vm8693_vm15, %v18347_v13  ;;  %v13318_v13 = vld [vmem:[#allocation3] sm:$0xff] }
 0x969   : > { %v8765_v53 = vpop.permute.xlu0 %8764  ;;  %v8621_v11 = vpop.permute.xlu1 %8620  ;;  %v18799_v1 = vld [vmem:[#allocation4 + $0xd0] sm:$0xff]  ;;  %v18801_v51 = vld [vmem:[#allocation4 + $0xd8] sm:$0xff] }
 0x96a   : > { %8835 = vst.msk [vmem:[#allocation4 + $0xe7] sm:$0xff] %vm8808_vm0, %v8765_v53  ;;  %12297 = vmatprep.mubr.msk.f32.mxu0 %vm8474_vm4, %v18799_v1 }
 0x96b   : > { %8689 = vst.msk [vmem:[#allocation4 + $0xf0] sm:$0xff] %vm8660_vm6, %v8621_v11  ;;  %12298 = vmatmul.mubr.msk.f32.gmra.mrb[152].mxu0 %vm8474_vm4, %v18801_v51 }
 0x96d   : > { %v8623_v39 = vpop.permute.xlu0 %8622  ;;  %v8767_v23 = vpop.permute.xlu1 %8766 }
 0x96e   : > { %8690 = vst.msk [vmem:[#allocation4 + $0xf8] sm:$0xff] %vm8660_vm6, %v8623_v39 }
 0x96f   : > { %8836 = vst.msk [vmem:[#allocation4 + $0xef] sm:$0xfe] %vm8806_vm8, %v8767_v23 }
 0x970   : > { %8708 = vst.msk [vmem:[#allocation4 + $0xff] sm:$0x1] %vm8693_vm15, %v13318_v13 }
 0x971   : > { %v8769_v18 = vpop.permute.xlu0 %8768  ;;  %v8625_v59 = vpop.permute.xlu1 %8624  ;;  %v18812_v4 = vld [vmem:[#allocation4 + $0xe0] sm:$0xff]  ;;  %v18814_v47 = vld [vmem:[#allocation4 + $0xe8] sm:$0xff] }
 0x972   : > { %8837 = vst.msk [vmem:[#allocation4 + $0xf7] sm:$0xff] %vm8808_vm0, %v8769_v18  ;;  %12300 = vmatprep.mubr.msk.f32.mxu0 %vm8474_vm4, %v18812_v4 }
 0x973   : > { %8691 = vst.msk [vmem:[#allocation4 + $0x100] sm:$0xff] %vm8660_vm6, %v8625_v59  ;;  %12301 = vmatmul.mubr.msk.f32.gmra.mrb[154].mxu0 %vm8474_vm4, %v18814_v47 }
 0x975   : > { %v8627_v54 = vpop.permute.xlu0 %8626  ;;  %v8771_v2 = vpop.permute.xlu1 %8770 }
 0x976   : > { %8692 = vst.msk [vmem:[#allocation4 + $0x108] sm:$0xff] %vm8660_vm6, %v8627_v54 }
 0x977   : > { %8838 = vst.msk [vmem:[#allocation4 + $0xff] sm:$0xfe] %vm8806_vm8, %v8771_v2 }
 0x978   : > { %8709 = vst.msk [vmem:[#allocation4 + $0x10f] sm:$0x1] %vm8693_vm15, %v13318_v13 }
 0x979   : > { %v8773_v29 = vpop.permute.xlu0 %8772  ;;  %v18825_v28 = vld [vmem:[#allocation4 + $0xf0] sm:$0xff]  ;;  %v18827_v3 = vld [vmem:[#allocation4 + $0xf8] sm:$0xff] }
 0x97a   : > { %8839 = vst.msk [vmem:[#allocation4 + $0x107] sm:$0xff] %vm8808_vm0, %v8773_v29  ;;  %12303 = vmatprep.mubr.msk.f32.mxu0 %vm8474_vm4, %v18825_v28 }
 0x97b   : > { %12304 = vmatmul.mubr.msk.f32.gmra.mrb[156].mxu0 %vm8474_vm4, %v18827_v3 }
 0x97c   : > { %12330 = vmatprep.mubr.msk.f32.mxu0 %vm8474_vm4, %v18631_v17  ;;  %v10853_v17 = vld [vmem:[%s19036_s5 + $0xf0] sm:$0xff] }
 0x97f   : > { %12331 = vmatmul.mubr.msk.f32.vlgmr.msra.gmra.mrb[126].mxu0 %vm8474_vm4, %v18633_v27  ;;  %v10855_v27 = vld [vmem:[%s19036_s5 + $0x100] sm:$0xff] }
 0x980   : > { %12919 = vmatpush3.bf16.msra.mxu0 %v18610_v37  ;;  %12333 = vmatprep.mubr.msk.f32.mxu0 %vm8474_vm4, %v18645_v20  ;;  %v12928_v37 = vpack.c.bf16 %v10854_v49, %v10853_v17  ;;  %v12932_v56 = vpack.c.bf16 %v10856_v33, %v10855_v27 }
 0x981   : > { %12921 = vmatprep.subr.bf16.mxu0 %v12920_v52  ;;  %v9274_v30 = vld [vmem:[#allocation4 + $0x100] sm:$0xff]  ;;  %v9275_v32 = vld [vmem:[#allocation4 + $0x108] sm:$0xff] }
 0x983   : > { %12334 = vmatmul.mubr.msk.f32.gmra.mrb[128].mxu0 %vm8474_vm4, %v18647_v41 }
 0x984   : > { %12336 = vmatprep.mubr.msk.f32.mxu0 %vm8474_vm4, %v18659_v61  ;;  %12923 = vmatpush3.bf16.msra.mxu0 %v12920_v52 }
 0x985   : > { %12925 = vmatprep.subr.bf16.mxu0 %v12924_v22 }
 0x987   : > { %12337 = vmatmul.mubr.msk.f32.gmra.mrb[130].mxu0 %vm8474_vm4, %v18661_v63 }
 0x988   : > { %12339 = vmatprep.mubr.msk.f32.mxu0 %vm8474_vm4, %v18673_v43  ;;  %12927 = vmatpush3.bf16.msra.mxu0 %v12924_v22 }
 0x989   : > { %12929 = vmatprep.subr.bf16.mxu0 %v12928_v37 }
 0x98b   : > { %12340 = vmatmul.mubr.msk.f32.gmra.mrb[132].mxu0 %vm8474_vm4, %v18675_v9 }
 0x98c   : > { %12342 = vmatprep.mubr.msk.f32.mxu0 %vm8474_vm4, %v18687_v19  ;;  %12931 = vmatpush3.bf16.msra.mxu0 %v12928_v37 }
 0x98d   : > { %12933 = vmatprep.subr.bf16.mxu0 %v12932_v56 }
 0x98f   : > { %12343 = vmatmul.mubr.msk.f32.gmra.mrb[134].mxu0 %vm8474_vm4, %v18689_v55 }
 0x990   : > { %12345 = vmatprep.mubr.msk.f32.mxu0 %vm8474_vm4, %v18701_v25  ;;  %12935 = vmatpush3.bf16.msra.mxu0 %v12932_v56 }
 0x991   : > { %12937 = vmatprep.subr.bf16.mxu0 %v12936_v36 }
 0x993   : > { %12346 = vmatmul.mubr.msk.f32.gmra.mrb[136].mxu0 %vm8474_vm4, %v18703_v46 }
 0x994   : > { %12348 = vmatprep.mubr.msk.f32.mxu0 %vm8474_vm4, %v18715_v42  ;;  %12939 = vmatpush3.bf16.msra.mxu0 %v12936_v36 }
 0x997   : > { %12349 = vmatmul.mubr.msk.f32.gmra.mrb[138].mxu0 %vm8474_vm4, %v18717_v50 }
 0x998   : > { %12351 = vmatprep.mubr.msk.f32.mxu0 %vm8474_vm4, %v18729_v12 }
 0x99b   : > { %12352 = vmatmul.mubr.msk.f32.gmra.mrb[140].mxu0 %vm8474_vm4, %v18731_v8 }
 0x99c   : > { %12354 = vmatprep.mubr.msk.f32.mxu0 %vm8474_vm4, %v18743_v10 }
 0x99f   : > { %12355 = vmatmul.mubr.msk.f32.gmra.mrb[142].mxu0 %vm8474_vm4, %v18745_v15 }
 0x9a0   : > { %12357 = vmatprep.mubr.msk.f32.mxu0 %vm8474_vm4, %v18757_v24 }
 0x9a3   : > { %12358 = vmatmul.mubr.msk.f32.gmra.mrb[144].mxu0 %vm8474_vm4, %v18759_v62 }
 0x9a4   : > { %12360 = vmatprep.mubr.msk.f32.mxu0 %vm8474_vm4, %v18771_v44 }
 0x9a7   : > { %12361 = vmatmul.mubr.msk.f32.gmra.mrb[146].mxu0 %vm8474_vm4, %v18773_v34 }
 0x9a8   : > { %12363 = vmatprep.mubr.msk.f32.mxu0 %vm8474_vm4, %v18785_v26 }
 0x9ab   : > { %12364 = vmatmul.mubr.msk.f32.gmra.mrb[148].mxu0 %vm8474_vm4, %v18787_v5 }
 0x9ac   : > { %12366 = vmatprep.mubr.msk.f32.mxu0 %vm8474_vm4, %v18799_v1 }
 0x9af   : > { %12367 = vmatmul.mubr.msk.f32.gmra.mrb[150].mxu0 %vm8474_vm4, %v18801_v51 }
 0x9b0   : > { %12369 = vmatprep.mubr.msk.f32.mxu0 %vm8474_vm4, %v18812_v4 }
 0x9b3   : > { %12370 = vmatmul.mubr.msk.f32.gmra.mrb[152].mxu0 %vm8474_vm4, %v18814_v47 }
 0x9b4   : > { %12372 = vmatprep.mubr.msk.f32.mxu0 %vm8474_vm4, %v18825_v28 }
 0x9b7   : > { %12373 = vmatmul.mubr.msk.f32.gmra.mrb[154].mxu0 %vm8474_vm4, %v18827_v3 }
 0x9b8   : > { %12375 = vmatprep.mubr.msk.f32.mxu0 %vm8474_vm4, %v9274_v30 }
 0x9bb   : > { %12376 = vmatmul.mubr.msk.f32.gmra.mrb[156].mxu0 %vm8474_vm4, %v9275_v32 }
 0x9bc   : > { %12402 = vmatprep.mubr.msk.f32.mxu0 %vm8474_vm4, %v18645_v20  ;;  %v9673_v20 = vld [vmem:[#allocation4 + $0x110] sm:$0xff] }
 0x9bf   : > { %12403 = vmatmul.mubr.msk.f32.vlgmr.msra.gmra.mrb[126].mxu0 %vm8474_vm4, %v18647_v41  ;;  %v9674_v41 = vld [vmem:[#allocation4 + $0x118] sm:$0xff] }
 0x9c0   : > { %12405 = vmatprep.mubr.msk.f32.mxu0 %vm8474_vm4, %v18659_v61  ;;  %v18990_v61 = vld [vmem:[%s19037_s6] ss:$0 sm:$0xff] }
 0x9c3   : > { %12406 = vmatmul.mubr.msk.f32.gmra.mrb[128].mxu0 %vm8474_vm4, %v18661_v63 }
 0x9c4   : > { %12408 = vmatprep.mubr.msk.f32.mxu0 %vm8474_vm4, %v18673_v43 }
 0x9c7   : > { %12409 = vmatmul.mubr.msk.f32.gmra.mrb[130].mxu0 %vm8474_vm4, %v18675_v9 }
 0x9c8   : > { %12411 = vmatprep.mubr.msk.f32.mxu0 %vm8474_vm4, %v18687_v19 }
 0x9cb   : > { %12412 = vmatmul.mubr.msk.f32.gmra.mrb[132].mxu0 %vm8474_vm4, %v18689_v55 }
 0x9cc   : > { %12414 = vmatprep.mubr.msk.f32.mxu0 %vm8474_vm4, %v18701_v25 }
 0x9cf   : > { %12415 = vmatmul.mubr.msk.f32.gmra.mrb[134].mxu0 %vm8474_vm4, %v18703_v46 }
 0x9d0   : > { %12417 = vmatprep.mubr.msk.f32.mxu0 %vm8474_vm4, %v18715_v42 }
 0x9d3   : > { %12418 = vmatmul.mubr.msk.f32.gmra.mrb[136].mxu0 %vm8474_vm4, %v18717_v50 }
 0x9d4   : > { %12420 = vmatprep.mubr.msk.f32.mxu0 %vm8474_vm4, %v18729_v12 }
 0x9d7   : > { %12421 = vmatmul.mubr.msk.f32.gmra.mrb[138].mxu0 %vm8474_vm4, %v18731_v8 }
 0x9d8   : > { %12423 = vmatprep.mubr.msk.f32.mxu0 %vm8474_vm4, %v18743_v10 }
 0x9db   : > { %12424 = vmatmul.mubr.msk.f32.gmra.mrb[140].mxu0 %vm8474_vm4, %v18745_v15 }
 0x9dc   : > { %12426 = vmatprep.mubr.msk.f32.mxu0 %vm8474_vm4, %v18757_v24 }
 0x9df   : > { %12427 = vmatmul.mubr.msk.f32.gmra.mrb[142].mxu0 %vm8474_vm4, %v18759_v62 }
 0x9e0   : > { %12429 = vmatprep.mubr.msk.f32.mxu0 %vm8474_vm4, %v18771_v44 }
 0x9e3   : > { %12430 = vmatmul.mubr.msk.f32.gmra.mrb[144].mxu0 %vm8474_vm4, %v18773_v34 }
 0x9e4   : > { %12432 = vmatprep.mubr.msk.f32.mxu0 %vm8474_vm4, %v18785_v26 }
 0x9e7   : > { %12433 = vmatmul.mubr.msk.f32.gmra.mrb[146].mxu0 %vm8474_vm4, %v18787_v5 }
 0x9e8   : > { %12435 = vmatprep.mubr.msk.f32.mxu0 %vm8474_vm4, %v18799_v1 }
 0x9eb   : > { %12436 = vmatmul.mubr.msk.f32.gmra.mrb[148].mxu0 %vm8474_vm4, %v18801_v51 }
 0x9ec   : > { %12438 = vmatprep.mubr.msk.f32.mxu0 %vm8474_vm4, %v18812_v4 }
 0x9ef   : > { %12439 = vmatmul.mubr.msk.f32.gmra.mrb[150].mxu0 %vm8474_vm4, %v18814_v47 }
 0x9f0   : > { %12441 = vmatprep.mubr.msk.f32.mxu0 %vm8474_vm4, %v18825_v28 }
 0x9f3   : > { %12442 = vmatmul.mubr.msk.f32.gmra.mrb[152].mxu0 %vm8474_vm4, %v18827_v3 }
 0x9f4   : > { %12444 = vmatprep.mubr.msk.f32.mxu0 %vm8474_vm4, %v9274_v30 }
 0x9f7   : > { %12445 = vmatmul.mubr.msk.f32.gmra.mrb[154].mxu0 %vm8474_vm4, %v9275_v32 }
 0x9f8   : > { %12447 = vmatprep.mubr.msk.f32.mxu0 %vm8474_vm4, %v9673_v20 }
 0x9fb   : > { %12448 = vmatmul.mubr.msk.f32.gmra.mrb[156].mxu0 %vm8474_vm4, %v9674_v41 }
 0xa92   : > { %v12404_v63 = vpop.f32.mrb[126].mxu0 }
 0xa93   : > { %v9850_v43 = vpop.f32.mrb[127].mxu0  ;;  %v13004_v25 = vadd.f32 %v12404_v63, %v18990_v61 }
 0xa94   : > { %v13005_v9 = vadd.f32 %v18990_v61, %v9850_v43 }
 0xa96   : > { %10041 = vxpose.xlu1.b32.start [1/16] (narrow) %v13005_v9, 8  ;;  %v12407_v19 = vpop.f32.mrb[128].mxu0 }
 0xa97   : > { %v9860_v55 = vpop.f32.mrb[129].mxu0  ;;  %v13006_v10 = vadd.f32 %v12407_v19, %v18990_v61 }
 0xa98   : > { %v13007_v50 = vadd.f32 %v18990_v61, %v9860_v55 }
 0xa9a   : > { %10042 = vxpose.xlu1.b32.cont [2/16] (narrow) %v13004_v25, 8  ;;  %v12410_v46 = vpop.f32.mrb[130].mxu0 }
 0xa9b   : > { %v9870_v42 = vpop.f32.mrb[131].mxu0  ;;  %v13008_v58 = vadd.f32 %v12410_v46, %v18990_v61 }
 0xa9c   : > { %v13009_v62 = vadd.f32 %v18990_v61, %v9870_v42 }
 0xa9e   : > { %10043 = vxpose.xlu1.b32.cont [3/16] (narrow) %v13007_v50, 8  ;;  %v12413_v12 = vpop.f32.mrb[132].mxu0 }
 0xa9f   : > { %v9880_v8 = vpop.f32.mrb[133].mxu0  ;;  %v13010_v48 = vadd.f32 %v12413_v12, %v18990_v61 }
 0xaa0   : > { %v13011_v21 = vadd.f32 %v18990_v61, %v9880_v8 }
 0xaa2   : > { %10044 = vxpose.xlu1.b32.cont [4/16] (narrow) %v13006_v10, 8  ;;  %v12416_v15 = vpop.f32.mrb[134].mxu0 }
 0xaa3   : > { %v9890_v24 = vpop.f32.mrb[135].mxu0  ;;  %v13012_v1 = vadd.f32 %v12416_v15, %v18990_v61 }
 0xaa4   : > { %v13013_v7 = vadd.f32 %v18990_v61, %v9890_v24 }
 0xaa6   : > { %10045 = vxpose.xlu1.b32.cont [5/16] (narrow) %v13009_v62, 8  ;;  %v12419_v45 = vpop.f32.mrb[136].mxu0 }
 0xaa7   : > { %v9900_v40 = vpop.f32.mrb[137].mxu0  ;;  %v13014_v47 = vadd.f32 %v12419_v45, %v18990_v61 }
 0xaa8   : > { %v13015_v13 = vadd.f32 %v18990_v61, %v9900_v40 }
 0xaaa   : > { %10046 = vxpose.xlu1.b32.cont [6/16] (narrow) %v13008_v58, 8  ;;  %v12422_v44 = vpop.f32.mrb[138].mxu0 }
 0xaab   : > { %v9910_v34 = vpop.f32.mrb[139].mxu0  ;;  %v13016_v22 = vadd.f32 %v12422_v44, %v18990_v61 }
 0xaac   : > { %v13017_v3 = vadd.f32 %v18990_v61, %v9910_v34 }
 0xaae   : > { %10047 = vxpose.xlu1.b32.cont [7/16] (narrow) %v13011_v21, 8  ;;  %v12425_v0 = vpop.f32.mrb[140].mxu0 }
 0xaaf   : > { %v9920_v6 = vpop.f32.mrb[141].mxu0  ;;  %v13018_v20 = vadd.f32 %v12425_v0, %v18990_v61 }
 0xab0   : > { %v13019_v56 = vadd.f32 %v18990_v61, %v9920_v6 }
 0xab2   : > { %10048 = vxpose.xlu1.b32.cont [8/16] (narrow) %v13010_v48, 8  ;;  %v12428_v26 = vpop.f32.mrb[142].mxu0 }
 0xab3   : > { %v9930_v5 = vpop.f32.mrb[143].mxu0  ;;  %v13020_v51 = vadd.f32 %v12428_v26, %v18990_v61 }
 0xab4   : > { %v13021_v31 = vadd.f32 %v18990_v61, %v9930_v5 }
 0xab6   : > { %10049 = vxpose.xlu1.b32.cont [9/16] (narrow) %v13013_v7, 8  ;;  %10073 = vxpose.xlu0.b32.start [1/16] (narrow) %v13021_v31, 8  ;;  %v12431_v53 = vpop.f32.mrb[144].mxu0 }
 0xab7   : > { %v9940_v11 = vpop.f32.mrb[145].mxu0  ;;  %v13022_v54 = vadd.f32 %v12431_v53, %v18990_v61 }
 0xab8   : > { %v13023_v18 = vadd.f32 %v18990_v61, %v9940_v11 }
 0xaba   : > { %10050 = vxpose.xlu1.b32.cont [10/16] (narrow) %v13012_v1, 8  ;;  %10074 = vxpose.xlu0.b32.cont [2/16] (narrow) %v13020_v51, 8  ;;  %v12434_v39 = vpop.f32.mrb[146].mxu0 }
 0xabb   : > { %v9950_v23 = vpop.f32.mrb[147].mxu0  ;;  %v13024_v17 = vadd.f32 %v12434_v39, %v18990_v61 }
 0xabc   : > { %v13025_v16 = vadd.f32 %v18990_v61, %v9950_v23 }
 0xabe   : > { %10051 = vxpose.xlu1.b32.cont [11/16] (narrow) %v13015_v13, 8  ;;  %10075 = vxpose.xlu0.b32.cont [3/16] (narrow) %v13023_v18, 8  ;;  %v12437_v59 = vpop.f32.mrb[148].mxu0 }
 0xabf   : > { %v9960_v4 = vpop.f32.mrb[149].mxu0  ;;  %v13026_v41 = vadd.f32 %v12437_v59, %v18990_v61 }
 0xac0   : > { %v13027_v57 = vadd.f32 %v18990_v61, %v9960_v4 }
 0xac2   : > { %10052 = vxpose.xlu1.b32.cont [12/16] (narrow) %v13014_v47, 8  ;;  %10076 = vxpose.xlu0.b32.cont [4/16] (narrow) %v13022_v54, 8  ;;  %v12440_v2 = vpop.f32.mrb[150].mxu0 }
 0xac3   : > { %v13028_v29 = vadd.f32 %v12440_v2, %v18990_v61  ;;  %v9970_v28 = vpop.f32.mrb[151].mxu0 }
 0xac4   : > { %v13029_v38 = vadd.f32 %v18990_v61, %v9970_v28 }
 0xac6   : > { %10053 = vxpose.xlu1.b32.cont [13/16] (narrow) %v13017_v3, 8  ;;  %10077 = vxpose.xlu0.b32.cont [5/16] (narrow) %v13025_v16, 8  ;;  %v12443_v52 = vpop.f32.mrb[152].mxu0 }
 0xac7   : > { %v13030_v14 = vadd.f32 %v12443_v52, %v18990_v61  ;;  %v9980_v60 = vpop.f32.mrb[153].mxu0 }
 0xac8   : > { %v13031_v49 = vadd.f32 %v18990_v61, %v9980_v60 }
 0xaca   : > { %10054 = vxpose.xlu1.b32.cont [14/16] (narrow) %v13016_v22, 8  ;;  %10078 = vxpose.xlu0.b32.cont [6/16] (narrow) %v13024_v17, 8  ;;  %v12446_v37 = vpop.f32.mrb[154].mxu0 }
 0xacb   : > { %v13032_v27 = vadd.f32 %v12446_v37, %v18990_v61  ;;  %v9990_v33 = vpop.f32.mrb[155].mxu0 }
 0xacc   : > { %v13033_v35 = vadd.f32 %v18990_v61, %v9990_v33 }
 0xace   : > { %10055 = vxpose.xlu1.b32.cont [15/16] (narrow) %v13019_v56, 8  ;;  %10079 = vxpose.xlu0.b32.cont [7/16] (narrow) %v13027_v57, 8  ;;  %v12449_v36 = vpop.f32.mrb[156].mxu0 }
 0xacf   : > { %v13034_v30 = vadd.f32 %v12449_v36, %v18990_v61  ;;  %v10000_v32 = vpop.f32.mrb[157].mxu0 }
 0xad0   : > { %v13035_v63 = vadd.f32 %v18990_v61, %v10000_v32 }
 0xad2   : > { %10056 = vxpose.xlu1.b32.end [16/16] (narrow) %v13018_v20, 8  ;;  %10080 = vxpose.xlu0.b32.cont [8/16] (narrow) %v13026_v41, 8 }
 0xad6   : > { %10081 = vxpose.xlu0.b32.cont [9/16] (narrow) %v13029_v38, 8 }
 0xada   : > { %10082 = vxpose.xlu0.b32.cont [10/16] (narrow) %v13028_v29, 8 }
 0xade   : > { %10083 = vxpose.xlu0.b32.cont [11/16] (narrow) %v13031_v49, 8 }
 0xae2   : > { %10084 = vxpose.xlu0.b32.cont [12/16] (narrow) %v13030_v14, 8 }
 0xae6   : > { %10085 = vxpose.xlu0.b32.cont [13/16] (narrow) %v13033_v35, 8 }
 0xaea   : > { %10086 = vxpose.xlu0.b32.cont [14/16] (narrow) %v13032_v27, 8 }
 0xaee   : > { %10087 = vxpose.xlu0.b32.cont [15/16] (narrow) %v13035_v63, 8 }
 0xaf2   : > { %10088 = vxpose.xlu0.b32.end [16/16] (narrow) %v13034_v30, 8 }
 0xb16   : > { %v10057_v43 = vpop.trf.xlu1 }
 0xb36   : > { %v10089_v9 = vpop.trf.xlu0 }
 0xb37   : > { %v10107_v19 = vcombine.low %v10057_v43, %v10089_v9 }
 0xb39   : > { %10891 = vst.sshfl [vmem:[%s278_s13] sm:$0x33 pattern:$0x76325410] %v10107_v19 }
 0xb3a PF: > { %s17_s24 = sadd.s32 1, %s13325_s24  }
 0xb3b   : > { %p14_p4 = scmp.ge.s32.totalorder %s17_s24, 4  }
 0xb3d   :  { %16 = sbr.rel (!%p14_p4) target bundleno = 1 (0x1), region = 105 }

</bundles_post_ra>
